<compile_context>
chip_gen: v5e
topology: v5e:2x2
jax: 0.10.0
libtpu: 0.0.40
codegen_flags: <defaults>
</compile_context>

<pallas_src>
import functools

import jax
import jax.numpy as jnp
from jax.experimental import pallas as pl
from jax.experimental.pallas import tpu as pltpu

EPS = 1e-5


# --------------------- VMEM budgeting (generation aware) ---------------------

def _vmem_limit_bytes():
    # v5e/v6e: 128 MiB physical VMEM; v7x: only 64 MiB.  Stay well under half
    # so Pallas double-buffering and compiler scratch always have headroom.
    try:
        phys = pltpu.get_tpu_info().vmem_capacity_bytes
    except Exception:
        phys = 64 * 1024 * 1024
    return int(min(phys // 2, 64 * 1024 * 1024))


_VMEM_LIMIT = _vmem_limit_bytes()
_TILE_BUDGET = _VMEM_LIMIT // 2


def _round_up(x, m):
    return (x + m - 1) // m * m


def _pick_tile_m(m, cin, cout):
    """Row tile for the 1x1 kernel: multiple of 8, <= 1024 (roofline saturates
    well before that), divides round_up(m, 8) (no row-pad pass), gives >= 2
    grid tiles when possible (both v7x TensorCores), and fits the VMEM budget
    with double-buffered input/output blocks."""
    m8 = _round_up(m, 8)
    bytes_per_row = 2 * (4 * cin + 2 * cout)          # dbl-buffered x (f32) + y (bf16)
    fixed = 2 * cin * cout + 16 * cin + 32 * cout     # weights + scale/bias + stats
    avail = max(_TILE_BUDGET - fixed, 8 * bytes_per_row)
    cap = min(int(avail // bytes_per_row), 1024)
    cap = min(cap, _round_up((m8 + 1) // 2, 8))       # >= 2 tiles when m allows it
    cap = max(8, (cap // 8) * 8)
    t = cap
    while t > 8 and m8 % t:
        t -= 8
    return t


def _pick_h_chunk(h, w, c, g):
    # Bound the per-chunk 3x3 matmul operands (~4 MiB) so the kernel also fits
    # v7x's 64 MiB VMEM at production spatial sizes.  Single chunk at toy sizes.
    budget = 4 * 1024 * 1024
    per_row = w * (2 * 9 * c + 4 * g)
    return int(max(1, min(h, budget // max(per_row, 1))))


# ----------------------------- kernels ---------------------------------------

def _bn_relu_conv1x1_kernel(*refs, widths, m_total, tile_m):
    # refs = (slice_0..slice_{S-1}, scale, bias, w, y, psum, psq)
    # slice_j: (tile_m, C_j) f32/bf16   scale/bias: (1, sum C_j) f32
    # w: (sum C_j, Cmid) bf16           y: (tile_m, Cmid) bf16
    # psum/psq: (1, 1, Cmid) f32 per-tile partials feeding BatchNorm2 stats.
    n = len(widths)
    x_refs = refs[:n]
    scale_ref, bias_ref, w_ref, y_ref, sum_ref, sq_ref = refs[n:]

    # One fused BN1 scale/shift + ReLU + matmul per input slice, accumulated in
    # f32.  Channel offsets are static -> static ref slices (free).
    acc = None
    off = 0
    for j, c in enumerate(widths):
        h = jnp.maximum(x_refs[j][...].astype(jnp.float32)
                        * scale_ref[:, off:off + c]
                        + bias_ref[:, off:off + c], 0.0)
        t = jnp.dot(h.astype(jnp.bfloat16), w_ref[off:off + c, :],
                    preferred_element_type=jnp.float32)
        acc = t if acc is None else acc + t
        off += c
    y_ref[...] = acc.astype(y_ref.dtype)

    # Fused per-tile partial sums for BatchNorm2 batch statistics (avoids a
    # second full HBM pass over y).  Padded rows of a ragged last tile are
    # masked out of the statistics only.
    if m_total % tile_m != 0:
        row = (jax.lax.broadcasted_iota(jnp.int32, (tile_m, 1), 0)
               + pl.program_id(0) * tile_m)
        acc = jnp.where(row < m_total, acc, 0.0)
    sum_ref[0] = jnp.sum(acc, axis=0, keepdims=True)
    sq_ref[0] = jnp.sum(acc * acc, axis=0, keepdims=True)


def _bn_relu_conv3x3_kernel(y_ref, scale_ref, bias_ref, w_ref,
                            o_ref, sum_ref, sq_ref, *, h_chunk):
    # y_ref: (1, H, W, C) bf16   scale/bias: (1, C) f32   w_ref: (9*C, G) bf16
    # o_ref: (1, H*W, G) bf16    sum_ref/sq_ref: (1, 1, G) f32 per-image partials
    H, W, C = y_ref.shape[1], y_ref.shape[2], y_ref.shape[3]
    G = w_ref.shape[1]

    # BN2 scale/shift + ReLU in f32 (VPU).  The conv's zero-padding applies
    # AFTER BN+ReLU, so the halo is plain zeros: build it with two zero-border
    # concatenations instead of an HBM-padded copy of y.
    h = jnp.maximum(y_ref[0].astype(jnp.float32) * scale_ref[...]
                    + bias_ref[...], 0.0)                       # (H, W, C)
    zc = jnp.zeros((H, 1, C), jnp.float32)
    zr = jnp.zeros((1, W + 2, C), jnp.float32)
    hp = jnp.concatenate(
        [zr, jnp.concatenate([zc, h, zc], axis=1), zr], axis=0)  # (H+2, W+2, C)

    lane_aligned = (C % 128 == 0)
    zsum = jnp.zeros((1, G), jnp.float32)
    zsq = jnp.zeros((1, G), jnp.float32)
    # Row-chunked so matmul operands stay bounded in VMEM at production sizes.
    for r0 in range(0, H, h_chunk):
        rows = min(h_chunk, H - r0)
        if lane_aligned:
            # Lane-aligned channel count: one K = 9*C im2col matmul.
            taps = [hp[r0 + dy:r0 + dy + rows, dx:dx + W, :]
                    for dy in range(3) for dx in range(3)]
            patches = jnp.concatenate(taps, axis=-1).reshape(rows * W, 9 * C)
            z = jnp.dot(patches.astype(jnp.bfloat16), w_ref[...],
                        preferred_element_type=jnp.float32)
        else:
            # Small C: accumulate 9 shifted K=C matmuls instead of a
            # lane-misaligned 9-way concat.
            z = jnp.zeros((rows * W, G), jnp.float32)
            for k in range(9):
                dy, dx = k // 3, k % 3
                tap = hp[r0 + dy:r0 + dy + rows, dx:dx + W, :].reshape(rows * W, C)
                z = z + jnp.dot(tap.astype(jnp.bfloat16),
                                w_ref[k * C:(k + 1) * C, :],
                                preferred_element_type=jnp.float32)
        o_ref[0, r0 * W:(r0 + rows) * W, :] = z.astype(o_ref.dtype)
        # Fused per-image partial sums -> batch statistics used by LATER layers'
        # BatchNorm1 over this slice (removes the per-layer stats pass).
        zsum = zsum + jnp.sum(z, axis=0, keepdims=True)
        zsq = zsq + jnp.sum(z * z, axis=0, keepdims=True)
    sum_ref[0] = zsum
    sq_ref[0] = zsq


# --------------------------- pallas wrappers ----------------------------------

def bn_relu_conv1x1(slices2d, scale, bias, w1):
    """Fused BN1 scale/shift + ReLU + 1x1 conv over a list of channel slices.

    Returns (y_bf16 (M, Cmid), mean_y, var_y) where mean/var are the biased
    batch statistics of y (used by BatchNorm2), from fused per-tile partials.
    """
    M = slices2d[0].shape[0]
    widths = tuple(int(s.shape[1]) for s in slices2d)
    cin = sum(widths)
    cmid = w1.shape[1]

    tile_m = _pick_tile_m(M, cin, cmid)
    m_pad = _round_up(M, tile_m)          # tile_m divides round_up(M, 8): pad <= 7 rows
    if m_pad != M:
        slices2d = [jnp.pad(s, ((0, m_pad - M), (0, 0))) for s in slices2d]
    num_tiles = m_pad // tile_m

    kernel = functools.partial(_bn_relu_conv1x1_kernel, widths=widths,
                               m_total=M, tile_m=tile_m)
    cost = pl.CostEstimate(
        flops=2 * M * cin * cmid,
        transcendentals=0,
        bytes_accessed=int(sum(s.size * s.dtype.itemsize for s in slices2d)
                           + 2 * M * cmid + 2 * cin * cmid + 8 * cin
                           + 8 * num_tiles * cmid))

    in_specs = ([pl.BlockSpec((tile_m, c), lambda i: (i, 0)) for c in widths]
                + [pl.BlockSpec((1, cin), lambda i: (0, 0)),
                   pl.BlockSpec((1, cin), lambda i: (0, 0)),
                   pl.BlockSpec((cin, cmid), lambda i: (0, 0))])

    y, psum, psq = pl.pallas_call(
        kernel,
        out_shape=(jax.ShapeDtypeStruct((m_pad, cmid), jnp.bfloat16),
                   jax.ShapeDtypeStruct((num_tiles, 1, cmid), jnp.float32),
                   jax.ShapeDtypeStruct((num_tiles, 1, cmid), jnp.float32)),
        grid=(num_tiles,),
        in_specs=in_specs,
        out_specs=(pl.BlockSpec((tile_m, cmid), lambda i: (i, 0)),
                   pl.BlockSpec((1, 1, cmid), lambda i: (i, 0, 0)),
                   pl.BlockSpec((1, 1, cmid), lambda i: (i, 0, 0))),
        compiler_params=pltpu.CompilerParams(
            dimension_semantics=("parallel",),
            vmem_limit_bytes=_VMEM_LIMIT),
        cost_estimate=cost,
    )(*slices2d, scale, bias, w1)

    if m_pad != M:
        y = y[:M]
    mean = jnp.sum(psum, axis=(0, 1)) / M
    # One-pass E[y^2]-E[y]^2 in f32 with clamp; fine while |mean|^2 !>> var.
    var = jnp.maximum(jnp.sum(psq, axis=(0, 1)) / M - mean * mean, 0.0)
    return y, mean, var


def bn_relu_conv3x3(y4d, scale, bias, w_flat):
    """Fused BN2 scale/shift + ReLU + 3x3 conv (pad=1), one image per grid step.
    Also returns the new slice's fused per-image partial sums (for later BN1)."""
    N, H, W, C = y4d.shape
    G = w_flat.shape[1]
    HW = H * W
    h_chunk = _pick_h_chunk(H, W, C, G)

    kernel = functools.partial(_bn_relu_conv3x3_kernel, h_chunk=h_chunk)
    cost = pl.CostEstimate(
        flops=2 * N * HW * 9 * C * G,
        transcendentals=0,
        bytes_accessed=int(2 * N * HW * C + 2 * N * HW * G + 2 * 9 * C * G
                           + 8 * C + 8 * N * G))

    z, zsum, zsq = pl.pallas_call(
        kernel,
        out_shape=(jax.ShapeDtypeStruct((N, HW, G), jnp.bfloat16),
                   jax.ShapeDtypeStruct((N, 1, G), jnp.float32),
                   jax.ShapeDtypeStruct((N, 1, G), jnp.float32)),
        grid=(N,),
        in_specs=[pl.BlockSpec((1, H, W, C), lambda n: (n, 0, 0, 0)),
                  pl.BlockSpec((1, C), lambda n: (0, 0)),
                  pl.BlockSpec((1, C), lambda n: (0, 0)),
                  pl.BlockSpec((9 * C, G), lambda n: (0, 0))],
        out_specs=(pl.BlockSpec((1, HW, G), lambda n: (n, 0, 0)),
                   pl.BlockSpec((1, 1, G), lambda n: (n, 0, 0)),
                   pl.BlockSpec((1, 1, G), lambda n: (n, 0, 0))),
        compiler_params=pltpu.CompilerParams(
            dimension_semantics=("parallel",),
            vmem_limit_bytes=_VMEM_LIMIT),
        cost_estimate=cost,
    )(y4d, scale, bias, w_flat)
    return z.reshape(N * HW, G), zsum, zsq


# ----------------------------- model glue -------------------------------------

@jax.jit
def dense_block_forward(x_nchw, params):
    x = jnp.transpose(x_nchw, (0, 2, 3, 1)).astype(jnp.float32)   # NCHW -> NHWC (once)
    N, H, W, C0 = x.shape
    M = N * H * W

    # Feature slices, newest first (matches torch.cat((conv_out, res), dim=1)).
    # Residual input slice stays f32; new slices are stored bf16.
    feats = [x.reshape(M, C0)]
    # Cached per-slice channel statistics: stats of already-produced channels
    # never change, so BN1 never re-reads the growing feature map.
    stats = [(jnp.mean(x, axis=(0, 1, 2)), jnp.var(x, axis=(0, 1, 2)))]

    for p in params:
        cmid = p["w1"].shape[1]
        G = p["w2"].shape[3]

        # BatchNorm1 (training: biased batch stats) assembled from the cache.
        mean1 = jnp.concatenate([m for m, _ in stats])
        var1 = jnp.concatenate([v for _, v in stats])
        s1 = p["gamma1"] * jax.lax.rsqrt(var1 + EPS)
        b1 = p["beta1"] - mean1 * s1

        # Fused BN1 + ReLU + 1x1 conv; BN2 statistics come back fused.
        y2d, mean2, var2 = bn_relu_conv1x1(feats, s1[None, :], b1[None, :],
                                           p["w1"])
        s2 = p["gamma2"] * jax.lax.rsqrt(var2 + EPS)
        b2 = p["beta2"] - mean2 * s2

        # Fused BN2 + ReLU + 3x3 conv (halo built in-kernel); the new slice's
        # BN statistics come back fused for later layers.
        y4d = y2d.reshape(N, H, W, cmid)
        w2_flat = p["w2"].reshape(9 * cmid, G)        # (dy, dx, c) row order
        z2d, zsum, zsq = bn_relu_conv3x3(y4d, s2[None, :], b2[None, :], w2_flat)
        zmean = jnp.sum(zsum, axis=(0, 1)) / M
        zvar = jnp.maximum(jnp.sum(zsq, axis=(0, 1)) / M - zmean * zmean, 0.0)

        feats.insert(0, z2d)
        stats.insert(0, (zmean, zvar))

    # Single final concat + layout conversion (the only full-feature-map pass).
    out = jnp.concatenate(
        [f.astype(jnp.float32).reshape(N, H, W, f.shape[1]) for f in feats],
        axis=-1)
    return jnp.transpose(out, (0, 3, 1, 2))                       # NHWC -> NCHW


def init_params(key, num_layers, in_channels, growth_rate):
    params = []
    for i in range(num_layers):
        cin = in_channels + i * growth_rate
        cmid = 4 * growth_rate
        key, k1, k2 = jax.random.split(key, 3)
        params.append(dict(
            gamma1=jnp.ones((cin,), jnp.float32),      # PyTorch BN defaults
            beta1=jnp.zeros((cin,), jnp.float32),
            # Conv weights stored bf16 (MXU operands); accumulation stays f32.
            w1=(0.1 * jax.random.normal(k1, (cin, cmid), jnp.float32)
                ).astype(jnp.bfloat16),                            # (Cin, 4g)
            gamma2=jnp.ones((cmid,), jnp.float32),
            beta2=jnp.zeros((cmid,), jnp.float32),
            w2=(0.1 * jax.random.normal(k2, (3, 3, cmid, growth_rate),
                                        jnp.float32)).astype(jnp.bfloat16),  # HWIO
        ))
    return params


def _reference_dense_block(x_nchw, params):
    # Pure-JAX/XLA reference (f32 math, same bf16-stored weights).
    x = jnp.transpose(x_nchw, (0, 2, 3, 1)).astype(jnp.float32)
    for p in params:
        m1 = jnp.mean(x, axis=(0, 1, 2))
        v1 = jnp.var(x, axis=(0, 1, 2))
        h = jnp.maximum((x - m1) * jax.lax.rsqrt(v1 + EPS) * p["gamma1"]
                        + p["beta1"], 0.0)
        y = jnp.einsum("nhwc,cd->nhwd", h, p["w1"].astype(jnp.float32))
        m2 = jnp.mean(y, axis=(0, 1, 2))
        v2 = jnp.var(y, axis=(0, 1, 2))
        h2 = jnp.maximum((y - m2) * jax.lax.rsqrt(v2 + EPS) * p["gamma2"]
                         + p["beta2"], 0.0)
        z = jax.lax.conv_general_dilated(
            h2, p["w2"].astype(jnp.float32), window_strides=(1, 1),
            padding=((1, 1), (1, 1)),
            dimension_numbers=("NHWC", "HWIO", "NHWC"))
        x = jnp.concatenate([z, x], axis=-1)
    return jnp.transpose(x, (0, 3, 1, 2))


if __name__ == "__main__":
    key = jax.random.PRNGKey(0)
    kx, kp = jax.random.split(key)

    N, C, H, W = 2, 4, 16, 16          # input is NCHW, like PyTorch
    num_layers, growth_rate = 2, 4

    x = jax.random.normal(kx, (N, C, H, W), jnp.float32)
    params = init_params(kp, num_layers, C, growth_rate)

    out = dense_block_forward(x, params)
    out = jax.block_until_ready(out)

    assert out.shape == (N, C + num_layers * growth_rate, H, W), out.shape
    assert bool(jnp.all(jnp.isfinite(out)))

    # bf16 matmul operands + bf16 feature storage -> loose tolerance vs f32 ref.
    ref = _reference_dense_block(x, params)
    max_err = float(jnp.max(jnp.abs(out - ref)))
    assert max_err < 0.2, f"max abs error vs reference: {max_err}"
    print("KERNEL_OK")
</pallas_src>

<mosaic_0001>
module attributes {stable_mosaic.version = 11 : i64} {
  func.func @_bn_relu_conv1x1_kernel(%arg0: i32, %arg1: memref<256x4xf32, #tpu.memory_space<vmem>>, %arg2: memref<1x4xf32, #tpu.memory_space<vmem>>, %arg3: memref<1x4xf32, #tpu.memory_space<vmem>>, %arg4: memref<4x16xbf16, #tpu.memory_space<vmem>>, %arg5: memref<256x16xbf16, #tpu.memory_space<vmem>>, %arg6: memref<1x1x16xf32, #tpu.memory_space<vmem>>, %arg7: memref<1x1x16xf32, #tpu.memory_space<vmem>>) attributes {dimension_semantics = [#tpu.dimension_semantics<parallel>], iteration_bounds = array<i64: 2>, scalar_prefetch = 0 : i64, scratch_operands = 0 : i64, tpu.core_type = #tpu.core_type<tc>, window_params = [{transform_indices = @transform_0, window_bounds = array<i64: 256, 4>}, {pipeline_mode = #tpu.pipeline_mode<synchronous>, transform_indices = @transform_1, window_bounds = array<i64: 1, 4>}, {pipeline_mode = #tpu.pipeline_mode<synchronous>, transform_indices = @transform_2, window_bounds = array<i64: 1, 4>}, {pipeline_mode = #tpu.pipeline_mode<synchronous>, transform_indices = @transform_3, window_bounds = array<i64: 4, 16>}, {transform_indices = @transform_4, window_bounds = array<i64: 256, 16>}, {transform_indices = @transform_5, window_bounds = array<i64: 1, 1, 16>}, {transform_indices = @transform_6, window_bounds = array<i64: 1, 1, 16>}]} {
    %c0 = arith.constant 0 : index
    %c0_0 = arith.constant 0 : index
    %0 = vector.load %arg1[%c0, %c0_0] : memref<256x4xf32, #tpu.memory_space<vmem>>, vector<256x4xf32>
    %c0_1 = arith.constant 0 : index
    %c0_2 = arith.constant 0 : index
    %1 = vector.load %arg2[%c0_1, %c0_2] : memref<1x4xf32, #tpu.memory_space<vmem>>, vector<1x4xf32>
    %2 = vector.broadcast %1 : vector<1x4xf32> to vector<256x4xf32>
    %3 = arith.mulf %0, %2 : vector<256x4xf32>
    %c0_3 = arith.constant 0 : index
    %c0_4 = arith.constant 0 : index
    %4 = vector.load %arg3[%c0_3, %c0_4] : memref<1x4xf32, #tpu.memory_space<vmem>>, vector<1x4xf32>
    %5 = vector.broadcast %4 : vector<1x4xf32> to vector<256x4xf32>
    %6 = arith.addf %3, %5 : vector<256x4xf32>
    %cst = arith.constant 0.000000e+00 : f32
    %7 = vector.broadcast %cst : f32 to vector<256x4xf32>
    %8 = arith.maximumf %6, %7 : vector<256x4xf32>
    %9 = arith.truncf %8 : vector<256x4xf32> to vector<256x4xbf16>
    %c0_5 = arith.constant 0 : index
    %c0_6 = arith.constant 0 : index
    %10 = vector.load %arg4[%c0_5, %c0_6] : memref<4x16xbf16, #tpu.memory_space<vmem>>, vector<4x16xbf16>
    %cst_7 = arith.constant dense<0.000000e+00> : vector<256x16xf32>
    %11 = tpu.matmul %9, %10, %cst_7 {dimension_numbers = #tpu.dot_dimension_numbers<[1], [0], [0], [1], [0, 0, 1, 1], [], []>} : vector<256x4xbf16>, vector<4x16xbf16>, vector<256x16xf32> -> vector<256x16xf32>
    %12 = arith.truncf %11 : vector<256x16xf32> to vector<256x16xbf16>
    %c0_8 = arith.constant 0 : index
    %c0_9 = arith.constant 0 : index
    %13 = vector.load %arg5[%c0_8, %c0_9] : memref<256x16xbf16, #tpu.memory_space<vmem>>, vector<256x16xbf16>
    tpu.vector_store %arg5[%c0_8, %c0_9], %12 {strides = array<i32>} : memref<256x16xbf16, #tpu.memory_space<vmem>>, vector<256x16xbf16>,
    %cst_10 = arith.constant dense<0.000000e+00> : vector<16xf32>
    %14 = vector.multi_reduction <add>, %11, %cst_10 [0] : vector<256x16xf32> to vector<16xf32>
    %15 = vector.shape_cast %14 : vector<16xf32> to vector<1x16xf32>
    %c0_11 = arith.constant 0 : index
    %c0_12 = arith.constant 0 : index
    %c0_13 = arith.constant 0 : index
    %16 = vector.load %arg6[%c0_11, %c0_12, %c0_13] : memref<1x1x16xf32, #tpu.memory_space<vmem>>, vector<1x1x16xf32>
    %17 = vector.shape_cast %16 : vector<1x1x16xf32> to vector<1x16xf32>
    %18 = vector.shape_cast %15 : vector<1x16xf32> to vector<1x1x16xf32>
    tpu.vector_store %arg6[%c0_11, %c0_12, %c0_13], %18 {strides = array<i32>} : memref<1x1x16xf32, #tpu.memory_space<vmem>>, vector<1x1x16xf32>,
    %19 = arith.mulf %11, %11 : vector<256x16xf32>
    %cst_14 = arith.constant dense<0.000000e+00> : vector<16xf32>
    %20 = vector.multi_reduction <add>, %19, %cst_14 [0] : vector<256x16xf32> to vector<16xf32>
    %21 = vector.shape_cast %20 : vector<16xf32> to vector<1x16xf32>
    %c0_15 = arith.constant 0 : index
    %c0_16 = arith.constant 0 : index
    %c0_17 = arith.constant 0 : index
    %22 = vector.load %arg7[%c0_15, %c0_16, %c0_17] : memref<1x1x16xf32, #tpu.memory_space<vmem>>, vector<1x1x16xf32>
    %23 = vector.shape_cast %22 : vector<1x1x16xf32> to vector<1x16xf32>
    %24 = vector.shape_cast %21 : vector<1x16xf32> to vector<1x1x16xf32>
    tpu.vector_store %arg7[%c0_15, %c0_16, %c0_17], %24 {strides = array<i32>} : memref<1x1x16xf32, #tpu.memory_space<vmem>>, vector<1x1x16xf32>,
    return
  }
  func.func @transform_0(%arg0: i32) -> (i32, i32) {
    %c0_i32 = arith.constant 0 : i32
    %c0_i32_0 = arith.constant 0 : i32
    return %arg0, %c0_i32 : i32, i32
  }
  func.func @transform_1(%arg0: i32) -> (i32, i32) {
    %c0_i32 = arith.constant 0 : i32
    %c0_i32_0 = arith.constant 0 : i32
    %c0_i32_1 = arith.constant 0 : i32
    return %c0_i32, %c0_i32_0 : i32, i32
  }
  func.func @transform_2(%arg0: i32) -> (i32, i32) {
    %c0_i32 = arith.constant 0 : i32
    %c0_i32_0 = arith.constant 0 : i32
    %c0_i32_1 = arith.constant 0 : i32
    return %c0_i32, %c0_i32_0 : i32, i32
  }
  func.func @transform_3(%arg0: i32) -> (i32, i32) {
    %c0_i32 = arith.constant 0 : i32
    %c0_i32_0 = arith.constant 0 : i32
    %c0_i32_1 = arith.constant 0 : i32
    return %c0_i32, %c0_i32_0 : i32, i32
  }
  func.func @transform_4(%arg0: i32) -> (i32, i32) {
    %c0_i32 = arith.constant 0 : i32
    %c0_i32_0 = arith.constant 0 : i32
    return %arg0, %c0_i32 : i32, i32
  }
  func.func @transform_5(%arg0: i32) -> (i32, i32, i32) {
    %c0_i32 = arith.constant 0 : i32
    %c0_i32_0 = arith.constant 0 : i32
    %c0_i32_1 = arith.constant 0 : i32
    return %arg0, %c0_i32, %c0_i32_0 : i32, i32, i32
  }
  func.func @transform_6(%arg0: i32) -> (i32, i32, i32) {
    %c0_i32 = arith.constant 0 : i32
    %c0_i32_0 = arith.constant 0 : i32
    %c0_i32_1 = arith.constant 0 : i32
    return %arg0, %c0_i32, %c0_i32_0 : i32, i32, i32
  }
}

module attributes {stable_mosaic.version = 11 : i64} {
  func.func @_bn_relu_conv3x3_kernel(%arg0: i32, %arg1: memref<1x16x16x16xbf16, #tpu.memory_space<vmem>>, %arg2: memref<1x16xf32, #tpu.memory_space<vmem>>, %arg3: memref<1x16xf32, #tpu.memory_space<vmem>>, %arg4: memref<144x4xbf16, #tpu.memory_space<vmem>>, %arg5: memref<1x256x4xbf16, #tpu.memory_space<vmem>>, %arg6: memref<1x1x4xf32, #tpu.memory_space<vmem>>, %arg7: memref<1x1x4xf32, #tpu.memory_space<vmem>>) attributes {dimension_semantics = [#tpu.dimension_semantics<parallel>], iteration_bounds = array<i64: 2>, scalar_prefetch = 0 : i64, scratch_operands = 0 : i64, tpu.core_type = #tpu.core_type<tc>, window_params = [{transform_indices = @transform_0, window_bounds = array<i64: 1, 16, 16, 16>}, {pipeline_mode = #tpu.pipeline_mode<synchronous>, transform_indices = @transform_1, window_bounds = array<i64: 1, 16>}, {pipeline_mode = #tpu.pipeline_mode<synchronous>, transform_indices = @transform_2, window_bounds = array<i64: 1, 16>}, {pipeline_mode = #tpu.pipeline_mode<synchronous>, transform_indices = @transform_3, window_bounds = array<i64: 144, 4>}, {transform_indices = @transform_4, window_bounds = array<i64: 1, 256, 4>}, {transform_indices = @transform_5, window_bounds = array<i64: 1, 1, 4>}, {transform_indices = @transform_6, window_bounds = array<i64: 1, 1, 4>}]} {
    %c0 = arith.constant 0 : index
    %c0_0 = arith.constant 0 : index
    %c0_1 = arith.constant 0 : index
    %c0_2 = arith.constant 0 : index
    %0 = vector.load %arg1[%c0, %c0_0, %c0_1, %c0_2] : memref<1x16x16x16xbf16, #tpu.memory_space<vmem>>, vector<1x16x16x16xbf16>
    %1 = vector.shape_cast %0 : vector<1x16x16x16xbf16> to vector<16x16x16xbf16>
    %2 = arith.extf %1 : vector<16x16x16xbf16> to vector<16x16x16xf32>
    %c0_3 = arith.constant 0 : index
    %c0_4 = arith.constant 0 : index
    %3 = vector.load %arg2[%c0_3, %c0_4] : memref<1x16xf32, #tpu.memory_space<vmem>>, vector<1x16xf32>
    %4 = vector.shape_cast %3 : vector<1x16xf32> to vector<1x1x16xf32>
    %5 = vector.broadcast %4 : vector<1x1x16xf32> to vector<16x16x16xf32>
    %6 = arith.mulf %2, %5 : vector<16x16x16xf32>
    %c0_5 = arith.constant 0 : index
    %c0_6 = arith.constant 0 : index
    %7 = vector.load %arg3[%c0_5, %c0_6] : memref<1x16xf32, #tpu.memory_space<vmem>>, vector<1x16xf32>
    %8 = vector.shape_cast %7 : vector<1x16xf32> to vector<1x1x16xf32>
    %9 = vector.broadcast %8 : vector<1x1x16xf32> to vector<16x16x16xf32>
    %10 = arith.addf %6, %9 : vector<16x16x16xf32>
    %cst = arith.constant 0.000000e+00 : f32
    %11 = vector.broadcast %cst : f32 to vector<16x16x16xf32>
    %12 = arith.maximumf %10, %11 : vector<16x16x16xf32>
    %cst_7 = arith.constant 0.000000e+00 : f32
    %13 = vector.broadcast %cst_7 : f32 to vector<16x1x16xf32>
    %cst_8 = arith.constant 0.000000e+00 : f32
    %14 = vector.broadcast %cst_8 : f32 to vector<1x18x16xf32>
    %15 = tpu.concatenate %13, %12, %13 in 1 : vector<16x1x16xf32>, vector<16x16x16xf32>, vector<16x1x16xf32> -> vector<16x18x16xf32>
    %16 = tpu.concatenate %14, %15, %14 in 0 : vector<1x18x16xf32>, vector<16x18x16xf32>, vector<1x18x16xf32> -> vector<18x18x16xf32>
    %cst_9 = arith.constant 0.000000e+00 : f32
    %17 = vector.broadcast %cst_9 : f32 to vector<1x4xf32>
    %cst_10 = arith.constant 0.000000e+00 : f32
    %18 = vector.broadcast %cst_10 : f32 to vector<1x4xf32>
    %cst_11 = arith.constant 0.000000e+00 : f32
    %19 = vector.broadcast %cst_11 : f32 to vector<256x4xf32>
    %20 = vector.extract_strided_slice %16 {offsets = [0, 0, 0], sizes = [16, 16, 16], strides = [1, 1, 1]} : vector<18x18x16xf32> to vector<16x16x16xf32>
    %21 = vector.shape_cast %20 : vector<16x16x16xf32> to vector<256x16xf32>
    %22 = arith.truncf %21 : vector<256x16xf32> to vector<256x16xbf16>
    %c0_12 = arith.constant 0 : index
    %c0_13 = arith.constant 0 : index
    %23 = vector.load %arg4[%c0_12, %c0_13] : memref<144x4xbf16, #tpu.memory_space<vmem>>, vector<16x4xbf16>
    %cst_14 = arith.constant dense<0.000000e+00> : vector<256x4xf32>
    %24 = tpu.matmul %22, %23, %cst_14 {dimension_numbers = #tpu.dot_dimension_numbers<[1], [0], [0], [1], [0, 0, 1, 1], [], []>} : vector<256x16xbf16>, vector<16x4xbf16>, vector<256x4xf32> -> vector<256x4xf32>
    %25 = arith.addf %19, %24 : vector<256x4xf32>
    %26 = vector.extract_strided_slice %16 {offsets = [0, 1, 0], sizes = [16, 16, 16], strides = [1, 1, 1]} : vector<18x18x16xf32> to vector<16x16x16xf32>
    %27 = vector.shape_cast %26 : vector<16x16x16xf32> to vector<256x16xf32>
    %28 = arith.truncf %27 : vector<256x16xf32> to vector<256x16xbf16>
    %c16 = arith.constant 16 : index
    %c0_15 = arith.constant 0 : index
    %29 = vector.load %arg4[%c16, %c0_15] : memref<144x4xbf16, #tpu.memory_space<vmem>>, vector<16x4xbf16>
    %cst_16 = arith.constant dense<0.000000e+00> : vector<256x4xf32>
    %30 = tpu.matmul %28, %29, %cst_16 {dimension_numbers = #tpu.dot_dimension_numbers<[1], [0], [0], [1], [0, 0, 1, 1], [], []>} : vector<256x16xbf16>, vector<16x4xbf16>, vector<256x4xf32> -> vector<256x4xf32>
    %31 = arith.addf %25, %30 : vector<256x4xf32>
    %32 = vector.extract_strided_slice %16 {offsets = [0, 2, 0], sizes = [16, 16, 16], strides = [1, 1, 1]} : vector<18x18x16xf32> to vector<16x16x16xf32>
    %33 = vector.shape_cast %32 : vector<16x16x16xf32> to vector<256x16xf32>
    %34 = arith.truncf %33 : vector<256x16xf32> to vector<256x16xbf16>
    %c32 = arith.constant 32 : index
    %c0_17 = arith.constant 0 : index
    %35 = vector.load %arg4[%c32, %c0_17] : memref<144x4xbf16, #tpu.memory_space<vmem>>, vector<16x4xbf16>
    %cst_18 = arith.constant dense<0.000000e+00> : vector<256x4xf32>
    %36 = tpu.matmul %34, %35, %cst_18 {dimension_numbers = #tpu.dot_dimension_numbers<[1], [0], [0], [1], [0, 0, 1, 1], [], []>} : vector<256x16xbf16>, vector<16x4xbf16>, vector<256x4xf32> -> vector<256x4xf32>
    %37 = arith.addf %31, %36 : vector<256x4xf32>
    %38 = vector.extract_strided_slice %16 {offsets = [1, 0, 0], sizes = [16, 16, 16], strides = [1, 1, 1]} : vector<18x18x16xf32> to vector<16x16x16xf32>
    %39 = vector.shape_cast %38 : vector<16x16x16xf32> to vector<256x16xf32>
    %40 = arith.truncf %39 : vector<256x16xf32> to vector<256x16xbf16>
    %c48 = arith.constant 48 : index
    %c0_19 = arith.constant 0 : index
    %41 = vector.load %arg4[%c48, %c0_19] : memref<144x4xbf16, #tpu.memory_space<vmem>>, vector<16x4xbf16>
    %cst_20 = arith.constant dense<0.000000e+00> : vector<256x4xf32>
    %42 = tpu.matmul %40, %41, %cst_20 {dimension_numbers = #tpu.dot_dimension_numbers<[1], [0], [0], [1], [0, 0, 1, 1], [], []>} : vector<256x16xbf16>, vector<16x4xbf16>, vector<256x4xf32> -> vector<256x4xf32>
    %43 = arith.addf %37, %42 : vector<256x4xf32>
    %44 = vector.extract_strided_slice %16 {offsets = [1, 1, 0], sizes = [16, 16, 16], strides = [1, 1, 1]} : vector<18x18x16xf32> to vector<16x16x16xf32>
    %45 = vector.shape_cast %44 : vector<16x16x16xf32> to vector<256x16xf32>
    %46 = arith.truncf %45 : vector<256x16xf32> to vector<256x16xbf16>
    %c64 = arith.constant 64 : index
    %c0_21 = arith.constant 0 : index
    %47 = vector.load %arg4[%c64, %c0_21] : memref<144x4xbf16, #tpu.memory_space<vmem>>, vector<16x4xbf16>
    %cst_22 = arith.constant dense<0.000000e+00> : vector<256x4xf32>
    %48 = tpu.matmul %46, %47, %cst_22 {dimension_numbers = #tpu.dot_dimension_numbers<[1], [0], [0], [1], [0, 0, 1, 1], [], []>} : vector<256x16xbf16>, vector<16x4xbf16>, vector<256x4xf32> -> vector<256x4xf32>
    %49 = arith.addf %43, %48 : vector<256x4xf32>
    %50 = vector.extract_strided_slice %16 {offsets = [1, 2, 0], sizes = [16, 16, 16], strides = [1, 1, 1]} : vector<18x18x16xf32> to vector<16x16x16xf32>
    %51 = vector.shape_cast %50 : vector<16x16x16xf32> to vector<256x16xf32>
    %52 = arith.truncf %51 : vector<256x16xf32> to vector<256x16xbf16>
    %c80 = arith.constant 80 : index
    %c0_23 = arith.constant 0 : index
    %53 = vector.load %arg4[%c80, %c0_23] : memref<144x4xbf16, #tpu.memory_space<vmem>>, vector<16x4xbf16>
    %cst_24 = arith.constant dense<0.000000e+00> : vector<256x4xf32>
    %54 = tpu.matmul %52, %53, %cst_24 {dimension_numbers = #tpu.dot_dimension_numbers<[1], [0], [0], [1], [0, 0, 1, 1], [], []>} : vector<256x16xbf16>, vector<16x4xbf16>, vector<256x4xf32> -> vector<256x4xf32>
    %55 = arith.addf %49, %54 : vector<256x4xf32>
    %56 = vector.extract_strided_slice %16 {offsets = [2, 0, 0], sizes = [16, 16, 16], strides = [1, 1, 1]} : vector<18x18x16xf32> to vector<16x16x16xf32>
    %57 = vector.shape_cast %56 : vector<16x16x16xf32> to vector<256x16xf32>
    %58 = arith.truncf %57 : vector<256x16xf32> to vector<256x16xbf16>
    %c96 = arith.constant 96 : index
    %c0_25 = arith.constant 0 : index
    %59 = vector.load %arg4[%c96, %c0_25] : memref<144x4xbf16, #tpu.memory_space<vmem>>, vector<16x4xbf16>
    %cst_26 = arith.constant dense<0.000000e+00> : vector<256x4xf32>
    %60 = tpu.matmul %58, %59, %cst_26 {dimension_numbers = #tpu.dot_dimension_numbers<[1], [0], [0], [1], [0, 0, 1, 1], [], []>} : vector<256x16xbf16>, vector<16x4xbf16>, vector<256x4xf32> -> vector<256x4xf32>
    %61 = arith.addf %55, %60 : vector<256x4xf32>
    %62 = vector.extract_strided_slice %16 {offsets = [2, 1, 0], sizes = [16, 16, 16], strides = [1, 1, 1]} : vector<18x18x16xf32> to vector<16x16x16xf32>
    %63 = vector.shape_cast %62 : vector<16x16x16xf32> to vector<256x16xf32>
    %64 = arith.truncf %63 : vector<256x16xf32> to vector<256x16xbf16>
    %c112 = arith.constant 112 : index
    %c0_27 = arith.constant 0 : index
    %65 = vector.load %arg4[%c112, %c0_27] : memref<144x4xbf16, #tpu.memory_space<vmem>>, vector<16x4xbf16>
    %cst_28 = arith.constant dense<0.000000e+00> : vector<256x4xf32>
    %66 = tpu.matmul %64, %65, %cst_28 {dimension_numbers = #tpu.dot_dimension_numbers<[1], [0], [0], [1], [0, 0, 1, 1], [], []>} : vector<256x16xbf16>, vector<16x4xbf16>, vector<256x4xf32> -> vector<256x4xf32>
    %67 = arith.addf %61, %66 : vector<256x4xf32>
    %68 = vector.extract_strided_slice %16 {offsets = [2, 2, 0], sizes = [16, 16, 16], strides = [1, 1, 1]} : vector<18x18x16xf32> to vector<16x16x16xf32>
    %69 = vector.shape_cast %68 : vector<16x16x16xf32> to vector<256x16xf32>
    %70 = arith.truncf %69 : vector<256x16xf32> to vector<256x16xbf16>
    %c128 = arith.constant 128 : index
    %c0_29 = arith.constant 0 : index
    %71 = vector.load %arg4[%c128, %c0_29] : memref<144x4xbf16, #tpu.memory_space<vmem>>, vector<16x4xbf16>
    %cst_30 = arith.constant dense<0.000000e+00> : vector<256x4xf32>
    %72 = tpu.matmul %70, %71, %cst_30 {dimension_numbers = #tpu.dot_dimension_numbers<[1], [0], [0], [1], [0, 0, 1, 1], [], []>} : vector<256x16xbf16>, vector<16x4xbf16>, vector<256x4xf32> -> vector<256x4xf32>
    %73 = arith.addf %67, %72 : vector<256x4xf32>
    %74 = arith.truncf %73 : vector<256x4xf32> to vector<256x4xbf16>
    %c0_31 = arith.constant 0 : index
    %c0_32 = arith.constant 0 : index
    %c0_33 = arith.constant 0 : index
    %75 = vector.load %arg5[%c0_31, %c0_32, %c0_33] : memref<1x256x4xbf16, #tpu.memory_space<vmem>>, vector<1x256x4xbf16>
    %76 = vector.shape_cast %75 : vector<1x256x4xbf16> to vector<256x4xbf16>
    %77 = vector.shape_cast %74 : vector<256x4xbf16> to vector<1x256x4xbf16>
    tpu.vector_store %arg5[%c0_31, %c0_32, %c0_33], %77 {strides = array<i32>} : memref<1x256x4xbf16, #tpu.memory_space<vmem>>, vector<1x256x4xbf16>,
    %cst_34 = arith.constant dense<0.000000e+00> : vector<4xf32>
    %78 = vector.multi_reduction <add>, %73, %cst_34 [0] : vector<256x4xf32> to vector<4xf32>
    %79 = vector.shape_cast %78 : vector<4xf32> to vector<1x4xf32>
    %80 = arith.addf %17, %79 : vector<1x4xf32>
    %81 = arith.mulf %73, %73 : vector<256x4xf32>
    %cst_35 = arith.constant dense<0.000000e+00> : vector<4xf32>
    %82 = vector.multi_reduction <add>, %81, %cst_35 [0] : vector<256x4xf32> to vector<4xf32>
    %83 = vector.shape_cast %82 : vector<4xf32> to vector<1x4xf32>
    %84 = arith.addf %18, %83 : vector<1x4xf32>
    %c0_36 = arith.constant 0 : index
    %c0_37 = arith.constant 0 : index
    %c0_38 = arith.constant 0 : index
    %85 = vector.load %arg6[%c0_36, %c0_37, %c0_38] : memref<1x1x4xf32, #tpu.memory_space<vmem>>, vector<1x1x4xf32>
    %86 = vector.shape_cast %85 : vector<1x1x4xf32> to vector<1x4xf32>
    %87 = vector.shape_cast %80 : vector<1x4xf32> to vector<1x1x4xf32>
    tpu.vector_store %arg6[%c0_36, %c0_37, %c0_38], %87 {strides = array<i32>} : memref<1x1x4xf32, #tpu.memory_space<vmem>>, vector<1x1x4xf32>,
    %c0_39 = arith.constant 0 : index
    %c0_40 = arith.constant 0 : index
    %c0_41 = arith.constant 0 : index
    %88 = vector.load %arg7[%c0_39, %c0_40, %c0_41] : memref<1x1x4xf32, #tpu.memory_space<vmem>>, vector<1x1x4xf32>
    %89 = vector.shape_cast %88 : vector<1x1x4xf32> to vector<1x4xf32>
    %90 = vector.shape_cast %84 : vector<1x4xf32> to vector<1x1x4xf32>
    tpu.vector_store %arg7[%c0_39, %c0_40, %c0_41], %90 {strides = array<i32>} : memref<1x1x4xf32, #tpu.memory_space<vmem>>, vector<1x1x4xf32>,
    return
  }
  func.func @transform_0(%arg0: i32) -> (i32, i32, i32, i32) {
    %c0_i32 = arith.constant 0 : i32
    %c0_i32_0 = arith.constant 0 : i32
    %c0_i32_1 = arith.constant 0 : i32
    %c0_i32_2 = arith.constant 0 : i32
    return %arg0, %c0_i32, %c0_i32_0, %c0_i32_1 : i32, i32, i32, i32
  }
  func.func @transform_1(%arg0: i32) -> (i32, i32) {
    %c0_i32 = arith.constant 0 : i32
    %c0_i32_0 = arith.constant 0 : i32
    %c0_i32_1 = arith.constant 0 : i32
    return %c0_i32, %c0_i32_0 : i32, i32
  }
  func.func @transform_2(%arg0: i32) -> (i32, i32) {
    %c0_i32 = arith.constant 0 : i32
    %c0_i32_0 = arith.constant 0 : i32
    %c0_i32_1 = arith.constant 0 : i32
    return %c0_i32, %c0_i32_0 : i32, i32
  }
  func.func @transform_3(%arg0: i32) -> (i32, i32) {
    %c0_i32 = arith.constant 0 : i32
    %c0_i32_0 = arith.constant 0 : i32
    %c0_i32_1 = arith.constant 0 : i32
    return %c0_i32, %c0_i32_0 : i32, i32
  }
  func.func @transform_4(%arg0: i32) -> (i32, i32, i32) {
    %c0_i32 = arith.constant 0 : i32
    %c0_i32_0 = arith.constant 0 : i32
    %c0_i32_1 = arith.constant 0 : i32
    return %arg0, %c0_i32, %c0_i32_0 : i32, i32, i32
  }
  func.func @transform_5(%arg0: i32) -> (i32, i32, i32) {
    %c0_i32 = arith.constant 0 : i32
    %c0_i32_0 = arith.constant 0 : i32
    %c0_i32_1 = arith.constant 0 : i32
    return %arg0, %c0_i32, %c0_i32_0 : i32, i32, i32
  }
  func.func @transform_6(%arg0: i32) -> (i32, i32, i32) {
    %c0_i32 = arith.constant 0 : i32
    %c0_i32_0 = arith.constant 0 : i32
    %c0_i32_1 = arith.constant 0 : i32
    return %arg0, %c0_i32, %c0_i32_0 : i32, i32, i32
  }
}

module attributes {stable_mosaic.version = 11 : i64} {
  func.func @_bn_relu_conv1x1_kernel(%arg0: i32, %arg1: memref<256x4xbf16, #tpu.memory_space<vmem>>, %arg2: memref<256x4xf32, #tpu.memory_space<vmem>>, %arg3: memref<1x8xf32, #tpu.memory_space<vmem>>, %arg4: memref<1x8xf32, #tpu.memory_space<vmem>>, %arg5: memref<8x16xbf16, #tpu.memory_space<vmem>>, %arg6: memref<256x16xbf16, #tpu.memory_space<vmem>>, %arg7: memref<1x1x16xf32, #tpu.memory_space<vmem>>, %arg8: memref<1x1x16xf32, #tpu.memory_space<vmem>>) attributes {dimension_semantics = [#tpu.dimension_semantics<parallel>], iteration_bounds = array<i64: 2>, scalar_prefetch = 0 : i64, scratch_operands = 0 : i64, tpu.core_type = #tpu.core_type<tc>, window_params = [{transform_indices = @transform_0, window_bounds = array<i64: 256, 4>}, {transform_indices = @transform_1, window_bounds = array<i64: 256, 4>}, {pipeline_mode = #tpu.pipeline_mode<synchronous>, transform_indices = @transform_2, window_bounds = array<i64: 1, 8>}, {pipeline_mode = #tpu.pipeline_mode<synchronous>, transform_indices = @transform_3, window_bounds = array<i64: 1, 8>}, {pipeline_mode = #tpu.pipeline_mode<synchronous>, transform_indices = @transform_4, window_bounds = array<i64: 8, 16>}, {transform_indices = @transform_5, window_bounds = array<i64: 256, 16>}, {transform_indices = @transform_6, window_bounds = array<i64: 1, 1, 16>}, {transform_indices = @transform_7, window_bounds = array<i64: 1, 1, 16>}]} {
    %c0 = arith.constant 0 : index
    %c0_0 = arith.constant 0 : index
    %0 = vector.load %arg1[%c0, %c0_0] : memref<256x4xbf16, #tpu.memory_space<vmem>>, vector<256x4xbf16>
    %1 = arith.extf %0 : vector<256x4xbf16> to vector<256x4xf32>
    %c0_1 = arith.constant 0 : index
    %c0_2 = arith.constant 0 : index
    %2 = vector.load %arg3[%c0_1, %c0_2] : memref<1x8xf32, #tpu.memory_space<vmem>>, vector<1x4xf32>
    %3 = vector.broadcast %2 : vector<1x4xf32> to vector<256x4xf32>
    %4 = arith.mulf %1, %3 : vector<256x4xf32>
    %c0_3 = arith.constant 0 : index
    %c0_4 = arith.constant 0 : index
    %5 = vector.load %arg4[%c0_3, %c0_4] : memref<1x8xf32, #tpu.memory_space<vmem>>, vector<1x4xf32>
    %6 = vector.broadcast %5 : vector<1x4xf32> to vector<256x4xf32>
    %7 = arith.addf %4, %6 : vector<256x4xf32>
    %cst = arith.constant 0.000000e+00 : f32
    %8 = vector.broadcast %cst : f32 to vector<256x4xf32>
    %9 = arith.maximumf %7, %8 : vector<256x4xf32>
    %10 = arith.truncf %9 : vector<256x4xf32> to vector<256x4xbf16>
    %c0_5 = arith.constant 0 : index
    %c0_6 = arith.constant 0 : index
    %11 = vector.load %arg5[%c0_5, %c0_6] : memref<8x16xbf16, #tpu.memory_space<vmem>>, vector<4x16xbf16>
    %cst_7 = arith.constant dense<0.000000e+00> : vector<256x16xf32>
    %12 = tpu.matmul %10, %11, %cst_7 {dimension_numbers = #tpu.dot_dimension_numbers<[1], [0], [0], [1], [0, 0, 1, 1], [], []>} : vector<256x4xbf16>, vector<4x16xbf16>, vector<256x16xf32> -> vector<256x16xf32>
    %c0_8 = arith.constant 0 : index
    %c0_9 = arith.constant 0 : index
    %13 = vector.load %arg2[%c0_8, %c0_9] : memref<256x4xf32, #tpu.memory_space<vmem>>, vector<256x4xf32>
    %c0_10 = arith.constant 0 : index
    %c4 = arith.constant 4 : index
    %14 = vector.load %arg3[%c0_10, %c4] : memref<1x8xf32, #tpu.memory_space<vmem>>, vector<1x4xf32>
    %15 = vector.broadcast %14 : vector<1x4xf32> to vector<256x4xf32>
    %16 = arith.mulf %13, %15 : vector<256x4xf32>
    %c0_11 = arith.constant 0 : index
    %c4_12 = arith.constant 4 : index
    %17 = vector.load %arg4[%c0_11, %c4_12] : memref<1x8xf32, #tpu.memory_space<vmem>>, vector<1x4xf32>
    %18 = vector.broadcast %17 : vector<1x4xf32> to vector<256x4xf32>
    %19 = arith.addf %16, %18 : vector<256x4xf32>
    %cst_13 = arith.constant 0.000000e+00 : f32
    %20 = vector.broadcast %cst_13 : f32 to vector<256x4xf32>
    %21 = arith.maximumf %19, %20 : vector<256x4xf32>
    %22 = arith.truncf %21 : vector<256x4xf32> to vector<256x4xbf16>
    %c4_14 = arith.constant 4 : index
    %c0_15 = arith.constant 0 : index
    %23 = vector.load %arg5[%c4_14, %c0_15] : memref<8x16xbf16, #tpu.memory_space<vmem>>, vector<4x16xbf16>
    %cst_16 = arith.constant dense<0.000000e+00> : vector<256x16xf32>
    %24 = tpu.matmul %22, %23, %cst_16 {dimension_numbers = #tpu.dot_dimension_numbers<[1], [0], [0], [1], [0, 0, 1, 1], [], []>} : vector<256x4xbf16>, vector<4x16xbf16>, vector<256x16xf32> -> vector<256x16xf32>
    %25 = arith.addf %12, %24 : vector<256x16xf32>
    %26 = arith.truncf %25 : vector<256x16xf32> to vector<256x16xbf16>
    %c0_17 = arith.constant 0 : index
    %c0_18 = arith.constant 0 : index
    %27 = vector.load %arg6[%c0_17, %c0_18] : memref<256x16xbf16, #tpu.memory_space<vmem>>, vector<256x16xbf16>
    tpu.vector_store %arg6[%c0_17, %c0_18], %26 {strides = array<i32>} : memref<256x16xbf16, #tpu.memory_space<vmem>>, vector<256x16xbf16>,
    %cst_19 = arith.constant dense<0.000000e+00> : vector<16xf32>
    %28 = vector.multi_reduction <add>, %25, %cst_19 [0] : vector<256x16xf32> to vector<16xf32>
    %29 = vector.shape_cast %28 : vector<16xf32> to vector<1x16xf32>
    %c0_20 = arith.constant 0 : index
    %c0_21 = arith.constant 0 : index
    %c0_22 = arith.constant 0 : index
    %30 = vector.load %arg7[%c0_20, %c0_21, %c0_22] : memref<1x1x16xf32, #tpu.memory_space<vmem>>, vector<1x1x16xf32>
    %31 = vector.shape_cast %30 : vector<1x1x16xf32> to vector<1x16xf32>
    %32 = vector.shape_cast %29 : vector<1x16xf32> to vector<1x1x16xf32>
    tpu.vector_store %arg7[%c0_20, %c0_21, %c0_22], %32 {strides = array<i32>} : memref<1x1x16xf32, #tpu.memory_space<vmem>>, vector<1x1x16xf32>,
    %33 = arith.mulf %25, %25 : vector<256x16xf32>
    %cst_23 = arith.constant dense<0.000000e+00> : vector<16xf32>
    %34 = vector.multi_reduction <add>, %33, %cst_23 [0] : vector<256x16xf32> to vector<16xf32>
    %35 = vector.shape_cast %34 : vector<16xf32> to vector<1x16xf32>
    %c0_24 = arith.constant 0 : index
    %c0_25 = arith.constant 0 : index
    %c0_26 = arith.constant 0 : index
    %36 = vector.load %arg8[%c0_24, %c0_25, %c0_26] : memref<1x1x16xf32, #tpu.memory_space<vmem>>, vector<1x1x16xf32>
    %37 = vector.shape_cast %36 : vector<1x1x16xf32> to vector<1x16xf32>
    %38 = vector.shape_cast %35 : vector<1x16xf32> to vector<1x1x16xf32>
    tpu.vector_store %arg8[%c0_24, %c0_25, %c0_26], %38 {strides = array<i32>} : memref<1x1x16xf32, #tpu.memory_space<vmem>>, vector<1x1x16xf32>,
    return
  }
  func.func @transform_0(%arg0: i32) -> (i32, i32) {
    %c0_i32 = arith.constant 0 : i32
    %c0_i32_0 = arith.constant 0 : i32
    return %arg0, %c0_i32 : i32, i32
  }
  func.func @transform_1(%arg0: i32) -> (i32, i32) {
    %c0_i32 = arith.constant 0 : i32
    %c0_i32_0 = arith.constant 0 : i32
    return %arg0, %c0_i32 : i32, i32
  }
  func.func @transform_2(%arg0: i32) -> (i32, i32) {
    %c0_i32 = arith.constant 0 : i32
    %c0_i32_0 = arith.constant 0 : i32
    %c0_i32_1 = arith.constant 0 : i32
    return %c0_i32, %c0_i32_0 : i32, i32
  }
  func.func @transform_3(%arg0: i32) -> (i32, i32) {
    %c0_i32 = arith.constant 0 : i32
    %c0_i32_0 = arith.constant 0 : i32
    %c0_i32_1 = arith.constant 0 : i32
    return %c0_i32, %c0_i32_0 : i32, i32
  }
  func.func @transform_4(%arg0: i32) -> (i32, i32) {
    %c0_i32 = arith.constant 0 : i32
    %c0_i32_0 = arith.constant 0 : i32
    %c0_i32_1 = arith.constant 0 : i32
    return %c0_i32, %c0_i32_0 : i32, i32
  }
  func.func @transform_5(%arg0: i32) -> (i32, i32) {
    %c0_i32 = arith.constant 0 : i32
    %c0_i32_0 = arith.constant 0 : i32
    return %arg0, %c0_i32 : i32, i32
  }
  func.func @transform_6(%arg0: i32) -> (i32, i32, i32) {
    %c0_i32 = arith.constant 0 : i32
    %c0_i32_0 = arith.constant 0 : i32
    %c0_i32_1 = arith.constant 0 : i32
    return %arg0, %c0_i32, %c0_i32_0 : i32, i32, i32
  }
  func.func @transform_7(%arg0: i32) -> (i32, i32, i32) {
    %c0_i32 = arith.constant 0 : i32
    %c0_i32_0 = arith.constant 0 : i32
    %c0_i32_1 = arith.constant 0 : i32
    return %arg0, %c0_i32, %c0_i32_0 : i32, i32, i32
  }
}

module attributes {stable_mosaic.version = 11 : i64} {
  func.func @_bn_relu_conv3x3_kernel(%arg0: i32, %arg1: memref<1x16x16x16xbf16, #tpu.memory_space<vmem>>, %arg2: memref<1x16xf32, #tpu.memory_space<vmem>>, %arg3: memref<1x16xf32, #tpu.memory_space<vmem>>, %arg4: memref<144x4xbf16, #tpu.memory_space<vmem>>, %arg5: memref<1x256x4xbf16, #tpu.memory_space<vmem>>, %arg6: memref<1x1x4xf32, #tpu.memory_space<vmem>>, %arg7: memref<1x1x4xf32, #tpu.memory_space<vmem>>) attributes {dimension_semantics = [#tpu.dimension_semantics<parallel>], iteration_bounds = array<i64: 2>, scalar_prefetch = 0 : i64, scratch_operands = 0 : i64, tpu.core_type = #tpu.core_type<tc>, window_params = [{transform_indices = @transform_0, window_bounds = array<i64: 1, 16, 16, 16>}, {pipeline_mode = #tpu.pipeline_mode<synchronous>, transform_indices = @transform_1, window_bounds = array<i64: 1, 16>}, {pipeline_mode = #tpu.pipeline_mode<synchronous>, transform_indices = @transform_2, window_bounds = array<i64: 1, 16>}, {pipeline_mode = #tpu.pipeline_mode<synchronous>, transform_indices = @transform_3, window_bounds = array<i64: 144, 4>}, {transform_indices = @transform_4, window_bounds = array<i64: 1, 256, 4>}, {transform_indices = @transform_5, window_bounds = array<i64: 1, 1, 4>}, {transform_indices = @transform_6, window_bounds = array<i64: 1, 1, 4>}]} {
    %c0 = arith.constant 0 : index
    %c0_0 = arith.constant 0 : index
    %c0_1 = arith.constant 0 : index
    %c0_2 = arith.constant 0 : index
    %0 = vector.load %arg1[%c0, %c0_0, %c0_1, %c0_2] : memref<1x16x16x16xbf16, #tpu.memory_space<vmem>>, vector<1x16x16x16xbf16>
    %1 = vector.shape_cast %0 : vector<1x16x16x16xbf16> to vector<16x16x16xbf16>
    %2 = arith.extf %1 : vector<16x16x16xbf16> to vector<16x16x16xf32>
    %c0_3 = arith.constant 0 : index
    %c0_4 = arith.constant 0 : index
    %3 = vector.load %arg2[%c0_3, %c0_4] : memref<1x16xf32, #tpu.memory_space<vmem>>, vector<1x16xf32>
    %4 = vector.shape_cast %3 : vector<1x16xf32> to vector<1x1x16xf32>
    %5 = vector.broadcast %4 : vector<1x1x16xf32> to vector<16x16x16xf32>
    %6 = arith.mulf %2, %5 : vector<16x16x16xf32>
    %c0_5 = arith.constant 0 : index
    %c0_6 = arith.constant 0 : index
    %7 = vector.load %arg3[%c0_5, %c0_6] : memref<1x16xf32, #tpu.memory_space<vmem>>, vector<1x16xf32>
    %8 = vector.shape_cast %7 : vector<1x16xf32> to vector<1x1x16xf32>
    %9 = vector.broadcast %8 : vector<1x1x16xf32> to vector<16x16x16xf32>
    %10 = arith.addf %6, %9 : vector<16x16x16xf32>
    %cst = arith.constant 0.000000e+00 : f32
    %11 = vector.broadcast %cst : f32 to vector<16x16x16xf32>
    %12 = arith.maximumf %10, %11 : vector<16x16x16xf32>
    %cst_7 = arith.constant 0.000000e+00 : f32
    %13 = vector.broadcast %cst_7 : f32 to vector<16x1x16xf32>
    %cst_8 = arith.constant 0.000000e+00 : f32
    %14 = vector.broadcast %cst_8 : f32 to vector<1x18x16xf32>
    %15 = tpu.concatenate %13, %12, %13 in 1 : vector<16x1x16xf32>, vector<16x16x16xf32>, vector<16x1x16xf32> -> vector<16x18x16xf32>
    %16 = tpu.concatenate %14, %15, %14 in 0 : vector<1x18x16xf32>, vector<16x18x16xf32>, vector<1x18x16xf32> -> vector<18x18x16xf32>
    %cst_9 = arith.constant 0.000000e+00 : f32
    %17 = vector.broadcast %cst_9 : f32 to vector<1x4xf32>
    %cst_10 = arith.constant 0.000000e+00 : f32
    %18 = vector.broadcast %cst_10 : f32 to vector<1x4xf32>
    %cst_11 = arith.constant 0.000000e+00 : f32
    %19 = vector.broadcast %cst_11 : f32 to vector<256x4xf32>
    %20 = vector.extract_strided_slice %16 {offsets = [0, 0, 0], sizes = [16, 16, 16], strides = [1, 1, 1]} : vector<18x18x16xf32> to vector<16x16x16xf32>
    %21 = vector.shape_cast %20 : vector<16x16x16xf32> to vector<256x16xf32>
    %22 = arith.truncf %21 : vector<256x16xf32> to vector<256x16xbf16>
    %c0_12 = arith.constant 0 : index
    %c0_13 = arith.constant 0 : index
    %23 = vector.load %arg4[%c0_12, %c0_13] : memref<144x4xbf16, #tpu.memory_space<vmem>>, vector<16x4xbf16>
    %cst_14 = arith.constant dense<0.000000e+00> : vector<256x4xf32>
    %24 = tpu.matmul %22, %23, %cst_14 {dimension_numbers = #tpu.dot_dimension_numbers<[1], [0], [0], [1], [0, 0, 1, 1], [], []>} : vector<256x16xbf16>, vector<16x4xbf16>, vector<256x4xf32> -> vector<256x4xf32>
    %25 = arith.addf %19, %24 : vector<256x4xf32>
    %26 = vector.extract_strided_slice %16 {offsets = [0, 1, 0], sizes = [16, 16, 16], strides = [1, 1, 1]} : vector<18x18x16xf32> to vector<16x16x16xf32>
    %27 = vector.shape_cast %26 : vector<16x16x16xf32> to vector<256x16xf32>
    %28 = arith.truncf %27 : vector<256x16xf32> to vector<256x16xbf16>
    %c16 = arith.constant 16 : index
    %c0_15 = arith.constant 0 : index
    %29 = vector.load %arg4[%c16, %c0_15] : memref<144x4xbf16, #tpu.memory_space<vmem>>, vector<16x4xbf16>
    %cst_16 = arith.constant dense<0.000000e+00> : vector<256x4xf32>
    %30 = tpu.matmul %28, %29, %cst_16 {dimension_numbers = #tpu.dot_dimension_numbers<[1], [0], [0], [1], [0, 0, 1, 1], [], []>} : vector<256x16xbf16>, vector<16x4xbf16>, vector<256x4xf32> -> vector<256x4xf32>
    %31 = arith.addf %25, %30 : vector<256x4xf32>
    %32 = vector.extract_strided_slice %16 {offsets = [0, 2, 0], sizes = [16, 16, 16], strides = [1, 1, 1]} : vector<18x18x16xf32> to vector<16x16x16xf32>
    %33 = vector.shape_cast %32 : vector<16x16x16xf32> to vector<256x16xf32>
    %34 = arith.truncf %33 : vector<256x16xf32> to vector<256x16xbf16>
    %c32 = arith.constant 32 : index
    %c0_17 = arith.constant 0 : index
    %35 = vector.load %arg4[%c32, %c0_17] : memref<144x4xbf16, #tpu.memory_space<vmem>>, vector<16x4xbf16>
    %cst_18 = arith.constant dense<0.000000e+00> : vector<256x4xf32>
    %36 = tpu.matmul %34, %35, %cst_18 {dimension_numbers = #tpu.dot_dimension_numbers<[1], [0], [0], [1], [0, 0, 1, 1], [], []>} : vector<256x16xbf16>, vector<16x4xbf16>, vector<256x4xf32> -> vector<256x4xf32>
    %37 = arith.addf %31, %36 : vector<256x4xf32>
    %38 = vector.extract_strided_slice %16 {offsets = [1, 0, 0], sizes = [16, 16, 16], strides = [1, 1, 1]} : vector<18x18x16xf32> to vector<16x16x16xf32>
    %39 = vector.shape_cast %38 : vector<16x16x16xf32> to vector<256x16xf32>
    %40 = arith.truncf %39 : vector<256x16xf32> to vector<256x16xbf16>
    %c48 = arith.constant 48 : index
    %c0_19 = arith.constant 0 : index
    %41 = vector.load %arg4[%c48, %c0_19] : memref<144x4xbf16, #tpu.memory_space<vmem>>, vector<16x4xbf16>
    %cst_20 = arith.constant dense<0.000000e+00> : vector<256x4xf32>
    %42 = tpu.matmul %40, %41, %cst_20 {dimension_numbers = #tpu.dot_dimension_numbers<[1], [0], [0], [1], [0, 0, 1, 1], [], []>} : vector<256x16xbf16>, vector<16x4xbf16>, vector<256x4xf32> -> vector<256x4xf32>
    %43 = arith.addf %37, %42 : vector<256x4xf32>
    %44 = vector.extract_strided_slice %16 {offsets = [1, 1, 0], sizes = [16, 16, 16], strides = [1, 1, 1]} : vector<18x18x16xf32> to vector<16x16x16xf32>
    %45 = vector.shape_cast %44 : vector<16x16x16xf32> to vector<256x16xf32>
    %46 = arith.truncf %45 : vector<256x16xf32> to vector<256x16xbf16>
    %c64 = arith.constant 64 : index
    %c0_21 = arith.constant 0 : index
    %47 = vector.load %arg4[%c64, %c0_21] : memref<144x4xbf16, #tpu.memory_space<vmem>>, vector<16x4xbf16>
    %cst_22 = arith.constant dense<0.000000e+00> : vector<256x4xf32>
    %48 = tpu.matmul %46, %47, %cst_22 {dimension_numbers = #tpu.dot_dimension_numbers<[1], [0], [0], [1], [0, 0, 1, 1], [], []>} : vector<256x16xbf16>, vector<16x4xbf16>, vector<256x4xf32> -> vector<256x4xf32>
    %49 = arith.addf %43, %48 : vector<256x4xf32>
    %50 = vector.extract_strided_slice %16 {offsets = [1, 2, 0], sizes = [16, 16, 16], strides = [1, 1, 1]} : vector<18x18x16xf32> to vector<16x16x16xf32>
    %51 = vector.shape_cast %50 : vector<16x16x16xf32> to vector<256x16xf32>
    %52 = arith.truncf %51 : vector<256x16xf32> to vector<256x16xbf16>
    %c80 = arith.constant 80 : index
    %c0_23 = arith.constant 0 : index
    %53 = vector.load %arg4[%c80, %c0_23] : memref<144x4xbf16, #tpu.memory_space<vmem>>, vector<16x4xbf16>
    %cst_24 = arith.constant dense<0.000000e+00> : vector<256x4xf32>
    %54 = tpu.matmul %52, %53, %cst_24 {dimension_numbers = #tpu.dot_dimension_numbers<[1], [0], [0], [1], [0, 0, 1, 1], [], []>} : vector<256x16xbf16>, vector<16x4xbf16>, vector<256x4xf32> -> vector<256x4xf32>
    %55 = arith.addf %49, %54 : vector<256x4xf32>
    %56 = vector.extract_strided_slice %16 {offsets = [2, 0, 0], sizes = [16, 16, 16], strides = [1, 1, 1]} : vector<18x18x16xf32> to vector<16x16x16xf32>
    %57 = vector.shape_cast %56 : vector<16x16x16xf32> to vector<256x16xf32>
    %58 = arith.truncf %57 : vector<256x16xf32> to vector<256x16xbf16>
    %c96 = arith.constant 96 : index
    %c0_25 = arith.constant 0 : index
    %59 = vector.load %arg4[%c96, %c0_25] : memref<144x4xbf16, #tpu.memory_space<vmem>>, vector<16x4xbf16>
    %cst_26 = arith.constant dense<0.000000e+00> : vector<256x4xf32>
    %60 = tpu.matmul %58, %59, %cst_26 {dimension_numbers = #tpu.dot_dimension_numbers<[1], [0], [0], [1], [0, 0, 1, 1], [], []>} : vector<256x16xbf16>, vector<16x4xbf16>, vector<256x4xf32> -> vector<256x4xf32>
    %61 = arith.addf %55, %60 : vector<256x4xf32>
    %62 = vector.extract_strided_slice %16 {offsets = [2, 1, 0], sizes = [16, 16, 16], strides = [1, 1, 1]} : vector<18x18x16xf32> to vector<16x16x16xf32>
    %63 = vector.shape_cast %62 : vector<16x16x16xf32> to vector<256x16xf32>
    %64 = arith.truncf %63 : vector<256x16xf32> to vector<256x16xbf16>
    %c112 = arith.constant 112 : index
    %c0_27 = arith.constant 0 : index
    %65 = vector.load %arg4[%c112, %c0_27] : memref<144x4xbf16, #tpu.memory_space<vmem>>, vector<16x4xbf16>
    %cst_28 = arith.constant dense<0.000000e+00> : vector<256x4xf32>
    %66 = tpu.matmul %64, %65, %cst_28 {dimension_numbers = #tpu.dot_dimension_numbers<[1], [0], [0], [1], [0, 0, 1, 1], [], []>} : vector<256x16xbf16>, vector<16x4xbf16>, vector<256x4xf32> -> vector<256x4xf32>
    %67 = arith.addf %61, %66 : vector<256x4xf32>
    %68 = vector.extract_strided_slice %16 {offsets = [2, 2, 0], sizes = [16, 16, 16], strides = [1, 1, 1]} : vector<18x18x16xf32> to vector<16x16x16xf32>
    %69 = vector.shape_cast %68 : vector<16x16x16xf32> to vector<256x16xf32>
    %70 = arith.truncf %69 : vector<256x16xf32> to vector<256x16xbf16>
    %c128 = arith.constant 128 : index
    %c0_29 = arith.constant 0 : index
    %71 = vector.load %arg4[%c128, %c0_29] : memref<144x4xbf16, #tpu.memory_space<vmem>>, vector<16x4xbf16>
    %cst_30 = arith.constant dense<0.000000e+00> : vector<256x4xf32>
    %72 = tpu.matmul %70, %71, %cst_30 {dimension_numbers = #tpu.dot_dimension_numbers<[1], [0], [0], [1], [0, 0, 1, 1], [], []>} : vector<256x16xbf16>, vector<16x4xbf16>, vector<256x4xf32> -> vector<256x4xf32>
    %73 = arith.addf %67, %72 : vector<256x4xf32>
    %74 = arith.truncf %73 : vector<256x4xf32> to vector<256x4xbf16>
    %c0_31 = arith.constant 0 : index
    %c0_32 = arith.constant 0 : index
    %c0_33 = arith.constant 0 : index
    %75 = vector.load %arg5[%c0_31, %c0_32, %c0_33] : memref<1x256x4xbf16, #tpu.memory_space<vmem>>, vector<1x256x4xbf16>
    %76 = vector.shape_cast %75 : vector<1x256x4xbf16> to vector<256x4xbf16>
    %77 = vector.shape_cast %74 : vector<256x4xbf16> to vector<1x256x4xbf16>
    tpu.vector_store %arg5[%c0_31, %c0_32, %c0_33], %77 {strides = array<i32>} : memref<1x256x4xbf16, #tpu.memory_space<vmem>>, vector<1x256x4xbf16>,
    %cst_34 = arith.constant dense<0.000000e+00> : vector<4xf32>
    %78 = vector.multi_reduction <add>, %73, %cst_34 [0] : vector<256x4xf32> to vector<4xf32>
    %79 = vector.shape_cast %78 : vector<4xf32> to vector<1x4xf32>
    %80 = arith.addf %17, %79 : vector<1x4xf32>
    %81 = arith.mulf %73, %73 : vector<256x4xf32>
    %cst_35 = arith.constant dense<0.000000e+00> : vector<4xf32>
    %82 = vector.multi_reduction <add>, %81, %cst_35 [0] : vector<256x4xf32> to vector<4xf32>
    %83 = vector.shape_cast %82 : vector<4xf32> to vector<1x4xf32>
    %84 = arith.addf %18, %83 : vector<1x4xf32>
    %c0_36 = arith.constant 0 : index
    %c0_37 = arith.constant 0 : index
    %c0_38 = arith.constant 0 : index
    %85 = vector.load %arg6[%c0_36, %c0_37, %c0_38] : memref<1x1x4xf32, #tpu.memory_space<vmem>>, vector<1x1x4xf32>
    %86 = vector.shape_cast %85 : vector<1x1x4xf32> to vector<1x4xf32>
    %87 = vector.shape_cast %80 : vector<1x4xf32> to vector<1x1x4xf32>
    tpu.vector_store %arg6[%c0_36, %c0_37, %c0_38], %87 {strides = array<i32>} : memref<1x1x4xf32, #tpu.memory_space<vmem>>, vector<1x1x4xf32>,
    %c0_39 = arith.constant 0 : index
    %c0_40 = arith.constant 0 : index
    %c0_41 = arith.constant 0 : index
    %88 = vector.load %arg7[%c0_39, %c0_40, %c0_41] : memref<1x1x4xf32, #tpu.memory_space<vmem>>, vector<1x1x4xf32>
    %89 = vector.shape_cast %88 : vector<1x1x4xf32> to vector<1x4xf32>
    %90 = vector.shape_cast %84 : vector<1x4xf32> to vector<1x1x4xf32>
    tpu.vector_store %arg7[%c0_39, %c0_40, %c0_41], %90 {strides = array<i32>} : memref<1x1x4xf32, #tpu.memory_space<vmem>>, vector<1x1x4xf32>,
    return
  }
  func.func @transform_0(%arg0: i32) -> (i32, i32, i32, i32) {
    %c0_i32 = arith.constant 0 : i32
    %c0_i32_0 = arith.constant 0 : i32
    %c0_i32_1 = arith.constant 0 : i32
    %c0_i32_2 = arith.constant 0 : i32
    return %arg0, %c0_i32, %c0_i32_0, %c0_i32_1 : i32, i32, i32, i32
  }
  func.func @transform_1(%arg0: i32) -> (i32, i32) {
    %c0_i32 = arith.constant 0 : i32
    %c0_i32_0 = arith.constant 0 : i32
    %c0_i32_1 = arith.constant 0 : i32
    return %c0_i32, %c0_i32_0 : i32, i32
  }
  func.func @transform_2(%arg0: i32) -> (i32, i32) {
    %c0_i32 = arith.constant 0 : i32
    %c0_i32_0 = arith.constant 0 : i32
    %c0_i32_1 = arith.constant 0 : i32
    return %c0_i32, %c0_i32_0 : i32, i32
  }
  func.func @transform_3(%arg0: i32) -> (i32, i32) {
    %c0_i32 = arith.constant 0 : i32
    %c0_i32_0 = arith.constant 0 : i32
    %c0_i32_1 = arith.constant 0 : i32
    return %c0_i32, %c0_i32_0 : i32, i32
  }
  func.func @transform_4(%arg0: i32) -> (i32, i32, i32) {
    %c0_i32 = arith.constant 0 : i32
    %c0_i32_0 = arith.constant 0 : i32
    %c0_i32_1 = arith.constant 0 : i32
    return %arg0, %c0_i32, %c0_i32_0 : i32, i32, i32
  }
  func.func @transform_5(%arg0: i32) -> (i32, i32, i32) {
    %c0_i32 = arith.constant 0 : i32
    %c0_i32_0 = arith.constant 0 : i32
    %c0_i32_1 = arith.constant 0 : i32
    return %arg0, %c0_i32, %c0_i32_0 : i32, i32, i32
  }
  func.func @transform_6(%arg0: i32) -> (i32, i32, i32) {
    %c0_i32 = arith.constant 0 : i32
    %c0_i32_0 = arith.constant 0 : i32
    %c0_i32_1 = arith.constant 0 : i32
    return %arg0, %c0_i32, %c0_i32_0 : i32, i32, i32
  }
}

</mosaic_0001>

<bundles_post_ra>
// kernel: dense_block_forward.4
= control target key start
LH: loop header
LB: loop body
LE: loop exit
PB: predicated region body
PF: predicated region fallthrough
CT: control target
= control target key end

     0   :  { %s996_s21 = smov 0   ;;  %s1453_s0 = inlined_call_operand.vmem [shape: f32[512,4], index: 0, kind: input, shape index: {}]   ;;  %s1454_s1 = inlined_call_operand.vmem [shape: f32[1,4], index: 1, kind: input, shape index: {}]   ;;  %s1455_s2 = inlined_call_operand.vmem [shape: f32[1,4], index: 2, kind: input, shape index: {}]   ;;  %s1456_s3 = inlined_call_operand.vmem [shape: bf16[4,16], index: 3, kind: input, shape index: {}]   ;;  %s1457_s4 = inlined_call_operand.vmem [shape: bf16[512,16], index: 4, kind: output, shape index: {0}]   ;;  %s1458_s5 = inlined_call_operand.vmem [shape: f32[2,1,16], index: 5, kind: output, shape index: {1}]   ;;  %s1459_s6 = inlined_call_operand.vmem [shape: f32[2,1,16], index: 6, kind: output, shape index: {2}]  }
   0x1 LB: > { %s1002_s22 = sadd.s32 4294967295, %s959_s21   ;;  %p917_p0 = scmp.ge.s32.totalorder %s959_s21, 1  ;;  %s959_s21 = sphi %s996_s21, %s17_s21  }
   0x2   : > { %p218_p1 = scmp.lt.s32.totalorder %s959_s21, 3 }
   0x4   : > { %p219_p2 = pnand %p917_p0, %p218_p1 }
   0x5   : > { %s918_s25 = sshll.u32 (!%p219_p2), %s1002_s22, 5  ;;  %p266_p4 = scmp.lt.s32.totalorder (!%p219_p2), %s1002_s22, 1 }
   0x6   : > { %222 = sbr.rel (%p219_p2) target bundleno = 271 (0x10f), region = 36  ;;  %p255_p3 = scmp.lt.s32.totalorder (!%p219_p2), %s918_s25, 63 }
   0xb   : > { %v425_v0 = vld [vmem:[%s1456_s3] sm:$0x3]  ;;  %vm475_vm0 = vcmask 1041408   ;;  %s1461_s25 = smov (!%p255_p3, %s918_s25), 63  ;;  %vm426_vm1 = vcmask 31744   ;;  %vm600_vm2 = vcmask 125952  }
   0xc   : > { %v477_v1 = vsel %vm475_vm0, %v425_v0, 0  ;;  %v1015_v2 = vld [vmem:[%s1454_s1] ss:$0 sm:$0xff]  ;;  %s919_s28 = sshll.u32 %s1461_s25, 3  ;;  %s921_s10 = sshll.u32 %s1461_s25, 2  ;;  %vm633_vm3 = vcmask 130048  }
   0xd   : > { %486 = vmatpush.bf16.msra.mxu0 %v477_v1  ;;  %940 = vmatpush.bf16.msra.mxu1 %v477_v1  ;;  %s1021_s7 = scalar_lea.vmem %s1453_s0, %s919_s28  ;;  %v1026_v3 = vld [vmem:[%s1455_s2] ss:$0 sm:$0xff]  ;;  %s1144_s13 = scalar_lea.vmem %s1457_s4, %s921_s10  ;;  %vm703_vm4 = vcmask 122880  }
   0xe   : > { %941 = vmatpush.bf16.msra.mxu2 %v477_v1  ;;  %942 = vmatpush.bf16.msra.mxu3 %v477_v1  ;;  %v273_v4 = vld [vmem:[%s1021_s7] sm:$0xff]  ;;  %v274_v5 = vld [vmem:[%s1021_s7 + $0x8] sm:$0xff]  ;;  %v275_v25 = vld [vmem:[%s1021_s7 + $0x10] sm:$0xff]  ;;  %s1463_s22 = smov (!%p266_p4, %s1002_s22), 1 }
   0xf   : > { %v281_v6 = vld [vmem:[%s1021_s7 + $0x40] sm:$0xff]  ;;  %v309_v7 = vmul.f32 %v1015_v2, %v273_v4  ;;  %v310_v8 = vmul.f32 %v1015_v2, %v274_v5  ;;  %v282_v9 = vld [vmem:[%s1021_s7 + $0x48] sm:$0xff]  ;;  %v276_v26 = vld [vmem:[%s1021_s7 + $0x18] sm:$0xff]  ;;  %v311_v35 = vmul.f32 %v1015_v2, %v275_v25  ;;  %s268_s16 = scalar_lea.vmem %s1458_s5, %s1463_s22  ;;  %s271_s19 = scalar_lea.vmem %s1459_s6, %s1463_s22 }
  0x10   : > { %v317_v10 = vmul.f32 %v1015_v2, %v281_v6  ;;  %v318_v11 = vmul.f32 %v1015_v2, %v282_v9  ;;  %v289_v12 = vld [vmem:[%s1021_s7 + $0x80] sm:$0xff]  ;;  %v290_v13 = vld [vmem:[%s1021_s7 + $0x88] sm:$0xff]  ;;  %v283_v30 = vld [vmem:[%s1021_s7 + $0x50] sm:$0xff]  ;;  %v312_v36 = vmul.f32 %v1015_v2, %v276_v26 }
  0x11   : > { %v345_v14 = vadd.f32 %v1026_v3, %v309_v7  ;;  %v346_v15 = vadd.f32 %v1026_v3, %v310_v8  ;;  %v325_v17 = vmul.f32 %v1015_v2, %v289_v12  ;;  %v326_v19 = vmul.f32 %v1015_v2, %v290_v13  ;;  %v284_v31 = vld [vmem:[%s1021_s7 + $0x58] sm:$0xff]  ;;  %v297_v32 = vld [vmem:[%s1021_s7 + $0xc0] sm:$0xff]  ;;  %v291_v37 = vld [vmem:[%s1021_s7 + $0x90] sm:$0xff] }
  0x12   : > { %v353_v16 = vadd.f32 %v1026_v3, %v317_v10  ;;  %v354_v18 = vadd.f32 %v1026_v3, %v318_v11  ;;  %v292_v38 = vld [vmem:[%s1021_s7 + $0x98] sm:$0xff]  ;;  %v298_v39 = vld [vmem:[%s1021_s7 + $0xc8] sm:$0xff]  ;;  %v319_v41 = vmul.f32 %v1015_v2, %v283_v30  ;;  %v320_v42 = vmul.f32 %v1015_v2, %v284_v31  ;;  %v299_v62 = vld [vmem:[%s1021_s7 + $0xd0] sm:$0xff] }
  0x13   : > { %v377_v20 = vmax.f32 %v345_v14, 0.0  ;;  %v378_v21 = vmax.f32 %v346_v15, 0.0  ;;  %v361_v23 = vadd.f32 %v1026_v3, %v325_v17  ;;  %v362_v27 = vadd.f32 %v1026_v3, %v326_v19  ;;  %v300_v63 = vld [vmem:[%s1021_s7 + $0xd8] sm:$0xff]  ;;  %v277_v8 = vld [vmem:[%s1021_s7 + $0x20] sm:$0xff]  ;;  %v278_v9 = vld [vmem:[%s1021_s7 + $0x28] sm:$0xff] }
  0x14   : > { %v385_v22 = vmax.f32 %v353_v16, 0.0  ;;  %v386_v24 = vmax.f32 %v354_v18, 0.0  ;;  %v333_v43 = vmul.f32 %v1015_v2, %v297_v32  ;;  %v327_v44 = vmul.f32 %v1015_v2, %v291_v37  ;;  %v285_v10 = vld [vmem:[%s1021_s7 + $0x60] sm:$0xff]  ;;  %v286_v11 = vld [vmem:[%s1021_s7 + $0x68] sm:$0xff] }
  0x15   : > { %v409_v28 = vpack.c.bf16 %v378_v21, %v377_v20  ;;  %v393_v29 = vmax.f32 %v361_v23, 0.0  ;;  %v394_v34 = vmax.f32 %v362_v27, 0.0  ;;  %v328_v45 = vmul.f32 %v1015_v2, %v292_v38  ;;  %v293_v17 = vld [vmem:[%s1021_s7 + $0xa0] sm:$0xff]  ;;  %v294_v18 = vld [vmem:[%s1021_s7 + $0xa8] sm:$0xff] }
  0x16   : > { %v413_v33 = vpack.c.bf16 %v386_v24, %v385_v22  ;;  %v334_v46 = vmul.f32 %v1015_v2, %v298_v39  ;;  %v369_v47 = vadd.f32 %v1026_v3, %v333_v43  ;;  %v347_v48 = vadd.f32 %v1026_v3, %v311_v35  ;;  %v302_v35 = vld [vmem:[%s1021_s7 + $0xe8] sm:$0xff] }
  0x17   : > { %922 = vmatmul.msk.bf16.vlgmr.msra.gmra.mxu0 %vm426_vm1, %v409_v28  ;;  %v417_v40 = vpack.c.bf16 %v394_v34, %v393_v29  ;;  %v348_v49 = vadd.f32 %v1026_v3, %v312_v36  ;;  %v355_v50 = vadd.f32 %v1026_v3, %v319_v41  ;;  %v356_v51 = vadd.f32 %v1026_v3, %v320_v42  ;;  %v301_v34 = vld [vmem:[%s1021_s7 + $0xe0] sm:$0xff] }
  0x18   : > { %926 = vmatmul.msk.bf16.vlgmr.msra.gmra.mxu1 %vm426_vm1, %v413_v33  ;;  %v370_v52 = vadd.f32 %v1026_v3, %v334_v46  ;;  %v401_v53 = vmax.f32 %v369_v47, 0.0  ;;  %v363_v54 = vadd.f32 %v1026_v3, %v327_v44  ;;  %v364_v55 = vadd.f32 %v1026_v3, %v328_v45  ;;  %v279_v44 = vld [vmem:[%s1021_s7 + $0x30] sm:$0xff]  ;;  %v280_v45 = vld [vmem:[%s1021_s7 + $0x38] sm:$0xff] }
  0x19   : > { %930 = vmatmul.msk.bf16.vlgmr.msra.gmra.mxu2 %vm426_vm1, %v417_v40  ;;  %v379_v57 = vmax.f32 %v347_v48, 0.0  ;;  %v380_v58 = vmax.f32 %v348_v49, 0.0  ;;  %v387_v59 = vmax.f32 %v355_v50, 0.0  ;;  %v388_v60 = vmax.f32 %v356_v51, 0.0  ;;  %v287_v46 = vld [vmem:[%s1021_s7 + $0x70] sm:$0xff]  ;;  %v288_v47 = vld [vmem:[%s1021_s7 + $0x78] sm:$0xff] }
  0x1a   : > { %v402_v56 = vmax.f32 %v370_v52, 0.0  ;;  %v395_v0 = vmax.f32 %v363_v54, 0.0  ;;  %v396_v1 = vmax.f32 %v364_v55, 0.0  ;;  %v335_v4 = vmul.f32 %v1015_v2, %v299_v62  ;;  %v296_v54 = vld [vmem:[%s1021_s7 + $0xb8] sm:$0xff] }
  0x1b   : > { %v336_v5 = vmul.f32 %v1015_v2, %v300_v63  ;;  %v410_v6 = vpack.c.bf16 %v380_v58, %v379_v57  ;;  %v414_v7 = vpack.c.bf16 %v388_v60, %v387_v59  ;;  %v313_v15 = vmul.f32 %v1015_v2, %v277_v8  ;;  %v303_v8 = vld [vmem:[%s1021_s7 + $0xf0] sm:$0xff] }
  0x1c   : > { %v421_v61 = vpack.c.bf16 %v402_v56, %v401_v53  ;;  %v418_v12 = vpack.c.bf16 %v396_v1, %v395_v0  ;;  %v371_v13 = vadd.f32 %v1026_v3, %v335_v4  ;;  %v314_v16 = vmul.f32 %v1015_v2, %v278_v9  ;;  %v295_v53 = vld [vmem:[%s1021_s7 + $0xb0] sm:$0xff]  ;;  %v304_v9 = vld [vmem:[%s1021_s7 + $0xf8] sm:$0xff] }
  0x1d   : > { %v372_v14 = vadd.f32 %v1026_v3, %v336_v5  ;;  %v321_v19 = vmul.f32 %v1015_v2, %v285_v10  ;;  %v322_v20 = vmul.f32 %v1015_v2, %v286_v11  ;;  %v329_v21 = vmul.f32 %v1015_v2, %v293_v17 }
  0x1e   : > { %934 = vmatmul.msk.bf16.vlgmr.msra.gmra.mxu3 %vm426_vm1, %v421_v61  ;;  %v330_v22 = vmul.f32 %v1015_v2, %v294_v18  ;;  %v403_v23 = vmax.f32 %v371_v13, 0.0  ;;  %v349_v25 = vadd.f32 %v1026_v3, %v313_v15  ;;  %v350_v26 = vadd.f32 %v1026_v3, %v314_v16 }
  0x1f   : > { %v404_v24 = vmax.f32 %v372_v14, 0.0  ;;  %v357_v27 = vadd.f32 %v1026_v3, %v321_v19  ;;  %v358_v28 = vadd.f32 %v1026_v3, %v322_v20  ;;  %v365_v29 = vadd.f32 %v1026_v3, %v329_v21 }
  0x20   : > { %v366_v30 = vadd.f32 %v1026_v3, %v330_v22  ;;  %v381_v32 = vmax.f32 %v349_v25, 0.0  ;;  %v382_v33 = vmax.f32 %v350_v26, 0.0  ;;  %v337_v40 = vmul.f32 %v1015_v2, %v301_v34 }
  0x21   : > { %v422_v31 = vpack.c.bf16 %v404_v24, %v403_v23  ;;  %v389_v36 = vmax.f32 %v357_v27, 0.0  ;;  %v390_v37 = vmax.f32 %v358_v28, 0.0  ;;  %v397_v38 = vmax.f32 %v365_v29, 0.0 }
  0x22   : > { %v398_v39 = vmax.f32 %v366_v30, 0.0  ;;  %v338_v41 = vmul.f32 %v1015_v2, %v302_v35  ;;  %v411_v42 = vpack.c.bf16 %v382_v33, %v381_v32  ;;  %v373_v49 = vadd.f32 %v1026_v3, %v337_v40 }
  0x23   : > { %v415_v43 = vpack.c.bf16 %v390_v37, %v389_v36  ;;  %v315_v51 = vmul.f32 %v1015_v2, %v279_v44  ;;  %v316_v52 = vmul.f32 %v1015_v2, %v280_v45  ;;  %v323_v55 = vmul.f32 %v1015_v2, %v287_v46 }
  0x24   : > { %v419_v48 = vpack.c.bf16 %v398_v39, %v397_v38  ;;  %v374_v50 = vadd.f32 %v1026_v3, %v338_v41  ;;  %v324_v56 = vmul.f32 %v1015_v2, %v288_v47  ;;  %v331_v57 = vmul.f32 %v1015_v2, %v295_v53 }
  0x25   : > { %v332_v58 = vmul.f32 %v1015_v2, %v296_v54  ;;  %v405_v59 = vmax.f32 %v373_v49, 0.0  ;;  %v351_v61 = vadd.f32 %v1026_v3, %v315_v51  ;;  %v352_v62 = vadd.f32 %v1026_v3, %v316_v52 }
  0x26   : > { %v406_v60 = vmax.f32 %v374_v50, 0.0  ;;  %v359_v63 = vadd.f32 %v1026_v3, %v323_v55  ;;  %v360_v0 = vadd.f32 %v1026_v3, %v324_v56  ;;  %v367_v1 = vadd.f32 %v1026_v3, %v331_v57 }
  0x27   : > { %923 = vmatmul.msk.bf16.gmra.mxu0 %vm426_vm1, %v410_v6  ;;  %v368_v4 = vadd.f32 %v1026_v3, %v332_v58  ;;  %v383_v6 = vmax.f32 %v351_v61, 0.0  ;;  %v339_v14 = vmul.f32 %v1015_v2, %v303_v8  ;;  %v340_v15 = vmul.f32 %v1015_v2, %v304_v9 }
  0x28   : > { %927 = vmatmul.msk.bf16.gmra.mxu1 %vm426_vm1, %v414_v7  ;;  %v423_v5 = vpack.c.bf16 %v406_v60, %v405_v59  ;;  %v384_v7 = vmax.f32 %v352_v62, 0.0  ;;  %v391_v10 = vmax.f32 %v359_v63, 0.0  ;;  %v392_v11 = vmax.f32 %v360_v0, 0.0 }
  0x29   : > { %931 = vmatmul.msk.bf16.gmra.mxu2 %vm426_vm1, %v418_v12  ;;  %v399_v12 = vmax.f32 %v367_v1, 0.0  ;;  %v400_v13 = vmax.f32 %v368_v4, 0.0  ;;  %v375_v19 = vadd.f32 %v1026_v3, %v339_v14  ;;  %v376_v20 = vadd.f32 %v1026_v3, %v340_v15 }
  0x2a   : > { %v412_v16 = vpack.c.bf16 %v384_v7, %v383_v6  ;;  %v416_v17 = vpack.c.bf16 %v392_v11, %v391_v10 }
  0x2b   : > { %v420_v18 = vpack.c.bf16 %v400_v13, %v399_v12  ;;  %v407_v21 = vmax.f32 %v375_v19, 0.0  ;;  %v408_v22 = vmax.f32 %v376_v20, 0.0 }
  0x2d   : > { %v424_v23 = vpack.c.bf16 %v408_v22, %v407_v21 }
  0x2e   : > { %935 = vmatmul.msk.bf16.gmra.mxu3 %vm426_vm1, %v422_v31 }
  0x37   : > { %924 = vmatmul.msk.bf16.gmra.mxu0 %vm426_vm1, %v411_v42 }
  0x38   : > { %928 = vmatmul.msk.bf16.gmra.mxu1 %vm426_vm1, %v415_v43 }
  0x39   : > { %932 = vmatmul.msk.bf16.gmra.mxu2 %vm426_vm1, %v419_v48 }
  0x3e   : > { %936 = vmatmul.msk.bf16.gmra.mxu3 %vm426_vm1, %v423_v5 }
  0x47   : > { %925 = vmatmul.msk.bf16.gmra.mxu0 %vm426_vm1, %v412_v16 }
  0x48   : > { %929 = vmatmul.msk.bf16.gmra.mxu1 %vm426_vm1, %v416_v17 }
  0x49   : > { %933 = vmatmul.msk.bf16.gmra.mxu2 %vm426_vm1, %v420_v18 }
  0x4e   : > { %937 = vmatmul.msk.bf16.gmra.mxu3 %vm426_vm1, %v424_v23 }
  0x94   : > { %v1146_v2 = vpop.f32.mrf.mxu0 }
  0x95   : > { %v568_v3 = vpack.c.bf16 %v1146_v2, %v1146_v2  ;;  %v1150_v24 = vpop.f32.mrf.mxu1  ;;  %v705_v63 = vmul.f32 %v1146_v2, %v1146_v2  ;;  %v634_v6 = vsel %vm633_vm3, %v1146_v2, 0.0 }
  0x96   : > { %v576_v25 = vpack.c.bf16 %v1150_v24, %v1150_v24 }
  0x97   : > { %601 = vst.msk [vmem:[%s1144_s13] sm:$0xf] %vm600_vm2, %v568_v3  ;;  %v737_v11 = vsel %vm633_vm3, %v705_v63, 0.0 }
  0x98   : > { %609 = vst.msk [vmem:[%s1144_s13 + $0x20] sm:$0xf] %vm600_vm2, %v576_v25 }
  0x9c   : > { %v490_v26 = vpop.f32.mrf.mxu0  ;;  %v1160_v29 = vpop.f32.mrf.mxu2 }
  0x9d   : > { %v569_v27 = vpack.c.bf16 %v490_v26, %v490_v26  ;;  %v1158_v28 = vpop.f32.mrf.mxu1  ;;  %v584_v31 = vpack.c.bf16 %v1160_v29, %v1160_v29  ;;  %v706_v57 = vmul.f32 %v490_v26, %v490_v26  ;;  %v635_v0 = vsel %vm633_vm3, %v490_v26, 0.0 }
  0x9e   : > { %v577_v30 = vpack.c.bf16 %v1158_v28, %v1158_v28  ;;  %v636_v10 = vadd.f32 %v635_v0, %v634_v6 }
  0x9f   : > { %602 = vst.msk [vmem:[%s1144_s13 + $0x4] sm:$0xf] %vm600_vm2, %v569_v27  ;;  %v738_v7 = vsel %vm633_vm3, %v706_v57, 0.0 }
  0xa0   : > { %610 = vst.msk [vmem:[%s1144_s13 + $0x24] sm:$0xf] %vm600_vm2, %v577_v30  ;;  %v739_v15 = vadd.f32 %v738_v7, %v737_v11 }
  0xa1   : > { %617 = vst.msk [vmem:[%s1144_s13 + $0x40] sm:$0xf] %vm600_vm2, %v584_v31  ;;  %v1178_v37 = vpop.f32.mrf.mxu3 }
  0xa2   : > { %v592_v39 = vpack.c.bf16 %v1178_v37, %v1178_v37 }
  0xa4   : > { %v493_v32 = vpop.f32.mrf.mxu0  ;;  %v1174_v35 = vpop.f32.mrf.mxu2  ;;  %625 = vst.msk [vmem:[%s1144_s13 + $0x60] sm:$0xf] %vm600_vm2, %v592_v39 }
  0xa5   : > { %v570_v33 = vpack.c.bf16 %v493_v32, %v493_v32  ;;  %v1172_v34 = vpop.f32.mrf.mxu1  ;;  %v585_v38 = vpack.c.bf16 %v1174_v35, %v1174_v35  ;;  %v707_v1 = vmul.f32 %v493_v32, %v493_v32  ;;  %v637_v8 = vsel %vm633_vm3, %v493_v32, 0.0 }
  0xa6   : > { %v578_v36 = vpack.c.bf16 %v1172_v34, %v1172_v34  ;;  %v638_v16 = vadd.f32 %v637_v8, %v636_v10 }
  0xa7   : > { %603 = vst.msk [vmem:[%s1144_s13 + $0x8] sm:$0xf] %vm600_vm2, %v570_v33  ;;  %v740_v12 = vsel %vm633_vm3, %v707_v1, 0.0 }
  0xa8   : > { %611 = vst.msk [vmem:[%s1144_s13 + $0x28] sm:$0xf] %vm600_vm2, %v578_v36  ;;  %v741_v2 = vadd.f32 %v740_v12, %v739_v15  ;;  %v715_v12 = vmul.f32 %v1172_v34, %v1172_v34 }
  0xa9   : > { %618 = vst.msk [vmem:[%s1144_s13 + $0x44] sm:$0xf] %vm600_vm2, %v585_v38  ;;  %v1198_v45 = vpop.f32.mrf.mxu3 }
  0xaa   : > { %v593_v47 = vpack.c.bf16 %v1198_v45, %v1198_v45 }
  0xac   : > { %v495_v40 = vpop.f32.mrf.mxu0  ;;  %v1194_v43 = vpop.f32.mrf.mxu2  ;;  %626 = vst.msk [vmem:[%s1144_s13 + $0x64] sm:$0xf] %vm600_vm2, %v593_v47 }
  0xad   : > { %v571_v41 = vpack.c.bf16 %v495_v40, %v495_v40  ;;  %v1192_v42 = vpop.f32.mrf.mxu1  ;;  %v586_v46 = vpack.c.bf16 %v1194_v43, %v1194_v43  ;;  %v708_v9 = vmul.f32 %v495_v40, %v495_v40  ;;  %v639_v13 = vsel %vm633_vm3, %v495_v40, 0.0 }
  0xae   : > { %v579_v44 = vpack.c.bf16 %v1192_v42, %v1192_v42  ;;  %v640_v3 = vadd.f32 %v639_v13, %v638_v16  ;;  %v653_v16 = vsel %vm633_vm3, %v1172_v34, 0.0 }
  0xaf   : > { %604 = vst.msk [vmem:[%s1144_s13 + $0xc] sm:$0xf] %vm600_vm2, %v571_v41  ;;  %v742_v18 = vsel %vm633_vm3, %v708_v9, 0.0 }
  0xb0   : > { %612 = vst.msk [vmem:[%s1144_s13 + $0x2c] sm:$0xf] %vm600_vm2, %v579_v44  ;;  %v743_v33 = vadd.f32 %v742_v18, %v741_v2 }
  0xb1   : > { %619 = vst.msk [vmem:[%s1144_s13 + $0x48] sm:$0xf] %vm600_vm2, %v586_v46  ;;  %v1218_v53 = vpop.f32.mrf.mxu3 }
  0xb2   : > { %v594_v55 = vpack.c.bf16 %v1218_v53, %v1218_v53 }
  0xb4   : > { %v498_v48 = vpop.f32.mrf.mxu0  ;;  %v1214_v51 = vpop.f32.mrf.mxu2  ;;  %627 = vst.msk [vmem:[%s1144_s13 + $0x68] sm:$0xf] %vm600_vm2, %v594_v55 }
  0xb5   : > { %v572_v49 = vpack.c.bf16 %v498_v48, %v498_v48  ;;  %v1212_v50 = vpop.f32.mrf.mxu1  ;;  %v587_v54 = vpack.c.bf16 %v1214_v51, %v1214_v51  ;;  %v709_v14 = vmul.f32 %v498_v48, %v498_v48  ;;  %v641_v19 = vsel %vm633_vm3, %v498_v48, 0.0 }
  0xb6   : > { %v580_v52 = vpack.c.bf16 %v1212_v50, %v1212_v50  ;;  %v642_v36 = vadd.f32 %v641_v19, %v640_v3  ;;  %v756_v19 = vsel %vm633_vm3, %v715_v12, 0.0 }
  0xb7   : > { %605 = vst.msk [vmem:[%s1144_s13 + $0x10] sm:$0xf] %vm600_vm2, %v572_v49  ;;  %v744_v27 = vsel %vm633_vm3, %v709_v14, 0.0 }
  0xb8   : > { %613 = vst.msk [vmem:[%s1144_s13 + $0x30] sm:$0xf] %vm600_vm2, %v580_v52  ;;  %v745_v41 = vadd.f32 %v744_v27, %v743_v33  ;;  %v713_v52 = vmul.f32 %v1150_v24, %v1150_v24 }
  0xb9   : > { %620 = vst.msk [vmem:[%s1144_s13 + $0x4c] sm:$0xf] %vm600_vm2, %v587_v54  ;;  %v1238_v62 = vpop.f32.mrf.mxu3 }
  0xba   : > { %v595_v5 = vpack.c.bf16 %v1238_v62, %v1238_v62  ;;  %v752_v11 = vsel %vm633_vm3, %v713_v52, 0.0  ;;  %v721_v52 = vmul.f32 %v1160_v29, %v1160_v29 }
  0xbc   : > { %v500_v56 = vpop.f32.mrf.mxu0  ;;  %v1234_v60 = vpop.f32.mrf.mxu2  ;;  %628 = vst.msk [vmem:[%s1144_s13 + $0x6c] sm:$0xf] %vm600_vm2, %v595_v5  ;;  %v714_v5 = vmul.f32 %v1158_v28, %v1158_v28 }
  0xbd   : > { %v573_v58 = vpack.c.bf16 %v500_v56, %v500_v56  ;;  %v1232_v59 = vpop.f32.mrf.mxu1  ;;  %v588_v4 = vpack.c.bf16 %v1234_v60, %v1234_v60  ;;  %v710_v20 = vmul.f32 %v500_v56, %v500_v56  ;;  %v643_v30 = vsel %vm633_vm3, %v500_v56, 0.0 }
  0xbe   : > { %v581_v61 = vpack.c.bf16 %v1232_v59, %v1232_v59  ;;  %v644_v44 = vadd.f32 %v643_v30, %v642_v36  ;;  %v754_v15 = vsel %vm633_vm3, %v714_v5, 0.0 }
  0xbf   : > { %606 = vst.msk [vmem:[%s1144_s13 + $0x14] sm:$0xf] %vm600_vm2, %v573_v58  ;;  %v746_v39 = vsel %vm633_vm3, %v710_v20, 0.0  ;;  %v655_v20 = vsel %vm633_vm3, %v1192_v42, 0.0 }
  0xc0   : > { %614 = vst.msk [vmem:[%s1144_s13 + $0x34] sm:$0xf] %vm600_vm2, %v581_v61  ;;  %v747_v47 = vadd.f32 %v746_v39, %v745_v41  ;;  %v659_v39 = vsel %vm633_vm3, %v1232_v59, 0.0 }
  0xc1   : > { %621 = vst.msk [vmem:[%s1144_s13 + $0x50] sm:$0xf] %vm600_vm2, %v588_v4  ;;  %v1270_v26 = vpop.f32.mrf.mxu3  ;;  %v649_v4 = vsel %vm633_vm3, %v1150_v24, 0.0  ;;  %v651_v24 = vsel %vm633_vm3, %v1158_v28, 0.0 }
  0xc2   : > { %v596_v38 = vpack.c.bf16 %v1270_v26, %v1270_v26 }
  0xc4   : > { %v503_v17 = vpop.f32.mrf.mxu0  ;;  %v1266_v23 = vpop.f32.mrf.mxu2  ;;  %629 = vst.msk [vmem:[%s1144_s13 + $0x70] sm:$0xf] %vm600_vm2, %v596_v38 }
  0xc5   : > { %v574_v21 = vpack.c.bf16 %v503_v17, %v503_v17  ;;  %v1264_v22 = vpop.f32.mrf.mxu1  ;;  %v711_v31 = vmul.f32 %v503_v17, %v503_v17  ;;  %v589_v32 = vpack.c.bf16 %v1266_v23, %v1266_v23  ;;  %v645_v40 = vsel %vm633_vm3, %v503_v17, 0.0 }
  0xc6   : > { %v582_v25 = vpack.c.bf16 %v1264_v22, %v1264_v22  ;;  %v646_v48 = vadd.f32 %v645_v40, %v644_v44  ;;  %v716_v17 = vmul.f32 %v1192_v42, %v1192_v42  ;;  %v718_v42 = vmul.f32 %v1232_v59, %v1232_v59 }
  0xc7   : > { %607 = vst.msk [vmem:[%s1144_s13 + $0x18] sm:$0xf] %vm600_vm2, %v574_v21  ;;  %v748_v46 = vsel %vm633_vm3, %v711_v31, 0.0  ;;  %v717_v21 = vmul.f32 %v1212_v50, %v1212_v50  ;;  %v657_v31 = vsel %vm633_vm3, %v1212_v50, 0.0  ;;  %v719_v40 = vmul.f32 %v1264_v22, %v1264_v22 }
  0xc8   : > { %615 = vst.msk [vmem:[%s1144_s13 + $0x38] sm:$0xf] %vm600_vm2, %v582_v25  ;;  %v749_v61 = vadd.f32 %v748_v46, %v747_v47  ;;  %v758_v30 = vsel %vm633_vm3, %v716_v17, 0.0  ;;  %v762_v44 = vsel %vm633_vm3, %v718_v42, 0.0  ;;  %v661_v46 = vsel %vm633_vm3, %v1264_v22, 0.0 }
  0xc9   : > { %622 = vst.msk [vmem:[%s1144_s13 + $0x54] sm:$0xf] %vm600_vm2, %v589_v32  ;;  %v1294_v1 = vpop.f32.mrf.mxu3  ;;  %v760_v38 = vsel %vm633_vm3, %v717_v21, 0.0  ;;  %v764_v59 = vsel %vm633_vm3, %v719_v40, 0.0  ;;  %v722_v22 = vmul.f32 %v1174_v35, %v1174_v35  ;;  %v681_v40 = vsel %vm633_vm3, %v1178_v37, 0.0 }
  0xca   : > { %v597_v10 = vpack.c.bf16 %v1294_v1, %v1294_v1 }
  0xcc   : > { %v505_v49 = vpop.f32.mrf.mxu0  ;;  %v1292_v58 = vpop.f32.mrf.mxu2  ;;  %630 = vst.msk [vmem:[%s1144_s13 + $0x74] sm:$0xf] %vm600_vm2, %v597_v10  ;;  %v770_v10 = vsel %vm633_vm3, %v722_v22, 0.0 }
  0xcd   : > { %v575_v54 = vpack.c.bf16 %v505_v49, %v505_v49  ;;  %v647_v55 = vsel %vm633_vm3, %v505_v49, 0.0  ;;  %v712_v56 = vmul.f32 %v505_v49, %v505_v49  ;;  %v525_v57 = vpop.f32.mrf.mxu1  ;;  %v590_v7 = vpack.c.bf16 %v1292_v58, %v1292_v58 }
  0xce   : > { %v648_v63 = vadd.f32 %v647_v55, %v646_v48  ;;  %v583_v0 = vpack.c.bf16 %v525_v57, %v525_v57  ;;  %v720_v47 = vmul.f32 %v525_v57, %v525_v57 }
  0xcf   : > { %608 = vst.msk [vmem:[%s1144_s13 + $0x1c] sm:$0xf] %vm600_vm2, %v575_v54  ;;  %v750_v6 = vsel %vm633_vm3, %v712_v56, 0.0  ;;  %v663_v54 = vsel %vm633_vm3, %v525_v57, 0.0  ;;  %v667_v57 = vsel %vm633_vm3, %v1174_v35, 0.0  ;;  %v671_v35 = vsel %vm633_vm3, %v1214_v51, 0.0 }
  0xd0   : > { %v650_v8 = vadd.f32 %v649_v4, %v648_v63  ;;  %v751_v9 = vadd.f32 %v750_v6, %v749_v61  ;;  %616 = vst.msk [vmem:[%s1144_s13 + $0x3c] sm:$0xf] %vm600_vm2, %v583_v0  ;;  %v665_v63 = vsel %vm633_vm3, %v1160_v29, 0.0  ;;  %v766_v0 = vsel %vm633_vm3, %v720_v47, 0.0 }
  0xd1   : > { %623 = vst.msk [vmem:[%s1144_s13 + $0x58] sm:$0xf] %vm600_vm2, %v590_v7  ;;  %v1332_v27 = vpop.f32.mrf.mxu3  ;;  %v768_v7 = vsel %vm633_vm3, %v721_v52, 0.0  ;;  %v683_v47 = vsel %vm633_vm3, %v1198_v45, 0.0 }
  0xd2   : > { %v652_v13 = vadd.f32 %v651_v24, %v650_v8  ;;  %v753_v14 = vadd.f32 %v752_v11, %v751_v9  ;;  %v598_v32 = vpack.c.bf16 %v1332_v27, %v1332_v27  ;;  %v723_v8 = vmul.f32 %v1194_v43, %v1194_v43 }
  0xd3   : > { %v669_v11 = vsel %vm633_vm3, %v1194_v43, 0.0  ;;  %v724_v24 = vmul.f32 %v1214_v51, %v1214_v51  ;;  %v673_v43 = vsel %vm633_vm3, %v1234_v60, 0.0  ;;  %v675_v51 = vsel %vm633_vm3, %v1266_v23, 0.0 }
  0xd4   : > { %v654_v18 = vadd.f32 %v653_v16, %v652_v13  ;;  %v755_v28 = vadd.f32 %v754_v15, %v753_v14  ;;  %v1328_v2 = vpop.f32.mrf.mxu2  ;;  %631 = vst.msk [vmem:[%s1144_s13 + $0x78] sm:$0xf] %vm600_vm2, %v598_v32  ;;  %v772_v14 = vsel %vm633_vm3, %v723_v8, 0.0  ;;  %v725_v15 = vmul.f32 %v1234_v60, %v1234_v60 }
  0xd5   : > { %v591_v34 = vpack.c.bf16 %v1328_v2, %v1328_v2  ;;  %v677_v60 = vsel %vm633_vm3, %v1292_v58, 0.0  ;;  %v735_v8 = vmul.f32 %v1332_v27, %v1332_v27 }
  0xd6   : > { %v757_v3 = vadd.f32 %v756_v19, %v755_v28  ;;  %v656_v25 = vadd.f32 %v655_v20, %v654_v18  ;;  %v774_v18 = vsel %vm633_vm3, %v724_v24, 0.0  ;;  %v726_v28 = vmul.f32 %v1266_v23, %v1266_v23 }
  0xd7   : > { %624 = vst.msk [vmem:[%s1144_s13 + $0x5c] sm:$0xf] %vm600_vm2, %v591_v34  ;;  %v776_v21 = vsel %vm633_vm3, %v725_v15, 0.0 }
  0xd8   : > { %v658_v33 = vadd.f32 %v657_v31, %v656_v25  ;;  %v759_v36 = vadd.f32 %v758_v30, %v757_v3  ;;  %v727_v3 = vmul.f32 %v1292_v58, %v1292_v58  ;;  %v778_v30 = vsel %vm633_vm3, %v726_v28, 0.0 }
  0xd9   : > { %v1357_v61 = vpop.f32.mrf.mxu3  ;;  %v728_v31 = vmul.f32 %v1328_v2, %v1328_v2  ;;  %v730_v58 = vmul.f32 %v1198_v45, %v1198_v45  ;;  %v687_v45 = vsel %vm633_vm3, %v1238_v62, 0.0 }
  0xda   : > { %v660_v50 = vadd.f32 %v659_v39, %v658_v33  ;;  %v761_v41 = vadd.f32 %v760_v38, %v759_v36  ;;  %v599_v4 = vpack.c.bf16 %v1357_v61, %v1357_v61  ;;  %v729_v33 = vmul.f32 %v1178_v37, %v1178_v37 }
  0xdb   : > { %v780_v23 = vsel %vm633_vm3, %v727_v3, 0.0  ;;  %v679_v36 = vsel %vm633_vm3, %v1328_v2, 0.0  ;;  %v731_v2 = vmul.f32 %v1218_v53, %v1218_v53  ;;  %v786_v52 = vsel %vm633_vm3, %v730_v58, 0.0 }
  0xdc   : > { %v662_v48 = vadd.f32 %v661_v46, %v660_v50  ;;  %v763_v49 = vadd.f32 %v762_v44, %v761_v41  ;;  %632 = vst.msk [vmem:[%s1144_s13 + $0x7c] sm:$0xf] %vm600_vm2, %v599_v4  ;;  %v782_v50 = vsel %vm633_vm3, %v728_v31, 0.0  ;;  %v784_v46 = vsel %vm633_vm3, %v729_v33, 0.0 }
  0xdd   : > { %v685_v37 = vsel %vm633_vm3, %v1218_v53, 0.0  ;;  %v689_v53 = vsel %vm633_vm3, %v1270_v26, 0.0 }
  0xde   : > { %v765_v55 = vadd.f32 %v764_v59, %v763_v49  ;;  %v664_v56 = vadd.f32 %v663_v54, %v662_v48  ;;  %v732_v59 = vmul.f32 %v1238_v62, %v1238_v62  ;;  %v691_v62 = vsel %vm633_vm3, %v1294_v1, 0.0 }
  0xe0   : > { %v666_v5 = vadd.f32 %v665_v63, %v664_v56  ;;  %v767_v6 = vadd.f32 %v766_v0, %v765_v55  ;;  %v788_v56 = vsel %vm633_vm3, %v731_v2, 0.0  ;;  %v733_v63 = vmul.f32 %v1270_v26, %v1270_v26 }
  0xe1   : > { %v790_v4 = vsel %vm633_vm3, %v732_v59, 0.0  ;;  %v693_v26 = vsel %vm633_vm3, %v1332_v27, 0.0 }
  0xe2   : > { %v668_v29 = vadd.f32 %v667_v57, %v666_v5  ;;  %v769_v9 = vadd.f32 %v768_v7, %v767_v6  ;;  %v734_v5 = vmul.f32 %v1294_v1, %v1294_v1  ;;  %v792_v57 = vsel %vm633_vm3, %v733_v63, 0.0 }
  0xe3   : > { %v695_v1 = vsel %vm633_vm3, %v1357_v61, 0.0 }
  0xe4   : > { %v670_v12 = vadd.f32 %v669_v11, %v668_v29  ;;  %v771_v13 = vadd.f32 %v770_v10, %v769_v9  ;;  %v794_v10 = vsel %vm633_vm3, %v734_v5, 0.0  ;;  %v736_v11 = vmul.f32 %v1357_v61, %v1357_v61 }
  0xe6   : > { %v773_v16 = vadd.f32 %v772_v14, %v771_v13  ;;  %v672_v17 = vadd.f32 %v671_v35, %v670_v12  ;;  %v796_v13 = vsel %vm633_vm3, %v735_v8, 0.0  ;;  %v798_v15 = vsel %vm633_vm3, %v736_v11, 0.0 }
  0xe8   : > { %v674_v19 = vadd.f32 %v673_v43, %v672_v17  ;;  %v775_v20 = vadd.f32 %v774_v18, %v773_v16 }
  0xea   : > { %v676_v25 = vadd.f32 %v675_v51, %v674_v19  ;;  %v777_v34 = vadd.f32 %v776_v21, %v775_v20 }
  0xec   : > { %v779_v42 = vadd.f32 %v778_v30, %v777_v34  ;;  %v678_v32 = vadd.f32 %v677_v60, %v676_v25 }
  0xee   : > { %v781_v38 = vadd.f32 %v780_v23, %v779_v42  ;;  %v680_v39 = vadd.f32 %v679_v36, %v678_v32 }
  0xf0   : > { %v682_v41 = vadd.f32 %v681_v40, %v680_v39  ;;  %v783_v44 = vadd.f32 %v782_v50, %v781_v38 }
  0xf2   : > { %v684_v48 = vadd.f32 %v683_v47, %v682_v41  ;;  %v785_v49 = vadd.f32 %v784_v46, %v783_v44 }
  0xf4   : > { %v686_v54 = vadd.f32 %v685_v37, %v684_v48  ;;  %v787_v55 = vadd.f32 %v786_v52, %v785_v49 }
  0xf6   : > { %v789_v22 = vadd.f32 %v788_v56, %v787_v55  ;;  %v688_v0 = vadd.f32 %v687_v45, %v686_v54 }
  0xf8   : > { %v690_v6 = vadd.f32 %v689_v53, %v688_v0  ;;  %v791_v7 = vadd.f32 %v790_v4, %v789_v22 }
  0xfa   : > { %v692_v29 = vadd.f32 %v691_v62, %v690_v6  ;;  %v793_v9 = vadd.f32 %v792_v57, %v791_v7 }
  0xfc   : > { %v795_v24 = vadd.f32 %v794_v10, %v793_v9  ;;  %v694_v12 = vadd.f32 %v693_v26, %v692_v29 }
  0xfe   : > { %v797_v14 = vadd.f32 %v796_v13, %v795_v24  ;;  %v696_v35 = vadd.f32 %v695_v1, %v694_v12 }
 0x100   : > { %v697_v16 = vrot.slane %v696_v35, 4  ;;  %v799_v17 = vadd.f32 %v798_v15, %v797_v14 }
 0x102   : > { %v698_v18 = vadd.f32 %v697_v16, %v696_v35  ;;  %v800_v27 = vrot.slane %v799_v17, 4 }
 0x104   : > { %v699_v43 = vrot.slane %v698_v18, 2  ;;  %v801_v28 = vadd.f32 %v800_v27, %v799_v17 }
 0x106   : > { %v700_v19 = vadd.f32 %v699_v43, %v698_v18  ;;  %v802_v20 = vrot.slane %v801_v28, 2 }
 0x108   : > { %v701_v21 = vrot.slane %v700_v19, 1  ;;  %v803_v51 = vadd.f32 %v802_v20, %v801_v28 }
 0x10a   : > { %v702_v61 = vadd.f32 %v701_v21, %v700_v19  ;;  %v804_v3 = vrot.slane %v803_v51, 1 }
 0x10c   : > { %704 = vst.msk [vmem:[%s268_s16] sm:$0x1] %vm703_vm4, %v702_v61  ;;  %v805_v25 = vadd.f32 %v804_v3, %v803_v51 }
 0x10e   : > { %806 = vst.msk [vmem:[%s271_s19] sm:$0x1] %vm703_vm4, %v805_v25 }
 0x10f PF: > { %s17_s21 = sadd.s32 1, %s959_s21  }
 0x110   : > { %p14_p5 = scmp.ge.s32.totalorder %s17_s21, 4  }
 0x112   :  { %16 = sbr.rel (!%p14_p5) target bundleno = 1 (0x1), region = 90 }

// kernel: dense_block_forward.6
= control target key start
LH: loop header
LB: loop body
LE: loop exit
PB: predicated region body
PF: predicated region fallthrough
CT: control target
= control target key end

     0   :  { %s1487_s24 = smov 0   ;;  %s2100_s0 = inlined_call_operand.vmem [shape: bf16[512,4], index: 0, kind: input, shape index: {}]   ;;  %s2101_s1 = inlined_call_operand.vmem [shape: f32[512,4], index: 1, kind: input, shape index: {}]   ;;  %s2102_s2 = inlined_call_operand.vmem [shape: f32[1,8], index: 2, kind: input, shape index: {}]   ;;  %s2103_s3 = inlined_call_operand.vmem [shape: f32[1,8], index: 3, kind: input, shape index: {}]   ;;  %s2104_s4 = inlined_call_operand.vmem [shape: bf16[8,16], index: 4, kind: input, shape index: {}]   ;;  %s2105_s5 = inlined_call_operand.vmem [shape: bf16[512,16], index: 5, kind: output, shape index: {0}]   ;;  %s2106_s6 = inlined_call_operand.vmem [shape: f32[2,1,16], index: 6, kind: output, shape index: {1}]   ;;  %s2107_s7 = inlined_call_operand.vmem [shape: f32[2,1,16], index: 7, kind: output, shape index: {2}]  }
   0x1 LB: > { %s1493_s25 = sadd.s32 4294967295, %s1444_s24   ;;  %p1305_p0 = scmp.ge.s32.totalorder %s1444_s24, 1  ;;  %s1444_s24 = sphi %s1487_s24, %s18_s24  }
   0x2   : > { %p254_p1 = scmp.lt.s32.totalorder %s1444_s24, 3 }
   0x4   : > { %p255_p2 = pnand %p1305_p0, %p254_p1 }
   0x5   : > { %s1446_s28 = smov (!%p255_p2), 124   ;;  %s1306_s8 = sshll.u32 (!%p255_p2), %s1493_s25, 5 }
   0x6   : > { %258 = sbr.rel (%p255_p2) target bundleno = 439 (0x1b7), region = 40  ;;  %p298_p3 = scmp.lt.s32.totalorder (!%p255_p2), %s1306_s8, 63 }
   0x7   : > { %p315_p4 = scmp.lt.s32.totalorder (!%p255_p2), %s1493_s25, 1 }
   0xb   : > { %v1500_v0 = vld [vmem:[%s2102_s2] ss:$0 sm:$0xff]  ;;  %s2109_s8 = smov (!%p298_p3, %s1306_s8), 63  ;;  %vm711_vm0 = vcmask 1041408   ;;  %vm662_vm1 = vcmask 31744   ;;  %vm976_vm2 = vcmask 125952  }
   0xc   : > { %539 = vrot.lane.b32.xlu0 %v1500_v0, %s1446_s28  ;;  %v1506_v1 = vld [vmem:[%s2103_s3] ss:$0 sm:$0xff]  ;;  %s1307_s9 = sshll.u32 %s2109_s8, 2  ;;  %v657_v13 = vld [vmem:[%s2104_s4] sm:$0xc]  ;;  %s1309_s17 = sshll.u32 %s2109_s8, 3 }
   0xd   : > { %s1518_s12 = scalar_lea.vmem %s2100_s0, %s1307_s9  ;;  %v506_v7 = vld [vmem:[%s2104_s4] sm:$0x3]  ;;  %v659_v16 = vunpack.c.l.b16 %v657_v13  ;;  %s1556_s20 = scalar_lea.vmem %s2101_s1, %s1309_s17  ;;  %vm1009_vm3 = vcmask 130048   ;;  %vm1079_vm4 = vcmask 122880  }
   0xe   : > { %v1347_v2 = vld [vmem:[%s1518_s12] sm:$0xff]   ;;  %v853_v8 = vsel %vm711_vm0, %v506_v7, 0  ;;  %v1410_v28 = vld [vmem:[%s1518_s12 + $0x8] sm:$0xff]   ;;  %v1411_v48 = vld [vmem:[%s1518_s12 + $0x10] sm:$0xff]   ;;  %s1820_s23 = scalar_lea.vmem %s2105_s5, %s1307_s9  ;;  %s2111_s25 = smov (!%p315_p4, %s1493_s25), 1 }
   0xf   : > { %v1348_v3 = vunpack.c.l.bf16 %v1347_v2  ;;  %v1349_v4 = vunpack.c.h.bf16 %v1347_v2  ;;  %862 = vmatpush.bf16.msra.mxu1 %v853_v8  ;;  %1426 = vmatpush.bf16.msra.mxu3 %v853_v8  ;;  %v1417_v14 = vld [vmem:[%s1518_s12 + $0x40] sm:$0xff]   ;;  %v660_v19 = vpack.c.b16 %v659_v16, %v659_v16  ;;  %v1352_v30 = vunpack.c.l.bf16 %v1410_v28  ;;  %v1418_v39 = vld [vmem:[%s1518_s12 + $0x48] sm:$0xff]   ;;  %v533_v7 = vld [vmem:[%s1556_s20 + $0xd0] sm:$0xff]  ;;  %s320_s8 = scalar_lea.vmem %s2107_s7, %s2111_s25 }
  0x10   : > { %v1380_v17 = vunpack.c.l.bf16 %v1417_v14  ;;  %v1381_v18 = vunpack.c.h.bf16 %v1417_v14  ;;  %v1353_v31 = vunpack.c.h.bf16 %v1410_v28  ;;  %v1384_v40 = vunpack.c.l.bf16 %v1418_v39  ;;  %v507_v55 = vld [vmem:[%s1556_s20] sm:$0xff]  ;;  %v508_v56 = vld [vmem:[%s1556_s20 + $0x8] sm:$0xff]  ;;  %v534_v8 = vld [vmem:[%s1556_s20 + $0xd8] sm:$0xff] }
  0x11   : > { %v390_v5 = vmul.f32 %v1500_v0, %v1348_v3  ;;  %v391_v6 = vmul.f32 %v1500_v0, %v1349_v4  ;;  %v661_v22 = vrot.slane %v660_v19, 2  ;;  %v392_v32 = vmul.f32 %v1500_v0, %v1352_v30  ;;  %v523_v57 = vld [vmem:[%s1556_s20 + $0x80] sm:$0xff]  ;;  %v524_v58 = vld [vmem:[%s1556_s20 + $0x88] sm:$0xff]  ;;  %v517_v3 = vld [vmem:[%s1556_s20 + $0x50] sm:$0xff] }
  0x12   : > { %v406_v20 = vmul.f32 %v1500_v0, %v1380_v17  ;;  %v407_v21 = vmul.f32 %v1500_v0, %v1381_v18  ;;  %v393_v33 = vmul.f32 %v1500_v0, %v1353_v31  ;;  %v1385_v41 = vunpack.c.h.bf16 %v1418_v39  ;;  %v515_v59 = vld [vmem:[%s1556_s20 + $0x40] sm:$0xff]  ;;  %v516_v60 = vld [vmem:[%s1556_s20 + $0x48] sm:$0xff]  ;;  %v525_v39 = vld [vmem:[%s1556_s20 + $0x90] sm:$0xff] }
  0x13   : > { %v426_v9 = vadd.f32 %v1506_v1, %v390_v5  ;;  %v427_v10 = vadd.f32 %v1506_v1, %v391_v6  ;;  %v713_v25 = vsel %vm711_vm0, %v661_v22, 0  ;;  %v428_v34 = vadd.f32 %v1506_v1, %v392_v32  ;;  %v531_v63 = vld [vmem:[%s1556_s20 + $0xc0] sm:$0xff]  ;;  %v532_v2 = vld [vmem:[%s1556_s20 + $0xc8] sm:$0xff]  ;;  %v518_v6 = vld [vmem:[%s1556_s20 + $0x58] sm:$0xff] }
  0x14   : > { %574 = vrot.lane.b32.xlu0 %v1506_v1, %s1446_s28  ;;  %v442_v23 = vadd.f32 %v1506_v1, %v406_v20  ;;  %v443_v24 = vadd.f32 %v1506_v1, %v407_v21  ;;  %722 = vmatpush.bf16.msra.mxu0 %v713_v25  ;;  %v429_v35 = vadd.f32 %v1506_v1, %v393_v33  ;;  %v1356_v50 = vunpack.c.l.bf16 %v1411_v48  ;;  %v519_v13 = vld [vmem:[%s1556_s20 + $0x60] sm:$0xff]  ;;  %v520_v14 = vld [vmem:[%s1556_s20 + $0x68] sm:$0xff]  ;;  %v509_v33 = vld [vmem:[%s1556_s20 + $0x10] sm:$0xff]  ;;  %s317_s28 = scalar_lea.vmem %s2106_s6, %s2111_s25 }
  0x15   : > { %v458_v11 = vmax.f32 %v426_v9, 0.0  ;;  %v459_v12 = vmax.f32 %v427_v10, 0.0  ;;  %1425 = vmatpush.bf16.msra.mxu2 %v713_v25  ;;  %v460_v36 = vmax.f32 %v428_v34, 0.0  ;;  %v408_v42 = vmul.f32 %v1500_v0, %v1384_v40  ;;  %v510_v34 = vld [vmem:[%s1556_s20 + $0x18] sm:$0xff] }
  0x16   : > { %v474_v26 = vmax.f32 %v442_v23, 0.0  ;;  %v475_v27 = vmax.f32 %v443_v24, 0.0  ;;  %v461_v37 = vmax.f32 %v429_v35, 0.0  ;;  %v409_v43 = vmul.f32 %v1500_v0, %v1385_v41  ;;  %v526_v40 = vld [vmem:[%s1556_s20 + $0x98] sm:$0xff] }
  0x17   : > { %v490_v15 = vpack.c.bf16 %v459_v12, %v458_v11  ;;  %v444_v44 = vadd.f32 %v1506_v1, %v408_v42  ;;  %v1357_v51 = vunpack.c.h.bf16 %v1411_v48  ;;  %v394_v53 = vmul.f32 %v1500_v0, %v1356_v50  ;;  %v511_v50 = vld [vmem:[%s1556_s20 + $0x20] sm:$0xff] }
  0x18   : > { %v498_v29 = vpack.c.bf16 %v475_v27, %v474_v26  ;;  %v491_v38 = vpack.c.bf16 %v461_v37, %v460_v36  ;;  %v445_v45 = vadd.f32 %v1506_v1, %v409_v43  ;;  %v1419_v43 = vld [vmem:[%s1518_s12 + $0x50] sm:$0xff]  }
  0x19   : > { %1328 = vmatmul.msk.bf16.vlgmr.msra.gmra.mxu1 %vm662_vm1, %v490_v15  ;;  %v476_v46 = vmax.f32 %v444_v44, 0.0  ;;  %v395_v54 = vmul.f32 %v1500_v0, %v1357_v51  ;;  %v430_v61 = vadd.f32 %v1506_v1, %v394_v53  ;;  %v535_v15 = vld [vmem:[%s1556_s20 + $0xe0] sm:$0xff]  ;;  %v512_v51 = vld [vmem:[%s1556_s20 + $0x28] sm:$0xff]  ;;  %v1388_v53 = vunpack.c.l.bf16 %v1419_v43 }
  0x1a   : > { %1336 = vmatmul.msk.bf16.vlgmr.msra.gmra.mxu3 %vm662_vm1, %v498_v29  ;;  %v477_v47 = vmax.f32 %v445_v45, 0.0 }
  0x1b   : > { %v431_v62 = vadd.f32 %v1506_v1, %v395_v54  ;;  %v462_v11 = vmax.f32 %v430_v61, 0.0  ;;  %v1389_v54 = vunpack.c.h.bf16 %v1419_v43 }
  0x1c   : > { %v499_v49 = vpack.c.bf16 %v477_v47, %v476_v46 }
  0x1d   : > { %v463_v12 = vmax.f32 %v431_v62, 0.0 }
  0x1f   : > { %v492_v20 = vpack.c.bf16 %v463_v12, %v462_v11 }
  0x29   : > { %1329 = vmatmul.msk.bf16.gmra.mxu1 %vm662_vm1, %v491_v38 }
  0x2a   : > { %1337 = vmatmul.msk.bf16.gmra.mxu3 %vm662_vm1, %v499_v49 }
  0x39   : > { %1330 = vmatmul.msk.bf16.gmra.mxu1 %vm662_vm1, %v492_v20 }
  0x7e   : > { %v1558_v52 = vpop.permute.xlu0 %539 }
  0x7f   : > { %v542_v4 = vmul.f32 %v1558_v52, %v507_v55  ;;  %v543_v5 = vmul.f32 %v1558_v52, %v508_v56  ;;  %v558_v9 = vmul.f32 %v1558_v52, %v523_v57  ;;  %v559_v10 = vmul.f32 %v1558_v52, %v524_v58  ;;  %v1412_v55 = vld [vmem:[%s1518_s12 + $0x18] sm:$0xff]   ;;  %v527_v58 = vld [vmem:[%s1556_s20 + $0xa0] sm:$0xff] }
  0x80   : > { %v1585_v16 = vmul.f32 %v1558_v52, %v515_v59  ;;  %v1588_v17 = vmul.f32 %v1558_v52, %v516_v60  ;;  %v1591_v18 = vmul.f32 %v1558_v52, %v531_v63  ;;  %v1594_v19 = vmul.f32 %v1558_v52, %v532_v2  ;;  %v528_v59 = vld [vmem:[%s1556_s20 + $0xa8] sm:$0xff] }
  0x81   : > { %v1597_v21 = vmul.f32 %v1558_v52, %v517_v3  ;;  %v1600_v22 = vmul.f32 %v1558_v52, %v518_v6  ;;  %v1603_v23 = vmul.f32 %v1558_v52, %v533_v7  ;;  %v1608_v25 = vmul.f32 %v1558_v52, %v534_v8 }
  0x82   : > { %v1611_v26 = vmul.f32 %v1558_v52, %v519_v13  ;;  %v1614_v27 = vmul.f32 %v1558_v52, %v520_v14  ;;  %v1617_v28 = vmul.f32 %v1558_v52, %v535_v15  ;;  %v544_v41 = vmul.f32 %v1558_v52, %v509_v33 }
  0x83   : > { %v545_v42 = vmul.f32 %v1558_v52, %v510_v34  ;;  %v560_v48 = vmul.f32 %v1558_v52, %v525_v39  ;;  %v561_v49 = vmul.f32 %v1558_v52, %v526_v40  ;;  %v1360_v60 = vunpack.c.l.bf16 %v1412_v55 }
  0x84   : > { %v1361_v61 = vunpack.c.h.bf16 %v1412_v55  ;;  %v546_v62 = vmul.f32 %v1558_v52, %v511_v50  ;;  %v547_v63 = vmul.f32 %v1558_v52, %v512_v51  ;;  %v410_v2 = vmul.f32 %v1500_v0, %v1388_v53  ;;  %v522_v51 = vld [vmem:[%s1556_s20 + $0x78] sm:$0xff]  ;;  %v537_v53 = vld [vmem:[%s1556_s20 + $0xf0] sm:$0xff] }
  0x85   : > { %v411_v3 = vmul.f32 %v1500_v0, %v1389_v54  ;;  %v396_v6 = vmul.f32 %v1500_v0, %v1360_v60  ;;  %v1651_v8 = vmul.f32 %v1558_v52, %v527_v58 }
  0x86   : > { %v1605_v24 = vpop.permute.xlu0 %574  ;;  %v397_v7 = vmul.f32 %v1500_v0, %v1361_v61 }
  0x87   : > { %v577_v29 = vadd.f32 %v1605_v24, %v542_v4  ;;  %v578_v30 = vadd.f32 %v1605_v24, %v543_v5  ;;  %v593_v31 = vadd.f32 %v1605_v24, %v558_v9  ;;  %v594_v32 = vadd.f32 %v1605_v24, %v559_v10 }
  0x88   : > { %v579_v46 = vadd.f32 %v1605_v24, %v544_v41  ;;  %v580_v47 = vadd.f32 %v1605_v24, %v545_v42  ;;  %v595_v56 = vadd.f32 %v1605_v24, %v560_v48  ;;  %v596_v57 = vadd.f32 %v1605_v24, %v561_v49  ;;  %v521_v48 = vld [vmem:[%s1556_s20 + $0x70] sm:$0xff] }
  0x89   : > { %v609_v35 = vmax.f32 %v577_v29, 0.0  ;;  %v610_v36 = vmax.f32 %v578_v30, 0.0  ;;  %v625_v37 = vmax.f32 %v593_v31, 0.0  ;;  %v626_v38 = vmax.f32 %v594_v32, 0.0 }
  0x8a   : > { %v611_v4 = vmax.f32 %v579_v46, 0.0  ;;  %v612_v5 = vmax.f32 %v580_v47, 0.0  ;;  %v1654_v9 = vmul.f32 %v1558_v52, %v528_v59  ;;  %v446_v10 = vadd.f32 %v1506_v1, %v410_v2  ;;  %v1420_v2 = vld [vmem:[%s1518_s12 + $0x58] sm:$0xff]  }
  0x8b   : > { %v641_v44 = vpack.c.bf16 %v610_v36, %v609_v35  ;;  %v649_v45 = vpack.c.bf16 %v626_v38, %v625_v37  ;;  %v447_v11 = vadd.f32 %v1506_v1, %v411_v3  ;;  %v627_v12 = vmax.f32 %v595_v56, 0.0  ;;  %v1413_v3 = vld [vmem:[%s1518_s12 + $0x20] sm:$0xff]  }
  0x8c   : > { %v628_v13 = vmax.f32 %v596_v57, 0.0  ;;  %v432_v14 = vadd.f32 %v1506_v1, %v396_v6  ;;  %v433_v15 = vadd.f32 %v1506_v1, %v397_v7  ;;  %v1661_v20 = vadd.f32 %v1605_v24, %v546_v62  ;;  %v538_v57 = vld [vmem:[%s1556_s20 + $0xf8] sm:$0xff] }
  0x8d   : > { %1312 = vmatmul.msk.bf16.vlgmr.msra.gmra.mxu0 %vm662_vm1, %v641_v44  ;;  %1320 = vmatmul.msk.bf16.vlgmr.msra.gmra.mxu2 %vm662_vm1, %v649_v45  ;;  %v478_v29 = vmax.f32 %v446_v10, 0.0  ;;  %v479_v30 = vmax.f32 %v447_v11, 0.0  ;;  %v585_v31 = vadd.f32 %v1605_v24, %v1585_v16  ;;  %v642_v32 = vpack.c.bf16 %v612_v5, %v611_v4  ;;  %v536_v45 = vld [vmem:[%s1556_s20 + $0xe8] sm:$0xff] }
  0x8e   : > { %v1666_v33 = vadd.f32 %v1605_v24, %v547_v63  ;;  %v464_v34 = vmax.f32 %v432_v14, 0.0  ;;  %v465_v35 = vmax.f32 %v433_v15, 0.0  ;;  %v586_v37 = vadd.f32 %v1605_v24, %v1588_v17 }
  0x8f   : > { %v500_v36 = vpack.c.bf16 %v479_v30, %v478_v29  ;;  %v617_v38 = vmax.f32 %v585_v31, 0.0  ;;  %v601_v39 = vadd.f32 %v1605_v24, %v1591_v18  ;;  %v650_v40 = vpack.c.bf16 %v628_v13, %v627_v12 }
  0x90   : > { %v493_v41 = vpack.c.bf16 %v465_v35, %v464_v34  ;;  %v602_v16 = vadd.f32 %v1605_v24, %v1594_v19  ;;  %v587_v42 = vadd.f32 %v1605_v24, %v1597_v21  ;;  %v618_v43 = vmax.f32 %v586_v37, 0.0 }
  0x91   : > { %1338 = vmatmul.msk.bf16.gmra.mxu3 %vm662_vm1, %v500_v36  ;;  %v633_v44 = vmax.f32 %v601_v39, 0.0  ;;  %v588_v17 = vadd.f32 %v1605_v24, %v1600_v22  ;;  %v603_v18 = vadd.f32 %v1605_v24, %v1603_v23  ;;  %v604_v21 = vadd.f32 %v1605_v24, %v1608_v25 }
  0x92   : > { %1331 = vmatmul.msk.bf16.gmra.mxu1 %vm662_vm1, %v493_v41  ;;  %v634_v19 = vmax.f32 %v602_v16, 0.0  ;;  %v619_v46 = vmax.f32 %v587_v42, 0.0  ;;  %v589_v47 = vadd.f32 %v1605_v24, %v1611_v26  ;;  %v1688_v49 = vpack.c.bf16 %v618_v43, %v617_v38 }
  0x93   : > { %v620_v50 = vmax.f32 %v588_v17, 0.0  ;;  %v635_v22 = vmax.f32 %v603_v18, 0.0  ;;  %v590_v23 = vadd.f32 %v1605_v24, %v1614_v27  ;;  %v636_v55 = vmax.f32 %v604_v21, 0.0 }
  0x94   : > { %v1694_v54 = vpack.c.bf16 %v634_v19, %v633_v44  ;;  %v621_v56 = vmax.f32 %v589_v47, 0.0  ;;  %v571_v25 = vmul.f32 %v1558_v52, %v536_v45  ;;  %v605_v59 = vadd.f32 %v1605_v24, %v1617_v28 }
  0x95   : > { %v1698_v26 = vpack.c.bf16 %v620_v50, %v619_v46  ;;  %v622_v58 = vmax.f32 %v590_v23, 0.0  ;;  %v556_v60 = vmul.f32 %v1558_v52, %v521_v48  ;;  %v1703_v27 = vpack.c.bf16 %v636_v55, %v635_v22  ;;  %v1421_v55 = vld [vmem:[%s1518_s12 + $0x60] sm:$0xff]  }
  0x96   : > { %v606_v61 = vadd.f32 %v1605_v24, %v571_v25  ;;  %v557_v62 = vmul.f32 %v1558_v52, %v522_v51  ;;  %v572_v63 = vmul.f32 %v1558_v52, %v537_v53  ;;  %v637_v5 = vmax.f32 %v605_v59, 0.0  ;;  %v513_v53 = vld [vmem:[%s1556_s20 + $0x30] sm:$0xff]  ;;  %v514_v25 = vld [vmem:[%s1556_s20 + $0x38] sm:$0xff] }
  0x97   : > { %v1712_v4 = vpack.c.bf16 %v622_v58, %v621_v56  ;;  %v591_v28 = vadd.f32 %v1605_v24, %v556_v60  ;;  %v573_v6 = vmul.f32 %v1558_v52, %v538_v57  ;;  %v1392_v7 = vunpack.c.l.bf16 %v1420_v2  ;;  %v1414_v56 = vld [vmem:[%s1518_s12 + $0x28] sm:$0xff]   ;;  %v529_v57 = vld [vmem:[%s1556_s20 + $0xb0] sm:$0xff] }
  0x98   : > { %v1393_v10 = vunpack.c.h.bf16 %v1420_v2  ;;  %v1364_v11 = vunpack.c.l.bf16 %v1413_v3  ;;  %v1365_v12 = vunpack.c.h.bf16 %v1413_v3  ;;  %v638_v13 = vmax.f32 %v606_v61, 0.0 }
  0x99   : > { %v592_v14 = vadd.f32 %v1605_v24, %v557_v62  ;;  %v623_v15 = vmax.f32 %v591_v28, 0.0  ;;  %v607_v29 = vadd.f32 %v1605_v24, %v572_v63  ;;  %v412_v30 = vmul.f32 %v1500_v0, %v1392_v7 }
  0x9a   : > { %v413_v31 = vmul.f32 %v1500_v0, %v1393_v10  ;;  %v399_v34 = vmul.f32 %v1500_v0, %v1365_v12  ;;  %v1722_v35 = vpack.c.bf16 %v638_v13, %v637_v5  ;;  %v608_v37 = vadd.f32 %v1605_v24, %v573_v6 }
  0x9b   : > { %v624_v36 = vmax.f32 %v592_v14, 0.0  ;;  %v639_v38 = vmax.f32 %v607_v29, 0.0  ;;  %v448_v39 = vadd.f32 %v1506_v1, %v412_v30  ;;  %v597_v42 = vadd.f32 %v1605_v24, %v1651_v8 }
  0x9c   : > { %v435_v16 = vadd.f32 %v1506_v1, %v399_v34  ;;  %v598_v43 = vadd.f32 %v1605_v24, %v1654_v9  ;;  %v640_v17 = vmax.f32 %v608_v37, 0.0  ;;  %v613_v8 = vmax.f32 %v1661_v20, 0.0  ;;  %v530_v20 = vld [vmem:[%s1556_s20 + $0xb8] sm:$0xff] }
  0x9d   : > { %1313 = vmatmul.msk.bf16.gmra.mxu0 %vm662_vm1, %v642_v32  ;;  %1321 = vmatmul.msk.bf16.gmra.mxu2 %vm662_vm1, %v650_v40  ;;  %v398_v32 = vmul.f32 %v1500_v0, %v1364_v11  ;;  %v449_v40 = vadd.f32 %v1506_v1, %v413_v31  ;;  %v1733_v44 = vpack.c.bf16 %v624_v36, %v623_v15  ;;  %v480_v18 = vmax.f32 %v448_v39, 0.0 }
  0x9e   : > { %v467_v46 = vmax.f32 %v435_v16, 0.0  ;;  %v1735_v21 = vpack.c.bf16 %v640_v17, %v639_v38  ;;  %v614_v9 = vmax.f32 %v1666_v33, 0.0  ;;  %v629_v50 = vmax.f32 %v597_v42, 0.0  ;;  %v1415_v42 = vld [vmem:[%s1518_s12 + $0x30] sm:$0xff]  }
  0x9f   : > { %v434_v41 = vadd.f32 %v1506_v1, %v398_v32  ;;  %v481_v45 = vmax.f32 %v449_v40, 0.0  ;;  %v630_v22 = vmax.f32 %v598_v43, 0.0  ;;  %v1396_v58 = vunpack.c.l.bf16 %v1421_v55 }
  0xa0   : > { %v643_v23 = vpack.c.bf16 %v614_v9, %v613_v8  ;;  %v1397_v33 = vunpack.c.h.bf16 %v1421_v55  ;;  %v1368_v59 = vunpack.c.l.bf16 %v1414_v56  ;;  %v1369_v60 = vunpack.c.h.bf16 %v1414_v56 }
  0xa1   : > { %v466_v19 = vmax.f32 %v434_v41, 0.0  ;;  %v501_v47 = vpack.c.bf16 %v481_v45, %v480_v18  ;;  %v651_v51 = vpack.c.bf16 %v630_v22, %v629_v50  ;;  %v414_v61 = vmul.f32 %v1500_v0, %v1396_v58 }
  0xa2   : > { %v415_v62 = vmul.f32 %v1500_v0, %v1397_v33  ;;  %v400_v63 = vmul.f32 %v1500_v0, %v1368_v59  ;;  %v401_v2 = vmul.f32 %v1500_v0, %v1369_v60  ;;  %v548_v3 = vmul.f32 %v1558_v52, %v513_v53 }
  0xa3   : > { %v494_v48 = vpack.c.bf16 %v467_v46, %v466_v19  ;;  %1339 = vmatmul.msk.bf16.gmra.mxu3 %vm662_vm1, %v501_v47  ;;  %v549_v5 = vmul.f32 %v1558_v52, %v514_v25  ;;  %v564_v28 = vmul.f32 %v1558_v52, %v529_v57  ;;  %v565_v6 = vmul.f32 %v1558_v52, %v530_v20  ;;  %v1423_v57 = vld [vmem:[%s1518_s12 + $0x70] sm:$0xff]   ;;  %v1416_v20 = vld [vmem:[%s1518_s12 + $0x38] sm:$0xff]  }
  0xa4   : > { %v450_v7 = vadd.f32 %v1506_v1, %v414_v61  ;;  %v451_v10 = vadd.f32 %v1506_v1, %v415_v62  ;;  %v436_v11 = vadd.f32 %v1506_v1, %v400_v63  ;;  %v437_v12 = vadd.f32 %v1506_v1, %v401_v2 }
  0xa5   : > { %1332 = vmatmul.msk.bf16.gmra.mxu1 %vm662_vm1, %v494_v48  ;;  %v583_v13 = vadd.f32 %v1605_v24, %v548_v3  ;;  %v584_v14 = vadd.f32 %v1605_v24, %v549_v5  ;;  %v599_v15 = vadd.f32 %v1605_v24, %v564_v28  ;;  %v600_v29 = vadd.f32 %v1605_v24, %v565_v6  ;;  %v1422_v24 = vld [vmem:[%s1518_s12 + $0x68] sm:$0xff]  }
  0xa6   : > { %v482_v30 = vmax.f32 %v450_v7, 0.0  ;;  %v483_v31 = vmax.f32 %v451_v10, 0.0  ;;  %v468_v52 = vmax.f32 %v436_v11, 0.0  ;;  %v469_v32 = vmax.f32 %v437_v12, 0.0 }
  0xa7   : > { %v615_v37 = vmax.f32 %v583_v13, 0.0  ;;  %v616_v38 = vmax.f32 %v584_v14, 0.0  ;;  %v631_v39 = vmax.f32 %v599_v15, 0.0  ;;  %v632_v40 = vmax.f32 %v600_v29, 0.0  ;;  %v1424_v13 = vld [vmem:[%s1518_s12 + $0x78] sm:$0xff]  }
  0xa8   : > { %v502_v34 = vpack.c.bf16 %v483_v31, %v482_v30  ;;  %v495_v36 = vpack.c.bf16 %v469_v32, %v468_v52  ;;  %v1400_v43 = vunpack.c.l.bf16 %v1422_v24  ;;  %v1401_v17 = vunpack.c.h.bf16 %v1422_v24 }
  0xa9   : > { %v644_v41 = vpack.c.bf16 %v616_v38, %v615_v37  ;;  %v652_v16 = vpack.c.bf16 %v632_v40, %v631_v39  ;;  %v1372_v18 = vunpack.c.l.bf16 %v1415_v42  ;;  %v1373_v45 = vunpack.c.h.bf16 %v1415_v42 }
  0xaa   : > { %v416_v19 = vmul.f32 %v1500_v0, %v1400_v43  ;;  %v417_v46 = vmul.f32 %v1500_v0, %v1401_v17  ;;  %v1404_v58 = vunpack.c.l.bf16 %v1423_v57  ;;  %v1405_v33 = vunpack.c.h.bf16 %v1423_v57 }
  0xab   : > { %v402_v47 = vmul.f32 %v1500_v0, %v1372_v18  ;;  %v403_v48 = vmul.f32 %v1500_v0, %v1373_v45  ;;  %v1376_v59 = vunpack.c.l.bf16 %v1416_v20  ;;  %v1377_v60 = vunpack.c.h.bf16 %v1416_v20 }
  0xac   : > { %v452_v8 = vadd.f32 %v1506_v1, %v416_v19  ;;  %v453_v9 = vadd.f32 %v1506_v1, %v417_v46  ;;  %v418_v61 = vmul.f32 %v1500_v0, %v1404_v58  ;;  %v419_v62 = vmul.f32 %v1500_v0, %v1405_v33 }
  0xad   : > { %1314 = vmatmul.msk.bf16.gmra.mxu0 %vm662_vm1, %v643_v23  ;;  %1322 = vmatmul.msk.bf16.gmra.mxu2 %vm662_vm1, %v651_v51  ;;  %v438_v50 = vadd.f32 %v1506_v1, %v402_v47  ;;  %v439_v22 = vadd.f32 %v1506_v1, %v403_v48  ;;  %v404_v63 = vmul.f32 %v1500_v0, %v1376_v59  ;;  %v1408_v14 = vunpack.c.l.bf16 %v1424_v13 }
  0xae   : > { %v484_v23 = vmax.f32 %v452_v8, 0.0  ;;  %v485_v51 = vmax.f32 %v453_v9, 0.0  ;;  %v405_v2 = vmul.f32 %v1500_v0, %v1377_v60  ;;  %v455_v3 = vadd.f32 %v1506_v1, %v419_v62 }
  0xaf   : > { %v470_v53 = vmax.f32 %v438_v50, 0.0  ;;  %v471_v55 = vmax.f32 %v439_v22, 0.0  ;;  %v1409_v15 = vunpack.c.h.bf16 %v1424_v13  ;;  %v420_v29 = vmul.f32 %v1500_v0, %v1408_v14 }
  0xb0   : > { %v503_v56 = vpack.c.bf16 %v485_v51, %v484_v23  ;;  %v441_v5 = vadd.f32 %v1506_v1, %v405_v2  ;;  %v487_v6 = vmax.f32 %v455_v3, 0.0 }
  0xb1   : > { %v496_v25 = vpack.c.bf16 %v471_v55, %v470_v53  ;;  %v421_v30 = vmul.f32 %v1500_v0, %v1409_v15  ;;  %v456_v31 = vadd.f32 %v1506_v1, %v420_v29 }
  0xb2   : > { %v473_v10 = vmax.f32 %v441_v5, 0.0 }
  0xb3   : > { %1340 = vmatmul.msk.bf16.gmra.mxu3 %vm662_vm1, %v502_v34  ;;  %v457_v52 = vadd.f32 %v1506_v1, %v421_v30  ;;  %v488_v32 = vmax.f32 %v456_v31, 0.0 }
  0xb5   : > { %1333 = vmatmul.msk.bf16.gmra.mxu1 %vm662_vm1, %v495_v36  ;;  %v489_v34 = vmax.f32 %v457_v52, 0.0 }
  0xb7   : > { %v505_v36 = vpack.c.bf16 %v489_v34, %v488_v32 }
  0xbd   : > { %1315 = vmatmul.msk.bf16.gmra.mxu0 %vm662_vm1, %v644_v41  ;;  %1323 = vmatmul.msk.bf16.gmra.mxu2 %vm662_vm1, %v652_v16 }
  0xc3   : > { %1341 = vmatmul.msk.bf16.gmra.mxu3 %vm662_vm1, %v503_v56 }
  0xc5   : > { %1334 = vmatmul.msk.bf16.gmra.mxu1 %vm662_vm1, %v496_v25 }
  0xcd   : > { %1316 = vmatmul.msk.bf16.gmra.mxu0 %vm662_vm1, %v1688_v49  ;;  %1324 = vmatmul.msk.bf16.gmra.mxu2 %vm662_vm1, %v1694_v54  ;;  %v454_v49 = vadd.f32 %v1506_v1, %v418_v61  ;;  %v440_v54 = vadd.f32 %v1506_v1, %v404_v63 }
  0xcf   : > { %v486_v28 = vmax.f32 %v454_v49, 0.0  ;;  %v472_v7 = vmax.f32 %v440_v54, 0.0 }
  0xd1   : > { %v504_v11 = vpack.c.bf16 %v487_v6, %v486_v28  ;;  %v497_v12 = vpack.c.bf16 %v473_v10, %v472_v7 }
  0xd3   : > { %1342 = vmatmul.msk.bf16.gmra.mxu3 %vm662_vm1, %v504_v11 }
  0xd5   : > { %1335 = vmatmul.msk.bf16.gmra.mxu1 %vm662_vm1, %v497_v12 }
  0xdd   : > { %1317 = vmatmul.msk.bf16.gmra.mxu0 %vm662_vm1, %v1698_v26  ;;  %1325 = vmatmul.msk.bf16.gmra.mxu2 %vm662_vm1, %v1703_v27  ;;  %v864_v26 = vpop.f32.mrf.mxu1  ;;  %v904_v27 = vpop.f32.mrf.mxu3 }
  0xe3   : > { %1343 = vmatmul.msk.bf16.gmra.mxu3 %vm662_vm1, %v505_v36 }
  0xe5   : > { %v866_v37 = vpop.f32.mrf.mxu1  ;;  %v906_v0 = vpop.f32.mrf.mxu3 }
  0xed   : > { %1318 = vmatmul.msk.bf16.gmra.mxu0 %vm662_vm1, %v1712_v4  ;;  %1326 = vmatmul.msk.bf16.gmra.mxu2 %vm662_vm1, %v1722_v35  ;;  %v869_v1 = vpop.f32.mrf.mxu1  ;;  %v909_v38 = vpop.f32.mrf.mxu3 }
  0xf5   : > { %v871_v40 = vpop.f32.mrf.mxu1 }
  0xfd   : > { %1319 = vmatmul.msk.bf16.gmra.mxu0 %vm662_vm1, %v1733_v44  ;;  %1327 = vmatmul.msk.bf16.gmra.mxu2 %vm662_vm1, %v1735_v21  ;;  %v911_v44 = vpop.f32.mrf.mxu3  ;;  %v874_v17 = vpop.f32.mrf.mxu1 }
 0x105   : > { %v876_v58 = vpop.f32.mrf.mxu1 }
 0x10a   : > { %v724_v39 = vpop.f32.mrf.mxu0 }
 0x10b   : > { %v865_v41 = vadd.f32 %v864_v26, %v724_v39 }
 0x10d   : > { %v944_v4 = vpack.c.bf16 %v865_v41, %v865_v41  ;;  %v1081_v24 = vmul.f32 %v865_v41, %v865_v41  ;;  %v1010_v18 = vsel %vm1009_vm3, %v865_v41, 0.0 }
 0x10f   : > { %977 = vst.msk [vmem:[%s1820_s23] sm:$0xf] %vm976_vm2, %v944_v4  ;;  %v1113_v48 = vsel %vm1009_vm3, %v1081_v24, 0.0  ;;  %v879_v11 = vpop.f32.mrf.mxu1 }
 0x110   : > { %v764_v35 = vpop.f32.mrf.mxu2 }
 0x111   : > { %v1824_v21 = vadd.f32 %v904_v27, %v764_v35 }
 0x112   : > { %v726_v16 = vpop.f32.mrf.mxu0 }
 0x113   : > { %v960_v42 = vpack.c.bf16 %v1824_v21, %v1824_v21  ;;  %v867_v43 = vadd.f32 %v866_v37, %v726_v16 }
 0x114   : > { %v914_v51 = vpop.f32.mrf.mxu3 }
 0x115   : > { %993 = vst.msk [vmem:[%s1820_s23 + $0x40] sm:$0xf] %vm976_vm2, %v960_v42  ;;  %v945_v45 = vpack.c.bf16 %v867_v43, %v867_v43  ;;  %v1011_v19 = vsel %vm1009_vm3, %v867_v43, 0.0  ;;  %v1082_v46 = vmul.f32 %v867_v43, %v867_v43 }
 0x116   : > { %v1012_v47 = vadd.f32 %v1011_v19, %v1010_v18 }
 0x117   : > { %978 = vst.msk [vmem:[%s1820_s23 + $0x4] sm:$0xf] %vm976_vm2, %v945_v45  ;;  %v1114_v8 = vsel %vm1009_vm3, %v1082_v46, 0.0 }
 0x118   : > { %v1115_v9 = vadd.f32 %v1114_v8, %v1113_v48  ;;  %v766_v50 = vpop.f32.mrf.mxu2 }
 0x119   : > { %v1836_v22 = vadd.f32 %v906_v0, %v766_v50  ;;  %v881_v0 = vpop.f32.mrf.mxu1 }
 0x11a   : > { %v729_v23 = vpop.f32.mrf.mxu0 }
 0x11b   : > { %v961_v53 = vpack.c.bf16 %v1836_v22, %v1836_v22  ;;  %v870_v55 = vadd.f32 %v869_v1, %v729_v23 }
 0x11c   : > { %v916_v63 = vpop.f32.mrf.mxu3 }
 0x11d   : > { %994 = vst.msk [vmem:[%s1820_s23 + $0x44] sm:$0xf] %vm976_vm2, %v961_v53  ;;  %v946_v56 = vpack.c.bf16 %v870_v55, %v870_v55  ;;  %v1013_v25 = vsel %vm1009_vm3, %v870_v55, 0.0  ;;  %v1083_v57 = vmul.f32 %v870_v55, %v870_v55 }
 0x11e   : > { %v1014_v20 = vadd.f32 %v1013_v25, %v1012_v47 }
 0x11f   : > { %979 = vst.msk [vmem:[%s1820_s23 + $0x8] sm:$0xf] %vm976_vm2, %v946_v56  ;;  %v1116_v33 = vsel %vm1009_vm3, %v1083_v57, 0.0 }
 0x120   : > { %v1117_v59 = vadd.f32 %v1116_v33, %v1115_v9  ;;  %v769_v60 = vpop.f32.mrf.mxu2 }
 0x121   : > { %v1846_v61 = vadd.f32 %v909_v38, %v769_v60 }
 0x122   : > { %v731_v62 = vpop.f32.mrf.mxu0  ;;  %v884_v24 = vpop.f32.mrf.mxu1 }
 0x123   : > { %v962_v2 = vpack.c.bf16 %v1846_v61, %v1846_v61  ;;  %v872_v49 = vadd.f32 %v871_v40, %v731_v62 }
 0x125   : > { %995 = vst.msk [vmem:[%s1820_s23 + $0x48] sm:$0xf] %vm976_vm2, %v962_v2  ;;  %v947_v3 = vpack.c.bf16 %v872_v49, %v872_v49  ;;  %v1015_v54 = vsel %vm1009_vm3, %v872_v49, 0.0  ;;  %v1084_v5 = vmul.f32 %v872_v49, %v872_v49 }
 0x126   : > { %v1016_v28 = vadd.f32 %v1015_v54, %v1014_v20  ;;  %v919_v29 = vpop.f32.mrf.mxu3 }
 0x127   : > { %980 = vst.msk [vmem:[%s1820_s23 + $0xc] sm:$0xf] %vm976_vm2, %v947_v3  ;;  %v1118_v6 = vsel %vm1009_vm3, %v1084_v5, 0.0 }
 0x128   : > { %v1119_v7 = vadd.f32 %v1118_v6, %v1117_v59  ;;  %v771_v10 = vpop.f32.mrf.mxu2 }
 0x129   : > { %v1856_v12 = vadd.f32 %v911_v44, %v771_v10 }
 0x12a   : > { %v734_v13 = vpop.f32.mrf.mxu0  ;;  %v886_v48 = vpop.f32.mrf.mxu1 }
 0x12b   : > { %v963_v14 = vpack.c.bf16 %v1856_v12, %v1856_v12  ;;  %v875_v15 = vadd.f32 %v874_v17, %v734_v13 }
 0x12d   : > { %996 = vst.msk [vmem:[%s1820_s23 + $0x4c] sm:$0xf] %vm976_vm2, %v963_v14  ;;  %v948_v30 = vpack.c.bf16 %v875_v15, %v875_v15  ;;  %v1017_v31 = vsel %vm1009_vm3, %v875_v15, 0.0  ;;  %v1085_v52 = vmul.f32 %v875_v15, %v875_v15 }
 0x12e   : > { %v1863_v32 = vadd.f32 %v1017_v31, %v1016_v28  ;;  %v921_v40 = vpop.f32.mrf.mxu3 }
 0x12f   : > { %981 = vst.msk [vmem:[%s1820_s23 + $0x10] sm:$0xf] %vm976_vm2, %v948_v30  ;;  %v1120_v34 = vsel %vm1009_vm3, %v1085_v52, 0.0 }
 0x130   : > { %v1868_v36 = vadd.f32 %v1120_v34, %v1119_v7  ;;  %v774_v26 = vpop.f32.mrf.mxu2 }
 0x131   : > { %v1870_v27 = vadd.f32 %v914_v51, %v774_v26 }
 0x132   : > { %v736_v37 = vpop.f32.mrf.mxu0  ;;  %v889_v25 = vpop.f32.mrf.mxu1 }
 0x133   : > { %v964_v1 = vpack.c.bf16 %v1870_v27, %v1870_v27  ;;  %v1874_v38 = vadd.f32 %v876_v58, %v736_v37 }
 0x135   : > { %997 = vst.msk [vmem:[%s1820_s23 + $0x50] sm:$0xf] %vm976_vm2, %v964_v1  ;;  %v949_v39 = vpack.c.bf16 %v1874_v38, %v1874_v38  ;;  %v1086_v37 = vmul.f32 %v1874_v38, %v1874_v38 }
 0x136   : > { %v924_v17 = vpop.f32.mrf.mxu3 }
 0x137   : > { %982 = vst.msk [vmem:[%s1820_s23 + $0x14] sm:$0xf] %vm976_vm2, %v949_v39 }
 0x138   : > { %v776_v41 = vpop.f32.mrf.mxu2 }
 0x139   : > { %v1882_v4 = vadd.f32 %v916_v63, %v776_v41 }
 0x13a   : > { %v739_v35 = vpop.f32.mrf.mxu0  ;;  %v891_v49 = vpop.f32.mrf.mxu1 }
 0x13b   : > { %v965_v44 = vpack.c.bf16 %v1882_v4, %v1882_v4  ;;  %v1886_v16 = vadd.f32 %v879_v11, %v739_v35  ;;  %v1122_v35 = vsel %vm1009_vm3, %v1086_v37, 0.0 }
 0x13d   : > { %998 = vst.msk [vmem:[%s1820_s23 + $0x54] sm:$0xf] %vm976_vm2, %v965_v44  ;;  %v950_v42 = vpack.c.bf16 %v1886_v16, %v1886_v16  ;;  %v1087_v1 = vmul.f32 %v1886_v16, %v1886_v16  ;;  %v1021_v44 = vsel %vm1009_vm3, %v1886_v16, 0.0 }
 0x13e   : > { %v926_v23 = vpop.f32.mrf.mxu3 }
 0x13f   : > { %983 = vst.msk [vmem:[%s1820_s23 + $0x18] sm:$0xf] %vm976_vm2, %v950_v42 }
 0x140   : > { %v779_v43 = vpop.f32.mrf.mxu2 }
 0x141   : > { %v1894_v18 = vadd.f32 %v919_v29, %v779_v43 }
 0x142   : > { %v741_v45 = vpop.f32.mrf.mxu0  ;;  %v894_v14 = vpop.f32.mrf.mxu1 }
 0x143   : > { %v966_v19 = vpack.c.bf16 %v1894_v18, %v1894_v18  ;;  %v1898_v46 = vadd.f32 %v881_v0, %v741_v45 }
 0x145   : > { %999 = vst.msk [vmem:[%s1820_s23 + $0x58] sm:$0xf] %vm976_vm2, %v966_v19  ;;  %v951_v47 = vpack.c.bf16 %v1898_v46, %v1898_v46  ;;  %v1023_v19 = vsel %vm1009_vm3, %v1898_v46, 0.0 }
 0x146   : > { %v929_v59 = vpop.f32.mrf.mxu3 }
 0x147   : > { %984 = vst.msk [vmem:[%s1820_s23 + $0x1c] sm:$0xf] %vm976_vm2, %v951_v47 }
 0x148   : > { %v781_v8 = vpop.f32.mrf.mxu2 }
 0x149   : > { %v1906_v9 = vadd.f32 %v921_v40, %v781_v8  ;;  %v1019_v40 = vsel %vm1009_vm3, %v1874_v38, 0.0  ;;  %v1123_v8 = vadd.f32 %v1122_v35, %v1868_v36 }
 0x14a   : > { %v744_v50 = vpop.f32.mrf.mxu0  ;;  %v896_v39 = vpop.f32.mrf.mxu1  ;;  %v1020_v43 = vadd.f32 %v1019_v40, %v1863_v32 }
 0x14b   : > { %v967_v51 = vpack.c.bf16 %v1906_v9, %v1906_v9  ;;  %v885_v53 = vadd.f32 %v884_v24, %v744_v50  ;;  %v1088_v24 = vmul.f32 %v1898_v46, %v1898_v46 }
 0x14c   : > { %v1022_v50 = vadd.f32 %v1021_v44, %v1020_v43 }
 0x14d   : > { %1000 = vst.msk [vmem:[%s1820_s23 + $0x5c] sm:$0xf] %vm976_vm2, %v967_v51  ;;  %v952_v55 = vpack.c.bf16 %v885_v53, %v885_v53  ;;  %v1089_v47 = vmul.f32 %v885_v53, %v885_v53  ;;  %v1025_v32 = vsel %vm1009_vm3, %v885_v53, 0.0 }
 0x14e   : > { %v931_v28 = vpop.f32.mrf.mxu3 }
 0x14f   : > { %985 = vst.msk [vmem:[%s1820_s23 + $0x20] sm:$0xf] %vm976_vm2, %v952_v55 }
 0x150   : > { %v784_v56 = vpop.f32.mrf.mxu2 }
 0x151   : > { %v1914_v57 = vadd.f32 %v924_v17, %v784_v56  ;;  %v1124_v17 = vsel %vm1009_vm3, %v1087_v1, 0.0 }
 0x152   : > { %v746_v20 = vpop.f32.mrf.mxu0  ;;  %v1125_v56 = vadd.f32 %v1124_v17, %v1123_v8 }
 0x153   : > { %v968_v58 = vpack.c.bf16 %v1914_v57, %v1914_v57  ;;  %v887_v33 = vadd.f32 %v886_v48, %v746_v20  ;;  %v1128_v20 = vsel %vm1009_vm3, %v1089_v47, 0.0 }
 0x155   : > { %1001 = vst.msk [vmem:[%s1820_s23 + $0x60] sm:$0xf] %vm976_vm2, %v968_v58  ;;  %v953_v60 = vpack.c.bf16 %v887_v33, %v887_v33  ;;  %v1090_v51 = vmul.f32 %v887_v33, %v887_v33  ;;  %v1027_v58 = vsel %vm1009_vm3, %v887_v33, 0.0 }
 0x156   : > { %v934_v30 = vpop.f32.mrf.mxu3 }
 0x157   : > { %986 = vst.msk [vmem:[%s1820_s23 + $0x24] sm:$0xf] %vm976_vm2, %v953_v60  ;;  %v899_v60 = vpop.f32.mrf.mxu1 }
 0x158   : > { %v786_v62 = vpop.f32.mrf.mxu2 }
 0x159   : > { %v1922_v63 = vadd.f32 %v926_v23, %v786_v62  ;;  %v1126_v23 = vsel %vm1009_vm3, %v1088_v24, 0.0 }
 0x15a   : > { %v749_v2 = vpop.f32.mrf.mxu0 }
 0x15b   : > { %v969_v3 = vpack.c.bf16 %v1922_v63, %v1922_v63  ;;  %v890_v54 = vadd.f32 %v889_v25, %v749_v2  ;;  %v1024_v25 = vadd.f32 %v1023_v19, %v1022_v50  ;;  %v1130_v2 = vsel %vm1009_vm3, %v1090_v51, 0.0 }
 0x15d   : > { %1002 = vst.msk [vmem:[%s1820_s23 + $0x64] sm:$0xf] %vm976_vm2, %v969_v3  ;;  %v954_v5 = vpack.c.bf16 %v890_v54, %v890_v54  ;;  %v1091_v46 = vmul.f32 %v890_v54, %v890_v54  ;;  %v1026_v36 = vadd.f32 %v1025_v32, %v1024_v25  ;;  %v1029_v53 = vsel %vm1009_vm3, %v890_v54, 0.0 }
 0x15e   : > { %v936_v38 = vpop.f32.mrf.mxu3  ;;  %v1097_v32 = vmul.f32 %v1824_v21, %v1824_v21 }
 0x15f   : > { %987 = vst.msk [vmem:[%s1820_s23 + $0x28] sm:$0xf] %vm976_vm2, %v954_v5  ;;  %v901_v19 = vpop.f32.mrf.mxu1 }
 0x160   : > { %v789_v6 = vpop.f32.mrf.mxu2 }
 0x161   : > { %v1930_v7 = vadd.f32 %v929_v59, %v789_v6  ;;  %v1127_v59 = vadd.f32 %v1126_v23, %v1125_v56  ;;  %v1132_v6 = vsel %vm1009_vm3, %v1091_v46, 0.0 }
 0x162   : > { %v751_v10 = vpop.f32.mrf.mxu0 }
 0x163   : > { %v970_v11 = vpack.c.bf16 %v1930_v7, %v1930_v7  ;;  %v892_v13 = vadd.f32 %v891_v49, %v751_v10  ;;  %v1129_v5 = vadd.f32 %v1128_v20, %v1127_v59  ;;  %v1098_v59 = vmul.f32 %v1836_v22, %v1836_v22 }
 0x165   : > { %1003 = vst.msk [vmem:[%s1820_s23 + $0x68] sm:$0xf] %vm976_vm2, %v970_v11  ;;  %v955_v15 = vpack.c.bf16 %v892_v13, %v892_v13  ;;  %v1092_v49 = vmul.f32 %v892_v13, %v892_v13  ;;  %v1031_v33 = vsel %vm1009_vm3, %v892_v13, 0.0 }
 0x166   : > { %v939_v54 = vpop.f32.mrf.mxu3 }
 0x167   : > { %988 = vst.msk [vmem:[%s1820_s23 + $0x2c] sm:$0xf] %vm976_vm2, %v955_v15 }
 0x168   : > { %v791_v29 = vpop.f32.mrf.mxu2 }
 0x169   : > { %v1938_v31 = vadd.f32 %v931_v28, %v791_v29  ;;  %v1028_v28 = vadd.f32 %v1027_v58, %v1026_v36  ;;  %v1131_v29 = vadd.f32 %v1130_v2, %v1129_v5  ;;  %v1041_v58 = vsel %vm1009_vm3, %v1824_v21, 0.0 }
 0x16a   : > { %v754_v52 = vpop.f32.mrf.mxu0  ;;  %v1099_v5 = vmul.f32 %v1846_v61, %v1846_v61 }
 0x16b   : > { %v971_v34 = vpack.c.bf16 %v1938_v31, %v1938_v31  ;;  %v895_v26 = vadd.f32 %v894_v14, %v754_v52  ;;  %v1134_v52 = vsel %vm1009_vm3, %v1092_v49, 0.0  ;;  %v1133_v1 = vadd.f32 %v1132_v6, %v1131_v29 }
 0x16c   : > { %v1043_v49 = vsel %vm1009_vm3, %v1836_v22, 0.0  ;;  %v1148_v29 = vsel %vm1009_vm3, %v1099_v5, 0.0 }
 0x16d   : > { %1004 = vst.msk [vmem:[%s1820_s23 + $0x6c] sm:$0xf] %vm976_vm2, %v971_v34  ;;  %v956_v0 = vpack.c.bf16 %v895_v26, %v895_v26  ;;  %v1093_v11 = vmul.f32 %v895_v26, %v895_v26  ;;  %v1033_v34 = vsel %vm1009_vm3, %v895_v26, 0.0  ;;  %v1135_v35 = vadd.f32 %v1134_v52, %v1133_v1 }
 0x16e   : > { %v941_v20 = vpop.f32.mrf.mxu3 }
 0x16f   : > { %989 = vst.msk [vmem:[%s1820_s23 + $0x30] sm:$0xf] %vm976_vm2, %v956_v0  ;;  %v1136_v13 = vsel %vm1009_vm3, %v1093_v11, 0.0  ;;  %v1100_v11 = vmul.f32 %v1856_v12, %v1856_v12 }
 0x170   : > { %v794_v41 = vpop.f32.mrf.mxu2 }
 0x171   : > { %v1957_v42 = vadd.f32 %v934_v30, %v794_v41  ;;  %v1030_v30 = vadd.f32 %v1029_v53, %v1028_v28  ;;  %v1144_v53 = vsel %vm1009_vm3, %v1097_v32, 0.0  ;;  %v1107_v32 = vmul.f32 %v1930_v7, %v1930_v7 }
 0x172   : > { %v756_v45 = vpop.f32.mrf.mxu0 }
 0x173   : > { %v972_v16 = vpack.c.bf16 %v1957_v42, %v1957_v42  ;;  %v897_v48 = vadd.f32 %v896_v39, %v756_v45  ;;  %v1032_v39 = vadd.f32 %v1031_v33, %v1030_v30  ;;  %v1137_v45 = vadd.f32 %v1136_v13, %v1135_v35 }
 0x174   : > { %v1045_v33 = vsel %vm1009_vm3, %v1846_v61, 0.0  ;;  %v1047_v30 = vsel %vm1009_vm3, %v1856_v12, 0.0  ;;  %v1051_v12 = vsel %vm1009_vm3, %v1882_v4, 0.0 }
 0x175   : > { %1005 = vst.msk [vmem:[%s1820_s23 + $0x70] sm:$0xf] %vm976_vm2, %v972_v16  ;;  %v957_v55 = vpack.c.bf16 %v897_v48, %v897_v48  ;;  %v1094_v37 = vmul.f32 %v897_v48, %v897_v48  ;;  %v1035_v40 = vsel %vm1009_vm3, %v897_v48, 0.0  ;;  %v1034_v44 = vadd.f32 %v1033_v34, %v1032_v39 }
 0x176   : > { %v1150_v34 = vsel %vm1009_vm3, %v1100_v11, 0.0 }
 0x177   : > { %990 = vst.msk [vmem:[%s1820_s23 + $0x34] sm:$0xf] %vm976_vm2, %v957_v55  ;;  %v1138_v43 = vsel %vm1009_vm3, %v1094_v37, 0.0  ;;  %v1049_v37 = vsel %vm1009_vm3, %v1870_v27, 0.0 }
 0x178   : > { %v796_v62 = vpop.f32.mrf.mxu2  ;;  %v1139_v50 = vadd.f32 %v1138_v43, %v1137_v45 }
 0x179   : > { %v1976_v3 = vadd.f32 %v936_v38, %v796_v62  ;;  %v1036_v38 = vadd.f32 %v1035_v40, %v1034_v44  ;;  %v1103_v40 = vmul.f32 %v1894_v18, %v1894_v18 }
 0x17a   : > { %v759_v10 = vpop.f32.mrf.mxu0 }
 0x17b   : > { %v973_v14 = vpack.c.bf16 %v1976_v3, %v1976_v3  ;;  %v900_v15 = vadd.f32 %v899_v60, %v759_v10  ;;  %v1146_v10 = vsel %vm1009_vm3, %v1098_v59, 0.0  ;;  %v1156_v45 = vsel %vm1009_vm3, %v1103_v40, 0.0 }
 0x17c   : > { %v1109_v59 = vmul.f32 %v1957_v42, %v1957_v42 }
 0x17d   : > { %1006 = vst.msk [vmem:[%s1820_s23 + $0x74] sm:$0xf] %vm976_vm2, %v973_v14  ;;  %v958_v0 = vpack.c.bf16 %v900_v15, %v900_v15  ;;  %v1095_v41 = vmul.f32 %v900_v15, %v900_v15  ;;  %v1037_v26 = vsel %vm1009_vm3, %v900_v15, 0.0 }
 0x17e   : > { %v1038_v23 = vadd.f32 %v1037_v26, %v1036_v38  ;;  %v1105_v38 = vmul.f32 %v1914_v57, %v1914_v57  ;;  %v1168_v5 = vsel %vm1009_vm3, %v1109_v59, 0.0 }
 0x17f   : > { %991 = vst.msk [vmem:[%s1820_s23 + $0x38] sm:$0xf] %vm976_vm2, %v958_v0  ;;  %v1140_v16 = vsel %vm1009_vm3, %v1095_v41, 0.0  ;;  %v1102_v0 = vmul.f32 %v1882_v4, %v1882_v4  ;;  %v1055_v4 = vsel %vm1009_vm3, %v1906_v9, 0.0 }
 0x180   : > { %v799_v24 = vpop.f32.mrf.mxu2  ;;  %v1141_v25 = vadd.f32 %v1140_v16, %v1139_v50 }
 0x181   : > { %v1992_v17 = vadd.f32 %v939_v54, %v799_v24  ;;  %v1101_v54 = vmul.f32 %v1870_v27, %v1870_v27  ;;  %v1154_v44 = vsel %vm1009_vm3, %v1102_v0, 0.0  ;;  %v1053_v27 = vsel %vm1009_vm3, %v1894_v18, 0.0 }
 0x182   : > { %v761_v47 = vpop.f32.mrf.mxu0  ;;  %v1104_v24 = vmul.f32 %v1906_v9, %v1906_v9  ;;  %v1057_v18 = vsel %vm1009_vm3, %v1914_v57, 0.0  ;;  %v1059_v9 = vsel %vm1009_vm3, %v1922_v63, 0.0  ;;  %v1061_v57 = vsel %vm1009_vm3, %v1930_v7, 0.0 }
 0x183   : > { %v974_v48 = vpack.c.bf16 %v1992_v17, %v1992_v17  ;;  %v902_v8 = vadd.f32 %v901_v19, %v761_v47  ;;  %v1152_v13 = vsel %vm1009_vm3, %v1101_v54, 0.0  ;;  %v1065_v7 = vsel %vm1009_vm3, %v1957_v42, 0.0 }
 0x184   : > { %v1158_v16 = vsel %vm1009_vm3, %v1104_v24, 0.0  ;;  %v1069_v42 = vsel %vm1009_vm3, %v1992_v17, 0.0 }
 0x185   : > { %1007 = vst.msk [vmem:[%s1820_s23 + $0x78] sm:$0xf] %vm976_vm2, %v974_v48  ;;  %v959_v51 = vpack.c.bf16 %v902_v8, %v902_v8  ;;  %v1039_v55 = vsel %vm1009_vm3, %v902_v8, 0.0  ;;  %v1096_v56 = vmul.f32 %v902_v8, %v902_v8  ;;  %v1106_v48 = vmul.f32 %v1922_v63, %v1922_v63 }
 0x186   : > { %v1040_v46 = vadd.f32 %v1039_v55, %v1038_v23  ;;  %v1160_v23 = vsel %vm1009_vm3, %v1105_v38, 0.0  ;;  %v1063_v63 = vsel %vm1009_vm3, %v1938_v31, 0.0 }
 0x187   : > { %992 = vst.msk [vmem:[%s1820_s23 + $0x3c] sm:$0xf] %vm976_vm2, %v959_v51  ;;  %v1142_v36 = vsel %vm1009_vm3, %v1096_v56, 0.0  ;;  %v1162_v56 = vsel %vm1009_vm3, %v1106_v48, 0.0 }
 0x188   : > { %v1042_v60 = vadd.f32 %v1041_v58, %v1040_v46  ;;  %v1143_v62 = vadd.f32 %v1142_v36, %v1141_v25  ;;  %v801_v2 = vpop.f32.mrf.mxu2  ;;  %v1108_v25 = vmul.f32 %v1938_v31, %v1938_v31  ;;  %v1164_v58 = vsel %vm1009_vm3, %v1107_v32, 0.0 }
 0x189   : > { %v2014_v21 = vadd.f32 %v941_v20, %v801_v2  ;;  %v1110_v2 = vmul.f32 %v1976_v3, %v1976_v3  ;;  %v1067_v31 = vsel %vm1009_vm3, %v1976_v3, 0.0 }
 0x18a   : > { %v1044_v28 = vadd.f32 %v1043_v49, %v1042_v60  ;;  %v1145_v6 = vadd.f32 %v1144_v53, %v1143_v62  ;;  %v1166_v62 = vsel %vm1009_vm3, %v1108_v25, 0.0 }
 0x18b   : > { %v975_v14 = vpack.c.bf16 %v2014_v21, %v2014_v21  ;;  %v1112_v11 = vmul.f32 %v2014_v21, %v2014_v21  ;;  %v1071_v3 = vsel %vm1009_vm3, %v2014_v21, 0.0 }
 0x18c   : > { %v1046_v15 = vadd.f32 %v1045_v33, %v1044_v28  ;;  %v1147_v22 = vadd.f32 %v1146_v10, %v1145_v6  ;;  %v1111_v28 = vmul.f32 %v1992_v17, %v1992_v17  ;;  %v1170_v33 = vsel %vm1009_vm3, %v1110_v2, 0.0 }
 0x18d   : > { %1008 = vst.msk [vmem:[%s1820_s23 + $0x7c] sm:$0xf] %vm976_vm2, %v975_v14  ;;  %v1174_v54 = vsel %vm1009_vm3, %v1112_v11, 0.0 }
 0x18e   : > { %v1048_v52 = vadd.f32 %v1047_v30, %v1046_v15  ;;  %v1149_v61 = vadd.f32 %v1148_v29, %v1147_v22  ;;  %v1172_v22 = vsel %vm1009_vm3, %v1111_v28, 0.0 }
 0x190   : > { %v1050_v1 = vadd.f32 %v1049_v37, %v1048_v52  ;;  %v1151_v39 = vadd.f32 %v1150_v34, %v1149_v61 }
 0x192   : > { %v1052_v41 = vadd.f32 %v1051_v12, %v1050_v1  ;;  %v1153_v35 = vadd.f32 %v1152_v13, %v1151_v39 }
 0x194   : > { %v1054_v43 = vadd.f32 %v1053_v27, %v1052_v41  ;;  %v1155_v26 = vadd.f32 %v1154_v44, %v1153_v35 }
 0x196   : > { %v1157_v19 = vadd.f32 %v1156_v45, %v1155_v26  ;;  %v1056_v47 = vadd.f32 %v1055_v4, %v1054_v43 }
 0x198   : > { %v1058_v8 = vadd.f32 %v1057_v18, %v1056_v47  ;;  %v1159_v50 = vadd.f32 %v1158_v16, %v1157_v19 }
 0x19a   : > { %v1060_v51 = vadd.f32 %v1059_v9, %v1058_v8  ;;  %v1161_v55 = vadd.f32 %v1160_v23, %v1159_v50 }
 0x19c   : > { %v1062_v46 = vadd.f32 %v1061_v57, %v1060_v51  ;;  %v1163_v20 = vadd.f32 %v1162_v56, %v1161_v55 }
 0x19e   : > { %v1064_v36 = vadd.f32 %v1063_v63, %v1062_v46  ;;  %v1165_v60 = vadd.f32 %v1164_v58, %v1163_v20 }
 0x1a0   : > { %v1066_v53 = vadd.f32 %v1065_v7, %v1064_v36  ;;  %v1167_v49 = vadd.f32 %v1166_v62, %v1165_v60 }
 0x1a2   : > { %v1068_v6 = vadd.f32 %v1067_v31, %v1066_v53  ;;  %v1169_v10 = vadd.f32 %v1168_v5, %v1167_v49 }
 0x1a4   : > { %v1070_v14 = vadd.f32 %v1069_v42, %v1068_v6  ;;  %v1171_v15 = vadd.f32 %v1170_v33, %v1169_v10 }
 0x1a6   : > { %v1072_v29 = vadd.f32 %v1071_v3, %v1070_v14  ;;  %v1173_v30 = vadd.f32 %v1172_v22, %v1171_v15 }
 0x1a8   : > { %v1073_v52 = vrot.slane %v1072_v29, 4  ;;  %v1175_v61 = vadd.f32 %v1174_v54, %v1173_v30 }
 0x1aa   : > { %v1074_v34 = vadd.f32 %v1073_v52, %v1072_v29  ;;  %v1176_v17 = vrot.slane %v1175_v61, 4 }
 0x1ac   : > { %v1075_v37 = vrot.slane %v1074_v34, 2  ;;  %v1177_v0 = vadd.f32 %v1176_v17, %v1175_v61 }
 0x1ae   : > { %v1076_v1 = vadd.f32 %v1075_v37, %v1074_v34  ;;  %v1178_v39 = vrot.slane %v1177_v0, 2 }
 0x1b0   : > { %v1077_v13 = vrot.slane %v1076_v1, 1  ;;  %v1179_v12 = vadd.f32 %v1178_v39, %v1177_v0 }
 0x1b2   : > { %v1078_v21 = vadd.f32 %v1077_v13, %v1076_v1  ;;  %v1180_v40 = vrot.slane %v1179_v12, 1 }
 0x1b4   : > { %1080 = vst.msk [vmem:[%s317_s28] sm:$0x1] %vm1079_vm4, %v1078_v21  ;;  %v1181_v41 = vadd.f32 %v1180_v40, %v1179_v12 }
 0x1b6   : > { %1182 = vst.msk [vmem:[%s320_s8] sm:$0x1] %vm1079_vm4, %v1181_v41 }
 0x1b7 PF: > { %s18_s24 = sadd.s32 1, %s1444_s24  }
 0x1b8   : > { %p15_p5 = scmp.ge.s32.totalorder %s18_s24, 4  }
 0x1ba   :  { %17 = sbr.rel (!%p15_p5) target bundleno = 1 (0x1), region = 97 }

// kernel: dense_block_forward.5
= control target key start
LH: loop header
LB: loop body
LE: loop exit
PB: predicated region body
PF: predicated region fallthrough
CT: control target
= control target key end

     0   :  { %s2853_s21 = smov 0   ;;  %s4034_s0 = inlined_call_operand.vmem [shape: bf16[2,16,16,16], index: 0, kind: input, shape index: {}]   ;;  %s4035_s1 = inlined_call_operand.vmem [shape: f32[1,16], index: 1, kind: input, shape index: {}]   ;;  %s4036_s2 = inlined_call_operand.vmem [shape: f32[1,16], index: 2, kind: input, shape index: {}]   ;;  %s4037_s3 = inlined_call_operand.vmem [shape: bf16[144,4], index: 3, kind: input, shape index: {}]   ;;  %s4038_s4 = inlined_call_operand.vmem [shape: bf16[2,256,4], index: 4, kind: output, shape index: {0}]   ;;  %s4039_s5 = inlined_call_operand.vmem [shape: f32[2,1,4], index: 5, kind: output, shape index: {1}]   ;;  %s4040_s6 = inlined_call_operand.vmem [shape: f32[2,1,4], index: 6, kind: output, shape index: {2}]  }
   0x1 LB: > { %s2512_s22 = sadd.s32 4294967295, %s2814_s21   ;;  %p2516_p0 = scmp.ge.s32.totalorder %s2814_s21, 1  ;;  %s2814_s21 = sphi %s2853_s21, %s17_s21  }
   0x2   : > { %p217_p1 = scmp.lt.s32.totalorder %s2814_s21, 3 }
   0x4   : > { %p218_p2 = pnand %p2516_p0, %p217_p1 }
   0x6   : > { %221 = sbr.rel (%p218_p2) target bundleno = 763 (0x2fb), region = 36 }
   0xb   : > { %v2704_v0 = vld [vmem:[%s4037_s3 + $0x8] sm:$0xff]  ;;  %p253_p3 = scmp.lt.s32.totalorder %s2512_s22, 1  ;;  %v2705_v1 = vld [vmem:[%s4037_s3 + $0x10] sm:$0xff]  ;;  %v2706_v2 = vld [vmem:[%s4037_s3 + $0x18] sm:$0xff]  ;;  %v4041_v4 = vmov 0.0   ;;  %vm470_vm0 = vcmask 1040384  }
   0xc   : > { %2791 = vmatpush.bf16.msra.mxu1 %v2704_v0  ;;  %2792 = vmatpush.bf16.msra.mxu2 %v2704_v0  ;;  %v2703_v3 = vld [vmem:[%s4037_s3] sm:$0xff]  ;;  %v649_v5 = vrot.slane %v4041_v4, 1  ;;  %vm781_vm1 = vcmask 130048   ;;  %vm648_vm2 = vcmask 1046528   ;;  %vm1062_vm3 = vcmask 1045504  }
   0xd   : > { %s4173_s22 = smov (!%p253_p3, %s2512_s22), 1  ;;  %2793 = vmatpush.bf16.msra.mxu3 %v2704_v0  ;;  %837 = vmatpush.bf16.msra.mxu0 %v2704_v0  ;;  %v2707_v6 = vld [vmem:[%s4037_s3 + $0x20] sm:$0xff]  ;;  %vm2198_vm4 = vcmask 27648   ;;  %vm2231_vm5 = vcmask 31744   ;;  %vm2404_vm6 = vcmask 24576  }
   0xe   : > { %s2701_s9 = sshll.u32 %s4173_s22, 7  ;;  %v2890_v7 = vld [vmem:[%s4035_s1] ss:$0 sm:$0xff]  ;;  %v2892_v8 = vpack.c.bf16 %v649_v5, %v649_v5  ;;  %s268_s15 = scalar_lea.vmem %s4040_s6, %s4173_s22 }
   0xf   : > { %s2885_s12 = scalar_lea.vmem %s4034_s0, %s2701_s9  ;;  %v2900_v14 = vld [vmem:[%s4036_s2] ss:$0 sm:$0xff]  ;;  %s3798_s10 = scalar_lea.vmem %s4038_s4, %s2701_s9 }
  0x10   : > { %1250 = vmatpush.bf16.msrb.mxu2 %v2705_v1  ;;  %4083 = vst [vmem:[#allocation2_spill] sm:$0xff] %v2892_v8  ;;  %980 = vmatpush.bf16.msrb.mxu1 %v2703_v3  ;;  %v2778_v9 = vld [vmem:[%s2885_s12 + $0x18] sm:$0xff]   ;;  %v2779_v17 = vld [vmem:[%s2885_s12 + $0x20] sm:$0xff]  }
  0x11   : > { %1383 = vmatpush.bf16.msrb.mxu3 %v2706_v2  ;;  %1525 = vmatpush.bf16.msrb.mxu0 %v2707_v6  ;;  %v2782_v10 = vld [vmem:[%s2885_s12 + $0x38] sm:$0xff]   ;;  %v2726_v12 = vunpack.c.l.bf16 %v2778_v9  ;;  %v2727_v13 = vunpack.c.h.bf16 %v2778_v9  ;;  %v2730_v20 = vunpack.c.l.bf16 %v2779_v17  ;;  %v2731_v21 = vunpack.c.h.bf16 %v2779_v17  ;;  %v2783_v17 = vld [vmem:[%s2885_s12 + $0x40] sm:$0xff]  }
  0x12   : > { %v2786_v11 = vld [vmem:[%s2885_s12 + $0x58] sm:$0xff]   ;;  %v2742_v15 = vunpack.c.l.bf16 %v2782_v10  ;;  %v2743_v16 = vunpack.c.h.bf16 %v2782_v10  ;;  %2525 = vmatmul.msk.bf16.vlgmr.msra.gmra.mxu0 %vm781_vm1, %v2892_v8 }
  0x13   : > { %v2758_v18 = vunpack.c.l.bf16 %v2786_v11  ;;  %v2759_v19 = vunpack.c.h.bf16 %v2786_v11  ;;  %v344_v22 = vmul.f32 %v2890_v7, %v2726_v12  ;;  %v345_v23 = vmul.f32 %v2890_v7, %v2727_v13 }
  0x14   : > { %v352_v24 = vmul.f32 %v2890_v7, %v2742_v15  ;;  %v353_v25 = vmul.f32 %v2890_v7, %v2743_v16  ;;  %v346_v28 = vmul.f32 %v2890_v7, %v2730_v20  ;;  %v347_v29 = vmul.f32 %v2890_v7, %v2731_v21  ;;  %v2787_v21 = vld [vmem:[%s2885_s12 + $0x60] sm:$0xff]  }
  0x15   : > { %v360_v26 = vmul.f32 %v2890_v7, %v2758_v18  ;;  %v361_v27 = vmul.f32 %v2890_v7, %v2759_v19  ;;  %v380_v30 = vadd.f32 %v2900_v14, %v344_v22  ;;  %v381_v31 = vadd.f32 %v2900_v14, %v345_v23  ;;  %v2713_v22 = vld [vmem:[%s2885_s12] sm:$0xff]  }
  0x16   : > { %v388_v32 = vadd.f32 %v2900_v14, %v352_v24  ;;  %v389_v33 = vadd.f32 %v2900_v14, %v353_v25  ;;  %v382_v36 = vadd.f32 %v2900_v14, %v346_v28  ;;  %v383_v37 = vadd.f32 %v2900_v14, %v347_v29 }
  0x17   : > { %v396_v34 = vadd.f32 %v2900_v14, %v360_v26  ;;  %v397_v35 = vadd.f32 %v2900_v14, %v361_v27  ;;  %v412_v38 = vmax.f32 %v380_v30, 0.0  ;;  %v413_v39 = vmax.f32 %v381_v31, 0.0 }
  0x18   : > { %v420_v40 = vmax.f32 %v388_v32, 0.0  ;;  %v421_v41 = vmax.f32 %v389_v33, 0.0  ;;  %v414_v44 = vmax.f32 %v382_v36, 0.0  ;;  %v415_v45 = vmax.f32 %v383_v37, 0.0 }
  0x19   : > { %v428_v42 = vmax.f32 %v396_v34, 0.0  ;;  %v429_v43 = vmax.f32 %v397_v35, 0.0  ;;  %v480_v46 = vrot.slane %v412_v38, 7  ;;  %v481_v47 = vrot.slane %v413_v39, 7  ;;  %v2780_v35 = vld [vmem:[%s2885_s12 + $0x28] sm:$0xff]  }
  0x1a   : > { %v492_v48 = vrot.slane %v420_v40, 7  ;;  %v493_v49 = vrot.slane %v421_v41, 7  ;;  %v483_v52 = vrot.slane %v414_v44, 7  ;;  %v484_v53 = vrot.slane %v415_v45, 7 }
  0x1b   : > { %v504_v50 = vrot.slane %v428_v42, 7  ;;  %v505_v51 = vrot.slane %v429_v43, 7  ;;  %v2922_v54 = vsel %vm470_vm0, %v480_v46, %v481_v47  ;;  %v2925_v55 = vsel %vm470_vm0, 0.0, %v480_v46 }
  0x1c   : > { %v2928_v56 = vsel %vm470_vm0, %v481_v47, 0.0  ;;  %v2931_v57 = vsel %vm470_vm0, %v492_v48, %v493_v49  ;;  %v666_v58 = vrot.slane %v2925_v55, 1  ;;  %v667_v59 = vrot.slane %v2922_v54, 1 }
  0x1d   : > { %v669_v60 = vrot.slane %v2928_v56, 1  ;;  %v2937_v61 = vsel %vm470_vm0, 0.0, %v492_v48  ;;  %v2940_v62 = vsel %vm470_vm0, %v493_v49, 0.0  ;;  %v687_v0 = vrot.slane %v2931_v57, 1 }
  0x1e   : > { %v686_v63 = vrot.slane %v2937_v61, 1  ;;  %v2945_v1 = vsel %vm470_vm0, %v504_v50, %v505_v51  ;;  %v668_v2 = vsel %vm648_vm2, %v666_v58, %v667_v59  ;;  %v689_v5 = vrot.slane %v2940_v62, 1 }
  0x1f   : > { %v670_v3 = vsel %vm648_vm2, %v667_v59, %v669_v60  ;;  %v2954_v10 = vsel %vm470_vm0, 0.0, %v504_v50  ;;  %v2957_v11 = vsel %vm470_vm0, %v505_v51, 0.0  ;;  %v707_v15 = vrot.slane %v2945_v1, 1 }
  0x20   : > { %v2950_v6 = vpack.c.bf16 %v670_v3, %v668_v2  ;;  %v688_v9 = vsel %vm648_vm2, %v686_v63, %v687_v0  ;;  %v690_v12 = vsel %vm648_vm2, %v687_v0, %v689_v5  ;;  %v706_v13 = vrot.slane %v2954_v10, 1 }
  0x21   : > { %v709_v16 = vrot.slane %v2957_v11, 1  ;;  %v2966_v18 = vpack.c.bf16 %v690_v12, %v688_v9  ;;  %v2969_v19 = vsel %vm470_vm0, %v483_v52, %v484_v53  ;;  %v2972_v20 = vsel %vm470_vm0, 0.0, %v483_v52 }
  0x22   : > { %2529 = vmatmul.msk.bf16.vlgmr.msra.gmra.mxu1 %vm781_vm1, %v2950_v6  ;;  %v708_v23 = vsel %vm648_vm2, %v706_v13, %v707_v15  ;;  %v2979_v25 = vsel %vm470_vm0, %v484_v53, 0.0  ;;  %v671_v26 = vrot.slane %v2972_v20, 1  ;;  %v672_v28 = vrot.slane %v2969_v19, 1 }
  0x23   : > { %4084 = vst [vmem:[#allocation3_spill] sm:$0xff] %v2966_v18  ;;  %v710_v24 = vsel %vm648_vm2, %v707_v15, %v709_v16  ;;  %2533 = vmatmul.msk.bf16.vlgmr.msra.gmra.mxu2 %vm781_vm1, %v2966_v18  ;;  %v674_v29 = vrot.slane %v2979_v25, 1  ;;  %v2746_v30 = vunpack.c.l.bf16 %v2783_v17  ;;  %v2747_v31 = vunpack.c.h.bf16 %v2783_v17 }
  0x24   : > { %v2984_v27 = vpack.c.bf16 %v710_v24, %v708_v23  ;;  %v2762_v32 = vunpack.c.l.bf16 %v2787_v21  ;;  %v2763_v33 = vunpack.c.h.bf16 %v2787_v21  ;;  %v2714_v34 = vunpack.c.l.bf16 %v2713_v22 }
  0x25   : > { %v673_v36 = vsel %vm648_vm2, %v671_v26, %v672_v28  ;;  %v354_v37 = vmul.f32 %v2890_v7, %v2746_v30  ;;  %v2715_v38 = vunpack.c.h.bf16 %v2713_v22  ;;  %v675_v39 = vsel %vm648_vm2, %v672_v28, %v674_v29 }
  0x26   : > { %2537 = vmatmul.msk.bf16.vlgmr.msra.gmra.mxu3 %vm781_vm1, %v2984_v27  ;;  %v355_v40 = vmul.f32 %v2890_v7, %v2747_v31  ;;  %v362_v41 = vmul.f32 %v2890_v7, %v2762_v32  ;;  %v363_v42 = vmul.f32 %v2890_v7, %v2763_v33  ;;  %v338_v44 = vmul.f32 %v2890_v7, %v2714_v34 }
  0x27   : > { %v390_v43 = vadd.f32 %v2900_v14, %v354_v37  ;;  %v339_v45 = vmul.f32 %v2890_v7, %v2715_v38  ;;  %v2734_v46 = vunpack.c.l.bf16 %v2780_v35  ;;  %v2735_v50 = vunpack.c.h.bf16 %v2780_v35 }
  0x28   : > { %v391_v47 = vadd.f32 %v2900_v14, %v355_v40  ;;  %v398_v48 = vadd.f32 %v2900_v14, %v362_v41  ;;  %v399_v49 = vadd.f32 %v2900_v14, %v363_v42  ;;  %v374_v52 = vadd.f32 %v2900_v14, %v338_v44  ;;  %v2784_v41 = vld [vmem:[%s2885_s12 + $0x48] sm:$0xff]  }
  0x29   : > { %v422_v51 = vmax.f32 %v390_v43, 0.0  ;;  %v375_v53 = vadd.f32 %v2900_v14, %v339_v45  ;;  %v348_v58 = vmul.f32 %v2890_v7, %v2734_v46  ;;  %v349_v0 = vmul.f32 %v2890_v7, %v2735_v50  ;;  %v2788_v46 = vld [vmem:[%s2885_s12 + $0x68] sm:$0xff]  }
  0x2a   : > { %v423_v59 = vmax.f32 %v391_v47, 0.0  ;;  %v430_v60 = vmax.f32 %v398_v48, 0.0  ;;  %v431_v63 = vmax.f32 %v399_v49, 0.0  ;;  %v406_v3 = vmax.f32 %v374_v52, 0.0 }
  0x2b   : > { %v495_v2 = vrot.slane %v422_v51, 7  ;;  %v407_v5 = vmax.f32 %v375_v53, 0.0  ;;  %v384_v9 = vadd.f32 %v2900_v14, %v348_v58  ;;  %v3008_v12 = vpack.c.bf16 %v675_v39, %v673_v36 }
  0x2c   : > { %v496_v13 = vrot.slane %v423_v59, 7  ;;  %v507_v15 = vrot.slane %v430_v60, 7  ;;  %v508_v16 = vrot.slane %v431_v63, 7  ;;  %v471_v21 = vrot.slane %v406_v3, 7 }
  0x2d   : > { %4085 = vst [vmem:[#allocation4_spill] sm:$0xff] %v3008_v12  ;;  %v3011_v17 = vsel %vm470_vm0, 0.0, %v495_v2  ;;  %v472_v22 = vrot.slane %v407_v5, 7  ;;  %v385_v23 = vadd.f32 %v2900_v14, %v349_v0  ;;  %v416_v33 = vmax.f32 %v384_v9, 0.0 }
  0x2e   : > { %v3015_v24 = vsel %vm470_vm0, %v495_v2, %v496_v13  ;;  %v3018_v26 = vsel %vm470_vm0, %v496_v13, 0.0  ;;  %v691_v28 = vrot.slane %v3011_v17, 1  ;;  %v3022_v29 = vsel %vm470_vm0, %v507_v15, %v508_v16  ;;  %v2776_v2 = vld [vmem:[%s2885_s12 + $0x8] sm:$0xff]  }
  0x2f   : > { %4086 = vst [vmem:[#allocation5_spill] sm:$0xff] %v3022_v29  ;;  %v692_v30 = vrot.slane %v3015_v24, 1  ;;  %v694_v31 = vrot.slane %v3018_v26, 1  ;;  %v3027_v32 = vsel %vm470_vm0, 0.0, %v507_v15  ;;  %v3030_v34 = vsel %vm470_vm0, %v508_v16, 0.0 }
  0x30   : > { %4087 = vst [vmem:[#allocation6_spill] sm:$0xff] %v3030_v34  ;;  %v711_v35 = vrot.slane %v3027_v32, 1  ;;  %v712_v36 = vrot.slane %v3022_v29, 1  ;;  %v3035_v37 = vsel %vm470_vm0, %v471_v21, %v472_v22  ;;  %v714_v40 = vrot.slane %v3030_v34, 1 }
  0x31   : > { %v693_v38 = vsel %vm648_vm2, %v691_v28, %v692_v30  ;;  %v695_v39 = vsel %vm648_vm2, %v692_v30, %v694_v31  ;;  %v3047_v44 = vsel %vm470_vm0, 0.0, %v471_v21  ;;  %v3050_v45 = vsel %vm470_vm0, %v472_v22, 0.0 }
  0x32   : > { %2530 = vmatmul.msk.bf16.gmra.mxu1 %vm781_vm1, %v3008_v12  ;;  %v3043_v42 = vpack.c.bf16 %v695_v39, %v693_v38  ;;  %v713_v43 = vsel %vm648_vm2, %v711_v35, %v712_v36  ;;  %v715_v47 = vsel %vm648_vm2, %v712_v36, %v714_v40  ;;  %v651_v48 = vrot.slane %v3047_v44, 1 }
  0x33   : > { %v652_v49 = vrot.slane %v3035_v37, 1  ;;  %v654_v50 = vrot.slane %v3050_v45, 1  ;;  %v3059_v51 = vpack.c.bf16 %v715_v47, %v713_v43  ;;  %v417_v52 = vmax.f32 %v385_v23, 0.0 }
  0x34   : > { %2534 = vmatmul.msk.bf16.gmra.mxu2 %vm781_vm1, %v3043_v42  ;;  %v486_v53 = vrot.slane %v416_v33, 7  ;;  %v2750_v58 = vunpack.c.l.bf16 %v2784_v41  ;;  %v2751_v63 = vunpack.c.h.bf16 %v2784_v41  ;;  %v2766_v0 = vunpack.c.l.bf16 %v2788_v46 }
  0x35   : > { %4088 = vst [vmem:[#allocation7_spill] sm:$0xff] %v3059_v51  ;;  %v653_v59 = vsel %vm648_vm2, %v651_v48, %v652_v49  ;;  %v655_v60 = vsel %vm648_vm2, %v652_v49, %v654_v50  ;;  %v487_v5 = vrot.slane %v417_v52, 7  ;;  %v2767_v21 = vunpack.c.h.bf16 %v2788_v46  ;;  %v2781_v50 = vld [vmem:[%s2885_s12 + $0x30] sm:$0xff]  }
  0x36   : > { %2538 = vmatmul.msk.bf16.gmra.mxu3 %vm781_vm1, %v3059_v51  ;;  %v3066_v3 = vpack.c.bf16 %v655_v60, %v653_v59  ;;  %v3069_v9 = vsel %vm470_vm0, 0.0, %v486_v53  ;;  %v356_v13 = vmul.f32 %v2890_v7, %v2750_v58  ;;  %v357_v16 = vmul.f32 %v2890_v7, %v2751_v63 }
  0x37   : > { %v676_v15 = vrot.slane %v3069_v9, 1  ;;  %v364_v22 = vmul.f32 %v2890_v7, %v2766_v0  ;;  %v3078_v23 = vsel %vm470_vm0, %v486_v53, %v487_v5  ;;  %v3081_v28 = vsel %vm470_vm0, %v487_v5, 0.0 }
  0x38   : > { %2526 = vmatmul.msk.bf16.gmra.mxu0 %vm781_vm1, %v3066_v3  ;;  %v392_v30 = vadd.f32 %v2900_v14, %v356_v13  ;;  %v2718_v31 = vunpack.c.l.bf16 %v2776_v2  ;;  %v677_v33 = vrot.slane %v3078_v23, 1  ;;  %v679_v35 = vrot.slane %v3081_v28, 1 }
  0x39   : > { %v393_v36 = vadd.f32 %v2900_v14, %v357_v16  ;;  %v365_v38 = vmul.f32 %v2890_v7, %v2767_v21  ;;  %v400_v40 = vadd.f32 %v2900_v14, %v364_v22  ;;  %v2719_v41 = vunpack.c.h.bf16 %v2776_v2 }
  0x3a   : > { %v424_v39 = vmax.f32 %v392_v30, 0.0  ;;  %v340_v43 = vmul.f32 %v2890_v7, %v2718_v31  ;;  %v678_v46 = vsel %vm648_vm2, %v676_v15, %v677_v33  ;;  %v680_v47 = vsel %vm648_vm2, %v677_v33, %v679_v35 }
  0x3b   : > { %v425_v48 = vmax.f32 %v393_v36, 0.0  ;;  %v401_v49 = vadd.f32 %v2900_v14, %v365_v38  ;;  %v432_v53 = vmax.f32 %v400_v40, 0.0  ;;  %v341_v58 = vmul.f32 %v2890_v7, %v2719_v41 }
  0x3c   : > { %v498_v52 = vrot.slane %v424_v39, 7  ;;  %v3095_v59 = vpack.c.bf16 %v680_v47, %v678_v46  ;;  %v376_v0 = vadd.f32 %v2900_v14, %v340_v43  ;;  %v2738_v15 = vunpack.c.l.bf16 %v2781_v50 }
  0x3d   : > { %v499_v60 = vrot.slane %v425_v48, 7  ;;  %v433_v63 = vmax.f32 %v401_v49, 0.0  ;;  %v510_v5 = vrot.slane %v432_v53, 7  ;;  %v377_v13 = vadd.f32 %v2900_v14, %v341_v58  ;;  %v2785_v49 = vld [vmem:[%s2885_s12 + $0x50] sm:$0xff]  }
  0x3e   : > { %4089 = vst [vmem:[#allocation8_spill] sm:$0xff] %v3095_v59  ;;  %v3099_v2 = vsel %vm470_vm0, 0.0, %v498_v52  ;;  %v2739_v36 = vunpack.c.h.bf16 %v2781_v50  ;;  %v408_v41 = vmax.f32 %v376_v0, 0.0 }
  0x3f   : > { %v3103_v16 = vsel %vm470_vm0, %v498_v52, %v499_v60  ;;  %v3106_v21 = vsel %vm470_vm0, %v499_v60, 0.0  ;;  %v696_v22 = vrot.slane %v3099_v2, 1  ;;  %v511_v30 = vrot.slane %v433_v63, 7 }
  0x40   : > { %v697_v31 = vrot.slane %v3103_v16, 1  ;;  %v699_v33 = vrot.slane %v3106_v21, 1  ;;  %v3112_v35 = vsel %vm470_vm0, 0.0, %v510_v5  ;;  %v409_v52 = vmax.f32 %v377_v13, 0.0 }
  0x41   : > { %4090 = vst [vmem:[#allocation9_spill] sm:$0xff] %v3112_v35  ;;  %v3117_v38 = vsel %vm470_vm0, %v510_v5, %v511_v30  ;;  %v3120_v39 = vsel %vm470_vm0, %v511_v30, 0.0  ;;  %v716_v40 = vrot.slane %v3112_v35, 1  ;;  %v474_v53 = vrot.slane %v408_v41, 7  ;;  %v2789_v5 = vld [vmem:[%s2885_s12 + $0x70] sm:$0xff]  }
  0x42   : > { %2531 = vmatmul.msk.bf16.gmra.mxu1 %vm781_vm1, %v3095_v59  ;;  %4091 = vst [vmem:[#allocation10_spill] sm:$0xff] %v3117_v38  ;;  %v698_v43 = vsel %vm648_vm2, %v696_v22, %v697_v31  ;;  %v700_v46 = vsel %vm648_vm2, %v697_v31, %v699_v33  ;;  %v717_v47 = vrot.slane %v3117_v38, 1  ;;  %v719_v48 = vrot.slane %v3120_v39, 1 }
  0x43   : > { %4092 = vst [vmem:[#allocation11_spill] sm:$0xff] %v3120_v39  ;;  %v3128_v50 = vpack.c.bf16 %v700_v46, %v698_v43  ;;  %v350_v63 = vmul.f32 %v2890_v7, %v2738_v15  ;;  %v351_v0 = vmul.f32 %v2890_v7, %v2739_v36  ;;  %v475_v30 = vrot.slane %v409_v52, 7 }
  0x44   : > { %v718_v58 = vsel %vm648_vm2, %v716_v40, %v717_v47  ;;  %v720_v60 = vsel %vm648_vm2, %v717_v47, %v719_v48  ;;  %v3140_v31 = vsel %vm470_vm0, 0.0, %v474_v53  ;;  %v2754_v13 = vunpack.c.l.bf16 %v2785_v49 }
  0x45   : > { %2535 = vmatmul.msk.bf16.gmra.mxu2 %vm781_vm1, %v3128_v50  ;;  %v3137_v22 = vpack.c.bf16 %v720_v60, %v718_v58  ;;  %v656_v33 = vrot.slane %v3140_v31, 1  ;;  %v386_v40 = vadd.f32 %v2900_v14, %v350_v63  ;;  %v387_v41 = vadd.f32 %v2900_v14, %v351_v0 }
  0x46   : > { %v2755_v15 = vunpack.c.h.bf16 %v2785_v49  ;;  %v3148_v36 = vsel %vm470_vm0, %v474_v53, %v475_v30  ;;  %v3151_v43 = vsel %vm470_vm0, %v475_v30, 0.0  ;;  %v358_v46 = vmul.f32 %v2890_v7, %v2754_v13 }
  0x47   : > { %4093 = vst [vmem:[#allocation12_spill] sm:$0xff] %v3137_v22  ;;  %2539 = vmatmul.msk.bf16.gmra.mxu3 %vm781_vm1, %v3137_v22  ;;  %v2770_v47 = vunpack.c.l.bf16 %v2789_v5  ;;  %v657_v48 = vrot.slane %v3148_v36, 1  ;;  %v659_v52 = vrot.slane %v3151_v43, 1  ;;  %v418_v58 = vmax.f32 %v386_v40, 0.0  ;;  %v2709_v22 = vld [vmem:[%s4037_s3 + $0x30] sm:$0xff] }
  0x48   : > { %v419_v60 = vmax.f32 %v387_v41, 0.0  ;;  %v359_v49 = vmul.f32 %v2890_v7, %v2755_v15  ;;  %v394_v63 = vadd.f32 %v2900_v14, %v358_v46  ;;  %v2771_v0 = vunpack.c.h.bf16 %v2789_v5  ;;  %v2777_v5 = vld [vmem:[%s2885_s12 + $0x10] sm:$0xff]   ;;  %1794 = vmatpush.bf16.msra.mxu2 %v2709_v22 }
  0x49   : > { %v366_v53 = vmul.f32 %v2890_v7, %v2770_v47  ;;  %v658_v30 = vsel %vm648_vm2, %v656_v33, %v657_v48  ;;  %v660_v4 = vsel %vm648_vm2, %v657_v48, %v659_v52  ;;  %v489_v13 = vrot.slane %v418_v58, 7 }
  0x4a   : > { %v490_v8 = vrot.slane %v419_v60, 7  ;;  %v3164_v39 = vpack.c.bf16 %v660_v4, %v658_v30  ;;  %v395_v40 = vadd.f32 %v2900_v14, %v359_v49  ;;  %v426_v41 = vmax.f32 %v394_v63, 0.0 }
  0x4b   : > { %v367_v15 = vmul.f32 %v2890_v7, %v2771_v0  ;;  %v3173_v33 = vsel %vm470_vm0, 0.0, %v489_v13  ;;  %v402_v48 = vadd.f32 %v2900_v14, %v366_v53  ;;  %v2722_v30 = vunpack.c.l.bf16 %v2777_v5 }
  0x4c   : > { %v3170_v46 = vsel %vm470_vm0, %v489_v13, %v490_v8  ;;  %v3176_v47 = vsel %vm470_vm0, %v490_v8, 0.0  ;;  %2527 = vmatmul.msk.bf16.gmra.mxu0 %vm781_vm1, %v3164_v39  ;;  %v681_v4 = vrot.slane %v3173_v33, 1  ;;  %v427_v60 = vmax.f32 %v395_v40, 0.0 }
  0x4d   : > { %v682_v52 = vrot.slane %v3170_v46, 1  ;;  %v684_v58 = vrot.slane %v3176_v47, 1  ;;  %v501_v49 = vrot.slane %v426_v41, 7  ;;  %v403_v63 = vadd.f32 %v2900_v14, %v367_v15 }
  0x4e   : > { %v434_v0 = vmax.f32 %v402_v48, 0.0  ;;  %v502_v22 = vrot.slane %v427_v60, 7  ;;  %v2723_v13 = vunpack.c.h.bf16 %v2777_v5  ;;  %v342_v48 = vmul.f32 %v2890_v7, %v2722_v30  ;;  %v2708_v60 = vld [vmem:[%s4037_s3 + $0x28] sm:$0xff]  ;;  %v2711_v30 = vld [vmem:[%s4037_s3 + $0x40] sm:$0xff] }
  0x4f   : > { %v683_v8 = vsel %vm648_vm2, %v681_v4, %v682_v52  ;;  %v685_v53 = vsel %vm648_vm2, %v682_v52, %v684_v58  ;;  %v3190_v35 = vsel %vm470_vm0, 0.0, %v501_v49  ;;  %v435_v51 = vmax.f32 %v403_v63, 0.0  ;;  %v2710_v58 = vld [vmem:[%s4037_s3 + $0x38] sm:$0xff]  ;;  %1665 = vmatpush.bf16.msra.mxu1 %v2708_v60  ;;  %2052 = vmatpush.bf16.msra.mxu0 %v2711_v30 }
  0x50   : > { %v3187_v38 = vpack.c.bf16 %v685_v53, %v683_v8  ;;  %v513_v34 = vrot.slane %v434_v0, 7  ;;  %v3193_v40 = vsel %vm470_vm0, %v501_v49, %v502_v22  ;;  %v3196_v41 = vsel %vm470_vm0, %v502_v22, 0.0  ;;  %1923 = vmatpush.bf16.msra.mxu3 %v2710_v58 }
  0x51   : > { %v701_v15 = vrot.slane %v3190_v35, 1  ;;  %v702_v5 = vrot.slane %v3193_v40, 1  ;;  %v704_v4 = vrot.slane %v3196_v41, 1  ;;  %v514_v52 = vrot.slane %v435_v51, 7 }
  0x52   : > { %4094 = vst [vmem:[#allocation13_spill] sm:$0xff] %v3187_v38  ;;  %2532 = vmatmul.msk.bf16.gmra.mxu1 %vm781_vm1, %v3187_v38  ;;  %v3211_v49 = vsel %vm470_vm0, 0.0, %v513_v34  ;;  %v343_v63 = vmul.f32 %v2890_v7, %v2723_v13  ;;  %v378_v0 = vadd.f32 %v2900_v14, %v342_v48 }
  0x53   : > { %v703_v51 = vsel %vm648_vm2, %v701_v15, %v702_v5  ;;  %v705_v8 = vsel %vm648_vm2, %v702_v5, %v704_v4  ;;  %v3221_v53 = vsel %vm470_vm0, %v513_v34, %v514_v52  ;;  %v3224_v22 = vsel %vm470_vm0, %v514_v52, 0.0 }
  0x54   : > { %4095 = vst [vmem:[#allocation14_spill] sm:$0xff] %v3221_v53  ;;  %v3226_v29 = vpack.c.bf16 %v705_v8, %v703_v51  ;;  %v721_v7 = vrot.slane %v3211_v49, 1  ;;  %v722_v13 = vrot.slane %v3221_v53, 1  ;;  %v724_v48 = vrot.slane %v3224_v22, 1 }
  0x55   : > { %4096 = vst [vmem:[#allocation15_spill] sm:$0xff] %v3224_v22  ;;  %v379_v15 = vadd.f32 %v2900_v14, %v343_v63  ;;  %v410_v5 = vmax.f32 %v378_v0, 0.0 }
  0x56   : > { %2536 = vmatmul.msk.bf16.gmra.mxu2 %vm781_vm1, %v3226_v29  ;;  %v723_v34 = vsel %vm648_vm2, %v721_v7, %v722_v13  ;;  %v725_v4 = vsel %vm648_vm2, %v722_v13, %v724_v48  ;;  %v4097_v7 = vmov 0.0  }
  0x57   : > { %v3236_v52 = vpack.c.bf16 %v725_v4, %v723_v34  ;;  %v411_v58 = vmax.f32 %v379_v15, 0.0  ;;  %v477_v60 = vrot.slane %v410_v5, 7  ;;  %v1063_v53 = vrot.slane %v4097_v7, 2 }
  0x58   : > { %v4058_v5 = vmov 0.0|0.0   ;;  %v600_v4 = vpack.c.bf16 %v3035_v37, %v3047_v44 }
  0x59   : > { %2540 = vmatmul.msk.bf16.gmra.mxu3 %vm781_vm1, %v3236_v52  ;;  %v478_v51 = vrot.slane %v411_v58, 7  ;;  %v569_v30 = vsel %vm470_vm0, 0.0, %v477_v60  ;;  %v3251_v34 = vpack.c.bf16 %v1063_v53, %v1063_v53  ;;  %v1066_v58 = vrot.slane %v3035_v37, 2 }
  0x5a   : > { %v661_v8 = vrot.slane %v569_v30, 1  ;;  %v1070_v37 = vrot.slane %v3140_v31, 2 }
  0x5b   : > { %v479_v14 = vsel %vm470_vm0, %v477_v60, %v478_v51  ;;  %v585_v63 = vsel %vm470_vm0, %v478_v51, 0.0  ;;  %4098 = vst [vmem:[#allocation16_spill] sm:$0xff] %v3251_v34  ;;  %v1068_v60 = vrot.slane %v3050_v45, 2  ;;  %v1073_v45 = vrot.slane %v3151_v43, 2 }
  0x5c   : > { %v662_v0 = vrot.slane %v479_v14, 1  ;;  %v664_v22 = vrot.slane %v585_v63, 1  ;;  %v1078_v43 = vrot.slane %v585_v63, 2  ;;  %v1083_v63 = vrot.slane %v2928_v56, 2 }
  0x5d   : > { %v1069_v53 = vsel %vm1062_vm3, %v1066_v58, %v1068_v60  ;;  %v3303_v60 = vpack.c.bf16 %v2922_v54, %v2925_v55 }
  0x5e   : > { %v663_v13 = vsel %vm648_vm2, %v661_v8, %v662_v0  ;;  %v665_v48 = vsel %vm648_vm2, %v662_v0, %v664_v22  ;;  %v1065_v22 = vrot.slane %v3047_v44, 2  ;;  %v3270_v0 = vpack.c.bf16 %v3148_v36, %v3140_v31 }
  0x5f   : > { %v3246_v15 = vpack.c.bf16 %v665_v48, %v663_v13  ;;  %v1071_v44 = vrot.slane %v3148_v36, 2  ;;  %v3287_v48 = vpack.c.bf16 %v479_v14, %v569_v30  ;;  %v1075_v31 = vrot.slane %v569_v30, 2 }
  0x60   : > { %v1067_v51 = vsel %vm1062_vm3, %v1065_v22, %v1066_v58  ;;  %v1076_v36 = vrot.slane %v479_v14, 2  ;;  %v1080_v30 = vrot.slane %v2925_v55, 2  ;;  %v1081_v14 = vrot.slane %v2922_v54, 2 }
  0x61   : > { %2528 = vmatmul.msk.bf16.gmra.mxu0 %vm781_vm1, %v3246_v15  ;;  %v3266_v8 = vpack.c.bf16 %v1069_v53, %v1067_v51  ;;  %v1074_v7 = vsel %vm1062_vm3, %v1071_v44, %v1073_v45  ;;  %v3326_v54 = vpack.c.bf16 %v2969_v19, %v2972_v20 }
  0x62   : > { %981 = vmatmul.bf16.vlgmr.msrb.gmra.mxu1 %v4058_v5  ;;  %v1079_v22 = vsel %vm1062_vm3, %v1076_v36, %v1078_v43  ;;  %v1082_v53 = vsel %vm1062_vm3, %v1080_v30, %v1081_v14 }
  0x63   : > { %4100 = vst [vmem:[#allocation18_spill] sm:$0xff] %v3326_v54 }
  0x66   : > { %2564 = vmatmul.msk.bf16.vlgmr.msrb.gmra.mxu2 %vm781_vm1, %v3251_v34 }
  0x69   : > { %2584 = vmatmul.msk.bf16.vlgmr.msrb.gmra.mxu3 %vm781_vm1, %v600_v4 }
  0x71   : > { %2604 = vmatmul.msk.bf16.vlgmr.msrb.gmra.mxu0 %vm781_vm1, %v3066_v3  ;;  %v1072_v3 = vsel %vm1062_vm3, %v1070_v37, %v1071_v44  ;;  %v1084_v37 = vsel %vm1062_vm3, %v1081_v14, %v1083_v63 }
  0x72   : > { %2545 = vmatmul.msk.bf16.gmra.mxu1 %vm781_vm1, %v600_v4  ;;  %v3285_v13 = vpack.c.bf16 %v1074_v7, %v1072_v3  ;;  %v1077_v4 = vsel %vm1062_vm3, %v1075_v31, %v1076_v36  ;;  %v3322_v45 = vpack.c.bf16 %v1084_v37, %v1082_v53  ;;  %v1085_v7 = vrot.slane %v2972_v20, 2 }
  0x73   : > { %v3299_v58 = vpack.c.bf16 %v1079_v22, %v1077_v4  ;;  %v1086_v31 = vrot.slane %v2969_v19, 2  ;;  %v1088_v36 = vrot.slane %v2979_v25, 2  ;;  %v3359_v20 = vpack.c.bf16 %v3078_v23, %v3069_v9 }
  0x74   : > { %4099 = vst [vmem:[#allocation17_spill] sm:$0xff] %v3322_v45 }
  0x75   : > { %v1087_v14 = vsel %vm1062_vm3, %v1085_v7, %v1086_v31  ;;  %v1089_v63 = vsel %vm1062_vm3, %v1086_v31, %v1088_v36  ;;  %4104 = vst [vmem:[#allocation22_spill] sm:$0xff] %v3359_v20  ;;  %v1090_v31 = vrot.slane %v3069_v9, 2  ;;  %v1091_v36 = vrot.slane %v3078_v23, 2 }
  0x76   : > { %2565 = vmatmul.msk.bf16.gmra.mxu2 %vm781_vm1, %v3266_v8  ;;  %v3355_v19 = vpack.c.bf16 %v1089_v63, %v1087_v14  ;;  %v1093_v14 = vrot.slane %v3081_v28, 2  ;;  %v3394_v23 = vpack.c.bf16 %v3170_v46, %v3173_v33 }
  0x77   : > { %v1092_v34 = vsel %vm1062_vm3, %v1090_v31, %v1091_v36 }
  0x78   : > { %4103 = vst [vmem:[#allocation21_spill] sm:$0xff] %v3355_v19 }
  0x79   : > { %2585 = vmatmul.msk.bf16.gmra.mxu3 %vm781_vm1, %v3270_v0  ;;  %4108 = vst [vmem:[#allocation26_spill] sm:$0xff] %v3394_v23 }
  0x81   : > { %2605 = vmatmul.msk.bf16.gmra.mxu0 %vm781_vm1, %v3164_v39 }
  0x82   : > { %2546 = vmatmul.msk.bf16.gmra.mxu1 %vm781_vm1, %v3270_v0 }
  0x86   : > { %2566 = vmatmul.msk.bf16.gmra.mxu2 %vm781_vm1, %v3285_v13 }
  0x89   : > { %2586 = vmatmul.msk.bf16.gmra.mxu3 %vm781_vm1, %v3287_v48 }
  0x8f   : > { %v3320_v44 = vpop.f32.mrf.mxu0 }
  0x91   : > { %2606 = vmatmul.msk.bf16.gmra.mxu0 %vm781_vm1, %v3246_v15 }
  0x92   : > { %2547 = vmatmul.msk.bf16.gmra.mxu1 %vm781_vm1, %v3287_v48 }
  0x96   : > { %2567 = vmatmul.msk.bf16.gmra.mxu2 %vm781_vm1, %v3299_v58 }
  0x97   : > { %v3341_v43 = vpop.f32.mrf.mxu0 }
  0x99   : > { %2587 = vmatmul.msk.bf16.gmra.mxu3 %vm781_vm1, %v3303_v60 }
  0x9f   : > { %v3312_v51 = vpop.f32.mrf.mxu1 }
  0xa1   : > { %2607 = vmatmul.msk.bf16.gmra.mxu0 %vm781_vm1, %v2950_v6 }
  0xa2   : > { %2548 = vmatmul.msk.bf16.gmra.mxu1 %vm781_vm1, %v3303_v60 }
  0xa6   : > { %v3328_v55 = vpop.f32.mrf.mxu2  ;;  %2568 = vmatmul.msk.bf16.gmra.mxu2 %vm781_vm1, %v3322_v45 }
  0xa7   : > { %v3330_v56 = vpop.f32.mrf.mxu1 }
  0xa9   : > { %v3334_v3 = vpop.f32.mrf.mxu3  ;;  %2588 = vmatmul.msk.bf16.gmra.mxu3 %vm781_vm1, %v3326_v54 }
  0xaa   : > { %4101 = vst [vmem:[#allocation19_spill] sm:$0xff] %v3334_v3 }
  0xae   : > { %v3343_v4 = vpop.f32.mrf.mxu2 }
  0xaf   : > { %v3345_v22 = vpop.f32.mrf.mxu1 }
  0xb1   : > { %v3347_v30 = vpop.f32.mrf.mxu3  ;;  %2608 = vmatmul.msk.bf16.gmra.mxu0 %vm781_vm1, %v3008_v12 }
  0xb2   : > { %4102 = vst [vmem:[#allocation20_spill] sm:$0xff] %v3347_v30  ;;  %2549 = vmatmul.msk.bf16.gmra.mxu1 %vm781_vm1, %v3326_v54  ;;  %v1094_v30 = vsel %vm1062_vm3, %v1091_v36, %v1093_v14 }
  0xb3   : > { %v3390_v9 = vpack.c.bf16 %v1094_v30, %v1092_v34  ;;  %v1095_v34 = vrot.slane %v3173_v33, 2  ;;  %v1096_v30 = vrot.slane %v3170_v46, 2 }
  0xb5   : > { %v3363_v53 = vpop.f32.mrf.mxu0  ;;  %4107 = vst [vmem:[#allocation25_spill] sm:$0xff] %v3390_v9 }
  0xb6   : > { %2569 = vmatmul.msk.bf16.gmra.mxu2 %vm781_vm1, %v3355_v19 }
  0xb7   : > { %v3361_v25 = vpop.f32.mrf.mxu1  ;;  %v3367_v37 = vpop.f32.mrf.mxu2 }
  0xb9   : > { %v3369_v7 = vpop.f32.mrf.mxu3  ;;  %2589 = vmatmul.msk.bf16.gmra.mxu3 %vm781_vm1, %v3359_v20 }
  0xba   : > { %4105 = vst [vmem:[#allocation23_spill] sm:$0xff] %v3369_v7 }
  0xbd   : > { %v3382_v3 = vpop.f32.mrf.mxu0 }
  0xbf   : > { %v3376_v63 = vpop.f32.mrf.mxu1  ;;  %v3378_v5 = vpop.f32.mrf.mxu2 }
  0xc1   : > { %v3384_v7 = vpop.f32.mrf.mxu3  ;;  %2609 = vmatmul.msk.bf16.gmra.mxu0 %vm781_vm1, %v3095_v59 }
  0xc2   : > { %4106 = vst [vmem:[#allocation24_spill] sm:$0xff] %v3384_v7  ;;  %2550 = vmatmul.msk.bf16.gmra.mxu1 %vm781_vm1, %v3359_v20  ;;  %v1098_v7 = vrot.slane %v3176_v47, 2  ;;  %v3429_v47 = vpack.c.bf16 %v2931_v57, %v2937_v61 }
  0xc4   : > { %v1099_v19 = vsel %vm1062_vm3, %v1096_v30, %v1098_v7  ;;  %4113 = vst [vmem:[#allocation31_spill] sm:$0xff] %v3429_v47 }
  0xc6   : > { %2570 = vmatmul.msk.bf16.gmra.mxu2 %vm781_vm1, %v3390_v9  ;;  %v1097_v9 = vsel %vm1062_vm3, %v1095_v34, %v1096_v30  ;;  %v1103_v30 = vrot.slane %v2940_v62, 2  ;;  %v3460_v62 = vpack.c.bf16 %v3015_v24, %v3011_v17 }
  0xc7   : > { %v3396_v28 = vpop.f32.mrf.mxu1  ;;  %v3423_v33 = vpack.c.bf16 %v1099_v19, %v1097_v9  ;;  %v1100_v19 = vrot.slane %v2937_v61, 2  ;;  %v1101_v9 = vrot.slane %v2931_v57, 2 }
  0xc8   : > { %v3400_v31 = vpop.f32.mrf.mxu2 }
  0xc9   : > { %2590 = vmatmul.msk.bf16.gmra.mxu3 %vm781_vm1, %v3394_v23  ;;  %v3406_v14 = vpop.f32.mrf.mxu0  ;;  %4112 = vst [vmem:[#allocation30_spill] sm:$0xff] %v3423_v33  ;;  %v1104_v12 = vsel %vm1062_vm3, %v1101_v9, %v1103_v30 }
  0xca   : > { %v3404_v36 = vpop.f32.mrf.mxu3 }
  0xcb   : > { %4109 = vst [vmem:[#allocation27_spill] sm:$0xff] %v3404_v36 }
  0xcf   : > { %v3411_v59 = vpop.f32.mrf.mxu1 }
  0xd0   : > { %v3413_v20 = vpop.f32.mrf.mxu2 }
  0xd1   : > { %4110 = vst [vmem:[#allocation28_spill] sm:$0xff] %v3413_v20  ;;  %2610 = vmatmul.msk.bf16.gmra.mxu0 %vm781_vm1, %v3187_v38  ;;  %v3425_v46 = vpop.f32.mrf.mxu0 }
  0xd2   : > { %2551 = vmatmul.msk.bf16.gmra.mxu1 %vm781_vm1, %v3394_v23  ;;  %v3421_v36 = vpop.f32.mrf.mxu3 }
  0xd3   : > { %4111 = vst [vmem:[#allocation29_spill] sm:$0xff] %v3421_v36 }
  0xd6   : > { %2571 = vmatmul.msk.bf16.gmra.mxu2 %vm781_vm1, %v3423_v33  ;;  %v1102_v33 = vsel %vm1062_vm3, %v1100_v19, %v1101_v9 }
  0xd7   : > { %v3433_v7 = vpop.f32.mrf.mxu1  ;;  %v3454_v61 = vpack.c.bf16 %v1104_v12, %v1102_v33 }
  0xd9   : > { %2591 = vmatmul.msk.bf16.gmra.mxu3 %vm781_vm1, %v3429_v47  ;;  %v3437_v34 = vpop.f32.mrf.mxu2  ;;  %4117 = vst [vmem:[#allocation35_spill] sm:$0xff] %v3454_v61 }
  0xda   : > { %4114 = vst [vmem:[#allocation32_spill] sm:$0xff] %v3437_v34 }
  0xdc   : > { %v3442_v36 = vpop.f32.mrf.mxu3 }
  0xdd   : > { %4115 = vst [vmem:[#allocation33_spill] sm:$0xff] %v3442_v36 }
  0xde   : > { %v3444_v38 = vpop.f32.mrf.mxu0 }
  0xdf   : > { %v982_v23 = vpop.f32.mrf.mxu1 }
  0xe0   : > { %v983_v9 = vadd.f32 %v982_v23, %v3320_v44 }
  0xe1   : > { %2611 = vmatmul.msk.bf16.gmra.mxu0 %vm781_vm1, %v2966_v18  ;;  %v3450_v54 = vpop.f32.mrf.mxu2  ;;  %v1105_v18 = vrot.slane %v3011_v17, 2 }
  0xe2   : > { %4116 = vst [vmem:[#allocation34_spill] sm:$0xff] %v3450_v54  ;;  %2552 = vmatmul.msk.bf16.gmra.mxu1 %vm781_vm1, %v3429_v47  ;;  %v1106_v47 = vrot.slane %v3015_v24, 2 }
  0xe4   : > { %v3456_v57 = vpop.f32.mrf.mxu3 }
  0xe5   : > { %4118 = vst [vmem:[#allocation36_spill] sm:$0xff] %v3456_v57  ;;  %v1108_v57 = vrot.slane %v3018_v26, 2 }
  0xe6   : > { %v3462_v36 = vpop.f32.mrf.mxu0  ;;  %2572 = vmatmul.msk.bf16.gmra.mxu2 %vm781_vm1, %v3454_v61 }
  0xe7   : > { %v984_v30 = vpop.f32.mrf.mxu1  ;;  %v1109_v44 = vsel %vm1062_vm3, %v1106_v47, %v1108_v57 }
  0xe8   : > { %v985_v19 = vadd.f32 %v984_v30, %v3341_v43  ;;  %v1107_v43 = vsel %vm1062_vm3, %v1105_v18, %v1106_v47 }
  0xe9   : > { %2592 = vmatmul.msk.bf16.gmra.mxu3 %vm781_vm1, %v3460_v62  ;;  %v1252_v12 = vpop.f32.mrf.mxu2  ;;  %v3482_v24 = vpack.c.bf16 %v1109_v44, %v1107_v43 }
  0xea   : > { %v1332_v33 = vadd.f32 %v1252_v12, %v983_v9  ;;  %v1110_v9 = vrot.slane %v3099_v2, 2  ;;  %v1111_v12 = vrot.slane %v3103_v16, 2 }
  0xec   : > { %v1385_v54 = vpop.f32.mrf.mxu3 }
  0xed   : > { %v1465_v34 = vadd.f32 %v1385_v54, %v1332_v33 }
  0xee   : > { %v1527_v45 = vpop.f32.mrf.mxu0 }
  0xef   : > { %v987_v61 = vpop.f32.mrf.mxu1  ;;  %v3476_v23 = vadd.f32 %v1527_v45, %v1465_v34 }
  0xf0   : > { %v988_v20 = vadd.f32 %v987_v61, %v3363_v53  ;;  %v3486_v53 = vpack.c.bf16 %v3103_v16, %v3099_v2 }
  0xf1   : > { %2612 = vmatmul.msk.bf16.gmra.mxu0 %vm781_vm1, %v3043_v42  ;;  %v1254_v26 = vpop.f32.mrf.mxu2 }
  0xf2   : > { %2553 = vmatmul.msk.bf16.gmra.mxu1 %vm781_vm1, %v3460_v62  ;;  %v1333_v17 = vadd.f32 %v1254_v26, %v985_v19  ;;  %v1113_v19 = vrot.slane %v3106_v21, 2 }
  0xf4   : > { %v1387_v54 = vpop.f32.mrf.mxu3 }
  0xf5   : > { %v1466_v30 = vadd.f32 %v1387_v54, %v1333_v17  ;;  %v1114_v54 = vsel %vm1062_vm3, %v1111_v12, %v1113_v19 }
  0xf6   : > { %v1529_v18 = vpop.f32.mrf.mxu0  ;;  %2573 = vmatmul.msk.bf16.gmra.mxu2 %vm781_vm1, %v3482_v24 }
  0xf7   : > { %v989_v45 = vpop.f32.mrf.mxu1  ;;  %v3491_v34 = vadd.f32 %v1529_v18, %v1466_v30 }
  0xf8   : > { %v990_v47 = vadd.f32 %v989_v45, %v3382_v3  ;;  %v1112_v3 = vsel %vm1062_vm3, %v1110_v9, %v1111_v12  ;;  %v1118_v12 = vrot.slane %v3196_v41, 2 }
  0xf9   : > { %2593 = vmatmul.msk.bf16.gmra.mxu3 %vm781_vm1, %v3486_v53  ;;  %v1257_v61 = vpop.f32.mrf.mxu2  ;;  %v3507_v16 = vpack.c.bf16 %v1114_v54, %v1112_v3 }
  0xfa   : > { %v1334_v57 = vadd.f32 %v1257_v61, %v988_v20 }
  0xfc   : > { %v1390_v33 = vpop.f32.mrf.mxu3 }
  0xfd   : > { %v1467_v43 = vadd.f32 %v1390_v33, %v1334_v57  ;;  %v1115_v33 = vrot.slane %v3190_v35, 2 }
  0xfe   : > { %v1532_v44 = vpop.f32.mrf.mxu0 }
  0xff   : > { %v992_v26 = vpop.f32.mrf.mxu1  ;;  %v3501_v30 = vadd.f32 %v1532_v44, %v1467_v43  ;;  %v1116_v43 = vrot.slane %v3193_v40, 2 }
 0x100   : > { %v993_v17 = vadd.f32 %v992_v26, %v3406_v14  ;;  %v3511_v14 = vpack.c.bf16 %v3193_v40, %v3190_v35 }
 0x101   : > { %2613 = vmatmul.msk.bf16.gmra.mxu0 %vm781_vm1, %v3128_v50  ;;  %v1259_v21 = vpop.f32.mrf.mxu2 }
 0x102   : > { %2554 = vmatmul.msk.bf16.gmra.mxu1 %vm781_vm1, %v3486_v53  ;;  %v1335_v2 = vadd.f32 %v1259_v21, %v990_v47 }
 0x104   : > { %v1392_v20 = vpop.f32.mrf.mxu3 }
 0x105   : > { %v1468_v18 = vadd.f32 %v1392_v20, %v1335_v2  ;;  %v1119_v2 = vsel %vm1062_vm3, %v1116_v43, %v1118_v12 }
 0x106   : > { %v1534_v45 = vpop.f32.mrf.mxu0  ;;  %2574 = vmatmul.msk.bf16.gmra.mxu2 %vm781_vm1, %v3507_v16 }
 0x107   : > { %v994_v61 = vpop.f32.mrf.mxu1  ;;  %v3516_v19 = vadd.f32 %v1534_v45, %v1468_v18 }
 0x108   : > { %v995_v57 = vadd.f32 %v994_v61, %v3425_v46  ;;  %v1117_v46 = vsel %vm1062_vm3, %v1115_v33, %v1116_v43  ;;  %v1123_v33 = vrot.slane %v2957_v11, 2  ;;  %v1120_v43 = vrot.slane %v2954_v10, 2 }
 0x109   : > { %2594 = vmatmul.msk.bf16.gmra.mxu3 %vm781_vm1, %v3511_v14  ;;  %v1262_v47 = vpop.f32.mrf.mxu2  ;;  %v3532_v40 = vpack.c.bf16 %v1119_v2, %v1117_v46 }
 0x10a   : > { %v1336_v9 = vadd.f32 %v1262_v47, %v993_v17 }
 0x10c   : > { %v1395_v44 = vpop.f32.mrf.mxu3 }
 0x10d   : > { %v1469_v26 = vadd.f32 %v1395_v44, %v1336_v9  ;;  %v1121_v44 = vrot.slane %v2945_v1, 2 }
 0x10e   : > { %v1537_v3 = vpop.f32.mrf.mxu0 }
 0x10f   : > { %v997_v54 = vpop.f32.mrf.mxu1  ;;  %v3526_v20 = vadd.f32 %v1537_v3, %v1469_v26  ;;  %v1122_v2 = vsel %vm1062_vm3, %v1120_v43, %v1121_v44  ;;  %v4120_v43 = vld [vmem:[#allocation6_spill] sm:$0xff] }
 0x110   : > { %v998_v21 = vadd.f32 %v997_v54, %v3444_v38  ;;  %v3536_v38 = vpack.c.bf16 %v2945_v1, %v2954_v10 }
 0x111   : > { %2614 = vmatmul.msk.bf16.gmra.mxu0 %vm781_vm1, %v3226_v29  ;;  %v1264_v41 = vpop.f32.mrf.mxu2 }
 0x112   : > { %2555 = vmatmul.msk.bf16.gmra.mxu1 %vm781_vm1, %v3511_v14  ;;  %v1337_v35 = vadd.f32 %v1264_v41, %v995_v57 }
 0x114   : > { %v1397_v17 = vpop.f32.mrf.mxu3 }
 0x115   : > { %v1470_v18 = vadd.f32 %v1397_v17, %v1337_v35  ;;  %v4119_v17 = vld [vmem:[#allocation5_spill] sm:$0xff] }
 0x116   : > { %v1539_v45 = vpop.f32.mrf.mxu0  ;;  %2575 = vmatmul.msk.bf16.gmra.mxu2 %vm781_vm1, %v3532_v40 }
 0x117   : > { %v999_v61 = vpop.f32.mrf.mxu1  ;;  %v3541_v9 = vadd.f32 %v1539_v45, %v1470_v18  ;;  %v3560_v18 = vpack.c.bf16 %v4119_v17, %v3027_v32 }
 0x118   : > { %v1000_v47 = vadd.f32 %v999_v61, %v3462_v36  ;;  %v1124_v36 = vsel %vm1062_vm3, %v1121_v44, %v1123_v33  ;;  %v1128_v44 = vrot.slane %v4120_v43, 2  ;;  %v4125_v43 = vld [vmem:[#allocation10_spill] sm:$0xff] }
 0x119   : > { %2595 = vmatmul.msk.bf16.gmra.mxu3 %vm781_vm1, %v3536_v38  ;;  %v1267_v57 = vpop.f32.mrf.mxu2  ;;  %v3556_v11 = vpack.c.bf16 %v1124_v36, %v1122_v2 }
 0x11a   : > { %v1338_v12 = vadd.f32 %v1267_v57, %v998_v21 }
 0x11c   : > { %v1400_v26 = vpop.f32.mrf.mxu3 }
 0x11d   : > { %v1471_v3 = vadd.f32 %v1400_v26, %v1338_v12  ;;  %v1125_v26 = vrot.slane %v3027_v32, 2 }
 0x11e   : > { %v1542_v54 = vpop.f32.mrf.mxu0 }
 0x11f   : > { %v1002_v46 = vpop.f32.mrf.mxu1  ;;  %v3550_v41 = vadd.f32 %v1542_v54, %v1471_v3  ;;  %v1126_v3 = vrot.slane %v4119_v17, 2 }
 0x120   : > { %v1003_v12 = vadd.f32 %v1002_v46, %v3312_v51 }
 0x121   : > { %2615 = vmatmul.msk.bf16.gmra.mxu0 %vm781_vm1, %v2984_v27  ;;  %v1269_v21 = vpop.f32.mrf.mxu2 }
 0x122   : > { %2556 = vmatmul.msk.bf16.gmra.mxu1 %vm781_vm1, %v3536_v38  ;;  %v1339_v10 = vadd.f32 %v1269_v21, %v1000_v47 }
 0x124   : > { %v1402_v1 = vpop.f32.mrf.mxu3 }
 0x125   : > { %v1472_v35 = vadd.f32 %v1402_v1, %v1339_v10  ;;  %v1127_v10 = vsel %vm1062_vm3, %v1125_v26, %v1126_v3  ;;  %v1129_v1 = vsel %vm1062_vm3, %v1126_v3, %v1128_v44 }
 0x126   : > { %v1544_v45 = vpop.f32.mrf.mxu0  ;;  %2576 = vmatmul.msk.bf16.gmra.mxu2 %vm781_vm1, %v3556_v11  ;;  %v3581_v17 = vpack.c.bf16 %v1129_v1, %v1127_v10 }
 0x127   : > { %v1004_v61 = vpop.f32.mrf.mxu1  ;;  %v3564_v57 = vadd.f32 %v1544_v45, %v1472_v35  ;;  %v4122_v35 = vld [vmem:[#allocation7_spill] sm:$0xff] }
 0x128   : > { %v1005_v46 = vadd.f32 %v1004_v61, %v3330_v56  ;;  %4123 = vst [vmem:[#allocation6_spill] sm:$0xff] %v3581_v17 }
 0x129   : > { %2596 = vmatmul.msk.bf16.gmra.mxu3 %vm781_vm1, %v3560_v18  ;;  %v1272_v47 = vpop.f32.mrf.mxu2 }
 0x12a   : > { %v1340_v33 = vadd.f32 %v1272_v47, %v1003_v12 }
 0x12c   : > { %v1405_v54 = vpop.f32.mrf.mxu3 }
 0x12d   : > { %v1473_v2 = vadd.f32 %v1405_v54, %v1340_v33  ;;  %v4124_v33 = vld [vmem:[#allocation9_spill] sm:$0xff] }
 0x12e   : > { %v1547_v36 = vpop.f32.mrf.mxu0  ;;  %v3585_v44 = vpack.c.bf16 %v4125_v43, %v4124_v33  ;;  %v1130_v1 = vrot.slane %v4124_v33, 2 }
 0x12f   : > { %v1007_v21 = vpop.f32.mrf.mxu1  ;;  %v3574_v51 = vadd.f32 %v1547_v36, %v1473_v2  ;;  %v4128_v36 = vld [vmem:[#allocation11_spill] sm:$0xff] }
 0x130   : > { %4126 = vst [vmem:[#allocation7_spill] sm:$0xff] %v3585_v44  ;;  %v1008_v3 = vadd.f32 %v1007_v21, %v3345_v22  ;;  %v1133_v10 = vrot.slane %v4128_v36, 2  ;;  %v2806_v36 = vld [vmem:[%s4035_s1] ss:$0 sm:$0xff] }
 0x131   : > { %4121 = vst [vmem:[#allocation5_spill] sm:$0xff] %v3574_v51  ;;  %2616 = vmatmul.msk.bf16.gmra.mxu0 %vm781_vm1, %v4122_v35  ;;  %v1274_v45 = vpop.f32.mrf.mxu2 }
 0x132   : > { %2557 = vmatmul.msk.bf16.gmra.mxu1 %vm781_vm1, %v3560_v18  ;;  %v1341_v32 = vadd.f32 %v1274_v45, %v1005_v46  ;;  %v1131_v46 = vrot.slane %v4125_v43, 2  ;;  %v2790_v45 = vld [vmem:[%s2885_s12 + $0x78] sm:$0xff]   ;;  %s265_s12 = scalar_lea.vmem %s4039_s5, %s4173_s22 }
 0x134   : > { %v1407_v12 = vpop.f32.mrf.mxu3  ;;  %v1132_v22 = vsel %vm1062_vm3, %v1130_v1, %v1131_v46  ;;  %v1134_v21 = vsel %vm1062_vm3, %v1131_v46, %v1133_v10 }
 0x135   : > { %v1474_v47 = vadd.f32 %v1407_v12, %v1341_v32 }
 0x136   : > { %v1549_v26 = vpop.f32.mrf.mxu0  ;;  %2577 = vmatmul.msk.bf16.gmra.mxu2 %vm781_vm1, %v3581_v17 }
 0x137   : > { %v1009_v56 = vpop.f32.mrf.mxu1  ;;  %v3589_v61 = vadd.f32 %v1549_v26, %v1474_v47  ;;  %v2774_v47 = vunpack.c.l.bf16 %v2790_v45  ;;  %v2775_v26 = vunpack.c.h.bf16 %v2790_v45 }
 0x139   : > { %4127 = vst [vmem:[#allocation9_spill] sm:$0xff] %v3589_v61  ;;  %2597 = vmatmul.msk.bf16.gmra.mxu3 %vm781_vm1, %v3585_v44  ;;  %v1277_v54 = vpop.f32.mrf.mxu2  ;;  %v368_v1 = vmul.f32 %v2806_v36, %v2774_v47  ;;  %v369_v10 = vmul.f32 %v2806_v36, %v2775_v26 }
 0x13a   : > { %v1342_v2 = vadd.f32 %v1277_v54, %v1008_v3  ;;  %v1010_v3 = vadd.f32 %v1009_v56, %v3361_v25  ;;  %v4130_v54 = vld [vmem:[#allocation12_spill] sm:$0xff]  ;;  %v4132_v25 = vld [vmem:[#allocation14_spill] sm:$0xff] }
 0x13b   : > { %v3614_v56 = vpack.c.bf16 %v4132_v25, %v3211_v49 }
 0x13c   : > { %v1410_v32 = vpop.f32.mrf.mxu3 }
 0x13d   : > { %v1475_v12 = vadd.f32 %v1410_v32, %v1342_v2  ;;  %v3607_v2 = vpack.c.bf16 %v1134_v21, %v1132_v22 }
 0x13e   : > { %v1552_v51 = vpop.f32.mrf.mxu0 }
 0x13f   : > { %v1012_v17 = vpop.f32.mrf.mxu1  ;;  %v3600_v61 = vadd.f32 %v1552_v51, %v1475_v12  ;;  %4131 = vst [vmem:[#allocation11_spill] sm:$0xff] %v3607_v2  ;;  %v2807_v12 = vld [vmem:[%s4036_s2] ss:$0 sm:$0xff] }
 0x140   : > { %v404_v22 = vadd.f32 %v2807_v12, %v368_v1  ;;  %v405_v21 = vadd.f32 %v2807_v12, %v369_v10  ;;  %v1013_v47 = vadd.f32 %v1012_v17, %v3376_v63 }
 0x141   : > { %4129 = vst [vmem:[#allocation10_spill] sm:$0xff] %v3600_v61  ;;  %2617 = vmatmul.msk.bf16.gmra.mxu0 %vm781_vm1, %v4130_v54  ;;  %v1279_v33 = vpop.f32.mrf.mxu2  ;;  %v1136_v54 = vrot.slane %v4132_v25, 2 }
 0x142   : > { %2558 = vmatmul.msk.bf16.gmra.mxu1 %vm781_vm1, %v3585_v44  ;;  %v1343_v43 = vadd.f32 %v1279_v33, %v1010_v3  ;;  %v437_v36 = vmax.f32 %v405_v21, 0.0 }
 0x144   : > { %v1412_v51 = vpop.f32.mrf.mxu3  ;;  %v517_v12 = vrot.slane %v437_v36, 7 }
 0x145   : > { %v1476_v46 = vadd.f32 %v1412_v51, %v1343_v43  ;;  %v436_v43 = vmax.f32 %v404_v22, 0.0  ;;  %v4134_v51 = vld [vmem:[#allocation15_spill] sm:$0xff] }
 0x146   : > { %v1554_v45 = vpop.f32.mrf.mxu0  ;;  %2578 = vmatmul.msk.bf16.gmra.mxu2 %vm781_vm1, %v3607_v2  ;;  %v1138_v61 = vrot.slane %v4134_v51, 2  ;;  %v1135_v2 = vrot.slane %v3211_v49, 2 }
 0x147   : > { %v1014_v32 = vpop.f32.mrf.mxu1  ;;  %v3621_v3 = vadd.f32 %v1554_v45, %v1476_v46  ;;  %v516_v45 = vrot.slane %v436_v43, 7 }
 0x148   : > { %v1137_v63 = vsel %vm1062_vm3, %v1135_v2, %v1136_v54  ;;  %v1139_v17 = vsel %vm1062_vm3, %v1136_v54, %v1138_v61  ;;  %v1015_v22 = vadd.f32 %v1014_v32, %v3396_v28  ;;  %v3647_v61 = vsel %vm470_vm0, %v517_v12, 0.0 }
 0x149   : > { %4133 = vst [vmem:[#allocation14_spill] sm:$0xff] %v3621_v3  ;;  %2598 = vmatmul.msk.bf16.gmra.mxu3 %vm781_vm1, %v3614_v56  ;;  %v1282_v26 = vpop.f32.mrf.mxu2  ;;  %v3638_v25 = vpack.c.bf16 %v1139_v17, %v1137_v63  ;;  %v3641_v21 = vsel %vm470_vm0, %v516_v45, %v517_v12  ;;  %v3644_v2 = vsel %vm470_vm0, 0.0, %v516_v45  ;;  %v1502_v43 = vrot.slane %v3647_v61, 1 }
 0x14a   : > { %v1344_v33 = vadd.f32 %v1282_v26, %v1013_v47  ;;  %v3651_v32 = vpack.c.bf16 %v3641_v21, %v3644_v2  ;;  %v1499_v26 = vrot.slane %v3644_v2, 1 }
 0x14c   : > { %v1415_v44 = vpop.f32.mrf.mxu3 }
 0x14d   : > { %v1477_v1 = vadd.f32 %v1415_v44, %v1344_v33  ;;  %v1500_v33 = vrot.slane %v3641_v21, 1 }
 0x14e   : > { %v1557_v10 = vpop.f32.mrf.mxu0 }
 0x14f   : > { %v1017_v46 = vpop.f32.mrf.mxu1  ;;  %v3631_v3 = vadd.f32 %v1557_v10, %v1477_v1  ;;  %v1501_v45 = vsel %vm648_vm2, %v1499_v26, %v1500_v33  ;;  %v1503_v12 = vsel %vm648_vm2, %v1500_v33, %v1502_v43 }
 0x150   : > { %v1018_v1 = vadd.f32 %v1017_v46, %v3411_v59 }
 0x151   : > { %4135 = vst [vmem:[#allocation15_spill] sm:$0xff] %v3631_v3  ;;  %2618 = vmatmul.msk.bf16.gmra.mxu0 %vm781_vm1, %v3236_v52  ;;  %v1284_v49 = vpop.f32.mrf.mxu2 }
 0x152   : > { %2559 = vmatmul.msk.bf16.gmra.mxu1 %vm781_vm1, %v3614_v56  ;;  %v1345_v44 = vadd.f32 %v1284_v49, %v1015_v22  ;;  %v3665_v22 = vpack.c.bf16 %v1503_v12, %v1501_v45 }
 0x154   : > { %v1417_v28 = vpop.f32.mrf.mxu3 }
 0x155   : > { %v1478_v54 = vadd.f32 %v1417_v28, %v1345_v44 }
 0x156   : > { %v1559_v47 = vpop.f32.mrf.mxu0  ;;  %2579 = vmatmul.msk.bf16.gmra.mxu2 %vm781_vm1, %v3638_v25 }
 0x157   : > { %v1019_v36 = vpop.f32.mrf.mxu1  ;;  %v3658_v51 = vadd.f32 %v1559_v47, %v1478_v54 }
 0x158   : > { %v1020_v54 = vadd.f32 %v1019_v36, %v3433_v7 }
 0x159   : > { %2599 = vmatmul.msk.bf16.gmra.mxu3 %vm781_vm1, %v3651_v32  ;;  %v1287_v10 = vpop.f32.mrf.mxu2 }
 0x15a   : > { %v1346_v63 = vadd.f32 %v1287_v10, %v1018_v1 }
 0x15c   : > { %v1420_v17 = vpop.f32.mrf.mxu3 }
 0x15d   : > { %v1479_v49 = vadd.f32 %v1420_v17, %v1346_v63 }
 0x15e   : > { %v1562_v44 = vpop.f32.mrf.mxu0 }
 0x15f   : > { %v1022_v28 = vpop.f32.mrf.mxu1  ;;  %v3667_v3 = vadd.f32 %v1562_v44, %v1479_v49 }
 0x160   : > { %v1023_v10 = vadd.f32 %v1022_v28, %v3328_v55 }
 0x161   : > { %2619 = vmatmul.msk.bf16.gmra.mxu0 %vm781_vm1, %v3665_v22  ;;  %v1289_v59 = vpop.f32.mrf.mxu2 }
 0x162   : > { %2624 = vmatmul.msk.bf16.vlgmr.msra.gmra.mxu1 %vm781_vm1, %v3266_v8  ;;  %v1347_v46 = vadd.f32 %v1289_v59, %v1020_v54 }
 0x164   : > { %v1422_v47 = vpop.f32.mrf.mxu3 }
 0x165   : > { %v1480_v26 = vadd.f32 %v1422_v47, %v1347_v46 }
 0x166   : > { %v1564_v33 = vpop.f32.mrf.mxu0  ;;  %2644 = vmatmul.msk.bf16.vlgmr.msra.gmra.mxu2 %vm781_vm1, %v3270_v0 }
 0x167   : > { %v1024_v43 = vpop.f32.mrf.mxu1  ;;  %v3676_v1 = vadd.f32 %v1564_v33, %v1480_v26 }
 0x168   : > { %v1025_v49 = vadd.f32 %v1024_v43, %v3343_v4 }
 0x169   : > { %2663 = vmatmul.msk.bf16.vlgmr.msra.gmra.mxu3 %vm781_vm1, %v3164_v39  ;;  %v1292_v7 = vpop.f32.mrf.mxu2 }
 0x16a   : > { %v1348_v36 = vadd.f32 %v1292_v7, %v1023_v10 }
 0x16c   : > { %v1425_v45 = vpop.f32.mrf.mxu3 }
 0x16d   : > { %v1481_v12 = vadd.f32 %v1425_v45, %v1348_v36 }
 0x16e   : > { %v1567_v8 = vpop.f32.mrf.mxu0 }
 0x16f   : > { %v1027_v63 = vpop.f32.mrf.mxu1  ;;  %v3681_v17 = vadd.f32 %v1567_v8, %v1481_v12 }
 0x170   : > { %v1028_v46 = vadd.f32 %v1027_v63, %v3367_v37 }
 0x171   : > { %2683 = vmatmul.msk.bf16.vlgmr.msra.gmra.mxu0 %vm781_vm1, %v3285_v13  ;;  %v1294_v0 = vpop.f32.mrf.mxu2 }
 0x172   : > { %2625 = vmatmul.msk.bf16.gmra.mxu1 %vm781_vm1, %v3285_v13  ;;  %v1349_v55 = vadd.f32 %v1294_v0, %v1025_v49 }
 0x174   : > { %v1427_v44 = vpop.f32.mrf.mxu3 }
 0x175   : > { %v1482_v39 = vadd.f32 %v1427_v44, %v1349_v55 }
 0x176   : > { %v1569_v28 = vpop.f32.mrf.mxu0  ;;  %2645 = vmatmul.msk.bf16.gmra.mxu2 %vm781_vm1, %v3287_v48 }
 0x177   : > { %v1029_v54 = vpop.f32.mrf.mxu1  ;;  %v3690_v59 = vadd.f32 %v1569_v28, %v1482_v39  ;;  %v4136_v28 = vld [vmem:[#allocation28_spill] sm:$0xff] }
 0x178   : > { %v1030_v7 = vadd.f32 %v1029_v54, %v3378_v5 }
 0x179   : > { %2664 = vmatmul.msk.bf16.gmra.mxu3 %vm781_vm1, %v3246_v15  ;;  %v1297_v4 = vpop.f32.mrf.mxu2 }
 0x17a   : > { %v1350_v47 = vadd.f32 %v1297_v4, %v1028_v46  ;;  %v4137_v46 = vld [vmem:[#allocation17_spill] sm:$0xff] }
 0x17c   : > { %v1430_v26 = vpop.f32.mrf.mxu3 }
 0x17d   : > { %v1483_v33 = vadd.f32 %v1430_v26, %v1350_v47  ;;  %v4138_v26 = vld [vmem:[#allocation18_spill] sm:$0xff] }
 0x17e   : > { %v1572_v13 = vpop.f32.mrf.mxu0 }
 0x17f   : > { %v1032_v43 = vpop.f32.mrf.mxu1  ;;  %v3695_v10 = vadd.f32 %v1572_v13, %v1483_v33 }
 0x180   : > { %v1033_v63 = vadd.f32 %v1032_v43, %v3400_v31  ;;  %v4139_v43 = vld [vmem:[#allocation32_spill] sm:$0xff] }
 0x181   : > { %2684 = vmatmul.msk.bf16.gmra.mxu0 %vm781_vm1, %v3299_v58  ;;  %v1299_v48 = vpop.f32.mrf.mxu2 }
 0x182   : > { %2626 = vmatmul.msk.bf16.gmra.mxu1 %vm781_vm1, %v3299_v58  ;;  %v1351_v37 = vadd.f32 %v1299_v48, %v1030_v7  ;;  %v4140_v48 = vld [vmem:[#allocation4_spill] sm:$0xff] }
 0x184   : > { %v1432_v36 = vpop.f32.mrf.mxu3 }
 0x185   : > { %v1484_v15 = vadd.f32 %v1432_v36, %v1351_v37 }
 0x186   : > { %v1574_v45 = vpop.f32.mrf.mxu0  ;;  %2646 = vmatmul.msk.bf16.gmra.mxu2 %vm781_vm1, %v3303_v60 }
 0x187   : > { %v1034_v12 = vpop.f32.mrf.mxu1  ;;  %v3704_v8 = vadd.f32 %v1574_v45, %v1484_v15 }
 0x188   : > { %v1035_v54 = vadd.f32 %v1034_v12, %v4136_v28 }
 0x189   : > { %2665 = vmatmul.msk.bf16.gmra.mxu3 %vm781_vm1, %v2950_v6  ;;  %v1302_v5 = vpop.f32.mrf.mxu2 }
 0x18a   : > { %v1352_v49 = vadd.f32 %v1302_v5, %v1033_v63 }
 0x18c   : > { %v1435_v0 = vpop.f32.mrf.mxu3 }
 0x18d   : > { %v1485_v55 = vadd.f32 %v1435_v0, %v1352_v49  ;;  %v4141_v49 = vld [vmem:[#allocation34_spill] sm:$0xff] }
 0x18e   : > { %v1577_v58 = vpop.f32.mrf.mxu0 }
 0x18f   : > { %v1037_v44 = vpop.f32.mrf.mxu1  ;;  %v3709_v39 = vadd.f32 %v1577_v58, %v1485_v55  ;;  %v4142_v55 = vld [vmem:[#allocation21_spill] sm:$0xff] }
 0x190   : > { %v1038_v7 = vadd.f32 %v1037_v44, %v4139_v43 }
 0x191   : > { %2685 = vmatmul.msk.bf16.gmra.mxu0 %vm781_vm1, %v4137_v46  ;;  %v1304_v60 = vpop.f32.mrf.mxu2 }
 0x192   : > { %2627 = vmatmul.msk.bf16.gmra.mxu1 %vm781_vm1, %v4137_v46  ;;  %v1353_v31 = vadd.f32 %v1304_v60, %v1035_v54  ;;  %v4143_v60 = vld [vmem:[#allocation22_spill] sm:$0xff] }
 0x194   : > { %v1437_v4 = vpop.f32.mrf.mxu3 }
 0x195   : > { %v1486_v6 = vadd.f32 %v1437_v4, %v1353_v31 }
 0x196   : > { %v1579_v47 = vpop.f32.mrf.mxu0  ;;  %2647 = vmatmul.msk.bf16.gmra.mxu2 %vm781_vm1, %v4138_v26  ;;  %v4145_v26 = vld [vmem:[#allocation8_spill] sm:$0xff] }
 0x197   : > { %v1039_v33 = vpop.f32.mrf.mxu1  ;;  %v3718_v13 = vadd.f32 %v1579_v47, %v1486_v6  ;;  %v4144_v6 = vld [vmem:[#allocation19_spill] sm:$0xff] }
 0x198   : > { %v1040_v0 = vadd.f32 %v1039_v33, %v4141_v49  ;;  %v4147_v49 = vld [vmem:[#allocation25_spill] sm:$0xff] }
 0x199   : > { %2666 = vmatmul.msk.bf16.gmra.mxu3 %vm781_vm1, %v4140_v48  ;;  %v1307_v37 = vpop.f32.mrf.mxu2 }
 0x19a   : > { %v1354_v36 = vadd.f32 %v1307_v37, %v1038_v7 }
 0x19c   : > { %v1440_v15 = vpop.f32.mrf.mxu3 }
 0x19d   : > { %v1487_v45 = vadd.f32 %v1440_v15, %v1354_v36 }
 0x19e   : > { %v1582_v12 = vpop.f32.mrf.mxu0 }
 0x19f   : > { %v1042_v63 = vpop.f32.mrf.mxu1  ;;  %v3723_v5 = vadd.f32 %v1582_v12, %v1487_v45  ;;  %v4146_v45 = vld [vmem:[#allocation20_spill] sm:$0xff] }
 0x1a0   : > { %v1043_v47 = vadd.f32 %v1042_v63, %v4144_v6 }
 0x1a1   : > { %2686 = vmatmul.msk.bf16.gmra.mxu0 %vm781_vm1, %v4142_v55  ;;  %v1309_v58 = vpop.f32.mrf.mxu2 }
 0x1a2   : > { %2628 = vmatmul.msk.bf16.gmra.mxu1 %vm781_vm1, %v4142_v55  ;;  %v1355_v44 = vadd.f32 %v1309_v58, %v1040_v0 }
 0x1a4   : > { %v1442_v28 = vpop.f32.mrf.mxu3 }
 0x1a5   : > { %v1488_v54 = vadd.f32 %v1442_v28, %v1355_v44  ;;  %v4148_v28 = vld [vmem:[#allocation26_spill] sm:$0xff] }
 0x1a6   : > { %v1584_v46 = vpop.f32.mrf.mxu0  ;;  %2648 = vmatmul.msk.bf16.gmra.mxu2 %vm781_vm1, %v4143_v60  ;;  %v4149_v60 = vld [vmem:[#allocation23_spill] sm:$0xff] }
 0x1a7   : > { %v1044_v31 = vpop.f32.mrf.mxu1  ;;  %v3732_v4 = vadd.f32 %v1584_v46, %v1488_v54 }
 0x1a8   : > { %v1045_v12 = vadd.f32 %v1044_v31, %v4146_v45  ;;  %v4150_v31 = vld [vmem:[#allocation13_spill] sm:$0xff]  ;;  %v4151_v45 = vld [vmem:[#allocation24_spill] sm:$0xff] }
 0x1a9   : > { %2667 = vmatmul.msk.bf16.gmra.mxu3 %vm781_vm1, %v4145_v26  ;;  %v1312_v33 = vpop.f32.mrf.mxu2 }
 0x1aa   : > { %v1356_v43 = vadd.f32 %v1312_v33, %v1043_v47 }
 0x1ac   : > { %v1445_v7 = vpop.f32.mrf.mxu3 }
 0x1ad   : > { %v1489_v48 = vadd.f32 %v1445_v7, %v1356_v43 }
 0x1ae   : > { %v1587_v37 = vpop.f32.mrf.mxu0 }
 0x1af   : > { %v1047_v36 = vpop.f32.mrf.mxu1  ;;  %v3737_v15 = vadd.f32 %v1587_v37, %v1489_v48 }
 0x1b0   : > { %v1048_v6 = vadd.f32 %v1047_v36, %v4149_v60 }
 0x1b1   : > { %2687 = vmatmul.msk.bf16.gmra.mxu0 %vm781_vm1, %v4147_v49  ;;  %v1314_v0 = vpop.f32.mrf.mxu2 }
 0x1b2   : > { %2629 = vmatmul.msk.bf16.gmra.mxu1 %vm781_vm1, %v4147_v49  ;;  %v1357_v63 = vadd.f32 %v1314_v0, %v1045_v12  ;;  %v4152_v49 = vld [vmem:[#allocation30_spill] sm:$0xff] }
 0x1b4   : > { %v1447_v55 = vpop.f32.mrf.mxu3 }
 0x1b5   : > { %v1490_v58 = vadd.f32 %v1447_v55, %v1357_v63 }
 0x1b6   : > { %v1589_v44 = vpop.f32.mrf.mxu0  ;;  %2649 = vmatmul.msk.bf16.gmra.mxu2 %vm781_vm1, %v4148_v28 }
 0x1b7   : > { %v1049_v54 = vpop.f32.mrf.mxu1  ;;  %v3746_v46 = vadd.f32 %v1589_v44, %v1490_v58  ;;  %v4153_v44 = vld [vmem:[#allocation31_spill] sm:$0xff] }
 0x1b8   : > { %v1050_v12 = vadd.f32 %v1049_v54, %v4151_v45  ;;  %v4155_v54 = vld [vmem:[#allocation3_spill] sm:$0xff] }
 0x1b9   : > { %2668 = vmatmul.msk.bf16.gmra.mxu3 %vm781_vm1, %v4150_v31  ;;  %v1317_v47 = vpop.f32.mrf.mxu2 }
 0x1ba   : > { %v1358_v26 = vadd.f32 %v1317_v47, %v1048_v6  ;;  %v4154_v6 = vld [vmem:[#allocation27_spill] sm:$0xff] }
 0x1bc   : > { %v1450_v33 = vpop.f32.mrf.mxu3 }
 0x1bd   : > { %v1491_v43 = vadd.f32 %v1450_v33, %v1358_v26 }
 0x1be   : > { %v1592_v7 = vpop.f32.mrf.mxu0 }
 0x1bf   : > { %v1052_v48 = vpop.f32.mrf.mxu1  ;;  %v3751_v37 = vadd.f32 %v1592_v7, %v1491_v43 }
 0x1c0   : > { %v1053_v31 = vadd.f32 %v1052_v48, %v4154_v6 }
 0x1c1   : > { %2688 = vmatmul.msk.bf16.gmra.mxu0 %vm781_vm1, %v4152_v49  ;;  %v1319_v0 = vpop.f32.mrf.mxu2 }
 0x1c2   : > { %2630 = vmatmul.msk.bf16.gmra.mxu1 %vm781_vm1, %v4152_v49  ;;  %v1359_v36 = vadd.f32 %v1319_v0, %v1050_v12  ;;  %v4156_v49 = vld [vmem:[#allocation29_spill] sm:$0xff] }
 0x1c4   : > { %v1452_v63 = vpop.f32.mrf.mxu3 }
 0x1c5   : > { %v1492_v55 = vadd.f32 %v1452_v63, %v1359_v36  ;;  %v4157_v36 = vld [vmem:[#allocation35_spill] sm:$0xff] }
 0x1c6   : > { %v1594_v58 = vpop.f32.mrf.mxu0  ;;  %2650 = vmatmul.msk.bf16.gmra.mxu2 %vm781_vm1, %v4153_v44 }
 0x1c7   : > { %v1054_v28 = vpop.f32.mrf.mxu1  ;;  %v3760_v60 = vadd.f32 %v1594_v58, %v1492_v55 }
 0x1c8   : > { %v1055_v0 = vadd.f32 %v1054_v28, %v4156_v49 }
 0x1c9   : > { %2669 = vmatmul.msk.bf16.gmra.mxu3 %vm781_vm1, %v4155_v54  ;;  %v1322_v47 = vpop.f32.mrf.mxu2  ;;  %v4158_v54 = vld [vmem:[#allocation33_spill] sm:$0xff] }
 0x1ca   : > { %v1360_v26 = vadd.f32 %v1322_v47, %v1053_v31 }
 0x1cc   : > { %v1455_v33 = vpop.f32.mrf.mxu3 }
 0x1cd   : > { %v1493_v43 = vadd.f32 %v1455_v33, %v1360_v26 }
 0x1ce   : > { %v1597_v7 = vpop.f32.mrf.mxu0 }
 0x1cf   : > { %v1057_v45 = vpop.f32.mrf.mxu1  ;;  %v3765_v12 = vadd.f32 %v1597_v7, %v1493_v43 }
 0x1d0   : > { %v1058_v47 = vadd.f32 %v1057_v45, %v4158_v54 }
 0x1d1   : > { %2689 = vmatmul.msk.bf16.gmra.mxu0 %vm781_vm1, %v4157_v36  ;;  %v1324_v63 = vpop.f32.mrf.mxu2 }
 0x1d2   : > { %2631 = vmatmul.msk.bf16.gmra.mxu1 %vm781_vm1, %v4157_v36  ;;  %v1361_v48 = vadd.f32 %v1324_v63, %v1055_v0  ;;  %v4159_v36 = vld [vmem:[#allocation36_spill] sm:$0xff] }
 0x1d4   : > { %v1457_v55 = vpop.f32.mrf.mxu3 }
 0x1d5   : > { %v1494_v58 = vadd.f32 %v1457_v55, %v1361_v48 }
 0x1d6   : > { %v1599_v44 = vpop.f32.mrf.mxu0  ;;  %2651 = vmatmul.msk.bf16.gmra.mxu2 %vm781_vm1, %v3460_v62 }
 0x1d7   : > { %v1059_v6 = vpop.f32.mrf.mxu1  ;;  %v3774_v31 = vadd.f32 %v1599_v44, %v1494_v58 }
 0x1d8   : > { %v1060_v63 = vadd.f32 %v1059_v6, %v4159_v36 }
 0x1d9   : > { %2670 = vmatmul.msk.bf16.gmra.mxu3 %vm781_vm1, %v3043_v42  ;;  %v1327_v28 = vpop.f32.mrf.mxu2 }
 0x1da   : > { %v1362_v26 = vadd.f32 %v1327_v28, %v1058_v47 }
 0x1dc   : > { %v1460_v33 = vpop.f32.mrf.mxu3 }
 0x1dd   : > { %v1495_v43 = vadd.f32 %v1460_v33, %v1362_v26 }
 0x1de   : > { %v1602_v7 = vpop.f32.mrf.mxu0 }
 0x1df   : > { %v1667_v49 = vpop.f32.mrf.mxu1  ;;  %v3779_v0 = vadd.f32 %v1602_v7, %v1495_v43 }
 0x1e0   : > { %v1747_v6 = vadd.f32 %v1667_v49, %v3476_v23 }
 0x1e1   : > { %2690 = vmatmul.msk.bf16.gmra.mxu0 %vm781_vm1, %v3482_v24  ;;  %v1329_v62 = vpop.f32.mrf.mxu2 }
 0x1e2   : > { %2632 = vmatmul.msk.bf16.gmra.mxu1 %vm781_vm1, %v3482_v24  ;;  %v1363_v45 = vadd.f32 %v1329_v62, %v1060_v63 }
 0x1e4   : > { %v1462_v42 = vpop.f32.mrf.mxu3 }
 0x1e5   : > { %v1496_v48 = vadd.f32 %v1462_v42, %v1363_v45 }
 0x1e6   : > { %v1604_v55 = vpop.f32.mrf.mxu0  ;;  %2652 = vmatmul.msk.bf16.gmra.mxu2 %vm781_vm1, %v3486_v53 }
 0x1e7   : > { %v1669_v58 = vpop.f32.mrf.mxu1  ;;  %v3788_v44 = vadd.f32 %v1604_v55, %v1496_v48 }
 0x1e8   : > { %v1748_v23 = vadd.f32 %v1669_v58, %v3491_v34 }
 0x1e9   : > { %2671 = vmatmul.msk.bf16.gmra.mxu3 %vm781_vm1, %v3128_v50  ;;  %v1796_v54 = vpop.f32.mrf.mxu2 }
 0x1ea   : > { %v1876_v47 = vadd.f32 %v1796_v54, %v1747_v6 }
 0x1ec   : > { %v1925_v28 = vpop.f32.mrf.mxu3 }
 0x1ed   : > { %v2005_v24 = vadd.f32 %v1925_v28, %v1876_v47 }
 0x1ee   : > { %v2054_v26 = vpop.f32.mrf.mxu0 }
 0x1ef   : > { %v1672_v33 = vpop.f32.mrf.mxu1  ;;  %v2134_v43 = vadd.f32 %v2054_v26, %v2005_v24 }
 0x1f0   : > { %v1749_v42 = vadd.f32 %v1672_v33, %v3501_v30 }
 0x1f1   : > { %2691 = vmatmul.msk.bf16.gmra.mxu0 %vm781_vm1, %v3507_v16  ;;  %v2166_v50 = vpack.c.bf16 %v2134_v43, %v2134_v43  ;;  %v1798_v53 = vpop.f32.mrf.mxu2  ;;  %v2302_v62 = vmul.f32 %v2134_v43, %v2134_v43  ;;  %v2232_v48 = vsel %vm2231_vm5, %v2134_v43, 0.0 }
 0x1f2   : > { %2633 = vmatmul.msk.bf16.gmra.mxu1 %vm781_vm1, %v3507_v16  ;;  %v1877_v7 = vadd.f32 %v1798_v53, %v1748_v23 }
 0x1f3   : > { %2199 = vst.msk [vmem:[%s3798_s10] sm:$0xf] %vm2198_vm4, %v2166_v50  ;;  %v2334_v28 = vsel %vm2231_vm5, %v2302_v62, 0.0 }
 0x1f4   : > { %v1927_v49 = vpop.f32.mrf.mxu3 }
 0x1f5   : > { %v2006_v36 = vadd.f32 %v1927_v49, %v1877_v7 }
 0x1f6   : > { %v2056_v63 = vpop.f32.mrf.mxu0  ;;  %2653 = vmatmul.msk.bf16.gmra.mxu2 %vm781_vm1, %v3511_v14 }
 0x1f7   : > { %v1674_v34 = vpop.f32.mrf.mxu1  ;;  %v2135_v45 = vadd.f32 %v2056_v63, %v2006_v36 }
 0x1f8   : > { %v1750_v50 = vadd.f32 %v1674_v34, %v3516_v19 }
 0x1f9   : > { %v2167_v55 = vpack.c.bf16 %v2135_v45, %v2135_v45  ;;  %v2233_v16 = vsel %vm2231_vm5, %v2135_v45, 0.0  ;;  %v2303_v58 = vmul.f32 %v2135_v45, %v2135_v45  ;;  %2672 = vmatmul.msk.bf16.gmra.mxu3 %vm781_vm1, %v3226_v29  ;;  %v1801_v6 = vpop.f32.mrf.mxu2 }
 0x1fa   : > { %v2234_v54 = vadd.f32 %v2233_v16, %v2232_v48  ;;  %v1878_v47 = vadd.f32 %v1801_v6, %v1749_v42 }
 0x1fb   : > { %2200 = vst.msk [vmem:[%s3798_s10 + $0x4] sm:$0xf] %vm2198_vm4, %v2167_v55  ;;  %v2335_v14 = vsel %vm2231_vm5, %v2303_v58, 0.0 }
 0x1fc   : > { %v2336_v30 = vadd.f32 %v2335_v14, %v2334_v28  ;;  %v1930_v24 = vpop.f32.mrf.mxu3 }
 0x1fd   : > { %v2007_v26 = vadd.f32 %v1930_v24, %v1878_v47 }
 0x1fe   : > { %v2059_v33 = vpop.f32.mrf.mxu0 }
 0x1ff   : > { %v1677_v43 = vpop.f32.mrf.mxu1  ;;  %v2136_v23 = vadd.f32 %v2059_v33, %v2007_v26 }
 0x200   : > { %v1751_v16 = vadd.f32 %v1677_v43, %v3526_v20 }
 0x201   : > { %2692 = vmatmul.msk.bf16.gmra.mxu0 %vm781_vm1, %v3532_v40  ;;  %v2168_v29 = vpack.c.bf16 %v2136_v23, %v2136_v23  ;;  %v2235_v53 = vsel %vm2231_vm5, %v2136_v23, 0.0  ;;  %v2304_v7 = vmul.f32 %v2136_v23, %v2136_v23  ;;  %v1803_v49 = vpop.f32.mrf.mxu2 }
 0x202   : > { %2634 = vmatmul.msk.bf16.gmra.mxu1 %vm781_vm1, %v3532_v40  ;;  %v2236_v36 = vadd.f32 %v2235_v53, %v2234_v54  ;;  %v1879_v63 = vadd.f32 %v1803_v49, %v1750_v50 }
 0x203   : > { %2201 = vst.msk [vmem:[%s3798_s10 + $0x8] sm:$0xf] %vm2198_vm4, %v2168_v29  ;;  %v2337_v62 = vsel %vm2231_vm5, %v2304_v7, 0.0 }
 0x204   : > { %v2338_v45 = vadd.f32 %v2337_v62, %v2336_v30  ;;  %v1932_v19 = vpop.f32.mrf.mxu3 }
 0x205   : > { %v2008_v34 = vadd.f32 %v1932_v19, %v1879_v63 }
 0x206   : > { %v2061_v42 = vpop.f32.mrf.mxu0  ;;  %2654 = vmatmul.msk.bf16.gmra.mxu2 %vm781_vm1, %v3536_v38 }
 0x207   : > { %v1679_v48 = vpop.f32.mrf.mxu1  ;;  %v2137_v55 = vadd.f32 %v2061_v42, %v2008_v34 }
 0x208   : > { %v1752_v43 = vadd.f32 %v1679_v48, %v3541_v9 }
 0x209   : > { %v2169_v58 = vpack.c.bf16 %v2137_v55, %v2137_v55  ;;  %v2237_v40 = vsel %vm2231_vm5, %v2137_v55, 0.0  ;;  %v2305_v6 = vmul.f32 %v2137_v55, %v2137_v55  ;;  %2673 = vmatmul.msk.bf16.gmra.mxu3 %vm781_vm1, %v2984_v27  ;;  %v1806_v54 = vpop.f32.mrf.mxu2 }
 0x20a   : > { %v2238_v47 = vadd.f32 %v2237_v40, %v2236_v36  ;;  %v1880_v28 = vadd.f32 %v1806_v54, %v1751_v16 }
 0x20b   : > { %2202 = vst.msk [vmem:[%s3798_s10 + $0xc] sm:$0xf] %vm2198_vm4, %v2169_v58  ;;  %v2339_v14 = vsel %vm2231_vm5, %v2305_v6, 0.0 }
 0x20c   : > { %v2340_v38 = vadd.f32 %v2339_v14, %v2338_v45  ;;  %v1935_v30 = vpop.f32.mrf.mxu3 }
 0x20d   : > { %v2009_v24 = vadd.f32 %v1935_v30, %v1880_v28 }
 0x20e   : > { %v2064_v26 = vpop.f32.mrf.mxu0 }
 0x20f   : > { %v1682_v20 = vpop.f32.mrf.mxu1  ;;  %v2138_v33 = vadd.f32 %v2064_v26, %v2009_v24 }
 0x210   : > { %v1753_v34 = vadd.f32 %v1682_v20, %v3550_v41 }
 0x211   : > { %2693 = vmatmul.msk.bf16.gmra.mxu0 %vm781_vm1, %v3556_v11  ;;  %v2170_v27 = vpack.c.bf16 %v2138_v33, %v2138_v33  ;;  %v2239_v23 = vsel %vm2231_vm5, %v2138_v33, 0.0  ;;  %v2306_v50 = vmul.f32 %v2138_v33, %v2138_v33  ;;  %v1808_v29 = vpop.f32.mrf.mxu2 }
 0x212   : > { %2635 = vmatmul.msk.bf16.gmra.mxu1 %vm781_vm1, %v3556_v11  ;;  %v2240_v53 = vadd.f32 %v2239_v23, %v2238_v47  ;;  %v1881_v7 = vadd.f32 %v1808_v29, %v1752_v43  ;;  %v4161_v29 = vld [vmem:[#allocation7_spill] sm:$0xff] }
 0x213   : > { %2203 = vst.msk [vmem:[%s3798_s10 + $0x10] sm:$0xf] %vm2198_vm4, %v2170_v27  ;;  %v2341_v49 = vsel %vm2231_vm5, %v2306_v50, 0.0 }
 0x214   : > { %v2342_v36 = vadd.f32 %v2341_v49, %v2340_v38  ;;  %v1937_v9 = vpop.f32.mrf.mxu3  ;;  %v4160_v38 = vld [vmem:[#allocation6_spill] sm:$0xff]  ;;  %v4162_v49 = vld [vmem:[#allocation5_spill] sm:$0xff] }
 0x215   : > { %v2010_v63 = vadd.f32 %v1937_v9, %v1881_v7 }
 0x216   : > { %v2066_v62 = vpop.f32.mrf.mxu0  ;;  %2655 = vmatmul.msk.bf16.gmra.mxu2 %vm781_vm1, %v3560_v18 }
 0x217   : > { %v1684_v45 = vpop.f32.mrf.mxu1  ;;  %v2139_v19 = vadd.f32 %v2066_v62, %v2010_v63 }
 0x218   : > { %v1754_v14 = vadd.f32 %v1684_v45, %v3564_v57  ;;  %v4163_v45 = vld [vmem:[#allocation12_spill] sm:$0xff] }
 0x219   : > { %v2171_v42 = vpack.c.bf16 %v2139_v19, %v2139_v19  ;;  %v2241_v11 = vsel %vm2231_vm5, %v2139_v19, 0.0  ;;  %v2307_v48 = vmul.f32 %v2139_v19, %v2139_v19  ;;  %2674 = vmatmul.msk.bf16.gmra.mxu3 %vm781_vm1, %v4122_v35  ;;  %v1811_v55 = vpop.f32.mrf.mxu2 }
 0x21a   : > { %v2242_v16 = vadd.f32 %v2241_v11, %v2240_v53  ;;  %v1882_v58 = vadd.f32 %v1811_v55, %v1753_v34  ;;  %v1639_v34 = vrot.slane %v3644_v2, 2 }
 0x21b   : > { %2204 = vst.msk [vmem:[%s3798_s10 + $0x14] sm:$0xf] %vm2198_vm4, %v2171_v42  ;;  %v2343_v40 = vsel %vm2231_vm5, %v2307_v48, 0.0  ;;  %v1640_v42 = vrot.slane %v3641_v21, 2 }
 0x21c   : > { %v2344_v18 = vadd.f32 %v2343_v40, %v2342_v36  ;;  %v1940_v6 = vpop.f32.mrf.mxu3  ;;  %v1642_v40 = vrot.slane %v3647_v61, 2 }
 0x21d   : > { %v2011_v54 = vadd.f32 %v1940_v6, %v1882_v58 }
 0x21e   : > { %v2069_v47 = vpop.f32.mrf.mxu0  ;;  %v1643_v2 = vsel %vm1062_vm3, %v1640_v42, %v1642_v40 }
 0x21f   : > { %v1687_v41 = vpop.f32.mrf.mxu1  ;;  %v2140_v28 = vadd.f32 %v2069_v47, %v2011_v54  ;;  %v1641_v47 = vsel %vm1062_vm3, %v1639_v34, %v1640_v42 }
 0x220   : > { %v1755_v36 = vadd.f32 %v1687_v41, %v4162_v49  ;;  %v3877_v21 = vpack.c.bf16 %v1643_v2, %v1641_v47 }
 0x221   : > { %2694 = vmatmul.msk.bf16.gmra.mxu0 %vm781_vm1, %v4160_v38  ;;  %v2172_v35 = vpack.c.bf16 %v2140_v28, %v2140_v28  ;;  %v2243_v30 = vsel %vm2231_vm5, %v2140_v28, 0.0  ;;  %v2308_v24 = vmul.f32 %v2140_v28, %v2140_v28  ;;  %v1813_v26 = vpop.f32.mrf.mxu2  ;;  %v4164_v28 = vld [vmem:[#allocation9_spill] sm:$0xff] }
 0x222   : > { %2636 = vmatmul.msk.bf16.gmra.mxu1 %vm781_vm1, %v4160_v38  ;;  %v2244_v20 = vadd.f32 %v2243_v30, %v2242_v16  ;;  %v1883_v33 = vadd.f32 %v1813_v26, %v1754_v14  ;;  %v4165_v38 = vld [vmem:[#allocation11_spill] sm:$0xff] }
 0x223   : > { %2205 = vst.msk [vmem:[%s3798_s10 + $0x18] sm:$0xf] %vm2198_vm4, %v2172_v35  ;;  %v2345_v43 = vsel %vm2231_vm5, %v2308_v24, 0.0 }
 0x224   : > { %v2346_v27 = vadd.f32 %v2345_v43, %v2344_v18  ;;  %v1942_v23 = vpop.f32.mrf.mxu3 }
 0x225   : > { %v2012_v57 = vadd.f32 %v1942_v23, %v1883_v33 }
 0x226   : > { %v2071_v50 = vpop.f32.mrf.mxu0  ;;  %2656 = vmatmul.msk.bf16.gmra.mxu2 %vm781_vm1, %v4161_v29 }
 0x227   : > { %v1689_v53 = vpop.f32.mrf.mxu1  ;;  %v2141_v7 = vadd.f32 %v2071_v50, %v2012_v57 }
 0x228   : > { %v1756_v14 = vadd.f32 %v1689_v53, %v4164_v28  ;;  %v4166_v53 = vld [vmem:[#allocation10_spill] sm:$0xff] }
 0x229   : > { %v2173_v9 = vpack.c.bf16 %v2141_v7, %v2141_v7  ;;  %v2245_v63 = vsel %vm2231_vm5, %v2141_v7, 0.0  ;;  %v2309_v62 = vmul.f32 %v2141_v7, %v2141_v7  ;;  %2675 = vmatmul.msk.bf16.gmra.mxu3 %vm781_vm1, %v4163_v45  ;;  %v1816_v19 = vpop.f32.mrf.mxu2 }
 0x22a   : > { %v2246_v11 = vadd.f32 %v2245_v63, %v2244_v20  ;;  %v1884_v48 = vadd.f32 %v1816_v19, %v1755_v36 }
 0x22b   : > { %2206 = vst.msk [vmem:[%s3798_s10 + $0x1c] sm:$0xf] %vm2198_vm4, %v2173_v9  ;;  %v2347_v55 = vsel %vm2231_vm5, %v2309_v62, 0.0 }
 0x22c   : > { %v2348_v16 = vadd.f32 %v2347_v55, %v2346_v27  ;;  %v1945_v58 = vpop.f32.mrf.mxu3 }
 0x22d   : > { %v2013_v18 = vadd.f32 %v1945_v58, %v1884_v48 }
 0x22e   : > { %v2074_v6 = vpop.f32.mrf.mxu0 }
 0x22f   : > { %v1692_v54 = vpop.f32.mrf.mxu1  ;;  %v2142_v41 = vadd.f32 %v2074_v6, %v2013_v18 }
 0x230   : > { %v1757_v7 = vadd.f32 %v1692_v54, %v4166_v53 }
 0x231   : > { %2695 = vmatmul.msk.bf16.gmra.mxu0 %vm781_vm1, %v4165_v38  ;;  %v2174_v35 = vpack.c.bf16 %v2142_v41, %v2142_v41  ;;  %v2247_v30 = vsel %vm2231_vm5, %v2142_v41, 0.0  ;;  %v2310_v61 = vmul.f32 %v2142_v41, %v2142_v41  ;;  %v1818_v24 = vpop.f32.mrf.mxu2 }
 0x232   : > { %2637 = vmatmul.msk.bf16.gmra.mxu1 %vm781_vm1, %v4165_v38  ;;  %v2248_v26 = vadd.f32 %v2247_v30, %v2246_v11  ;;  %v1885_v20 = vadd.f32 %v1818_v24, %v1756_v14 }
 0x233   : > { %2207 = vst.msk [vmem:[%s3798_s10 + $0x20] sm:$0xf] %vm2198_vm4, %v2174_v35  ;;  %v2349_v33 = vsel %vm2231_vm5, %v2310_v61, 0.0  ;;  %v4168_v61 = vld [vmem:[#allocation15_spill] sm:$0xff] }
 0x234   : > { %v2350_v43 = vadd.f32 %v2349_v33, %v2348_v16  ;;  %v1947_v27 = vpop.f32.mrf.mxu3  ;;  %v4167_v16 = vld [vmem:[#allocation14_spill] sm:$0xff] }
 0x235   : > { %v2014_v23 = vadd.f32 %v1947_v27, %v1885_v20 }
 0x236   : > { %v2076_v57 = vpop.f32.mrf.mxu0  ;;  %2657 = vmatmul.msk.bf16.gmra.mxu2 %vm781_vm1, %v3614_v56 }
 0x237   : > { %v1694_v50 = vpop.f32.mrf.mxu1  ;;  %v2143_v29 = vadd.f32 %v2076_v57, %v2014_v23 }
 0x238   : > { %v1758_v58 = vadd.f32 %v1694_v50, %v4167_v16 }
 0x239   : > { %v2175_v49 = vpack.c.bf16 %v2143_v29, %v2143_v29  ;;  %v2249_v36 = vsel %vm2231_vm5, %v2143_v29, 0.0  ;;  %v2311_v9 = vmul.f32 %v2143_v29, %v2143_v29  ;;  %2676 = vmatmul.msk.bf16.gmra.mxu3 %vm781_vm1, %v3236_v52  ;;  %v1821_v63 = vpop.f32.mrf.mxu2 }
 0x23a   : > { %v2250_v62 = vadd.f32 %v2249_v36, %v2248_v26  ;;  %v1886_v45 = vadd.f32 %v1821_v63, %v1757_v7 }
 0x23b   : > { %2208 = vst.msk [vmem:[%s3798_s10 + $0x24] sm:$0xf] %vm2198_vm4, %v2175_v49  ;;  %v2351_v19 = vsel %vm2231_vm5, %v2311_v9, 0.0 }
 0x23c   : > { %v2352_v56 = vadd.f32 %v2351_v19, %v2350_v43  ;;  %v1950_v34 = vpop.f32.mrf.mxu3 }
 0x23d   : > { %v2015_v42 = vadd.f32 %v1950_v34, %v1886_v45 }
 0x23e   : > { %v2079_v11 = vpop.f32.mrf.mxu0 }
 0x23f   : > { %v1697_v48 = vpop.f32.mrf.mxu1  ;;  %v2144_v55 = vadd.f32 %v2079_v11, %v2015_v42  ;;  %v4169_v11 = vmov 0.0|0.0  }
 0x240   : > { %v1759_v24 = vadd.f32 %v1697_v48, %v4168_v61 }
 0x241   : > { %2696 = vmatmul.msk.bf16.gmra.mxu0 %vm781_vm1, %v3638_v25  ;;  %v2176_v52 = vpack.c.bf16 %v2144_v55, %v2144_v55  ;;  %v2251_v40 = vsel %vm2231_vm5, %v2144_v55, 0.0  ;;  %v2312_v18 = vmul.f32 %v2144_v55, %v2144_v55  ;;  %v1823_v6 = vpop.f32.mrf.mxu2 }
 0x242   : > { %2638 = vmatmul.msk.bf16.gmra.mxu1 %vm781_vm1, %v3638_v25  ;;  %v2252_v54 = vadd.f32 %v2251_v40, %v2250_v62  ;;  %v1887_v47 = vadd.f32 %v1823_v6, %v1758_v58  ;;  %v4170_v40 = vld [vmem:[#allocation2_spill] sm:$0xff] }
 0x243   : > { %2209 = vst.msk [vmem:[%s3798_s10 + $0x28] sm:$0xf] %vm2198_vm4, %v2176_v52  ;;  %v2353_v2 = vsel %vm2231_vm5, %v2312_v18, 0.0 }
 0x244   : > { %v2354_v41 = vadd.f32 %v2353_v2, %v2352_v56  ;;  %v1952_v28 = vpop.f32.mrf.mxu3 }
 0x245   : > { %v2016_v14 = vadd.f32 %v1952_v28, %v1887_v47 }
 0x246   : > { %v2081_v38 = vpop.f32.mrf.mxu0  ;;  %2658 = vmatmul.msk.bf16.gmra.mxu2 %vm781_vm1, %v3651_v32 }
 0x247   : > { %v1699_v35 = vpop.f32.mrf.mxu1  ;;  %v2145_v30 = vadd.f32 %v2081_v38, %v2016_v14 }
 0x248   : > { %v1760_v49 = vadd.f32 %v1699_v35, %v3658_v51 }
 0x249   : > { %v2177_v26 = vpack.c.bf16 %v2145_v30, %v2145_v30  ;;  %v2253_v25 = vsel %vm2231_vm5, %v2145_v30, 0.0  ;;  %v2313_v20 = vmul.f32 %v2145_v30, %v2145_v30  ;;  %2677 = vmatmul.msk.bf16.gmra.mxu3 %vm781_vm1, %v3665_v22  ;;  %v1826_v33 = vpop.f32.mrf.mxu2  ;;  %v4171_v30 = vld [vmem:[#allocation16_spill] sm:$0xff] }
 0x24a   : > { %v2254_v43 = vadd.f32 %v2253_v25, %v2252_v54  ;;  %v1888_v27 = vadd.f32 %v1826_v33, %v1759_v24 }
 0x24b   : > { %2210 = vst.msk [vmem:[%s3798_s10 + $0x2c] sm:$0xf] %vm2198_vm4, %v2177_v26  ;;  %v2355_v23 = vsel %vm2231_vm5, %v2313_v20, 0.0 }
 0x24c   : > { %v2356_v32 = vadd.f32 %v2355_v23, %v2354_v41  ;;  %v1955_v57 = vpop.f32.mrf.mxu3 }
 0x24d   : > { %v2017_v50 = vadd.f32 %v1955_v57, %v1888_v27 }
 0x24e   : > { %v2084_v29 = vpop.f32.mrf.mxu0 }
 0x24f   : > { %v1702_v53 = vpop.f32.mrf.mxu1  ;;  %v2146_v7 = vadd.f32 %v2084_v29, %v2017_v50 }
 0x250   : > { %v1761_v16 = vadd.f32 %v1702_v53, %v3667_v3 }
 0x251   : > { %2697 = vmatmul.msk.bf16.gmra.mxu0 %vm781_vm1, %v3877_v21  ;;  %v2178_v22 = vpack.c.bf16 %v2146_v7, %v2146_v7  ;;  %v2255_v36 = vsel %vm2231_vm5, %v2146_v7, 0.0  ;;  %v2314_v9 = vmul.f32 %v2146_v7, %v2146_v7  ;;  %v1828_v63 = vpop.f32.mrf.mxu2 }
 0x252   : > { %2639 = vmatmul.msk.bf16.gmra.mxu1 %vm781_vm1, %v3877_v21  ;;  %v2256_v62 = vadd.f32 %v2255_v36, %v2254_v43  ;;  %v1889_v45 = vadd.f32 %v1828_v63, %v1760_v49 }
 0x253   : > { %2211 = vst.msk [vmem:[%s3798_s10 + $0x30] sm:$0xf] %vm2198_vm4, %v2178_v22  ;;  %v2357_v19 = vsel %vm2231_vm5, %v2314_v9, 0.0 }
 0x254   : > { %v2358_v56 = vadd.f32 %v2357_v19, %v2356_v32  ;;  %v1957_v51 = vpop.f32.mrf.mxu3 }
 0x255   : > { %v2018_v34 = vadd.f32 %v1957_v51, %v1889_v45 }
 0x256   : > { %v2086_v42 = vpop.f32.mrf.mxu0  ;;  %1870 = vmatmul.bf16.gmra.mxu2 %v4169_v11 }
 0x257   : > { %v1704_v48 = vpop.f32.mrf.mxu1  ;;  %v2147_v55 = vadd.f32 %v2086_v42, %v2018_v34 }
 0x258   : > { %v1762_v35 = vadd.f32 %v1704_v48, %v3676_v1 }
 0x259   : > { %v2179_v58 = vpack.c.bf16 %v2147_v55, %v2147_v55  ;;  %v2257_v21 = vsel %vm2231_vm5, %v2147_v55, 0.0  ;;  %v2315_v52 = vmul.f32 %v2147_v55, %v2147_v55  ;;  %2678 = vmatmul.msk.bf16.gmra.mxu3 %vm781_vm1, %v4170_v40  ;;  %v1831_v18 = vpop.f32.mrf.mxu2 }
 0x25a   : > { %v2258_v6 = vadd.f32 %v2257_v21, %v2256_v62  ;;  %v1890_v54 = vadd.f32 %v1831_v18, %v1761_v16 }
 0x25b   : > { %2212 = vst.msk [vmem:[%s3798_s10 + $0x34] sm:$0xf] %vm2198_vm4, %v2179_v58  ;;  %v2359_v47 = vsel %vm2231_vm5, %v2315_v52, 0.0 }
 0x25c   : > { %v2360_v2 = vadd.f32 %v2359_v47, %v2358_v56  ;;  %v1960_v41 = vpop.f32.mrf.mxu3 }
 0x25d   : > { %v2019_v28 = vadd.f32 %v1960_v41, %v1890_v54 }
 0x25e   : > { %v2089_v14 = vpop.f32.mrf.mxu0 }
 0x25f   : > { %v1707_v3 = vpop.f32.mrf.mxu1  ;;  %v2148_v38 = vadd.f32 %v2089_v14, %v2019_v28 }
 0x260   : > { %v1763_v29 = vadd.f32 %v1707_v3, %v3681_v17 }
 0x261   : > { %2698 = vmatmul.msk.bf16.gmra.mxu0 %vm781_vm1, %v4171_v30  ;;  %v2180_v61 = vpack.c.bf16 %v2148_v38, %v2148_v38  ;;  %v2259_v24 = vsel %vm2231_vm5, %v2148_v38, 0.0  ;;  %v2316_v26 = vmul.f32 %v2148_v38, %v2148_v38  ;;  %v1833_v25 = vpop.f32.mrf.mxu2 }
 0x262   : > { %v2260_v20 = vadd.f32 %v2259_v24, %v2258_v6  ;;  %v1891_v33 = vadd.f32 %v1833_v25, %v1762_v35 }
 0x263   : > { %2213 = vst.msk [vmem:[%s3798_s10 + $0x38] sm:$0xf] %vm2198_vm4, %v2180_v61  ;;  %v2361_v43 = vsel %vm2231_vm5, %v2316_v26, 0.0 }
 0x264   : > { %v2362_v27 = vadd.f32 %v2361_v43, %v2360_v2  ;;  %v1962_v23 = vpop.f32.mrf.mxu3 }
 0x265   : > { %v2020_v32 = vadd.f32 %v1962_v23, %v1891_v33 }
 0x266   : > { %v2091_v57 = vpop.f32.mrf.mxu0 }
 0x267   : > { %v1709_v1 = vpop.f32.mrf.mxu1  ;;  %v2149_v50 = vadd.f32 %v2091_v57, %v2020_v32 }
 0x268   : > { %v1764_v17 = vadd.f32 %v1709_v1, %v3690_v59 }
 0x269   : > { %v2181_v53 = vpack.c.bf16 %v2149_v50, %v2149_v50  ;;  %v2261_v7 = vsel %vm2231_vm5, %v2149_v50, 0.0  ;;  %v2317_v49 = vmul.f32 %v2149_v50, %v2149_v50  ;;  %v1836_v22 = vpop.f32.mrf.mxu2 }
 0x26a   : > { %v2262_v36 = vadd.f32 %v2261_v7, %v2260_v20  ;;  %v1892_v9 = vadd.f32 %v1836_v22, %v1763_v29 }
 0x26b   : > { %2214 = vst.msk [vmem:[%s3798_s10 + $0x3c] sm:$0xf] %vm2198_vm4, %v2181_v53  ;;  %v2363_v63 = vsel %vm2231_vm5, %v2317_v49, 0.0 }
 0x26c   : > { %v2364_v62 = vadd.f32 %v2363_v63, %v2362_v27  ;;  %v1965_v45 = vpop.f32.mrf.mxu3 }
 0x26d   : > { %v2021_v19 = vadd.f32 %v1965_v45, %v1892_v9 }
 0x26e   : > { %v2094_v56 = vpop.f32.mrf.mxu0 }
 0x26f   : > { %v1712_v51 = vpop.f32.mrf.mxu1  ;;  %v2150_v34 = vadd.f32 %v2094_v56, %v2021_v19 }
 0x270   : > { %v1765_v59 = vadd.f32 %v1712_v51, %v3695_v10 }
 0x271   : > { %v2182_v42 = vpack.c.bf16 %v2150_v34, %v2150_v34  ;;  %v2263_v11 = vsel %vm2231_vm5, %v2150_v34, 0.0  ;;  %v2318_v48 = vmul.f32 %v2150_v34, %v2150_v34  ;;  %v1838_v55 = vpop.f32.mrf.mxu2 }
 0x272   : > { %v2264_v16 = vadd.f32 %v2263_v11, %v2262_v36  ;;  %v1893_v58 = vadd.f32 %v1838_v55, %v1764_v17 }
 0x273   : > { %2215 = vst.msk [vmem:[%s3798_s10 + $0x40] sm:$0xf] %vm2198_vm4, %v2182_v42  ;;  %v2365_v21 = vsel %vm2231_vm5, %v2318_v48, 0.0 }
 0x274   : > { %v2366_v52 = vadd.f32 %v2365_v21, %v2364_v62  ;;  %v1967_v40 = vpop.f32.mrf.mxu3 }
 0x275   : > { %v2022_v18 = vadd.f32 %v1967_v40, %v1893_v58 }
 0x276   : > { %v2096_v6 = vpop.f32.mrf.mxu0 }
 0x277   : > { %v1714_v54 = vpop.f32.mrf.mxu1  ;;  %v2151_v47 = vadd.f32 %v2096_v6, %v2022_v18 }
 0x278   : > { %v1766_v10 = vadd.f32 %v1714_v54, %v3704_v8 }
 0x279   : > { %v2183_v2 = vpack.c.bf16 %v2151_v47, %v2151_v47  ;;  %v2265_v41 = vsel %vm2231_vm5, %v2151_v47, 0.0  ;;  %v2319_v28 = vmul.f32 %v2151_v47, %v2151_v47  ;;  %v1841_v14 = vpop.f32.mrf.mxu2 }
 0x27a   : > { %v2266_v3 = vadd.f32 %v2265_v41, %v2264_v16  ;;  %v1894_v38 = vadd.f32 %v1841_v14, %v1765_v59 }
 0x27b   : > { %2216 = vst.msk [vmem:[%s3798_s10 + $0x44] sm:$0xf] %vm2198_vm4, %v2183_v2  ;;  %v2367_v35 = vsel %vm2231_vm5, %v2319_v28, 0.0 }
 0x27c   : > { %v2368_v30 = vadd.f32 %v2367_v35, %v2366_v52  ;;  %v1970_v61 = vpop.f32.mrf.mxu3 }
 0x27d   : > { %v2023_v24 = vadd.f32 %v1970_v61, %v1894_v38 }
 0x27e   : > { %v2099_v26 = vpop.f32.mrf.mxu0 }
 0x27f   : > { %v1717_v25 = vpop.f32.mrf.mxu1  ;;  %v2152_v20 = vadd.f32 %v2099_v26, %v2023_v24 }
 0x280   : > { %v1767_v8 = vadd.f32 %v1717_v25, %v3709_v39 }
 0x281   : > { %v2184_v33 = vpack.c.bf16 %v2152_v20, %v2152_v20  ;;  %v2267_v43 = vsel %vm2231_vm5, %v2152_v20, 0.0  ;;  %v2320_v27 = vmul.f32 %v2152_v20, %v2152_v20  ;;  %v1843_v23 = vpop.f32.mrf.mxu2 }
 0x282   : > { %v2268_v32 = vadd.f32 %v2267_v43, %v2266_v3  ;;  %v1895_v57 = vadd.f32 %v1843_v23, %v1766_v10 }
 0x283   : > { %2217 = vst.msk [vmem:[%s3798_s10 + $0x48] sm:$0xf] %vm2198_vm4, %v2184_v33  ;;  %v2369_v1 = vsel %vm2231_vm5, %v2320_v27, 0.0 }
 0x284   : > { %v2370_v50 = vadd.f32 %v2369_v1, %v2368_v30  ;;  %v1972_v29 = vpop.f32.mrf.mxu3 }
 0x285   : > { %v2024_v53 = vadd.f32 %v1972_v29, %v1895_v57 }
 0x286   : > { %v2101_v7 = vpop.f32.mrf.mxu0 }
 0x287   : > { %v1719_v49 = vpop.f32.mrf.mxu1  ;;  %v2153_v22 = vadd.f32 %v2101_v7, %v2024_v53 }
 0x288   : > { %v1768_v39 = vadd.f32 %v1719_v49, %v3718_v13 }
 0x289   : > { %v2185_v36 = vpack.c.bf16 %v2153_v22, %v2153_v22  ;;  %v2269_v9 = vsel %vm2231_vm5, %v2153_v22, 0.0  ;;  %v2321_v63 = vmul.f32 %v2153_v22, %v2153_v22  ;;  %v1846_v62 = vpop.f32.mrf.mxu2 }
 0x28a   : > { %v2270_v45 = vadd.f32 %v2269_v9, %v2268_v32  ;;  %v1896_v19 = vadd.f32 %v1846_v62, %v1767_v8 }
 0x28b   : > { %2218 = vst.msk [vmem:[%s3798_s10 + $0x4c] sm:$0xf] %vm2198_vm4, %v2185_v36  ;;  %v2371_v56 = vsel %vm2231_vm5, %v2321_v63, 0.0 }
 0x28c   : > { %v2372_v51 = vadd.f32 %v2371_v56, %v2370_v50  ;;  %v1975_v34 = vpop.f32.mrf.mxu3 }
 0x28d   : > { %v2025_v17 = vadd.f32 %v1975_v34, %v1896_v19 }
 0x28e   : > { %v2104_v42 = vpop.f32.mrf.mxu0 }
 0x28f   : > { %v1722_v11 = vpop.f32.mrf.mxu1  ;;  %v2154_v48 = vadd.f32 %v2104_v42, %v2025_v17 }
 0x290   : > { %v1769_v13 = vadd.f32 %v1722_v11, %v3723_v5 }
 0x291   : > { %v2186_v55 = vpack.c.bf16 %v2154_v48, %v2154_v48  ;;  %v2271_v16 = vsel %vm2231_vm5, %v2154_v48, 0.0  ;;  %v2322_v58 = vmul.f32 %v2154_v48, %v2154_v48  ;;  %v1848_v21 = vpop.f32.mrf.mxu2 }
 0x292   : > { %v2272_v52 = vadd.f32 %v2271_v16, %v2270_v45  ;;  %v1897_v40 = vadd.f32 %v1848_v21, %v1768_v39 }
 0x293   : > { %2219 = vst.msk [vmem:[%s3798_s10 + $0x50] sm:$0xf] %vm2198_vm4, %v2186_v55  ;;  %v2373_v18 = vsel %vm2231_vm5, %v2322_v58, 0.0 }
 0x294   : > { %v2374_v6 = vadd.f32 %v2373_v18, %v2372_v51  ;;  %v1977_v54 = vpop.f32.mrf.mxu3 }
 0x295   : > { %v2026_v47 = vadd.f32 %v1977_v54, %v1897_v40 }
 0x296   : > { %v2106_v59 = vpop.f32.mrf.mxu0 }
 0x297   : > { %v1724_v2 = vpop.f32.mrf.mxu1  ;;  %v2155_v41 = vadd.f32 %v2106_v59, %v2026_v47 }
 0x298   : > { %v1770_v5 = vadd.f32 %v1724_v2, %v3732_v4 }
 0x299   : > { %v2187_v28 = vpack.c.bf16 %v2155_v41, %v2155_v41  ;;  %v2273_v14 = vsel %vm2231_vm5, %v2155_v41, 0.0  ;;  %v2323_v3 = vmul.f32 %v2155_v41, %v2155_v41  ;;  %v1851_v38 = vpop.f32.mrf.mxu2 }
 0x29a   : > { %v2274_v35 = vadd.f32 %v2273_v14, %v2272_v52  ;;  %v1898_v30 = vadd.f32 %v1851_v38, %v1769_v13 }
 0x29b   : > { %2220 = vst.msk [vmem:[%s3798_s10 + $0x54] sm:$0xf] %vm2198_vm4, %v2187_v28  ;;  %v2375_v61 = vsel %vm2231_vm5, %v2323_v3, 0.0 }
 0x29c   : > { %v2376_v24 = vadd.f32 %v2375_v61, %v2374_v6  ;;  %v1980_v26 = vpop.f32.mrf.mxu3 }
 0x29d   : > { %v2027_v25 = vadd.f32 %v1980_v26, %v1898_v30 }
 0x29e   : > { %v2109_v20 = vpop.f32.mrf.mxu0 }
 0x29f   : > { %v1727_v10 = vpop.f32.mrf.mxu1  ;;  %v2156_v33 = vadd.f32 %v2109_v20, %v2027_v25 }
 0x2a0   : > { %v1771_v4 = vadd.f32 %v1727_v10, %v3737_v15 }
 0x2a1   : > { %v2188_v43 = vpack.c.bf16 %v2156_v33, %v2156_v33  ;;  %v2275_v27 = vsel %vm2231_vm5, %v2156_v33, 0.0  ;;  %v2324_v23 = vmul.f32 %v2156_v33, %v2156_v33  ;;  %v1853_v32 = vpop.f32.mrf.mxu2 }
 0x2a2   : > { %v2276_v57 = vadd.f32 %v2275_v27, %v2274_v35  ;;  %v1899_v1 = vadd.f32 %v1853_v32, %v1770_v5 }
 0x2a3   : > { %2221 = vst.msk [vmem:[%s3798_s10 + $0x58] sm:$0xf] %vm2198_vm4, %v2188_v43  ;;  %v2377_v50 = vsel %vm2231_vm5, %v2324_v23, 0.0 }
 0x2a4   : > { %v2378_v29 = vadd.f32 %v2377_v50, %v2376_v24  ;;  %v1982_v53 = vpop.f32.mrf.mxu3 }
 0x2a5   : > { %v2028_v7 = vadd.f32 %v1982_v53, %v1899_v1 }
 0x2a6   : > { %v2111_v49 = vpop.f32.mrf.mxu0 }
 0x2a7   : > { %v1729_v22 = vpop.f32.mrf.mxu1  ;;  %v2157_v8 = vadd.f32 %v2111_v49, %v2028_v7 }
 0x2a8   : > { %v1772_v15 = vadd.f32 %v1729_v22, %v3746_v46 }
 0x2a9   : > { %v2189_v36 = vpack.c.bf16 %v2157_v8, %v2157_v8  ;;  %v2277_v9 = vsel %vm2231_vm5, %v2157_v8, 0.0  ;;  %v2325_v63 = vmul.f32 %v2157_v8, %v2157_v8  ;;  %v1856_v62 = vpop.f32.mrf.mxu2 }
 0x2aa   : > { %v2278_v45 = vadd.f32 %v2277_v9, %v2276_v57  ;;  %v1900_v19 = vadd.f32 %v1856_v62, %v1771_v4 }
 0x2ab   : > { %2222 = vst.msk [vmem:[%s3798_s10 + $0x5c] sm:$0xf] %vm2198_vm4, %v2189_v36  ;;  %v2379_v56 = vsel %vm2231_vm5, %v2325_v63, 0.0 }
 0x2ac   : > { %v2380_v51 = vadd.f32 %v2379_v56, %v2378_v29  ;;  %v1985_v34 = vpop.f32.mrf.mxu3 }
 0x2ad   : > { %v2029_v17 = vadd.f32 %v1985_v34, %v1900_v19 }
 0x2ae   : > { %v2114_v42 = vpop.f32.mrf.mxu0 }
 0x2af   : > { %v1732_v11 = vpop.f32.mrf.mxu1  ;;  %v2158_v48 = vadd.f32 %v2114_v42, %v2029_v17 }
 0x2b0   : > { %v1773_v46 = vadd.f32 %v1732_v11, %v3751_v37 }
 0x2b1   : > { %v2190_v39 = vpack.c.bf16 %v2158_v48, %v2158_v48  ;;  %v2279_v55 = vsel %vm2231_vm5, %v2158_v48, 0.0  ;;  %v2326_v16 = vmul.f32 %v2158_v48, %v2158_v48  ;;  %v1858_v58 = vpop.f32.mrf.mxu2 }
 0x2b2   : > { %v2280_v21 = vadd.f32 %v2279_v55, %v2278_v45  ;;  %v1901_v52 = vadd.f32 %v1858_v58, %v1772_v15 }
 0x2b3   : > { %2223 = vst.msk [vmem:[%s3798_s10 + $0x60] sm:$0xf] %vm2198_vm4, %v2190_v39  ;;  %v2381_v40 = vsel %vm2231_vm5, %v2326_v16, 0.0 }
 0x2b4   : > { %v2382_v18 = vadd.f32 %v2381_v40, %v2380_v51  ;;  %v1987_v6 = vpop.f32.mrf.mxu3 }
 0x2b5   : > { %v2030_v54 = vadd.f32 %v1987_v6, %v1901_v52 }
 0x2b6   : > { %v2116_v47 = vpop.f32.mrf.mxu0 }
 0x2b7   : > { %v1734_v59 = vpop.f32.mrf.mxu1  ;;  %v2159_v2 = vadd.f32 %v2116_v47, %v2030_v54 }
 0x2b8   : > { %v1774_v37 = vadd.f32 %v1734_v59, %v3760_v60 }
 0x2b9   : > { %v2191_v41 = vpack.c.bf16 %v2159_v2, %v2159_v2  ;;  %v2281_v13 = vsel %vm2231_vm5, %v2159_v2, 0.0  ;;  %v2327_v28 = vmul.f32 %v2159_v2, %v2159_v2  ;;  %v1861_v14 = vpop.f32.mrf.mxu2 }
 0x2ba   : > { %v2282_v3 = vadd.f32 %v2281_v13, %v2280_v21  ;;  %v1902_v38 = vadd.f32 %v1861_v14, %v1773_v46 }
 0x2bb   : > { %2224 = vst.msk [vmem:[%s3798_s10 + $0x64] sm:$0xf] %vm2198_vm4, %v2191_v41  ;;  %v2383_v35 = vsel %vm2231_vm5, %v2327_v28, 0.0 }
 0x2bc   : > { %v2384_v30 = vadd.f32 %v2383_v35, %v2382_v18  ;;  %v1990_v61 = vpop.f32.mrf.mxu3 }
 0x2bd   : > { %v2031_v24 = vadd.f32 %v1990_v61, %v1902_v38 }
 0x2be   : > { %v2119_v26 = vpop.f32.mrf.mxu0 }
 0x2bf   : > { %v2160_v25 = vadd.f32 %v2119_v26, %v2031_v24  ;;  %v1737_v20 = vpop.f32.mrf.mxu1 }
 0x2c0   : > { %v1775_v7 = vadd.f32 %v1737_v20, %v3765_v12 }
 0x2c1   : > { %v2192_v10 = vpack.c.bf16 %v2160_v25, %v2160_v25  ;;  %v2283_v33 = vsel %vm2231_vm5, %v2160_v25, 0.0  ;;  %v2328_v5 = vmul.f32 %v2160_v25, %v2160_v25  ;;  %v1863_v43 = vpop.f32.mrf.mxu2 }
 0x2c2   : > { %v2284_v27 = vadd.f32 %v2283_v33, %v2282_v3  ;;  %v1903_v23 = vadd.f32 %v1863_v43, %v1774_v37 }
 0x2c3   : > { %2225 = vst.msk [vmem:[%s3798_s10 + $0x68] sm:$0xf] %vm2198_vm4, %v2192_v10  ;;  %v2385_v32 = vsel %vm2231_vm5, %v2328_v5, 0.0 }
 0x2c4   : > { %v2386_v57 = vadd.f32 %v2385_v32, %v2384_v30  ;;  %v1992_v1 = vpop.f32.mrf.mxu3 }
 0x2c5   : > { %v2032_v50 = vadd.f32 %v1992_v1, %v1903_v23 }
 0x2c6   : > { %v2121_v29 = vpop.f32.mrf.mxu0 }
 0x2c7   : > { %v2161_v53 = vadd.f32 %v2121_v29, %v2032_v50  ;;  %v1739_v4 = vpop.f32.mrf.mxu1 }
 0x2c8   : > { %v1776_v12 = vadd.f32 %v1739_v4, %v3774_v31 }
 0x2c9   : > { %v2193_v60 = vpack.c.bf16 %v2161_v53, %v2161_v53  ;;  %v2285_v49 = vsel %vm2231_vm5, %v2161_v53, 0.0  ;;  %v2329_v22 = vmul.f32 %v2161_v53, %v2161_v53  ;;  %v1866_v8 = vpop.f32.mrf.mxu2 }
 0x2ca   : > { %v2286_v36 = vadd.f32 %v2285_v49, %v2284_v27  ;;  %v1904_v9 = vadd.f32 %v1866_v8, %v1775_v7 }
 0x2cb   : > { %2226 = vst.msk [vmem:[%s3798_s10 + $0x6c] sm:$0xf] %vm2198_vm4, %v2193_v60  ;;  %v2387_v63 = vsel %vm2231_vm5, %v2329_v22, 0.0 }
 0x2cc   : > { %v2388_v62 = vadd.f32 %v2387_v63, %v2386_v57  ;;  %v1995_v45 = vpop.f32.mrf.mxu3 }
 0x2cd   : > { %v2033_v19 = vadd.f32 %v1995_v45, %v1904_v9 }
 0x2ce   : > { %v2124_v56 = vpop.f32.mrf.mxu0 }
 0x2cf   : > { %v2162_v51 = vadd.f32 %v2124_v56, %v2033_v19  ;;  %v1742_v55 = vpop.f32.mrf.mxu1 }
 0x2d0   : > { %v1777_v31 = vadd.f32 %v1742_v55, %v3779_v0 }
 0x2d1   : > { %v2194_v34 = vpack.c.bf16 %v2162_v51, %v2162_v51  ;;  %v2287_v17 = vsel %vm2231_vm5, %v2162_v51, 0.0  ;;  %v2330_v42 = vmul.f32 %v2162_v51, %v2162_v51  ;;  %v1868_v11 = vpop.f32.mrf.mxu2 }
 0x2d2   : > { %v2288_v48 = vadd.f32 %v2287_v17, %v2286_v36  ;;  %v1905_v15 = vadd.f32 %v1868_v11, %v1776_v12 }
 0x2d3   : > { %2227 = vst.msk [vmem:[%s3798_s10 + $0x70] sm:$0xf] %vm2198_vm4, %v2194_v34  ;;  %v2389_v39 = vsel %vm2231_vm5, %v2330_v42, 0.0 }
 0x2d4   : > { %v2390_v16 = vadd.f32 %v2389_v39, %v2388_v62  ;;  %v1997_v58 = vpop.f32.mrf.mxu3 }
 0x2d5   : > { %v2034_v21 = vadd.f32 %v1997_v58, %v1905_v15 }
 0x2d6   : > { %v2126_v52 = vpop.f32.mrf.mxu0 }
 0x2d7   : > { %v2163_v40 = vadd.f32 %v2126_v52, %v2034_v21  ;;  %v1744_v14 = vpop.f32.mrf.mxu1 }
 0x2d8   : > { %v1778_v0 = vadd.f32 %v1744_v14, %v3788_v44 }
 0x2d9   : > { %v2195_v18 = vpack.c.bf16 %v2163_v40, %v2163_v40  ;;  %v2289_v6 = vsel %vm2231_vm5, %v2163_v40, 0.0  ;;  %v2331_v54 = vmul.f32 %v2163_v40, %v2163_v40  ;;  %v1871_v47 = vpop.f32.mrf.mxu2 }
 0x2da   : > { %v2290_v59 = vadd.f32 %v2289_v6, %v2288_v48  ;;  %v1906_v2 = vadd.f32 %v1871_v47, %v1777_v31 }
 0x2db   : > { %2228 = vst.msk [vmem:[%s3798_s10 + $0x74] sm:$0xf] %vm2198_vm4, %v2195_v18  ;;  %v2391_v46 = vsel %vm2231_vm5, %v2331_v54, 0.0 }
 0x2dc   : > { %v2392_v41 = vadd.f32 %v2391_v46, %v2390_v16  ;;  %v2000_v13 = vpop.f32.mrf.mxu3 }
 0x2dd   : > { %v2035_v28 = vadd.f32 %v2000_v13, %v1906_v2 }
 0x2de   : > { %v2129_v3 = vpop.f32.mrf.mxu0 }
 0x2df   : > { %v2164_v38 = vadd.f32 %v2129_v3, %v2035_v28 }
 0x2e1   : > { %v2196_v35 = vpack.c.bf16 %v2164_v38, %v2164_v38  ;;  %v2291_v30 = vsel %vm2231_vm5, %v2164_v38, 0.0  ;;  %v2332_v61 = vmul.f32 %v2164_v38, %v2164_v38  ;;  %v1873_v24 = vpop.f32.mrf.mxu2 }
 0x2e2   : > { %v2292_v26 = vadd.f32 %v2291_v30, %v2290_v59  ;;  %v1907_v25 = vadd.f32 %v1873_v24, %v1778_v0 }
 0x2e3   : > { %2229 = vst.msk [vmem:[%s3798_s10 + $0x78] sm:$0xf] %vm2198_vm4, %v2196_v35  ;;  %v2393_v20 = vsel %vm2231_vm5, %v2332_v61, 0.0 }
 0x2e4   : > { %v2394_v37 = vadd.f32 %v2393_v20, %v2392_v41  ;;  %v2002_v10 = vpop.f32.mrf.mxu3 }
 0x2e5   : > { %v2036_v33 = vadd.f32 %v2002_v10, %v1907_v25 }
 0x2e6   : > { %v2131_v5 = vpop.f32.mrf.mxu0 }
 0x2e7   : > { %v2165_v43 = vadd.f32 %v2131_v5, %v2036_v33 }
 0x2e9   : > { %v2197_v27 = vpack.c.bf16 %v2165_v43, %v2165_v43  ;;  %v2293_v44 = vsel %vm2231_vm5, %v2165_v43, 0.0  ;;  %v2333_v23 = vmul.f32 %v2165_v43, %v2165_v43 }
 0x2ea   : > { %v2294_v32 = vadd.f32 %v2293_v44, %v2292_v26 }
 0x2eb   : > { %2230 = vst.msk [vmem:[%s3798_s10 + $0x7c] sm:$0xf] %vm2198_vm4, %v2197_v27  ;;  %v2395_v57 = vsel %vm2231_vm5, %v2333_v23, 0.0 }
 0x2ec   : > { %v2295_v1 = vrot.slane %v2294_v32, 4  ;;  %v2396_v50 = vadd.f32 %v2395_v57, %v2394_v37 }
 0x2ee   : > { %v2296_v29 = vadd.f32 %v2295_v1, %v2294_v32  ;;  %v2397_v53 = vrot.slane %v2396_v50, 4 }
 0x2f0   : > { %v2297_v7 = vrot.slane %v2296_v29, 2  ;;  %v2398_v60 = vadd.f32 %v2397_v53, %v2396_v50 }
 0x2f2   : > { %v2298_v49 = vadd.f32 %v2297_v7, %v2296_v29  ;;  %v2399_v22 = vrot.slane %v2398_v60, 2 }
 0x2f4   : > { %v2299_v8 = vrot.slane %v2298_v49, 1  ;;  %v2400_v4 = vadd.f32 %v2399_v22, %v2398_v60 }
 0x2f6   : > { %v2300_v36 = vadd.f32 %v2299_v8, %v2298_v49  ;;  %v2401_v9 = vrot.slane %v2400_v4, 1 }
 0x2f8   : > { %v2402_v63 = vadd.f32 %v2401_v9, %v2400_v4  ;;  %2405 = vst.msk [vmem:[%s265_s12] sm:$0x1] %vm2404_vm6, %v2300_v36 }
 0x2fa   : > { %2406 = vst.msk [vmem:[%s268_s15] sm:$0x1] %vm2404_vm6, %v2402_v63 }
 0x2fb PF: > { %s17_s21 = sadd.s32 1, %s2814_s21  }
 0x2fc   : > { %p14_p4 = scmp.ge.s32.totalorder %s17_s21, 4  }
 0x2fe   :  { %16 = sbr.rel (!%p14_p4) target bundleno = 1 (0x1), region = 90 }

// kernel: dense_block_forward.7
= control target key start
LH: loop header
LB: loop body
LE: loop exit
PB: predicated region body
PF: predicated region fallthrough
CT: control target
= control target key end

     0   :  { %12 = vsyncpa [#allocation3], 0  ;;  %s4303_s0 = inlined_call_operand.vmem [shape: bf16[2,16,16,16], index: 0, kind: input, shape index: {}]   ;;  %s4304_s1 = inlined_call_operand.vmem [shape: f32[1,16], index: 1, kind: input, shape index: {}]   ;;  %s4305_s2 = inlined_call_operand.vmem [shape: f32[1,16], index: 2, kind: input, shape index: {}]   ;;  %s4306_s3 = inlined_call_operand.vmem [shape: bf16[144,4], index: 3, kind: input, shape index: {}]   ;;  %s4307_s4 = inlined_call_operand.vmem [shape: bf16[2,256,4], index: 4, kind: output, shape index: {0}]   ;;  %s4308_s5 = inlined_call_operand.hbm [shape: f32[2,1,4], index: 5, kind: output, shape index: {1}]   ;;  %s4309_s6 = inlined_call_operand.hbm [shape: f32[2,1,4], index: 6, kind: output, shape index: {2}]  }
   0x1   :  { %14 = vsyncpa [#allocation3 + $0x1], 0 }
   0x2   :  { %15 = vsyncpa [#allocation5], 0 }
   0x3   :  { %17 = vsyncpa [#allocation5 + $0x1], 0  ;;  %s3019_s21 = smov 0   ;;  %s3021_s22 = smov 0  }
   0x4   :  { %s3023_s23 = smov 0   ;;  %s3025_s24 = smov 0  }
   0x5 LB: > { %s3040_s25 = sadd.s32 4294967295, %s2980_s24   ;;  %s2555_s26 = sadd.s32 4294967294, %s2980_s24   ;;  %s2980_s24 = sphi %s3025_s24, %s4446_s24   ;;  %s2976_s23 = sphi %s3023_s23, %s4445_s23   ;;  %s2972_s22 = sphi %s3021_s22, %s4444_s22   ;;  %s2968_s21 = sphi %s3019_s21, %s4443_s21  }
   0x6   : > { %s3044_s27 = sadd.s32 1, %s2980_s24   ;;  %s145_s28 = sadd.s32 1, %s2976_s23 }
   0x7   : > { %s142_s29 = ssub.s32 %s2980_s24, %s3044_s27  ;;  %p155_p0 = scmp.ne.s32.totalorder %s2976_s23, %s2972_s22 }
   0x8   : > { %p143_p1 = scmp.eq.s32.totalorder %s142_s29, 0  ;;  %p156_p2 = scmp.eq.s32.totalorder %s3040_s25, 1 }
   0x9   : > { %p161_p3 = scmp.ne.s32.totalorder %s2972_s22, %s2968_s21  ;;  %p162_p4 = scmp.eq.s32.totalorder %s2555_s26, 1 }
   0xa   : > { %s3055_s30 = scalar_select %p143_p1, %s2976_s23, %s145_s28  }
   0xb   : > { %p3057_p5 = por %p156_p2, %p155_p0  ;;  %p3061_p6 = por %p162_p4, %p161_p3 }
   0xc   : > { %p2558_p7 = scmp.ge.s32.totalorder %s2980_s24, 1  ;;  %p223_p8 = scmp.lt.s32.totalorder %s2980_s24, 3 }
   0xe   : > { %p224_p9 = pnand %p2558_p7, %p223_p8 }
  0x10   : > { %227 = sbr.rel (%p224_p9) target bundleno = 786 (0x312), region = 36 }
  0x15   : > { %v2746_v0 = vld [vmem:[%s4306_s3 + $0x8] sm:$0xff]  ;;  %p261_p10 = scmp.lt.s32.totalorder %s3040_s25, 1  ;;  %v2747_v1 = vld [vmem:[%s4306_s3 + $0x10] sm:$0xff]  ;;  %v2748_v2 = vld [vmem:[%s4306_s3 + $0x18] sm:$0xff]  ;;  %v4310_v4 = vmov 0.0   ;;  %vm472_vm0 = vcmask 1040384   ;;  %s2430_s17 = scalar_lea.hbm %s4308_s5, %s3040_s25 }
  0x16   : > { %2833 = vmatpush.bf16.msra.mxu1 %v2746_v0  ;;  %2834 = vmatpush.bf16.msra.mxu2 %v2746_v0  ;;  %v2745_v3 = vld [vmem:[%s4306_s3] sm:$0xff]  ;;  %v651_v5 = vrot.slane %v4310_v4, 1  ;;  %vm783_vm1 = vcmask 130048   ;;  %vm650_vm2 = vcmask 1046528   ;;  %vm1064_vm3 = vcmask 1045504   ;;  %s2443_s26 = scalar_lea.hbm %s4309_s6, %s3040_s25  ;;  %s4245_s9 = sshll.u32 %s2430_s17, 4  ;;  %s2435_s9 = int_to_ptr.hbm [resolvable:$true] %s4245_s9 }
  0x17   : > { %s3072_s11 = scalar_select %p261_p10, %s3040_s25, 1  ;;  %2835 = vmatpush.bf16.msra.mxu3 %v2746_v0  ;;  %839 = vmatpush.bf16.msra.mxu0 %v2746_v0  ;;  %v2749_v6 = vld [vmem:[%s4306_s3 + $0x20] sm:$0xff]  ;;  %vm2200_vm4 = vcmask 27648   ;;  %vm2233_vm5 = vcmask 31744   ;;  %vm2406_vm6 = vcmask 24576  }
  0x18   : > { %v3098_v7 = vld [vmem:[%s4304_s1] ss:$0 sm:$0xff]  ;;  %v3100_v8 = vpack.c.bf16 %v651_v5, %v651_v5  ;;  %s4250_s13 = sshll.u32 %s2443_s26, 4  ;;  %s2900_s14 = sshra.s32 %s2435_s9, 4  ;;  %s2448_s13 = int_to_ptr.hbm [resolvable:$true] %s4250_s13  ;;  %s2901_s14 = int_to_ptr.hbm [resolvable:$true] %s2900_s14 }
  0x19   : > { %s2743_s20 = sshll.u32 %s3072_s11, 7  ;;  %v3108_v14 = vld [vmem:[%s4305_s2] ss:$0 sm:$0xff]  ;;  %s4232_s11 = sand.u32 1, %s2972_s22  }
  0x1a   : > { %1252 = vmatpush.bf16.msrb.mxu2 %v2747_v1  ;;  %s3093_s29 = scalar_lea.vmem %s4303_s0, %s2743_s20  ;;  %4354 = vst [vmem:[#allocation8_spill] sm:$0xff] %v3100_v8  ;;  %982 = vmatpush.bf16.msrb.mxu1 %v2745_v3  ;;  %s4006_s15 = scalar_lea.vmem %s4307_s4, %s2743_s20 }
  0x1b   : > { %1385 = vmatpush.bf16.msrb.mxu3 %v2748_v2  ;;  %1527 = vmatpush.bf16.msrb.mxu0 %v2749_v6  ;;  %v2820_v9 = vld [vmem:[%s3093_s29 + $0x18] sm:$0xff]   ;;  %v2821_v17 = vld [vmem:[%s3093_s29 + $0x20] sm:$0xff]   ;;  %s254_s28 = scalar_lea.vmem [#allocation2], %s4232_s11  ;;  %s260_s10 = scalar_lea.vmem [#allocation4], %s4232_s11 }
  0x1c   : > { %v2824_v10 = vld [vmem:[%s3093_s29 + $0x38] sm:$0xff]   ;;  %v2768_v12 = vunpack.c.l.bf16 %v2820_v9  ;;  %v2769_v13 = vunpack.c.h.bf16 %v2820_v9  ;;  %2567 = vmatmul.msk.bf16.vlgmr.msra.gmra.mxu0 %vm783_vm1, %v3100_v8  ;;  %v2772_v20 = vunpack.c.l.bf16 %v2821_v17  ;;  %v2773_v21 = vunpack.c.h.bf16 %v2821_v17  ;;  %v2825_v17 = vld [vmem:[%s3093_s29 + $0x40] sm:$0xff]   ;;  %s4248_s12 = sshll.u32 %s260_s10, 4  ;;  %s2415_s25 = scalar_lea.sflag [#allocation3], %s4232_s11  ;;  %s2446_s12 = int_to_ptr.vmem [resolvable:$true] %s4248_s12 }
  0x1d   : > { %v2828_v11 = vld [vmem:[%s3093_s29 + $0x58] sm:$0xff]   ;;  %v2784_v15 = vunpack.c.l.bf16 %v2824_v10  ;;  %v2785_v16 = vunpack.c.h.bf16 %v2824_v10  ;;  %s2906_s17 = scalar_lea.hbm %s4308_s5, 2  ;;  %p2907_p0 = scmp.lt.s32.totalorder %s2901_s14, %s4308_s5 }
  0x1e   : > { %v2800_v18 = vunpack.c.l.bf16 %v2828_v11  ;;  %v2801_v19 = vunpack.c.h.bf16 %v2828_v11  ;;  %v346_v22 = vmul.f32 %v3098_v7, %v2768_v12  ;;  %v347_v23 = vmul.f32 %v3098_v7, %v2769_v13 }
  0x1f   : > { %v354_v24 = vmul.f32 %v3098_v7, %v2784_v15  ;;  %v355_v25 = vmul.f32 %v3098_v7, %v2785_v16  ;;  %v348_v28 = vmul.f32 %v3098_v7, %v2772_v20  ;;  %v349_v29 = vmul.f32 %v3098_v7, %v2773_v21  ;;  %v2829_v21 = vld [vmem:[%s3093_s29 + $0x60] sm:$0xff]  }
  0x20   : > { %v362_v26 = vmul.f32 %v3098_v7, %v2800_v18  ;;  %v363_v27 = vmul.f32 %v3098_v7, %v2801_v19  ;;  %v382_v30 = vadd.f32 %v3108_v14, %v346_v22  ;;  %v383_v31 = vadd.f32 %v3108_v14, %v347_v23  ;;  %v2755_v22 = vld [vmem:[%s3093_s29] sm:$0xff]  }
  0x21   : > { %v390_v32 = vadd.f32 %v3108_v14, %v354_v24  ;;  %v391_v33 = vadd.f32 %v3108_v14, %v355_v25  ;;  %v384_v36 = vadd.f32 %v3108_v14, %v348_v28  ;;  %v385_v37 = vadd.f32 %v3108_v14, %v349_v29 }
  0x22   : > { %v398_v34 = vadd.f32 %v3108_v14, %v362_v26  ;;  %v399_v35 = vadd.f32 %v3108_v14, %v363_v27  ;;  %v414_v38 = vmax.f32 %v382_v30, 0.0  ;;  %v415_v39 = vmax.f32 %v383_v31, 0.0 }
  0x23   : > { %v422_v40 = vmax.f32 %v390_v32, 0.0  ;;  %v423_v41 = vmax.f32 %v391_v33, 0.0  ;;  %v416_v44 = vmax.f32 %v384_v36, 0.0  ;;  %v417_v45 = vmax.f32 %v385_v37, 0.0 }
  0x24   : > { %v430_v42 = vmax.f32 %v398_v34, 0.0  ;;  %v431_v43 = vmax.f32 %v399_v35, 0.0  ;;  %v482_v46 = vrot.slane %v414_v38, 7  ;;  %v483_v47 = vrot.slane %v415_v39, 7  ;;  %v2822_v35 = vld [vmem:[%s3093_s29 + $0x28] sm:$0xff]  }
  0x25   : > { %v494_v48 = vrot.slane %v422_v40, 7  ;;  %v495_v49 = vrot.slane %v423_v41, 7  ;;  %v485_v52 = vrot.slane %v416_v44, 7  ;;  %v486_v53 = vrot.slane %v417_v45, 7 }
  0x26   : > { %v506_v50 = vrot.slane %v430_v42, 7  ;;  %v507_v51 = vrot.slane %v431_v43, 7  ;;  %v3130_v54 = vsel %vm472_vm0, %v482_v46, %v483_v47  ;;  %v3133_v55 = vsel %vm472_vm0, 0.0, %v482_v46 }
  0x27   : > { %v3136_v56 = vsel %vm472_vm0, %v483_v47, 0.0  ;;  %v3139_v57 = vsel %vm472_vm0, %v494_v48, %v495_v49  ;;  %v668_v58 = vrot.slane %v3133_v55, 1  ;;  %v669_v59 = vrot.slane %v3130_v54, 1 }
  0x28   : > { %v671_v60 = vrot.slane %v3136_v56, 1  ;;  %v3145_v61 = vsel %vm472_vm0, 0.0, %v494_v48  ;;  %v3148_v62 = vsel %vm472_vm0, %v495_v49, 0.0  ;;  %v689_v0 = vrot.slane %v3139_v57, 1 }
  0x29   : > { %v688_v63 = vrot.slane %v3145_v61, 1  ;;  %v3153_v1 = vsel %vm472_vm0, %v506_v50, %v507_v51  ;;  %v670_v2 = vsel %vm650_vm2, %v668_v58, %v669_v59  ;;  %v691_v5 = vrot.slane %v3148_v62, 1 }
  0x2a   : > { %v672_v3 = vsel %vm650_vm2, %v669_v59, %v671_v60  ;;  %v3162_v10 = vsel %vm472_vm0, 0.0, %v506_v50  ;;  %v3165_v11 = vsel %vm472_vm0, %v507_v51, 0.0  ;;  %v709_v15 = vrot.slane %v3153_v1, 1 }
  0x2b   : > { %v3158_v6 = vpack.c.bf16 %v672_v3, %v670_v2  ;;  %v690_v9 = vsel %vm650_vm2, %v688_v63, %v689_v0  ;;  %v692_v12 = vsel %vm650_vm2, %v689_v0, %v691_v5  ;;  %v708_v13 = vrot.slane %v3162_v10, 1 }
  0x2c   : > { %v711_v16 = vrot.slane %v3165_v11, 1  ;;  %v3174_v18 = vpack.c.bf16 %v692_v12, %v690_v9  ;;  %v3177_v19 = vsel %vm472_vm0, %v485_v52, %v486_v53  ;;  %v3180_v20 = vsel %vm472_vm0, 0.0, %v485_v52 }
  0x2d   : > { %2571 = vmatmul.msk.bf16.vlgmr.msra.gmra.mxu1 %vm783_vm1, %v3158_v6  ;;  %v710_v23 = vsel %vm650_vm2, %v708_v13, %v709_v15  ;;  %v3187_v25 = vsel %vm472_vm0, %v486_v53, 0.0  ;;  %v673_v26 = vrot.slane %v3180_v20, 1  ;;  %v674_v28 = vrot.slane %v3177_v19, 1 }
  0x2e   : > { %4355 = vst [vmem:[#allocation9_spill] sm:$0xff] %v3174_v18  ;;  %v712_v24 = vsel %vm650_vm2, %v709_v15, %v711_v16  ;;  %2575 = vmatmul.msk.bf16.vlgmr.msra.gmra.mxu2 %vm783_vm1, %v3174_v18  ;;  %v676_v29 = vrot.slane %v3187_v25, 1  ;;  %v2788_v30 = vunpack.c.l.bf16 %v2825_v17  ;;  %v2789_v31 = vunpack.c.h.bf16 %v2825_v17 }
  0x2f   : > { %v3192_v27 = vpack.c.bf16 %v712_v24, %v710_v23  ;;  %v2804_v32 = vunpack.c.l.bf16 %v2829_v21  ;;  %v2805_v33 = vunpack.c.h.bf16 %v2829_v21  ;;  %v2756_v34 = vunpack.c.l.bf16 %v2755_v22 }
  0x30   : > { %v675_v36 = vsel %vm650_vm2, %v673_v26, %v674_v28  ;;  %v356_v37 = vmul.f32 %v3098_v7, %v2788_v30  ;;  %v2757_v38 = vunpack.c.h.bf16 %v2755_v22  ;;  %v677_v39 = vsel %vm650_vm2, %v674_v28, %v676_v29 }
  0x31   : > { %2579 = vmatmul.msk.bf16.vlgmr.msra.gmra.mxu3 %vm783_vm1, %v3192_v27  ;;  %v357_v40 = vmul.f32 %v3098_v7, %v2789_v31  ;;  %v364_v41 = vmul.f32 %v3098_v7, %v2804_v32  ;;  %v365_v42 = vmul.f32 %v3098_v7, %v2805_v33  ;;  %v340_v44 = vmul.f32 %v3098_v7, %v2756_v34 }
  0x32   : > { %v392_v43 = vadd.f32 %v3108_v14, %v356_v37  ;;  %v341_v45 = vmul.f32 %v3098_v7, %v2757_v38  ;;  %v2776_v46 = vunpack.c.l.bf16 %v2822_v35  ;;  %v2777_v50 = vunpack.c.h.bf16 %v2822_v35 }
  0x33   : > { %v393_v47 = vadd.f32 %v3108_v14, %v357_v40  ;;  %v400_v48 = vadd.f32 %v3108_v14, %v364_v41  ;;  %v401_v49 = vadd.f32 %v3108_v14, %v365_v42  ;;  %v376_v52 = vadd.f32 %v3108_v14, %v340_v44  ;;  %v2826_v41 = vld [vmem:[%s3093_s29 + $0x48] sm:$0xff]  }
  0x34   : > { %v424_v51 = vmax.f32 %v392_v43, 0.0  ;;  %v377_v53 = vadd.f32 %v3108_v14, %v341_v45  ;;  %v350_v58 = vmul.f32 %v3098_v7, %v2776_v46  ;;  %v351_v0 = vmul.f32 %v3098_v7, %v2777_v50  ;;  %v2830_v46 = vld [vmem:[%s3093_s29 + $0x68] sm:$0xff]  }
  0x35   : > { %v425_v59 = vmax.f32 %v393_v47, 0.0  ;;  %v432_v60 = vmax.f32 %v400_v48, 0.0  ;;  %v433_v63 = vmax.f32 %v401_v49, 0.0  ;;  %v408_v3 = vmax.f32 %v376_v52, 0.0 }
  0x36   : > { %v497_v2 = vrot.slane %v424_v51, 7  ;;  %v409_v5 = vmax.f32 %v377_v53, 0.0  ;;  %v386_v9 = vadd.f32 %v3108_v14, %v350_v58  ;;  %v3216_v12 = vpack.c.bf16 %v677_v39, %v675_v36 }
  0x37   : > { %v498_v13 = vrot.slane %v425_v59, 7  ;;  %v509_v15 = vrot.slane %v432_v60, 7  ;;  %v510_v16 = vrot.slane %v433_v63, 7  ;;  %v473_v21 = vrot.slane %v408_v3, 7 }
  0x38   : > { %4356 = vst [vmem:[#allocation10_spill] sm:$0xff] %v3216_v12  ;;  %v3219_v17 = vsel %vm472_vm0, 0.0, %v497_v2  ;;  %v474_v22 = vrot.slane %v409_v5, 7  ;;  %v387_v23 = vadd.f32 %v3108_v14, %v351_v0  ;;  %v418_v33 = vmax.f32 %v386_v9, 0.0 }
  0x39   : > { %v3223_v24 = vsel %vm472_vm0, %v497_v2, %v498_v13  ;;  %v3226_v26 = vsel %vm472_vm0, %v498_v13, 0.0  ;;  %v693_v28 = vrot.slane %v3219_v17, 1  ;;  %v3230_v29 = vsel %vm472_vm0, %v509_v15, %v510_v16  ;;  %v2818_v2 = vld [vmem:[%s3093_s29 + $0x8] sm:$0xff]  }
  0x3a   : > { %4357 = vst [vmem:[#allocation11_spill] sm:$0xff] %v3230_v29  ;;  %v694_v30 = vrot.slane %v3223_v24, 1  ;;  %v696_v31 = vrot.slane %v3226_v26, 1  ;;  %v3235_v32 = vsel %vm472_vm0, 0.0, %v509_v15  ;;  %v3238_v34 = vsel %vm472_vm0, %v510_v16, 0.0 }
  0x3b   : > { %4358 = vst [vmem:[#allocation12_spill] sm:$0xff] %v3238_v34  ;;  %v713_v35 = vrot.slane %v3235_v32, 1  ;;  %v714_v36 = vrot.slane %v3230_v29, 1  ;;  %v3243_v37 = vsel %vm472_vm0, %v473_v21, %v474_v22  ;;  %v716_v40 = vrot.slane %v3238_v34, 1 }
  0x3c   : > { %v695_v38 = vsel %vm650_vm2, %v693_v28, %v694_v30  ;;  %v697_v39 = vsel %vm650_vm2, %v694_v30, %v696_v31  ;;  %v3255_v44 = vsel %vm472_vm0, 0.0, %v473_v21  ;;  %v3258_v45 = vsel %vm472_vm0, %v474_v22, 0.0 }
  0x3d   : > { %2572 = vmatmul.msk.bf16.gmra.mxu1 %vm783_vm1, %v3216_v12  ;;  %v3251_v42 = vpack.c.bf16 %v697_v39, %v695_v38  ;;  %v715_v43 = vsel %vm650_vm2, %v713_v35, %v714_v36  ;;  %v717_v47 = vsel %vm650_vm2, %v714_v36, %v716_v40  ;;  %v653_v48 = vrot.slane %v3255_v44, 1 }
  0x3e   : > { %v654_v49 = vrot.slane %v3243_v37, 1  ;;  %v656_v50 = vrot.slane %v3258_v45, 1  ;;  %v3267_v51 = vpack.c.bf16 %v717_v47, %v715_v43  ;;  %v419_v52 = vmax.f32 %v387_v23, 0.0 }
  0x3f   : > { %2576 = vmatmul.msk.bf16.gmra.mxu2 %vm783_vm1, %v3251_v42  ;;  %v488_v53 = vrot.slane %v418_v33, 7  ;;  %v2792_v58 = vunpack.c.l.bf16 %v2826_v41  ;;  %v2793_v63 = vunpack.c.h.bf16 %v2826_v41  ;;  %v2808_v0 = vunpack.c.l.bf16 %v2830_v46 }
  0x40   : > { %4359 = vst [vmem:[#allocation13_spill] sm:$0xff] %v3267_v51  ;;  %v655_v59 = vsel %vm650_vm2, %v653_v48, %v654_v49  ;;  %v657_v60 = vsel %vm650_vm2, %v654_v49, %v656_v50  ;;  %v489_v5 = vrot.slane %v419_v52, 7  ;;  %v2809_v21 = vunpack.c.h.bf16 %v2830_v46  ;;  %v2823_v50 = vld [vmem:[%s3093_s29 + $0x30] sm:$0xff]  }
  0x41   : > { %2580 = vmatmul.msk.bf16.gmra.mxu3 %vm783_vm1, %v3267_v51  ;;  %v3274_v3 = vpack.c.bf16 %v657_v60, %v655_v59  ;;  %v3277_v9 = vsel %vm472_vm0, 0.0, %v488_v53  ;;  %v358_v13 = vmul.f32 %v3098_v7, %v2792_v58  ;;  %v359_v16 = vmul.f32 %v3098_v7, %v2793_v63 }
  0x42   : > { %v678_v15 = vrot.slane %v3277_v9, 1  ;;  %v366_v22 = vmul.f32 %v3098_v7, %v2808_v0  ;;  %v3286_v23 = vsel %vm472_vm0, %v488_v53, %v489_v5  ;;  %v3289_v28 = vsel %vm472_vm0, %v489_v5, 0.0 }
  0x43   : > { %2568 = vmatmul.msk.bf16.gmra.mxu0 %vm783_vm1, %v3274_v3  ;;  %v394_v30 = vadd.f32 %v3108_v14, %v358_v13  ;;  %v2760_v31 = vunpack.c.l.bf16 %v2818_v2  ;;  %v679_v33 = vrot.slane %v3286_v23, 1  ;;  %v681_v35 = vrot.slane %v3289_v28, 1 }
  0x44   : > { %v395_v36 = vadd.f32 %v3108_v14, %v359_v16  ;;  %v367_v38 = vmul.f32 %v3098_v7, %v2809_v21  ;;  %v402_v40 = vadd.f32 %v3108_v14, %v366_v22  ;;  %v2761_v41 = vunpack.c.h.bf16 %v2818_v2 }
  0x45   : > { %v426_v39 = vmax.f32 %v394_v30, 0.0  ;;  %v342_v43 = vmul.f32 %v3098_v7, %v2760_v31  ;;  %v680_v46 = vsel %vm650_vm2, %v678_v15, %v679_v33  ;;  %v682_v47 = vsel %vm650_vm2, %v679_v33, %v681_v35 }
  0x46   : > { %v427_v48 = vmax.f32 %v395_v36, 0.0  ;;  %v403_v49 = vadd.f32 %v3108_v14, %v367_v38  ;;  %v434_v53 = vmax.f32 %v402_v40, 0.0  ;;  %v343_v58 = vmul.f32 %v3098_v7, %v2761_v41 }
  0x47   : > { %v500_v52 = vrot.slane %v426_v39, 7  ;;  %v3303_v59 = vpack.c.bf16 %v682_v47, %v680_v46  ;;  %v378_v0 = vadd.f32 %v3108_v14, %v342_v43  ;;  %v2780_v15 = vunpack.c.l.bf16 %v2823_v50 }
  0x48   : > { %v501_v60 = vrot.slane %v427_v48, 7  ;;  %v435_v63 = vmax.f32 %v403_v49, 0.0  ;;  %v512_v5 = vrot.slane %v434_v53, 7  ;;  %v379_v13 = vadd.f32 %v3108_v14, %v343_v58  ;;  %v2827_v49 = vld [vmem:[%s3093_s29 + $0x50] sm:$0xff]  }
  0x49   : > { %4360 = vst [vmem:[#allocation14_spill] sm:$0xff] %v3303_v59  ;;  %v3307_v2 = vsel %vm472_vm0, 0.0, %v500_v52  ;;  %v2781_v36 = vunpack.c.h.bf16 %v2823_v50  ;;  %v410_v41 = vmax.f32 %v378_v0, 0.0 }
  0x4a   : > { %v3311_v16 = vsel %vm472_vm0, %v500_v52, %v501_v60  ;;  %v3314_v21 = vsel %vm472_vm0, %v501_v60, 0.0  ;;  %v698_v22 = vrot.slane %v3307_v2, 1  ;;  %v513_v30 = vrot.slane %v435_v63, 7 }
  0x4b   : > { %v699_v31 = vrot.slane %v3311_v16, 1  ;;  %v701_v33 = vrot.slane %v3314_v21, 1  ;;  %v3320_v35 = vsel %vm472_vm0, 0.0, %v512_v5  ;;  %v411_v52 = vmax.f32 %v379_v13, 0.0 }
  0x4c   : > { %4361 = vst [vmem:[#allocation15_spill] sm:$0xff] %v3320_v35  ;;  %v3325_v38 = vsel %vm472_vm0, %v512_v5, %v513_v30  ;;  %v3328_v39 = vsel %vm472_vm0, %v513_v30, 0.0  ;;  %v718_v40 = vrot.slane %v3320_v35, 1  ;;  %v476_v53 = vrot.slane %v410_v41, 7  ;;  %v2831_v5 = vld [vmem:[%s3093_s29 + $0x70] sm:$0xff]  }
  0x4d   : > { %2573 = vmatmul.msk.bf16.gmra.mxu1 %vm783_vm1, %v3303_v59  ;;  %4362 = vst [vmem:[#allocation16_spill] sm:$0xff] %v3325_v38  ;;  %v700_v43 = vsel %vm650_vm2, %v698_v22, %v699_v31  ;;  %v702_v46 = vsel %vm650_vm2, %v699_v31, %v701_v33  ;;  %v719_v47 = vrot.slane %v3325_v38, 1  ;;  %v721_v48 = vrot.slane %v3328_v39, 1 }
  0x4e   : > { %4363 = vst [vmem:[#allocation17_spill] sm:$0xff] %v3328_v39  ;;  %v3336_v50 = vpack.c.bf16 %v702_v46, %v700_v43  ;;  %v352_v63 = vmul.f32 %v3098_v7, %v2780_v15  ;;  %v353_v0 = vmul.f32 %v3098_v7, %v2781_v36  ;;  %v477_v30 = vrot.slane %v411_v52, 7 }
  0x4f   : > { %v720_v58 = vsel %vm650_vm2, %v718_v40, %v719_v47  ;;  %v722_v60 = vsel %vm650_vm2, %v719_v47, %v721_v48  ;;  %v3348_v31 = vsel %vm472_vm0, 0.0, %v476_v53  ;;  %v2796_v13 = vunpack.c.l.bf16 %v2827_v49 }
  0x50   : > { %2577 = vmatmul.msk.bf16.gmra.mxu2 %vm783_vm1, %v3336_v50  ;;  %v3345_v22 = vpack.c.bf16 %v722_v60, %v720_v58  ;;  %v658_v33 = vrot.slane %v3348_v31, 1  ;;  %v388_v40 = vadd.f32 %v3108_v14, %v352_v63  ;;  %v389_v41 = vadd.f32 %v3108_v14, %v353_v0 }
  0x51   : > { %v2797_v15 = vunpack.c.h.bf16 %v2827_v49  ;;  %v3356_v36 = vsel %vm472_vm0, %v476_v53, %v477_v30  ;;  %v3359_v43 = vsel %vm472_vm0, %v477_v30, 0.0  ;;  %v360_v46 = vmul.f32 %v3098_v7, %v2796_v13 }
  0x52   : > { %4364 = vst [vmem:[#allocation18_spill] sm:$0xff] %v3345_v22  ;;  %2581 = vmatmul.msk.bf16.gmra.mxu3 %vm783_vm1, %v3345_v22  ;;  %v2812_v47 = vunpack.c.l.bf16 %v2831_v5  ;;  %v659_v48 = vrot.slane %v3356_v36, 1  ;;  %v661_v52 = vrot.slane %v3359_v43, 1  ;;  %v420_v58 = vmax.f32 %v388_v40, 0.0  ;;  %v2751_v22 = vld [vmem:[%s4306_s3 + $0x30] sm:$0xff] }
  0x53   : > { %v421_v60 = vmax.f32 %v389_v41, 0.0  ;;  %v361_v49 = vmul.f32 %v3098_v7, %v2797_v15  ;;  %v396_v63 = vadd.f32 %v3108_v14, %v360_v46  ;;  %v2813_v0 = vunpack.c.h.bf16 %v2831_v5  ;;  %v2819_v5 = vld [vmem:[%s3093_s29 + $0x10] sm:$0xff]   ;;  %1796 = vmatpush.bf16.msra.mxu2 %v2751_v22 }
  0x54   : > { %v368_v53 = vmul.f32 %v3098_v7, %v2812_v47  ;;  %v660_v30 = vsel %vm650_vm2, %v658_v33, %v659_v48  ;;  %v662_v4 = vsel %vm650_vm2, %v659_v48, %v661_v52  ;;  %v491_v13 = vrot.slane %v420_v58, 7 }
  0x55   : > { %v492_v8 = vrot.slane %v421_v60, 7  ;;  %v3372_v39 = vpack.c.bf16 %v662_v4, %v660_v30  ;;  %v397_v40 = vadd.f32 %v3108_v14, %v361_v49  ;;  %v428_v41 = vmax.f32 %v396_v63, 0.0 }
  0x56   : > { %v369_v15 = vmul.f32 %v3098_v7, %v2813_v0  ;;  %v3381_v33 = vsel %vm472_vm0, 0.0, %v491_v13  ;;  %v404_v48 = vadd.f32 %v3108_v14, %v368_v53  ;;  %v2764_v30 = vunpack.c.l.bf16 %v2819_v5 }
  0x57   : > { %v3378_v46 = vsel %vm472_vm0, %v491_v13, %v492_v8  ;;  %v3384_v47 = vsel %vm472_vm0, %v492_v8, 0.0  ;;  %2569 = vmatmul.msk.bf16.gmra.mxu0 %vm783_vm1, %v3372_v39  ;;  %v683_v4 = vrot.slane %v3381_v33, 1  ;;  %v429_v60 = vmax.f32 %v397_v40, 0.0 }
  0x58   : > { %v684_v52 = vrot.slane %v3378_v46, 1  ;;  %v686_v58 = vrot.slane %v3384_v47, 1  ;;  %v503_v49 = vrot.slane %v428_v41, 7  ;;  %v405_v63 = vadd.f32 %v3108_v14, %v369_v15 }
  0x59   : > { %v436_v0 = vmax.f32 %v404_v48, 0.0  ;;  %v504_v22 = vrot.slane %v429_v60, 7  ;;  %v2765_v13 = vunpack.c.h.bf16 %v2819_v5  ;;  %v344_v48 = vmul.f32 %v3098_v7, %v2764_v30  ;;  %v2750_v60 = vld [vmem:[%s4306_s3 + $0x28] sm:$0xff]  ;;  %v2753_v30 = vld [vmem:[%s4306_s3 + $0x40] sm:$0xff] }
  0x5a   : > { %v685_v8 = vsel %vm650_vm2, %v683_v4, %v684_v52  ;;  %v687_v53 = vsel %vm650_vm2, %v684_v52, %v686_v58  ;;  %v3398_v35 = vsel %vm472_vm0, 0.0, %v503_v49  ;;  %v437_v51 = vmax.f32 %v405_v63, 0.0  ;;  %v2752_v58 = vld [vmem:[%s4306_s3 + $0x38] sm:$0xff]  ;;  %1667 = vmatpush.bf16.msra.mxu1 %v2750_v60  ;;  %2054 = vmatpush.bf16.msra.mxu0 %v2753_v30 }
  0x5b   : > { %v3395_v38 = vpack.c.bf16 %v687_v53, %v685_v8  ;;  %v515_v34 = vrot.slane %v436_v0, 7  ;;  %v3401_v40 = vsel %vm472_vm0, %v503_v49, %v504_v22  ;;  %v3404_v41 = vsel %vm472_vm0, %v504_v22, 0.0  ;;  %1925 = vmatpush.bf16.msra.mxu3 %v2752_v58 }
  0x5c   : > { %v703_v15 = vrot.slane %v3398_v35, 1  ;;  %v704_v5 = vrot.slane %v3401_v40, 1  ;;  %v706_v4 = vrot.slane %v3404_v41, 1  ;;  %v516_v52 = vrot.slane %v437_v51, 7 }
  0x5d   : > { %4365 = vst [vmem:[#allocation19_spill] sm:$0xff] %v3395_v38  ;;  %2574 = vmatmul.msk.bf16.gmra.mxu1 %vm783_vm1, %v3395_v38  ;;  %v3419_v49 = vsel %vm472_vm0, 0.0, %v515_v34  ;;  %v345_v63 = vmul.f32 %v3098_v7, %v2765_v13  ;;  %v380_v0 = vadd.f32 %v3108_v14, %v344_v48 }
  0x5e   : > { %v705_v51 = vsel %vm650_vm2, %v703_v15, %v704_v5  ;;  %v707_v8 = vsel %vm650_vm2, %v704_v5, %v706_v4  ;;  %v3429_v53 = vsel %vm472_vm0, %v515_v34, %v516_v52  ;;  %v3432_v22 = vsel %vm472_vm0, %v516_v52, 0.0 }
  0x5f   : > { %4366 = vst [vmem:[#allocation20_spill] sm:$0xff] %v3429_v53  ;;  %v3434_v29 = vpack.c.bf16 %v707_v8, %v705_v51  ;;  %v723_v7 = vrot.slane %v3419_v49, 1  ;;  %v724_v13 = vrot.slane %v3429_v53, 1  ;;  %v726_v48 = vrot.slane %v3432_v22, 1 }
  0x60   : > { %4367 = vst [vmem:[#allocation21_spill] sm:$0xff] %v3432_v22  ;;  %v381_v15 = vadd.f32 %v3108_v14, %v345_v63  ;;  %v412_v5 = vmax.f32 %v380_v0, 0.0 }
  0x61   : > { %2578 = vmatmul.msk.bf16.gmra.mxu2 %vm783_vm1, %v3434_v29  ;;  %v725_v34 = vsel %vm650_vm2, %v723_v7, %v724_v13  ;;  %v727_v4 = vsel %vm650_vm2, %v724_v13, %v726_v48  ;;  %v4368_v7 = vmov 0.0  }
  0x62   : > { %v3444_v52 = vpack.c.bf16 %v727_v4, %v725_v34  ;;  %v413_v58 = vmax.f32 %v381_v15, 0.0  ;;  %v479_v60 = vrot.slane %v412_v5, 7  ;;  %v1065_v53 = vrot.slane %v4368_v7, 2 }
  0x63   : > { %v4327_v5 = vmov 0.0|0.0   ;;  %v602_v4 = vpack.c.bf16 %v3243_v37, %v3255_v44 }
  0x64   : > { %2582 = vmatmul.msk.bf16.gmra.mxu3 %vm783_vm1, %v3444_v52  ;;  %v480_v51 = vrot.slane %v413_v58, 7  ;;  %v571_v30 = vsel %vm472_vm0, 0.0, %v479_v60  ;;  %v3459_v34 = vpack.c.bf16 %v1065_v53, %v1065_v53  ;;  %v1068_v58 = vrot.slane %v3243_v37, 2 }
  0x65   : > { %v663_v8 = vrot.slane %v571_v30, 1  ;;  %v1072_v37 = vrot.slane %v3348_v31, 2 }
  0x66   : > { %v481_v14 = vsel %vm472_vm0, %v479_v60, %v480_v51  ;;  %v587_v63 = vsel %vm472_vm0, %v480_v51, 0.0  ;;  %4369 = vst [vmem:[#allocation22_spill] sm:$0xff] %v3459_v34  ;;  %v1070_v60 = vrot.slane %v3258_v45, 2  ;;  %v1075_v45 = vrot.slane %v3359_v43, 2 }
  0x67   : > { %v664_v0 = vrot.slane %v481_v14, 1  ;;  %v666_v22 = vrot.slane %v587_v63, 1  ;;  %v1080_v43 = vrot.slane %v587_v63, 2  ;;  %v1085_v63 = vrot.slane %v3136_v56, 2 }
  0x68   : > { %v1071_v53 = vsel %vm1064_vm3, %v1068_v58, %v1070_v60  ;;  %v3511_v60 = vpack.c.bf16 %v3130_v54, %v3133_v55 }
  0x69   : > { %v665_v13 = vsel %vm650_vm2, %v663_v8, %v664_v0  ;;  %v667_v48 = vsel %vm650_vm2, %v664_v0, %v666_v22  ;;  %v1067_v22 = vrot.slane %v3255_v44, 2  ;;  %v3478_v0 = vpack.c.bf16 %v3356_v36, %v3348_v31 }
  0x6a   : > { %v3454_v15 = vpack.c.bf16 %v667_v48, %v665_v13  ;;  %v1073_v44 = vrot.slane %v3356_v36, 2  ;;  %v3495_v48 = vpack.c.bf16 %v481_v14, %v571_v30  ;;  %v1077_v31 = vrot.slane %v571_v30, 2 }
  0x6b   : > { %v1069_v51 = vsel %vm1064_vm3, %v1067_v22, %v1068_v58  ;;  %v1078_v36 = vrot.slane %v481_v14, 2  ;;  %v1082_v30 = vrot.slane %v3133_v55, 2  ;;  %v1083_v14 = vrot.slane %v3130_v54, 2 }
  0x6c   : > { %2570 = vmatmul.msk.bf16.gmra.mxu0 %vm783_vm1, %v3454_v15  ;;  %v3474_v8 = vpack.c.bf16 %v1071_v53, %v1069_v51  ;;  %v1076_v7 = vsel %vm1064_vm3, %v1073_v44, %v1075_v45  ;;  %v3534_v54 = vpack.c.bf16 %v3177_v19, %v3180_v20 }
  0x6d   : > { %983 = vmatmul.bf16.vlgmr.msrb.gmra.mxu1 %v4327_v5  ;;  %v1081_v22 = vsel %vm1064_vm3, %v1078_v36, %v1080_v43  ;;  %v1084_v53 = vsel %vm1064_vm3, %v1082_v30, %v1083_v14 }
  0x6e   : > { %4371 = vst [vmem:[#allocation24_spill] sm:$0xff] %v3534_v54 }
  0x71   : > { %2606 = vmatmul.msk.bf16.vlgmr.msrb.gmra.mxu2 %vm783_vm1, %v3459_v34 }
  0x74   : > { %2626 = vmatmul.msk.bf16.vlgmr.msrb.gmra.mxu3 %vm783_vm1, %v602_v4 }
  0x7c   : > { %2646 = vmatmul.msk.bf16.vlgmr.msrb.gmra.mxu0 %vm783_vm1, %v3274_v3  ;;  %v1074_v3 = vsel %vm1064_vm3, %v1072_v37, %v1073_v44  ;;  %v1086_v37 = vsel %vm1064_vm3, %v1083_v14, %v1085_v63 }
  0x7d   : > { %2587 = vmatmul.msk.bf16.gmra.mxu1 %vm783_vm1, %v602_v4  ;;  %v3493_v13 = vpack.c.bf16 %v1076_v7, %v1074_v3  ;;  %v1079_v4 = vsel %vm1064_vm3, %v1077_v31, %v1078_v36  ;;  %v3530_v45 = vpack.c.bf16 %v1086_v37, %v1084_v53  ;;  %v1087_v7 = vrot.slane %v3180_v20, 2 }
  0x7e   : > { %v3507_v58 = vpack.c.bf16 %v1081_v22, %v1079_v4  ;;  %v1088_v31 = vrot.slane %v3177_v19, 2  ;;  %v1090_v36 = vrot.slane %v3187_v25, 2  ;;  %v3567_v20 = vpack.c.bf16 %v3286_v23, %v3277_v9 }
  0x7f   : > { %4370 = vst [vmem:[#allocation23_spill] sm:$0xff] %v3530_v45 }
  0x80   : > { %v1089_v14 = vsel %vm1064_vm3, %v1087_v7, %v1088_v31  ;;  %v1091_v63 = vsel %vm1064_vm3, %v1088_v31, %v1090_v36  ;;  %4375 = vst [vmem:[#allocation28_spill] sm:$0xff] %v3567_v20  ;;  %v1092_v31 = vrot.slane %v3277_v9, 2  ;;  %v1093_v36 = vrot.slane %v3286_v23, 2 }
  0x81   : > { %2607 = vmatmul.msk.bf16.gmra.mxu2 %vm783_vm1, %v3474_v8  ;;  %v3563_v19 = vpack.c.bf16 %v1091_v63, %v1089_v14  ;;  %v1095_v14 = vrot.slane %v3289_v28, 2  ;;  %v3602_v23 = vpack.c.bf16 %v3378_v46, %v3381_v33 }
  0x82   : > { %v1094_v34 = vsel %vm1064_vm3, %v1092_v31, %v1093_v36 }
  0x83   : > { %4374 = vst [vmem:[#allocation27_spill] sm:$0xff] %v3563_v19 }
  0x84   : > { %2627 = vmatmul.msk.bf16.gmra.mxu3 %vm783_vm1, %v3478_v0  ;;  %4379 = vst [vmem:[#allocation32_spill] sm:$0xff] %v3602_v23 }
  0x8c   : > { %2647 = vmatmul.msk.bf16.gmra.mxu0 %vm783_vm1, %v3372_v39 }
  0x8d   : > { %2588 = vmatmul.msk.bf16.gmra.mxu1 %vm783_vm1, %v3478_v0 }
  0x91   : > { %2608 = vmatmul.msk.bf16.gmra.mxu2 %vm783_vm1, %v3493_v13 }
  0x94   : > { %2628 = vmatmul.msk.bf16.gmra.mxu3 %vm783_vm1, %v3495_v48 }
  0x99   : > { %v3528_v44 = vpop.f32.mrf.mxu0 }
  0x9c   : > { %2648 = vmatmul.msk.bf16.gmra.mxu0 %vm783_vm1, %v3454_v15 }
  0x9d   : > { %2589 = vmatmul.msk.bf16.gmra.mxu1 %vm783_vm1, %v3495_v48 }
  0xa1   : > { %2609 = vmatmul.msk.bf16.gmra.mxu2 %vm783_vm1, %v3507_v58  ;;  %v3549_v43 = vpop.f32.mrf.mxu0 }
  0xa4   : > { %2629 = vmatmul.msk.bf16.gmra.mxu3 %vm783_vm1, %v3511_v60 }
  0xaa   : > { %v3520_v51 = vpop.f32.mrf.mxu1 }
  0xac   : > { %2649 = vmatmul.msk.bf16.gmra.mxu0 %vm783_vm1, %v3158_v6 }
  0xad   : > { %2590 = vmatmul.msk.bf16.gmra.mxu1 %vm783_vm1, %v3511_v60 }
  0xb1   : > { %v3536_v55 = vpop.f32.mrf.mxu2  ;;  %2610 = vmatmul.msk.bf16.gmra.mxu2 %vm783_vm1, %v3530_v45 }
  0xb2   : > { %v3538_v56 = vpop.f32.mrf.mxu1 }
  0xb4   : > { %v3542_v3 = vpop.f32.mrf.mxu3  ;;  %2630 = vmatmul.msk.bf16.gmra.mxu3 %vm783_vm1, %v3534_v54 }
  0xb5   : > { %4372 = vst [vmem:[#allocation25_spill] sm:$0xff] %v3542_v3 }
  0xb9   : > { %v3551_v4 = vpop.f32.mrf.mxu2 }
  0xba   : > { %v3553_v22 = vpop.f32.mrf.mxu1 }
  0xbc   : > { %v3555_v30 = vpop.f32.mrf.mxu3  ;;  %2650 = vmatmul.msk.bf16.gmra.mxu0 %vm783_vm1, %v3216_v12 }
  0xbd   : > { %4373 = vst [vmem:[#allocation26_spill] sm:$0xff] %v3555_v30  ;;  %2591 = vmatmul.msk.bf16.gmra.mxu1 %vm783_vm1, %v3534_v54  ;;  %v1096_v30 = vsel %vm1064_vm3, %v1093_v36, %v1095_v14 }
  0xbe   : > { %v3598_v9 = vpack.c.bf16 %v1096_v30, %v1094_v34  ;;  %v1097_v34 = vrot.slane %v3381_v33, 2  ;;  %v1098_v30 = vrot.slane %v3378_v46, 2 }
  0xc0   : > { %v3571_v53 = vpop.f32.mrf.mxu0  ;;  %4378 = vst [vmem:[#allocation31_spill] sm:$0xff] %v3598_v9 }
  0xc1   : > { %2611 = vmatmul.msk.bf16.gmra.mxu2 %vm783_vm1, %v3563_v19 }
  0xc2   : > { %v3569_v25 = vpop.f32.mrf.mxu1  ;;  %v3575_v37 = vpop.f32.mrf.mxu2 }
  0xc4   : > { %v3577_v7 = vpop.f32.mrf.mxu3  ;;  %2631 = vmatmul.msk.bf16.gmra.mxu3 %vm783_vm1, %v3567_v20 }
  0xc5   : > { %4376 = vst [vmem:[#allocation29_spill] sm:$0xff] %v3577_v7 }
  0xc8   : > { %v3590_v3 = vpop.f32.mrf.mxu0 }
  0xca   : > { %v3584_v63 = vpop.f32.mrf.mxu1  ;;  %v3586_v5 = vpop.f32.mrf.mxu2 }
  0xcc   : > { %v3592_v7 = vpop.f32.mrf.mxu3  ;;  %2651 = vmatmul.msk.bf16.gmra.mxu0 %vm783_vm1, %v3303_v59 }
  0xcd   : > { %4377 = vst [vmem:[#allocation30_spill] sm:$0xff] %v3592_v7  ;;  %2592 = vmatmul.msk.bf16.gmra.mxu1 %vm783_vm1, %v3567_v20  ;;  %v1100_v7 = vrot.slane %v3384_v47, 2  ;;  %v3637_v47 = vpack.c.bf16 %v3139_v57, %v3145_v61 }
  0xcf   : > { %v1101_v19 = vsel %vm1064_vm3, %v1098_v30, %v1100_v7  ;;  %4384 = vst [vmem:[#allocation37_spill] sm:$0xff] %v3637_v47 }
  0xd1   : > { %2612 = vmatmul.msk.bf16.gmra.mxu2 %vm783_vm1, %v3598_v9  ;;  %v1099_v9 = vsel %vm1064_vm3, %v1097_v34, %v1098_v30  ;;  %v1105_v30 = vrot.slane %v3148_v62, 2  ;;  %v3668_v62 = vpack.c.bf16 %v3223_v24, %v3219_v17 }
  0xd2   : > { %v3604_v28 = vpop.f32.mrf.mxu1  ;;  %v3631_v33 = vpack.c.bf16 %v1101_v19, %v1099_v9  ;;  %v1102_v19 = vrot.slane %v3145_v61, 2  ;;  %v1103_v9 = vrot.slane %v3139_v57, 2 }
  0xd3   : > { %v3608_v31 = vpop.f32.mrf.mxu2 }
  0xd4   : > { %2632 = vmatmul.msk.bf16.gmra.mxu3 %vm783_vm1, %v3602_v23  ;;  %v3614_v14 = vpop.f32.mrf.mxu0  ;;  %4383 = vst [vmem:[#allocation36_spill] sm:$0xff] %v3631_v33  ;;  %v1106_v12 = vsel %vm1064_vm3, %v1103_v9, %v1105_v30 }
  0xd5   : > { %v3612_v36 = vpop.f32.mrf.mxu3 }
  0xd6   : > { %4380 = vst [vmem:[#allocation33_spill] sm:$0xff] %v3612_v36 }
  0xda   : > { %v3619_v59 = vpop.f32.mrf.mxu1 }
  0xdb   : > { %v3621_v20 = vpop.f32.mrf.mxu2 }
  0xdc   : > { %4381 = vst [vmem:[#allocation34_spill] sm:$0xff] %v3621_v20  ;;  %2652 = vmatmul.msk.bf16.gmra.mxu0 %vm783_vm1, %v3395_v38  ;;  %v3633_v46 = vpop.f32.mrf.mxu0 }
  0xdd   : > { %2593 = vmatmul.msk.bf16.gmra.mxu1 %vm783_vm1, %v3602_v23  ;;  %v3629_v36 = vpop.f32.mrf.mxu3 }
  0xde   : > { %4382 = vst [vmem:[#allocation35_spill] sm:$0xff] %v3629_v36 }
  0xe1   : > { %2613 = vmatmul.msk.bf16.gmra.mxu2 %vm783_vm1, %v3631_v33  ;;  %v1104_v33 = vsel %vm1064_vm3, %v1102_v19, %v1103_v9 }
  0xe2   : > { %v3641_v7 = vpop.f32.mrf.mxu1  ;;  %v3662_v61 = vpack.c.bf16 %v1106_v12, %v1104_v33 }
  0xe4   : > { %2633 = vmatmul.msk.bf16.gmra.mxu3 %vm783_vm1, %v3637_v47  ;;  %v3645_v34 = vpop.f32.mrf.mxu2  ;;  %4388 = vst [vmem:[#allocation41_spill] sm:$0xff] %v3662_v61 }
  0xe5   : > { %4385 = vst [vmem:[#allocation38_spill] sm:$0xff] %v3645_v34 }
  0xe7   : > { %v3650_v36 = vpop.f32.mrf.mxu3 }
  0xe8   : > { %4386 = vst [vmem:[#allocation39_spill] sm:$0xff] %v3650_v36 }
  0xe9   : > { %v3652_v38 = vpop.f32.mrf.mxu0 }
  0xea   : > { %v984_v23 = vpop.f32.mrf.mxu1 }
  0xeb   : > { %v985_v9 = vadd.f32 %v984_v23, %v3528_v44 }
  0xec   : > { %2653 = vmatmul.msk.bf16.gmra.mxu0 %vm783_vm1, %v3174_v18  ;;  %v3658_v54 = vpop.f32.mrf.mxu2  ;;  %v1107_v18 = vrot.slane %v3219_v17, 2 }
  0xed   : > { %4387 = vst [vmem:[#allocation40_spill] sm:$0xff] %v3658_v54  ;;  %2594 = vmatmul.msk.bf16.gmra.mxu1 %vm783_vm1, %v3637_v47  ;;  %v1108_v47 = vrot.slane %v3223_v24, 2 }
  0xef   : > { %v3664_v57 = vpop.f32.mrf.mxu3 }
  0xf0   : > { %4389 = vst [vmem:[#allocation42_spill] sm:$0xff] %v3664_v57  ;;  %v1110_v57 = vrot.slane %v3226_v26, 2 }
  0xf1   : > { %v3670_v36 = vpop.f32.mrf.mxu0  ;;  %2614 = vmatmul.msk.bf16.gmra.mxu2 %vm783_vm1, %v3662_v61 }
  0xf2   : > { %v986_v30 = vpop.f32.mrf.mxu1  ;;  %v1111_v44 = vsel %vm1064_vm3, %v1108_v47, %v1110_v57 }
  0xf3   : > { %v987_v19 = vadd.f32 %v986_v30, %v3549_v43  ;;  %v1109_v43 = vsel %vm1064_vm3, %v1107_v18, %v1108_v47 }
  0xf4   : > { %2634 = vmatmul.msk.bf16.gmra.mxu3 %vm783_vm1, %v3668_v62  ;;  %v1254_v12 = vpop.f32.mrf.mxu2  ;;  %v3690_v24 = vpack.c.bf16 %v1111_v44, %v1109_v43 }
  0xf5   : > { %v1334_v33 = vadd.f32 %v1254_v12, %v985_v9  ;;  %v1112_v9 = vrot.slane %v3307_v2, 2  ;;  %v1113_v12 = vrot.slane %v3311_v16, 2 }
  0xf7   : > { %v1387_v54 = vpop.f32.mrf.mxu3 }
  0xf8   : > { %v1467_v34 = vadd.f32 %v1387_v54, %v1334_v33 }
  0xf9   : > { %v1529_v45 = vpop.f32.mrf.mxu0 }
  0xfa   : > { %v989_v61 = vpop.f32.mrf.mxu1  ;;  %v3684_v23 = vadd.f32 %v1529_v45, %v1467_v34 }
  0xfb   : > { %v990_v20 = vadd.f32 %v989_v61, %v3571_v53  ;;  %v3694_v53 = vpack.c.bf16 %v3311_v16, %v3307_v2 }
  0xfc   : > { %2654 = vmatmul.msk.bf16.gmra.mxu0 %vm783_vm1, %v3251_v42  ;;  %v1256_v26 = vpop.f32.mrf.mxu2 }
  0xfd   : > { %2595 = vmatmul.msk.bf16.gmra.mxu1 %vm783_vm1, %v3668_v62  ;;  %v1335_v17 = vadd.f32 %v1256_v26, %v987_v19  ;;  %v1115_v19 = vrot.slane %v3314_v21, 2 }
  0xff   : > { %v1389_v54 = vpop.f32.mrf.mxu3 }
 0x100   : > { %v1468_v30 = vadd.f32 %v1389_v54, %v1335_v17  ;;  %v1116_v54 = vsel %vm1064_vm3, %v1113_v12, %v1115_v19 }
 0x101   : > { %v1531_v18 = vpop.f32.mrf.mxu0  ;;  %2615 = vmatmul.msk.bf16.gmra.mxu2 %vm783_vm1, %v3690_v24 }
 0x102   : > { %v991_v45 = vpop.f32.mrf.mxu1  ;;  %v3699_v34 = vadd.f32 %v1531_v18, %v1468_v30 }
 0x103   : > { %v992_v47 = vadd.f32 %v991_v45, %v3590_v3  ;;  %v1114_v3 = vsel %vm1064_vm3, %v1112_v9, %v1113_v12  ;;  %v1120_v12 = vrot.slane %v3404_v41, 2 }
 0x104   : > { %2635 = vmatmul.msk.bf16.gmra.mxu3 %vm783_vm1, %v3694_v53  ;;  %v1259_v61 = vpop.f32.mrf.mxu2  ;;  %v3715_v16 = vpack.c.bf16 %v1116_v54, %v1114_v3 }
 0x105   : > { %v1336_v57 = vadd.f32 %v1259_v61, %v990_v20 }
 0x107   : > { %v1392_v33 = vpop.f32.mrf.mxu3 }
 0x108   : > { %v1469_v43 = vadd.f32 %v1392_v33, %v1336_v57  ;;  %v1117_v33 = vrot.slane %v3398_v35, 2 }
 0x109   : > { %v1534_v44 = vpop.f32.mrf.mxu0 }
 0x10a   : > { %v994_v26 = vpop.f32.mrf.mxu1  ;;  %v3709_v30 = vadd.f32 %v1534_v44, %v1469_v43  ;;  %v1118_v43 = vrot.slane %v3401_v40, 2 }
 0x10b   : > { %v995_v17 = vadd.f32 %v994_v26, %v3614_v14  ;;  %v3719_v14 = vpack.c.bf16 %v3401_v40, %v3398_v35 }
 0x10c   : > { %2655 = vmatmul.msk.bf16.gmra.mxu0 %vm783_vm1, %v3336_v50  ;;  %v1261_v21 = vpop.f32.mrf.mxu2 }
 0x10d   : > { %2596 = vmatmul.msk.bf16.gmra.mxu1 %vm783_vm1, %v3694_v53  ;;  %v1337_v2 = vadd.f32 %v1261_v21, %v992_v47 }
 0x10f   : > { %v1394_v20 = vpop.f32.mrf.mxu3 }
 0x110   : > { %v1470_v18 = vadd.f32 %v1394_v20, %v1337_v2  ;;  %v1121_v2 = vsel %vm1064_vm3, %v1118_v43, %v1120_v12 }
 0x111   : > { %v1536_v45 = vpop.f32.mrf.mxu0  ;;  %2616 = vmatmul.msk.bf16.gmra.mxu2 %vm783_vm1, %v3715_v16 }
 0x112   : > { %v996_v61 = vpop.f32.mrf.mxu1  ;;  %v3724_v19 = vadd.f32 %v1536_v45, %v1470_v18 }
 0x113   : > { %v997_v57 = vadd.f32 %v996_v61, %v3633_v46  ;;  %v1119_v46 = vsel %vm1064_vm3, %v1117_v33, %v1118_v43  ;;  %v1125_v33 = vrot.slane %v3165_v11, 2  ;;  %v1122_v43 = vrot.slane %v3162_v10, 2 }
 0x114   : > { %2636 = vmatmul.msk.bf16.gmra.mxu3 %vm783_vm1, %v3719_v14  ;;  %v1264_v47 = vpop.f32.mrf.mxu2  ;;  %v3740_v40 = vpack.c.bf16 %v1121_v2, %v1119_v46 }
 0x115   : > { %v1338_v9 = vadd.f32 %v1264_v47, %v995_v17 }
 0x117   : > { %v1397_v44 = vpop.f32.mrf.mxu3 }
 0x118   : > { %v1471_v26 = vadd.f32 %v1397_v44, %v1338_v9  ;;  %v1123_v44 = vrot.slane %v3153_v1, 2 }
 0x119   : > { %v1539_v3 = vpop.f32.mrf.mxu0 }
 0x11a   : > { %v999_v54 = vpop.f32.mrf.mxu1  ;;  %v3734_v20 = vadd.f32 %v1539_v3, %v1471_v26  ;;  %v1124_v2 = vsel %vm1064_vm3, %v1122_v43, %v1123_v44  ;;  %v4391_v43 = vld [vmem:[#allocation12_spill] sm:$0xff] }
 0x11b   : > { %v1000_v21 = vadd.f32 %v999_v54, %v3652_v38  ;;  %v3744_v38 = vpack.c.bf16 %v3153_v1, %v3162_v10 }
 0x11c   : > { %2656 = vmatmul.msk.bf16.gmra.mxu0 %vm783_vm1, %v3434_v29  ;;  %v1266_v41 = vpop.f32.mrf.mxu2 }
 0x11d   : > { %2597 = vmatmul.msk.bf16.gmra.mxu1 %vm783_vm1, %v3719_v14  ;;  %v1339_v35 = vadd.f32 %v1266_v41, %v997_v57 }
 0x11f   : > { %v1399_v17 = vpop.f32.mrf.mxu3 }
 0x120   : > { %v1472_v18 = vadd.f32 %v1399_v17, %v1339_v35  ;;  %v4390_v17 = vld [vmem:[#allocation11_spill] sm:$0xff] }
 0x121   : > { %v1541_v45 = vpop.f32.mrf.mxu0  ;;  %2617 = vmatmul.msk.bf16.gmra.mxu2 %vm783_vm1, %v3740_v40 }
 0x122   : > { %v1001_v61 = vpop.f32.mrf.mxu1  ;;  %v3749_v9 = vadd.f32 %v1541_v45, %v1472_v18  ;;  %v3768_v18 = vpack.c.bf16 %v4390_v17, %v3235_v32 }
 0x123   : > { %v1002_v47 = vadd.f32 %v1001_v61, %v3670_v36  ;;  %v1126_v36 = vsel %vm1064_vm3, %v1123_v44, %v1125_v33  ;;  %v1130_v44 = vrot.slane %v4391_v43, 2  ;;  %v4396_v43 = vld [vmem:[#allocation16_spill] sm:$0xff] }
 0x124   : > { %2637 = vmatmul.msk.bf16.gmra.mxu3 %vm783_vm1, %v3744_v38  ;;  %v1269_v57 = vpop.f32.mrf.mxu2  ;;  %v3764_v11 = vpack.c.bf16 %v1126_v36, %v1124_v2 }
 0x125   : > { %v1340_v12 = vadd.f32 %v1269_v57, %v1000_v21 }
 0x127   : > { %v1402_v26 = vpop.f32.mrf.mxu3 }
 0x128   : > { %v1473_v3 = vadd.f32 %v1402_v26, %v1340_v12  ;;  %v1127_v26 = vrot.slane %v3235_v32, 2 }
 0x129   : > { %v1544_v54 = vpop.f32.mrf.mxu0 }
 0x12a   : > { %v1004_v46 = vpop.f32.mrf.mxu1  ;;  %v3758_v41 = vadd.f32 %v1544_v54, %v1473_v3  ;;  %v1128_v3 = vrot.slane %v4390_v17, 2 }
 0x12b   : > { %v1005_v12 = vadd.f32 %v1004_v46, %v3520_v51 }
 0x12c   : > { %2657 = vmatmul.msk.bf16.gmra.mxu0 %vm783_vm1, %v3192_v27  ;;  %v1271_v21 = vpop.f32.mrf.mxu2 }
 0x12d   : > { %2598 = vmatmul.msk.bf16.gmra.mxu1 %vm783_vm1, %v3744_v38  ;;  %v1341_v10 = vadd.f32 %v1271_v21, %v1002_v47 }
 0x12f   : > { %v1404_v1 = vpop.f32.mrf.mxu3 }
 0x130   : > { %v1474_v35 = vadd.f32 %v1404_v1, %v1341_v10  ;;  %v1129_v10 = vsel %vm1064_vm3, %v1127_v26, %v1128_v3  ;;  %v1131_v1 = vsel %vm1064_vm3, %v1128_v3, %v1130_v44 }
 0x131   : > { %v1546_v45 = vpop.f32.mrf.mxu0  ;;  %2618 = vmatmul.msk.bf16.gmra.mxu2 %vm783_vm1, %v3764_v11  ;;  %v3789_v17 = vpack.c.bf16 %v1131_v1, %v1129_v10 }
 0x132   : > { %v1006_v61 = vpop.f32.mrf.mxu1  ;;  %v3772_v57 = vadd.f32 %v1546_v45, %v1474_v35  ;;  %v4393_v35 = vld [vmem:[#allocation13_spill] sm:$0xff] }
 0x133   : > { %v1007_v46 = vadd.f32 %v1006_v61, %v3538_v56  ;;  %4394 = vst [vmem:[#allocation12_spill] sm:$0xff] %v3789_v17 }
 0x134   : > { %2638 = vmatmul.msk.bf16.gmra.mxu3 %vm783_vm1, %v3768_v18  ;;  %v1274_v47 = vpop.f32.mrf.mxu2 }
 0x135   : > { %v1342_v33 = vadd.f32 %v1274_v47, %v1005_v12 }
 0x137   : > { %v1407_v54 = vpop.f32.mrf.mxu3 }
 0x138   : > { %v1475_v2 = vadd.f32 %v1407_v54, %v1342_v33  ;;  %v4395_v33 = vld [vmem:[#allocation15_spill] sm:$0xff] }
 0x139   : > { %v1549_v36 = vpop.f32.mrf.mxu0  ;;  %v3793_v44 = vpack.c.bf16 %v4396_v43, %v4395_v33  ;;  %v1132_v1 = vrot.slane %v4395_v33, 2 }
 0x13a   : > { %v1009_v21 = vpop.f32.mrf.mxu1  ;;  %v3782_v51 = vadd.f32 %v1549_v36, %v1475_v2  ;;  %v4399_v36 = vld [vmem:[#allocation17_spill] sm:$0xff] }
 0x13b   : > { %4397 = vst [vmem:[#allocation13_spill] sm:$0xff] %v3793_v44  ;;  %v1010_v3 = vadd.f32 %v1009_v21, %v3553_v22  ;;  %v1135_v10 = vrot.slane %v4399_v36, 2  ;;  %v2884_v36 = vld [vmem:[%s4304_s1] ss:$0 sm:$0xff] }
 0x13c   : > { %4392 = vst [vmem:[#allocation11_spill] sm:$0xff] %v3782_v51  ;;  %2658 = vmatmul.msk.bf16.gmra.mxu0 %vm783_vm1, %v4393_v35  ;;  %v1276_v45 = vpop.f32.mrf.mxu2 }
 0x13d   : > { %2599 = vmatmul.msk.bf16.gmra.mxu1 %vm783_vm1, %v3768_v18  ;;  %v1343_v32 = vadd.f32 %v1276_v45, %v1007_v46  ;;  %v1133_v46 = vrot.slane %v4396_v43, 2  ;;  %v2832_v45 = vld [vmem:[%s3093_s29 + $0x78] sm:$0xff]   ;;  %s4243_s29 = sshll.u32 %s254_s28, 4  ;;  %s2433_s29 = int_to_ptr.vmem [resolvable:$true] %s4243_s29 }
 0x13f   : > { %v1409_v12 = vpop.f32.mrf.mxu3  ;;  %v1134_v22 = vsel %vm1064_vm3, %v1132_v1, %v1133_v46  ;;  %v1136_v21 = vsel %vm1064_vm3, %v1133_v46, %v1135_v10 }
 0x140   : > { %v1476_v47 = vadd.f32 %v1409_v12, %v1343_v32 }
 0x141   : > { %v1551_v26 = vpop.f32.mrf.mxu0  ;;  %2619 = vmatmul.msk.bf16.gmra.mxu2 %vm783_vm1, %v3789_v17 }
 0x142   : > { %v1011_v56 = vpop.f32.mrf.mxu1  ;;  %v3797_v61 = vadd.f32 %v1551_v26, %v1476_v47  ;;  %v2816_v47 = vunpack.c.l.bf16 %v2832_v45  ;;  %v2817_v26 = vunpack.c.h.bf16 %v2832_v45 }
 0x144   : > { %4398 = vst [vmem:[#allocation15_spill] sm:$0xff] %v3797_v61  ;;  %2639 = vmatmul.msk.bf16.gmra.mxu3 %vm783_vm1, %v3793_v44  ;;  %v1279_v54 = vpop.f32.mrf.mxu2  ;;  %v370_v1 = vmul.f32 %v2884_v36, %v2816_v47  ;;  %v371_v10 = vmul.f32 %v2884_v36, %v2817_v26 }
 0x145   : > { %v1344_v2 = vadd.f32 %v1279_v54, %v1010_v3  ;;  %v1012_v3 = vadd.f32 %v1011_v56, %v3569_v25  ;;  %v4401_v54 = vld [vmem:[#allocation18_spill] sm:$0xff]  ;;  %v4403_v25 = vld [vmem:[#allocation20_spill] sm:$0xff] }
 0x146   : > { %v3822_v56 = vpack.c.bf16 %v4403_v25, %v3419_v49 }
 0x147   : > { %v1412_v32 = vpop.f32.mrf.mxu3 }
 0x148   : > { %v1477_v12 = vadd.f32 %v1412_v32, %v1344_v2  ;;  %v3815_v2 = vpack.c.bf16 %v1136_v21, %v1134_v22 }
 0x149   : > { %v1554_v51 = vpop.f32.mrf.mxu0 }
 0x14a   : > { %v1014_v17 = vpop.f32.mrf.mxu1  ;;  %v3808_v61 = vadd.f32 %v1554_v51, %v1477_v12  ;;  %4402 = vst [vmem:[#allocation17_spill] sm:$0xff] %v3815_v2  ;;  %v2885_v12 = vld [vmem:[%s4305_s2] ss:$0 sm:$0xff] }
 0x14b   : > { %v406_v22 = vadd.f32 %v2885_v12, %v370_v1  ;;  %v407_v21 = vadd.f32 %v2885_v12, %v371_v10  ;;  %v1015_v47 = vadd.f32 %v1014_v17, %v3584_v63 }
 0x14c   : > { %4400 = vst [vmem:[#allocation16_spill] sm:$0xff] %v3808_v61  ;;  %2659 = vmatmul.msk.bf16.gmra.mxu0 %vm783_vm1, %v4401_v54  ;;  %v1281_v33 = vpop.f32.mrf.mxu2  ;;  %v1138_v54 = vrot.slane %v4403_v25, 2 }
 0x14d   : > { %2600 = vmatmul.msk.bf16.gmra.mxu1 %vm783_vm1, %v3793_v44  ;;  %v1345_v43 = vadd.f32 %v1281_v33, %v1012_v3  ;;  %v439_v36 = vmax.f32 %v407_v21, 0.0 }
 0x14f   : > { %v1414_v51 = vpop.f32.mrf.mxu3  ;;  %v519_v12 = vrot.slane %v439_v36, 7 }
 0x150   : > { %v1478_v46 = vadd.f32 %v1414_v51, %v1345_v43  ;;  %v438_v43 = vmax.f32 %v406_v22, 0.0  ;;  %v4405_v51 = vld [vmem:[#allocation21_spill] sm:$0xff] }
 0x151   : > { %v1556_v45 = vpop.f32.mrf.mxu0  ;;  %2620 = vmatmul.msk.bf16.gmra.mxu2 %vm783_vm1, %v3815_v2  ;;  %v1140_v61 = vrot.slane %v4405_v51, 2  ;;  %v1137_v2 = vrot.slane %v3419_v49, 2 }
 0x152   : > { %v1016_v32 = vpop.f32.mrf.mxu1  ;;  %v3829_v3 = vadd.f32 %v1556_v45, %v1478_v46  ;;  %v518_v45 = vrot.slane %v438_v43, 7 }
 0x153   : > { %v1139_v63 = vsel %vm1064_vm3, %v1137_v2, %v1138_v54  ;;  %v1141_v17 = vsel %vm1064_vm3, %v1138_v54, %v1140_v61  ;;  %v1017_v22 = vadd.f32 %v1016_v32, %v3604_v28  ;;  %v3855_v61 = vsel %vm472_vm0, %v519_v12, 0.0 }
 0x154   : > { %4404 = vst [vmem:[#allocation20_spill] sm:$0xff] %v3829_v3  ;;  %2640 = vmatmul.msk.bf16.gmra.mxu3 %vm783_vm1, %v3822_v56  ;;  %v1284_v26 = vpop.f32.mrf.mxu2  ;;  %v3846_v25 = vpack.c.bf16 %v1141_v17, %v1139_v63  ;;  %v3849_v21 = vsel %vm472_vm0, %v518_v45, %v519_v12  ;;  %v3852_v2 = vsel %vm472_vm0, 0.0, %v518_v45  ;;  %v1504_v43 = vrot.slane %v3855_v61, 1 }
 0x155   : > { %v1346_v33 = vadd.f32 %v1284_v26, %v1015_v47  ;;  %v3859_v32 = vpack.c.bf16 %v3849_v21, %v3852_v2  ;;  %v1501_v26 = vrot.slane %v3852_v2, 1 }
 0x157   : > { %v1417_v44 = vpop.f32.mrf.mxu3 }
 0x158   : > { %v1479_v1 = vadd.f32 %v1417_v44, %v1346_v33  ;;  %v1502_v33 = vrot.slane %v3849_v21, 1 }
 0x159   : > { %v1559_v10 = vpop.f32.mrf.mxu0 }
 0x15a   : > { %v1019_v46 = vpop.f32.mrf.mxu1  ;;  %v3839_v3 = vadd.f32 %v1559_v10, %v1479_v1  ;;  %v1503_v45 = vsel %vm650_vm2, %v1501_v26, %v1502_v33  ;;  %v1505_v12 = vsel %vm650_vm2, %v1502_v33, %v1504_v43 }
 0x15b   : > { %v1020_v1 = vadd.f32 %v1019_v46, %v3619_v59 }
 0x15c   : > { %4406 = vst [vmem:[#allocation21_spill] sm:$0xff] %v3839_v3  ;;  %2660 = vmatmul.msk.bf16.gmra.mxu0 %vm783_vm1, %v3444_v52  ;;  %v1286_v49 = vpop.f32.mrf.mxu2 }
 0x15d   : > { %2601 = vmatmul.msk.bf16.gmra.mxu1 %vm783_vm1, %v3822_v56  ;;  %v1347_v44 = vadd.f32 %v1286_v49, %v1017_v22  ;;  %v3873_v22 = vpack.c.bf16 %v1505_v12, %v1503_v45 }
 0x15f   : > { %v1419_v28 = vpop.f32.mrf.mxu3 }
 0x160   : > { %v1480_v54 = vadd.f32 %v1419_v28, %v1347_v44 }
 0x161   : > { %v1561_v47 = vpop.f32.mrf.mxu0  ;;  %2621 = vmatmul.msk.bf16.gmra.mxu2 %vm783_vm1, %v3846_v25 }
 0x162   : > { %v1021_v36 = vpop.f32.mrf.mxu1  ;;  %v3866_v51 = vadd.f32 %v1561_v47, %v1480_v54 }
 0x163   : > { %v1022_v54 = vadd.f32 %v1021_v36, %v3641_v7 }
 0x164   : > { %2641 = vmatmul.msk.bf16.gmra.mxu3 %vm783_vm1, %v3859_v32  ;;  %v1289_v10 = vpop.f32.mrf.mxu2 }
 0x165   : > { %v1348_v63 = vadd.f32 %v1289_v10, %v1020_v1 }
 0x167   : > { %v1422_v17 = vpop.f32.mrf.mxu3 }
 0x168   : > { %v1481_v49 = vadd.f32 %v1422_v17, %v1348_v63 }
 0x169   : > { %v1564_v44 = vpop.f32.mrf.mxu0 }
 0x16a   : > { %v1024_v28 = vpop.f32.mrf.mxu1  ;;  %v3875_v3 = vadd.f32 %v1564_v44, %v1481_v49 }
 0x16b   : > { %v1025_v10 = vadd.f32 %v1024_v28, %v3536_v55 }
 0x16c   : > { %2661 = vmatmul.msk.bf16.gmra.mxu0 %vm783_vm1, %v3873_v22  ;;  %v1291_v59 = vpop.f32.mrf.mxu2 }
 0x16d   : > { %2666 = vmatmul.msk.bf16.vlgmr.msra.gmra.mxu1 %vm783_vm1, %v3474_v8  ;;  %v1349_v46 = vadd.f32 %v1291_v59, %v1022_v54 }
 0x16f   : > { %v1424_v47 = vpop.f32.mrf.mxu3 }
 0x170   : > { %v1482_v26 = vadd.f32 %v1424_v47, %v1349_v46 }
 0x171   : > { %v1566_v33 = vpop.f32.mrf.mxu0  ;;  %2686 = vmatmul.msk.bf16.vlgmr.msra.gmra.mxu2 %vm783_vm1, %v3478_v0 }
 0x172   : > { %v1026_v43 = vpop.f32.mrf.mxu1  ;;  %v3884_v1 = vadd.f32 %v1566_v33, %v1482_v26 }
 0x173   : > { %v1027_v49 = vadd.f32 %v1026_v43, %v3551_v4 }
 0x174   : > { %2705 = vmatmul.msk.bf16.vlgmr.msra.gmra.mxu3 %vm783_vm1, %v3372_v39  ;;  %v1294_v7 = vpop.f32.mrf.mxu2 }
 0x175   : > { %v1350_v36 = vadd.f32 %v1294_v7, %v1025_v10 }
 0x177   : > { %v1427_v45 = vpop.f32.mrf.mxu3 }
 0x178   : > { %v1483_v12 = vadd.f32 %v1427_v45, %v1350_v36 }
 0x179   : > { %v1569_v8 = vpop.f32.mrf.mxu0 }
 0x17a   : > { %v1029_v63 = vpop.f32.mrf.mxu1  ;;  %v3889_v17 = vadd.f32 %v1569_v8, %v1483_v12 }
 0x17b   : > { %v1030_v46 = vadd.f32 %v1029_v63, %v3575_v37 }
 0x17c   : > { %2725 = vmatmul.msk.bf16.vlgmr.msra.gmra.mxu0 %vm783_vm1, %v3493_v13  ;;  %v1296_v0 = vpop.f32.mrf.mxu2 }
 0x17d   : > { %2667 = vmatmul.msk.bf16.gmra.mxu1 %vm783_vm1, %v3493_v13  ;;  %v1351_v55 = vadd.f32 %v1296_v0, %v1027_v49 }
 0x17f   : > { %v1429_v44 = vpop.f32.mrf.mxu3 }
 0x180   : > { %v1484_v39 = vadd.f32 %v1429_v44, %v1351_v55 }
 0x181   : > { %v1571_v28 = vpop.f32.mrf.mxu0  ;;  %2687 = vmatmul.msk.bf16.gmra.mxu2 %vm783_vm1, %v3495_v48 }
 0x182   : > { %v1031_v54 = vpop.f32.mrf.mxu1  ;;  %v3898_v59 = vadd.f32 %v1571_v28, %v1484_v39  ;;  %v4407_v28 = vld [vmem:[#allocation34_spill] sm:$0xff] }
 0x183   : > { %v1032_v7 = vadd.f32 %v1031_v54, %v3586_v5 }
 0x184   : > { %2706 = vmatmul.msk.bf16.gmra.mxu3 %vm783_vm1, %v3454_v15  ;;  %v1299_v4 = vpop.f32.mrf.mxu2 }
 0x185   : > { %v1352_v47 = vadd.f32 %v1299_v4, %v1030_v46  ;;  %v4408_v46 = vld [vmem:[#allocation23_spill] sm:$0xff] }
 0x187   : > { %v1432_v26 = vpop.f32.mrf.mxu3 }
 0x188   : > { %v1485_v33 = vadd.f32 %v1432_v26, %v1352_v47  ;;  %v4409_v26 = vld [vmem:[#allocation24_spill] sm:$0xff] }
 0x189   : > { %v1574_v13 = vpop.f32.mrf.mxu0 }
 0x18a   : > { %v1034_v43 = vpop.f32.mrf.mxu1  ;;  %v3903_v10 = vadd.f32 %v1574_v13, %v1485_v33 }
 0x18b   : > { %v1035_v63 = vadd.f32 %v1034_v43, %v3608_v31  ;;  %v4410_v43 = vld [vmem:[#allocation38_spill] sm:$0xff] }
 0x18c   : > { %2726 = vmatmul.msk.bf16.gmra.mxu0 %vm783_vm1, %v3507_v58  ;;  %v1301_v48 = vpop.f32.mrf.mxu2 }
 0x18d   : > { %2668 = vmatmul.msk.bf16.gmra.mxu1 %vm783_vm1, %v3507_v58  ;;  %v1353_v37 = vadd.f32 %v1301_v48, %v1032_v7  ;;  %v4411_v48 = vld [vmem:[#allocation10_spill] sm:$0xff] }
 0x18f   : > { %v1434_v36 = vpop.f32.mrf.mxu3 }
 0x190   : > { %v1486_v15 = vadd.f32 %v1434_v36, %v1353_v37 }
 0x191   : > { %v1576_v45 = vpop.f32.mrf.mxu0  ;;  %2688 = vmatmul.msk.bf16.gmra.mxu2 %vm783_vm1, %v3511_v60 }
 0x192   : > { %v1036_v12 = vpop.f32.mrf.mxu1  ;;  %v3912_v8 = vadd.f32 %v1576_v45, %v1486_v15 }
 0x193   : > { %v1037_v54 = vadd.f32 %v1036_v12, %v4407_v28 }
 0x194   : > { %2707 = vmatmul.msk.bf16.gmra.mxu3 %vm783_vm1, %v3158_v6  ;;  %v1304_v5 = vpop.f32.mrf.mxu2 }
 0x195   : > { %v1354_v49 = vadd.f32 %v1304_v5, %v1035_v63 }
 0x197   : > { %v1437_v0 = vpop.f32.mrf.mxu3 }
 0x198   : > { %v1487_v55 = vadd.f32 %v1437_v0, %v1354_v49  ;;  %v4412_v49 = vld [vmem:[#allocation40_spill] sm:$0xff] }
 0x199   : > { %v1579_v58 = vpop.f32.mrf.mxu0 }
 0x19a   : > { %v1039_v44 = vpop.f32.mrf.mxu1  ;;  %v3917_v39 = vadd.f32 %v1579_v58, %v1487_v55  ;;  %v4413_v55 = vld [vmem:[#allocation27_spill] sm:$0xff] }
 0x19b   : > { %v1040_v7 = vadd.f32 %v1039_v44, %v4410_v43 }
 0x19c   : > { %2727 = vmatmul.msk.bf16.gmra.mxu0 %vm783_vm1, %v4408_v46  ;;  %v1306_v60 = vpop.f32.mrf.mxu2 }
 0x19d   : > { %2669 = vmatmul.msk.bf16.gmra.mxu1 %vm783_vm1, %v4408_v46  ;;  %v1355_v31 = vadd.f32 %v1306_v60, %v1037_v54  ;;  %v4414_v60 = vld [vmem:[#allocation28_spill] sm:$0xff] }
 0x19f   : > { %v1439_v4 = vpop.f32.mrf.mxu3 }
 0x1a0   : > { %v1488_v6 = vadd.f32 %v1439_v4, %v1355_v31 }
 0x1a1   : > { %v1581_v47 = vpop.f32.mrf.mxu0  ;;  %2689 = vmatmul.msk.bf16.gmra.mxu2 %vm783_vm1, %v4409_v26  ;;  %v4416_v26 = vld [vmem:[#allocation14_spill] sm:$0xff] }
 0x1a2   : > { %v1041_v33 = vpop.f32.mrf.mxu1  ;;  %v3926_v13 = vadd.f32 %v1581_v47, %v1488_v6  ;;  %v4415_v6 = vld [vmem:[#allocation25_spill] sm:$0xff] }
 0x1a3   : > { %v1042_v0 = vadd.f32 %v1041_v33, %v4412_v49  ;;  %v4418_v49 = vld [vmem:[#allocation31_spill] sm:$0xff] }
 0x1a4   : > { %2708 = vmatmul.msk.bf16.gmra.mxu3 %vm783_vm1, %v4411_v48  ;;  %v1309_v37 = vpop.f32.mrf.mxu2 }
 0x1a5   : > { %v1356_v36 = vadd.f32 %v1309_v37, %v1040_v7 }
 0x1a7   : > { %v1442_v15 = vpop.f32.mrf.mxu3 }
 0x1a8   : > { %v1489_v45 = vadd.f32 %v1442_v15, %v1356_v36 }
 0x1a9   : > { %v1584_v12 = vpop.f32.mrf.mxu0 }
 0x1aa   : > { %v1044_v63 = vpop.f32.mrf.mxu1  ;;  %v3931_v5 = vadd.f32 %v1584_v12, %v1489_v45  ;;  %v4417_v45 = vld [vmem:[#allocation26_spill] sm:$0xff] }
 0x1ab   : > { %v1045_v47 = vadd.f32 %v1044_v63, %v4415_v6 }
 0x1ac   : > { %2728 = vmatmul.msk.bf16.gmra.mxu0 %vm783_vm1, %v4413_v55  ;;  %v1311_v58 = vpop.f32.mrf.mxu2 }
 0x1ad   : > { %2670 = vmatmul.msk.bf16.gmra.mxu1 %vm783_vm1, %v4413_v55  ;;  %v1357_v44 = vadd.f32 %v1311_v58, %v1042_v0 }
 0x1af   : > { %v1444_v28 = vpop.f32.mrf.mxu3 }
 0x1b0   : > { %v1490_v54 = vadd.f32 %v1444_v28, %v1357_v44  ;;  %v4419_v28 = vld [vmem:[#allocation32_spill] sm:$0xff] }
 0x1b1   : > { %v1586_v46 = vpop.f32.mrf.mxu0  ;;  %2690 = vmatmul.msk.bf16.gmra.mxu2 %vm783_vm1, %v4414_v60  ;;  %v4420_v60 = vld [vmem:[#allocation29_spill] sm:$0xff] }
 0x1b2   : > { %v1046_v31 = vpop.f32.mrf.mxu1  ;;  %v3940_v4 = vadd.f32 %v1586_v46, %v1490_v54 }
 0x1b3   : > { %v1047_v12 = vadd.f32 %v1046_v31, %v4417_v45  ;;  %v4421_v31 = vld [vmem:[#allocation19_spill] sm:$0xff]  ;;  %v4422_v45 = vld [vmem:[#allocation30_spill] sm:$0xff] }
 0x1b4   : > { %2709 = vmatmul.msk.bf16.gmra.mxu3 %vm783_vm1, %v4416_v26  ;;  %v1314_v33 = vpop.f32.mrf.mxu2 }
 0x1b5   : > { %v1358_v43 = vadd.f32 %v1314_v33, %v1045_v47 }
 0x1b7   : > { %v1447_v7 = vpop.f32.mrf.mxu3 }
 0x1b8   : > { %v1491_v48 = vadd.f32 %v1447_v7, %v1358_v43 }
 0x1b9   : > { %v1589_v37 = vpop.f32.mrf.mxu0 }
 0x1ba   : > { %v1049_v36 = vpop.f32.mrf.mxu1  ;;  %v3945_v15 = vadd.f32 %v1589_v37, %v1491_v48 }
 0x1bb   : > { %v1050_v6 = vadd.f32 %v1049_v36, %v4420_v60 }
 0x1bc   : > { %2729 = vmatmul.msk.bf16.gmra.mxu0 %vm783_vm1, %v4418_v49  ;;  %v1316_v0 = vpop.f32.mrf.mxu2 }
 0x1bd   : > { %2671 = vmatmul.msk.bf16.gmra.mxu1 %vm783_vm1, %v4418_v49  ;;  %v1359_v63 = vadd.f32 %v1316_v0, %v1047_v12  ;;  %v4423_v49 = vld [vmem:[#allocation36_spill] sm:$0xff] }
 0x1bf   : > { %v1449_v55 = vpop.f32.mrf.mxu3 }
 0x1c0   : > { %v1492_v58 = vadd.f32 %v1449_v55, %v1359_v63 }
 0x1c1   : > { %v1591_v44 = vpop.f32.mrf.mxu0  ;;  %2691 = vmatmul.msk.bf16.gmra.mxu2 %vm783_vm1, %v4419_v28 }
 0x1c2   : > { %v1051_v54 = vpop.f32.mrf.mxu1  ;;  %v3954_v46 = vadd.f32 %v1591_v44, %v1492_v58  ;;  %v4424_v44 = vld [vmem:[#allocation37_spill] sm:$0xff] }
 0x1c3   : > { %v1052_v12 = vadd.f32 %v1051_v54, %v4422_v45  ;;  %v4426_v54 = vld [vmem:[#allocation9_spill] sm:$0xff] }
 0x1c4   : > { %2710 = vmatmul.msk.bf16.gmra.mxu3 %vm783_vm1, %v4421_v31  ;;  %v1319_v47 = vpop.f32.mrf.mxu2 }
 0x1c5   : > { %v1360_v26 = vadd.f32 %v1319_v47, %v1050_v6  ;;  %v4425_v6 = vld [vmem:[#allocation33_spill] sm:$0xff] }
 0x1c7   : > { %v1452_v33 = vpop.f32.mrf.mxu3 }
 0x1c8   : > { %v1493_v43 = vadd.f32 %v1452_v33, %v1360_v26 }
 0x1c9   : > { %v1594_v7 = vpop.f32.mrf.mxu0 }
 0x1ca   : > { %v1054_v48 = vpop.f32.mrf.mxu1  ;;  %v3959_v37 = vadd.f32 %v1594_v7, %v1493_v43 }
 0x1cb   : > { %v1055_v31 = vadd.f32 %v1054_v48, %v4425_v6 }
 0x1cc   : > { %2730 = vmatmul.msk.bf16.gmra.mxu0 %vm783_vm1, %v4423_v49  ;;  %v1321_v0 = vpop.f32.mrf.mxu2 }
 0x1cd   : > { %2672 = vmatmul.msk.bf16.gmra.mxu1 %vm783_vm1, %v4423_v49  ;;  %v1361_v36 = vadd.f32 %v1321_v0, %v1052_v12  ;;  %v4427_v49 = vld [vmem:[#allocation35_spill] sm:$0xff] }
 0x1cf   : > { %v1454_v63 = vpop.f32.mrf.mxu3 }
 0x1d0   : > { %v1494_v55 = vadd.f32 %v1454_v63, %v1361_v36  ;;  %v4428_v36 = vld [vmem:[#allocation41_spill] sm:$0xff] }
 0x1d1   : > { %v1596_v58 = vpop.f32.mrf.mxu0  ;;  %2692 = vmatmul.msk.bf16.gmra.mxu2 %vm783_vm1, %v4424_v44 }
 0x1d2   : > { %v1056_v28 = vpop.f32.mrf.mxu1  ;;  %v3968_v60 = vadd.f32 %v1596_v58, %v1494_v55 }
 0x1d3   : > { %v1057_v0 = vadd.f32 %v1056_v28, %v4427_v49 }
 0x1d4   : > { %2711 = vmatmul.msk.bf16.gmra.mxu3 %vm783_vm1, %v4426_v54  ;;  %v1324_v47 = vpop.f32.mrf.mxu2  ;;  %v4429_v54 = vld [vmem:[#allocation39_spill] sm:$0xff] }
 0x1d5   : > { %v1362_v26 = vadd.f32 %v1324_v47, %v1055_v31 }
 0x1d7   : > { %v1457_v33 = vpop.f32.mrf.mxu3 }
 0x1d8   : > { %v1495_v43 = vadd.f32 %v1457_v33, %v1362_v26 }
 0x1d9   : > { %v1599_v7 = vpop.f32.mrf.mxu0 }
 0x1da   : > { %v1059_v45 = vpop.f32.mrf.mxu1  ;;  %v3973_v12 = vadd.f32 %v1599_v7, %v1495_v43 }
 0x1db   : > { %v1060_v47 = vadd.f32 %v1059_v45, %v4429_v54 }
 0x1dc   : > { %2731 = vmatmul.msk.bf16.gmra.mxu0 %vm783_vm1, %v4428_v36  ;;  %v1326_v63 = vpop.f32.mrf.mxu2 }
 0x1dd   : > { %2673 = vmatmul.msk.bf16.gmra.mxu1 %vm783_vm1, %v4428_v36  ;;  %v1363_v48 = vadd.f32 %v1326_v63, %v1057_v0  ;;  %v4430_v36 = vld [vmem:[#allocation42_spill] sm:$0xff] }
 0x1df   : > { %v1459_v55 = vpop.f32.mrf.mxu3 }
 0x1e0   : > { %v1496_v58 = vadd.f32 %v1459_v55, %v1363_v48 }
 0x1e1   : > { %v1601_v44 = vpop.f32.mrf.mxu0  ;;  %2693 = vmatmul.msk.bf16.gmra.mxu2 %vm783_vm1, %v3668_v62 }
 0x1e2   : > { %v1061_v6 = vpop.f32.mrf.mxu1  ;;  %v3982_v31 = vadd.f32 %v1601_v44, %v1496_v58 }
 0x1e3   : > { %v1062_v63 = vadd.f32 %v1061_v6, %v4430_v36 }
 0x1e4   : > { %2712 = vmatmul.msk.bf16.gmra.mxu3 %vm783_vm1, %v3251_v42  ;;  %v1329_v28 = vpop.f32.mrf.mxu2 }
 0x1e5   : > { %v1364_v26 = vadd.f32 %v1329_v28, %v1060_v47 }
 0x1e7   : > { %v1462_v33 = vpop.f32.mrf.mxu3 }
 0x1e8   : > { %v1497_v43 = vadd.f32 %v1462_v33, %v1364_v26 }
 0x1e9   : > { %v1604_v7 = vpop.f32.mrf.mxu0 }
 0x1ea   : > { %v1669_v49 = vpop.f32.mrf.mxu1  ;;  %v3987_v0 = vadd.f32 %v1604_v7, %v1497_v43 }
 0x1eb   : > { %v1749_v6 = vadd.f32 %v1669_v49, %v3684_v23 }
 0x1ec   : > { %2732 = vmatmul.msk.bf16.gmra.mxu0 %vm783_vm1, %v3690_v24  ;;  %v1331_v62 = vpop.f32.mrf.mxu2 }
 0x1ed   : > { %2674 = vmatmul.msk.bf16.gmra.mxu1 %vm783_vm1, %v3690_v24  ;;  %v1365_v45 = vadd.f32 %v1331_v62, %v1062_v63 }
 0x1ef   : > { %v1464_v42 = vpop.f32.mrf.mxu3 }
 0x1f0   : > { %v1498_v48 = vadd.f32 %v1464_v42, %v1365_v45 }
 0x1f1   : > { %v1606_v55 = vpop.f32.mrf.mxu0  ;;  %2694 = vmatmul.msk.bf16.gmra.mxu2 %vm783_vm1, %v3694_v53 }
 0x1f2   : > { %v1671_v58 = vpop.f32.mrf.mxu1  ;;  %v3996_v44 = vadd.f32 %v1606_v55, %v1498_v48 }
 0x1f3   : > { %v1750_v23 = vadd.f32 %v1671_v58, %v3699_v34 }
 0x1f4   : > { %2713 = vmatmul.msk.bf16.gmra.mxu3 %vm783_vm1, %v3336_v50  ;;  %v1798_v54 = vpop.f32.mrf.mxu2 }
 0x1f5   : > { %v1878_v47 = vadd.f32 %v1798_v54, %v1749_v6 }
 0x1f7   : > { %v1927_v28 = vpop.f32.mrf.mxu3 }
 0x1f8   : > { %v2007_v24 = vadd.f32 %v1927_v28, %v1878_v47 }
 0x1f9   : > { %v2056_v26 = vpop.f32.mrf.mxu0 }
 0x1fa   : > { %v1674_v33 = vpop.f32.mrf.mxu1  ;;  %v2136_v43 = vadd.f32 %v2056_v26, %v2007_v24 }
 0x1fb   : > { %v1751_v42 = vadd.f32 %v1674_v33, %v3709_v30 }
 0x1fc   : > { %2733 = vmatmul.msk.bf16.gmra.mxu0 %vm783_vm1, %v3715_v16  ;;  %v2168_v50 = vpack.c.bf16 %v2136_v43, %v2136_v43  ;;  %v1800_v53 = vpop.f32.mrf.mxu2  ;;  %v2304_v62 = vmul.f32 %v2136_v43, %v2136_v43  ;;  %v2234_v48 = vsel %vm2233_vm5, %v2136_v43, 0.0 }
 0x1fd   : > { %2675 = vmatmul.msk.bf16.gmra.mxu1 %vm783_vm1, %v3715_v16  ;;  %v1879_v7 = vadd.f32 %v1800_v53, %v1750_v23 }
 0x1fe   : > { %2201 = vst.msk [vmem:[%s4006_s15] sm:$0xf] %vm2200_vm4, %v2168_v50  ;;  %v2336_v28 = vsel %vm2233_vm5, %v2304_v62, 0.0 }
 0x1ff   : > { %v1929_v49 = vpop.f32.mrf.mxu3 }
 0x200   : > { %v2008_v36 = vadd.f32 %v1929_v49, %v1879_v7 }
 0x201   : > { %v2058_v63 = vpop.f32.mrf.mxu0  ;;  %2695 = vmatmul.msk.bf16.gmra.mxu2 %vm783_vm1, %v3719_v14 }
 0x202   : > { %v1676_v34 = vpop.f32.mrf.mxu1  ;;  %v2137_v45 = vadd.f32 %v2058_v63, %v2008_v36 }
 0x203   : > { %v1752_v50 = vadd.f32 %v1676_v34, %v3724_v19 }
 0x204   : > { %v2169_v55 = vpack.c.bf16 %v2137_v45, %v2137_v45  ;;  %v2235_v16 = vsel %vm2233_vm5, %v2137_v45, 0.0  ;;  %v2305_v58 = vmul.f32 %v2137_v45, %v2137_v45  ;;  %2714 = vmatmul.msk.bf16.gmra.mxu3 %vm783_vm1, %v3434_v29  ;;  %v1803_v6 = vpop.f32.mrf.mxu2 }
 0x205   : > { %v2236_v54 = vadd.f32 %v2235_v16, %v2234_v48  ;;  %v1880_v47 = vadd.f32 %v1803_v6, %v1751_v42 }
 0x206   : > { %2202 = vst.msk [vmem:[%s4006_s15 + $0x4] sm:$0xf] %vm2200_vm4, %v2169_v55  ;;  %v2337_v14 = vsel %vm2233_vm5, %v2305_v58, 0.0 }
 0x207   : > { %v2338_v30 = vadd.f32 %v2337_v14, %v2336_v28  ;;  %v1932_v24 = vpop.f32.mrf.mxu3 }
 0x208   : > { %v2009_v26 = vadd.f32 %v1932_v24, %v1880_v47 }
 0x209   : > { %v2061_v33 = vpop.f32.mrf.mxu0 }
 0x20a   : > { %v1679_v43 = vpop.f32.mrf.mxu1  ;;  %v2138_v23 = vadd.f32 %v2061_v33, %v2009_v26 }
 0x20b   : > { %v1753_v16 = vadd.f32 %v1679_v43, %v3734_v20 }
 0x20c   : > { %2734 = vmatmul.msk.bf16.gmra.mxu0 %vm783_vm1, %v3740_v40  ;;  %v2170_v29 = vpack.c.bf16 %v2138_v23, %v2138_v23  ;;  %v2237_v53 = vsel %vm2233_vm5, %v2138_v23, 0.0  ;;  %v2306_v7 = vmul.f32 %v2138_v23, %v2138_v23  ;;  %v1805_v49 = vpop.f32.mrf.mxu2 }
 0x20d   : > { %2676 = vmatmul.msk.bf16.gmra.mxu1 %vm783_vm1, %v3740_v40  ;;  %v2238_v36 = vadd.f32 %v2237_v53, %v2236_v54  ;;  %v1881_v63 = vadd.f32 %v1805_v49, %v1752_v50 }
 0x20e   : > { %2203 = vst.msk [vmem:[%s4006_s15 + $0x8] sm:$0xf] %vm2200_vm4, %v2170_v29  ;;  %v2339_v62 = vsel %vm2233_vm5, %v2306_v7, 0.0 }
 0x20f   : > { %v2340_v45 = vadd.f32 %v2339_v62, %v2338_v30  ;;  %v1934_v19 = vpop.f32.mrf.mxu3 }
 0x210   : > { %v2010_v34 = vadd.f32 %v1934_v19, %v1881_v63 }
 0x211   : > { %v2063_v42 = vpop.f32.mrf.mxu0  ;;  %2696 = vmatmul.msk.bf16.gmra.mxu2 %vm783_vm1, %v3744_v38 }
 0x212   : > { %v1681_v48 = vpop.f32.mrf.mxu1  ;;  %v2139_v55 = vadd.f32 %v2063_v42, %v2010_v34 }
 0x213   : > { %v1754_v43 = vadd.f32 %v1681_v48, %v3749_v9 }
 0x214   : > { %v2171_v58 = vpack.c.bf16 %v2139_v55, %v2139_v55  ;;  %v2239_v40 = vsel %vm2233_vm5, %v2139_v55, 0.0  ;;  %v2307_v6 = vmul.f32 %v2139_v55, %v2139_v55  ;;  %2715 = vmatmul.msk.bf16.gmra.mxu3 %vm783_vm1, %v3192_v27  ;;  %v1808_v54 = vpop.f32.mrf.mxu2 }
 0x215   : > { %v2240_v47 = vadd.f32 %v2239_v40, %v2238_v36  ;;  %v1882_v28 = vadd.f32 %v1808_v54, %v1753_v16 }
 0x216   : > { %2204 = vst.msk [vmem:[%s4006_s15 + $0xc] sm:$0xf] %vm2200_vm4, %v2171_v58  ;;  %v2341_v14 = vsel %vm2233_vm5, %v2307_v6, 0.0 }
 0x217   : > { %v2342_v38 = vadd.f32 %v2341_v14, %v2340_v45  ;;  %v1937_v30 = vpop.f32.mrf.mxu3 }
 0x218   : > { %v2011_v24 = vadd.f32 %v1937_v30, %v1882_v28 }
 0x219   : > { %v2066_v26 = vpop.f32.mrf.mxu0 }
 0x21a   : > { %v1684_v20 = vpop.f32.mrf.mxu1  ;;  %v2140_v33 = vadd.f32 %v2066_v26, %v2011_v24 }
 0x21b   : > { %v1755_v34 = vadd.f32 %v1684_v20, %v3758_v41 }
 0x21c   : > { %2735 = vmatmul.msk.bf16.gmra.mxu0 %vm783_vm1, %v3764_v11  ;;  %v2172_v27 = vpack.c.bf16 %v2140_v33, %v2140_v33  ;;  %v2241_v23 = vsel %vm2233_vm5, %v2140_v33, 0.0  ;;  %v2308_v50 = vmul.f32 %v2140_v33, %v2140_v33  ;;  %v1810_v29 = vpop.f32.mrf.mxu2 }
 0x21d   : > { %2677 = vmatmul.msk.bf16.gmra.mxu1 %vm783_vm1, %v3764_v11  ;;  %v2242_v53 = vadd.f32 %v2241_v23, %v2240_v47  ;;  %v1883_v7 = vadd.f32 %v1810_v29, %v1754_v43  ;;  %v4432_v29 = vld [vmem:[#allocation13_spill] sm:$0xff] }
 0x21e   : > { %2205 = vst.msk [vmem:[%s4006_s15 + $0x10] sm:$0xf] %vm2200_vm4, %v2172_v27  ;;  %v2343_v49 = vsel %vm2233_vm5, %v2308_v50, 0.0 }
 0x21f   : > { %v2344_v36 = vadd.f32 %v2343_v49, %v2342_v38  ;;  %v1939_v9 = vpop.f32.mrf.mxu3  ;;  %v4431_v38 = vld [vmem:[#allocation12_spill] sm:$0xff]  ;;  %v4433_v49 = vld [vmem:[#allocation11_spill] sm:$0xff] }
 0x220   : > { %v2012_v63 = vadd.f32 %v1939_v9, %v1883_v7 }
 0x221   : > { %v2068_v62 = vpop.f32.mrf.mxu0  ;;  %2697 = vmatmul.msk.bf16.gmra.mxu2 %vm783_vm1, %v3768_v18 }
 0x222   : > { %v1686_v45 = vpop.f32.mrf.mxu1  ;;  %v2141_v19 = vadd.f32 %v2068_v62, %v2012_v63 }
 0x223   : > { %v1756_v14 = vadd.f32 %v1686_v45, %v3772_v57  ;;  %v4434_v45 = vld [vmem:[#allocation18_spill] sm:$0xff] }
 0x224   : > { %v2173_v42 = vpack.c.bf16 %v2141_v19, %v2141_v19  ;;  %v2243_v11 = vsel %vm2233_vm5, %v2141_v19, 0.0  ;;  %v2309_v48 = vmul.f32 %v2141_v19, %v2141_v19  ;;  %2716 = vmatmul.msk.bf16.gmra.mxu3 %vm783_vm1, %v4393_v35  ;;  %v1813_v55 = vpop.f32.mrf.mxu2 }
 0x225   : > { %v2244_v16 = vadd.f32 %v2243_v11, %v2242_v53  ;;  %v1884_v58 = vadd.f32 %v1813_v55, %v1755_v34  ;;  %v1641_v34 = vrot.slane %v3852_v2, 2 }
 0x226   : > { %2206 = vst.msk [vmem:[%s4006_s15 + $0x14] sm:$0xf] %vm2200_vm4, %v2173_v42  ;;  %v2345_v40 = vsel %vm2233_vm5, %v2309_v48, 0.0  ;;  %v1642_v42 = vrot.slane %v3849_v21, 2 }
 0x227   : > { %v2346_v18 = vadd.f32 %v2345_v40, %v2344_v36  ;;  %v1942_v6 = vpop.f32.mrf.mxu3  ;;  %v1644_v40 = vrot.slane %v3855_v61, 2 }
 0x228   : > { %v2013_v54 = vadd.f32 %v1942_v6, %v1884_v58 }
 0x229   : > { %v2071_v47 = vpop.f32.mrf.mxu0  ;;  %v1645_v2 = vsel %vm1064_vm3, %v1642_v42, %v1644_v40 }
 0x22a   : > { %v1689_v41 = vpop.f32.mrf.mxu1  ;;  %v2142_v28 = vadd.f32 %v2071_v47, %v2013_v54  ;;  %v1643_v47 = vsel %vm1064_vm3, %v1641_v34, %v1642_v42 }
 0x22b   : > { %v1757_v36 = vadd.f32 %v1689_v41, %v4433_v49  ;;  %v4085_v21 = vpack.c.bf16 %v1645_v2, %v1643_v47 }
 0x22c   : > { %2736 = vmatmul.msk.bf16.gmra.mxu0 %vm783_vm1, %v4431_v38  ;;  %v2174_v35 = vpack.c.bf16 %v2142_v28, %v2142_v28  ;;  %v2245_v30 = vsel %vm2233_vm5, %v2142_v28, 0.0  ;;  %v2310_v24 = vmul.f32 %v2142_v28, %v2142_v28  ;;  %v1815_v26 = vpop.f32.mrf.mxu2  ;;  %v4435_v28 = vld [vmem:[#allocation15_spill] sm:$0xff] }
 0x22d   : > { %2678 = vmatmul.msk.bf16.gmra.mxu1 %vm783_vm1, %v4431_v38  ;;  %v2246_v20 = vadd.f32 %v2245_v30, %v2244_v16  ;;  %v1885_v33 = vadd.f32 %v1815_v26, %v1756_v14  ;;  %v4436_v38 = vld [vmem:[#allocation17_spill] sm:$0xff] }
 0x22e   : > { %2207 = vst.msk [vmem:[%s4006_s15 + $0x18] sm:$0xf] %vm2200_vm4, %v2174_v35  ;;  %v2347_v43 = vsel %vm2233_vm5, %v2310_v24, 0.0 }
 0x22f   : > { %v2348_v27 = vadd.f32 %v2347_v43, %v2346_v18  ;;  %v1944_v23 = vpop.f32.mrf.mxu3 }
 0x230   : > { %v2014_v57 = vadd.f32 %v1944_v23, %v1885_v33 }
 0x231   : > { %v2073_v50 = vpop.f32.mrf.mxu0  ;;  %2698 = vmatmul.msk.bf16.gmra.mxu2 %vm783_vm1, %v4432_v29 }
 0x232   : > { %v1691_v53 = vpop.f32.mrf.mxu1  ;;  %v2143_v7 = vadd.f32 %v2073_v50, %v2014_v57 }
 0x233   : > { %v1758_v14 = vadd.f32 %v1691_v53, %v4435_v28  ;;  %v4437_v53 = vld [vmem:[#allocation16_spill] sm:$0xff] }
 0x234   : > { %v2175_v9 = vpack.c.bf16 %v2143_v7, %v2143_v7  ;;  %v2247_v63 = vsel %vm2233_vm5, %v2143_v7, 0.0  ;;  %v2311_v62 = vmul.f32 %v2143_v7, %v2143_v7  ;;  %2717 = vmatmul.msk.bf16.gmra.mxu3 %vm783_vm1, %v4434_v45  ;;  %v1818_v19 = vpop.f32.mrf.mxu2 }
 0x235   : > { %v2248_v11 = vadd.f32 %v2247_v63, %v2246_v20  ;;  %v1886_v48 = vadd.f32 %v1818_v19, %v1757_v36 }
 0x236   : > { %2208 = vst.msk [vmem:[%s4006_s15 + $0x1c] sm:$0xf] %vm2200_vm4, %v2175_v9  ;;  %v2349_v55 = vsel %vm2233_vm5, %v2311_v62, 0.0 }
 0x237   : > { %v2350_v16 = vadd.f32 %v2349_v55, %v2348_v27  ;;  %v1947_v58 = vpop.f32.mrf.mxu3 }
 0x238   : > { %v2015_v18 = vadd.f32 %v1947_v58, %v1886_v48 }
 0x239   : > { %v2076_v6 = vpop.f32.mrf.mxu0 }
 0x23a   : > { %v1694_v54 = vpop.f32.mrf.mxu1  ;;  %v2144_v41 = vadd.f32 %v2076_v6, %v2015_v18 }
 0x23b   : > { %v1759_v7 = vadd.f32 %v1694_v54, %v4437_v53 }
 0x23c   : > { %2737 = vmatmul.msk.bf16.gmra.mxu0 %vm783_vm1, %v4436_v38  ;;  %v2176_v35 = vpack.c.bf16 %v2144_v41, %v2144_v41  ;;  %v2249_v30 = vsel %vm2233_vm5, %v2144_v41, 0.0  ;;  %v2312_v61 = vmul.f32 %v2144_v41, %v2144_v41  ;;  %v1820_v24 = vpop.f32.mrf.mxu2 }
 0x23d   : > { %2679 = vmatmul.msk.bf16.gmra.mxu1 %vm783_vm1, %v4436_v38  ;;  %v2250_v26 = vadd.f32 %v2249_v30, %v2248_v11  ;;  %v1887_v20 = vadd.f32 %v1820_v24, %v1758_v14 }
 0x23e   : > { %2209 = vst.msk [vmem:[%s4006_s15 + $0x20] sm:$0xf] %vm2200_vm4, %v2176_v35  ;;  %v2351_v33 = vsel %vm2233_vm5, %v2312_v61, 0.0  ;;  %v4439_v61 = vld [vmem:[#allocation21_spill] sm:$0xff] }
 0x23f   : > { %v2352_v43 = vadd.f32 %v2351_v33, %v2350_v16  ;;  %v1949_v27 = vpop.f32.mrf.mxu3  ;;  %v4438_v16 = vld [vmem:[#allocation20_spill] sm:$0xff] }
 0x240   : > { %v2016_v23 = vadd.f32 %v1949_v27, %v1887_v20 }
 0x241   : > { %v2078_v57 = vpop.f32.mrf.mxu0  ;;  %2699 = vmatmul.msk.bf16.gmra.mxu2 %vm783_vm1, %v3822_v56 }
 0x242   : > { %v1696_v50 = vpop.f32.mrf.mxu1  ;;  %v2145_v29 = vadd.f32 %v2078_v57, %v2016_v23 }
 0x243   : > { %v1760_v58 = vadd.f32 %v1696_v50, %v4438_v16 }
 0x244   : > { %v2177_v49 = vpack.c.bf16 %v2145_v29, %v2145_v29  ;;  %v2251_v36 = vsel %vm2233_vm5, %v2145_v29, 0.0  ;;  %v2313_v9 = vmul.f32 %v2145_v29, %v2145_v29  ;;  %2718 = vmatmul.msk.bf16.gmra.mxu3 %vm783_vm1, %v3444_v52  ;;  %v1823_v63 = vpop.f32.mrf.mxu2 }
 0x245   : > { %v2252_v62 = vadd.f32 %v2251_v36, %v2250_v26  ;;  %v1888_v45 = vadd.f32 %v1823_v63, %v1759_v7 }
 0x246   : > { %2210 = vst.msk [vmem:[%s4006_s15 + $0x24] sm:$0xf] %vm2200_vm4, %v2177_v49  ;;  %v2353_v19 = vsel %vm2233_vm5, %v2313_v9, 0.0 }
 0x247   : > { %v2354_v56 = vadd.f32 %v2353_v19, %v2352_v43  ;;  %v1952_v34 = vpop.f32.mrf.mxu3 }
 0x248   : > { %v2017_v42 = vadd.f32 %v1952_v34, %v1888_v45 }
 0x249   : > { %v2081_v11 = vpop.f32.mrf.mxu0 }
 0x24a   : > { %v1699_v48 = vpop.f32.mrf.mxu1  ;;  %v2146_v55 = vadd.f32 %v2081_v11, %v2017_v42  ;;  %v4440_v11 = vmov 0.0|0.0  }
 0x24b   : > { %v1761_v24 = vadd.f32 %v1699_v48, %v4439_v61 }
 0x24c   : > { %2738 = vmatmul.msk.bf16.gmra.mxu0 %vm783_vm1, %v3846_v25  ;;  %v2178_v52 = vpack.c.bf16 %v2146_v55, %v2146_v55  ;;  %v2253_v40 = vsel %vm2233_vm5, %v2146_v55, 0.0  ;;  %v2314_v18 = vmul.f32 %v2146_v55, %v2146_v55  ;;  %v1825_v6 = vpop.f32.mrf.mxu2 }
 0x24d   : > { %2680 = vmatmul.msk.bf16.gmra.mxu1 %vm783_vm1, %v3846_v25  ;;  %v2254_v54 = vadd.f32 %v2253_v40, %v2252_v62  ;;  %v1889_v47 = vadd.f32 %v1825_v6, %v1760_v58  ;;  %v4441_v40 = vld [vmem:[#allocation8_spill] sm:$0xff] }
 0x24e   : > { %2211 = vst.msk [vmem:[%s4006_s15 + $0x28] sm:$0xf] %vm2200_vm4, %v2178_v52  ;;  %v2355_v2 = vsel %vm2233_vm5, %v2314_v18, 0.0 }
 0x24f   : > { %v2356_v41 = vadd.f32 %v2355_v2, %v2354_v56  ;;  %v1954_v28 = vpop.f32.mrf.mxu3 }
 0x250   : > { %v2018_v14 = vadd.f32 %v1954_v28, %v1889_v47 }
 0x251   : > { %v2083_v38 = vpop.f32.mrf.mxu0  ;;  %2700 = vmatmul.msk.bf16.gmra.mxu2 %vm783_vm1, %v3859_v32 }
 0x252   : > { %v1701_v35 = vpop.f32.mrf.mxu1  ;;  %v2147_v30 = vadd.f32 %v2083_v38, %v2018_v14 }
 0x253   : > { %v1762_v49 = vadd.f32 %v1701_v35, %v3866_v51 }
 0x254   : > { %v2179_v26 = vpack.c.bf16 %v2147_v30, %v2147_v30  ;;  %v2255_v25 = vsel %vm2233_vm5, %v2147_v30, 0.0  ;;  %v2315_v20 = vmul.f32 %v2147_v30, %v2147_v30  ;;  %2719 = vmatmul.msk.bf16.gmra.mxu3 %vm783_vm1, %v3873_v22  ;;  %v1828_v33 = vpop.f32.mrf.mxu2  ;;  %v4442_v30 = vld [vmem:[#allocation22_spill] sm:$0xff] }
 0x255   : > { %v2256_v43 = vadd.f32 %v2255_v25, %v2254_v54  ;;  %v1890_v27 = vadd.f32 %v1828_v33, %v1761_v24 }
 0x256   : > { %2212 = vst.msk [vmem:[%s4006_s15 + $0x2c] sm:$0xf] %vm2200_vm4, %v2179_v26  ;;  %v2357_v23 = vsel %vm2233_vm5, %v2315_v20, 0.0 }
 0x257   : > { %v2358_v32 = vadd.f32 %v2357_v23, %v2356_v41  ;;  %v1957_v57 = vpop.f32.mrf.mxu3 }
 0x258   : > { %v2019_v50 = vadd.f32 %v1957_v57, %v1890_v27 }
 0x259   : > { %v2086_v29 = vpop.f32.mrf.mxu0 }
 0x25a   : > { %v1704_v53 = vpop.f32.mrf.mxu1  ;;  %v2148_v7 = vadd.f32 %v2086_v29, %v2019_v50 }
 0x25b   : > { %v1763_v16 = vadd.f32 %v1704_v53, %v3875_v3 }
 0x25c   : > { %2739 = vmatmul.msk.bf16.gmra.mxu0 %vm783_vm1, %v4085_v21  ;;  %v2180_v22 = vpack.c.bf16 %v2148_v7, %v2148_v7  ;;  %v2257_v36 = vsel %vm2233_vm5, %v2148_v7, 0.0  ;;  %v2316_v9 = vmul.f32 %v2148_v7, %v2148_v7  ;;  %v1830_v63 = vpop.f32.mrf.mxu2 }
 0x25d   : > { %2681 = vmatmul.msk.bf16.gmra.mxu1 %vm783_vm1, %v4085_v21  ;;  %v2258_v62 = vadd.f32 %v2257_v36, %v2256_v43  ;;  %v1891_v45 = vadd.f32 %v1830_v63, %v1762_v49 }
 0x25e   : > { %2213 = vst.msk [vmem:[%s4006_s15 + $0x30] sm:$0xf] %vm2200_vm4, %v2180_v22  ;;  %v2359_v19 = vsel %vm2233_vm5, %v2316_v9, 0.0 }
 0x25f   : > { %v2360_v56 = vadd.f32 %v2359_v19, %v2358_v32  ;;  %v1959_v51 = vpop.f32.mrf.mxu3 }
 0x260   : > { %v2020_v34 = vadd.f32 %v1959_v51, %v1891_v45 }
 0x261   : > { %v2088_v42 = vpop.f32.mrf.mxu0  ;;  %1872 = vmatmul.bf16.gmra.mxu2 %v4440_v11 }
 0x262   : > { %v1706_v48 = vpop.f32.mrf.mxu1  ;;  %v2149_v55 = vadd.f32 %v2088_v42, %v2020_v34 }
 0x263   : > { %v1764_v35 = vadd.f32 %v1706_v48, %v3884_v1 }
 0x264   : > { %v2181_v58 = vpack.c.bf16 %v2149_v55, %v2149_v55  ;;  %v2259_v21 = vsel %vm2233_vm5, %v2149_v55, 0.0  ;;  %v2317_v52 = vmul.f32 %v2149_v55, %v2149_v55  ;;  %2720 = vmatmul.msk.bf16.gmra.mxu3 %vm783_vm1, %v4441_v40  ;;  %v1833_v18 = vpop.f32.mrf.mxu2 }
 0x265   : > { %v2260_v6 = vadd.f32 %v2259_v21, %v2258_v62  ;;  %v1892_v54 = vadd.f32 %v1833_v18, %v1763_v16 }
 0x266   : > { %2214 = vst.msk [vmem:[%s4006_s15 + $0x34] sm:$0xf] %vm2200_vm4, %v2181_v58  ;;  %v2361_v47 = vsel %vm2233_vm5, %v2317_v52, 0.0 }
 0x267   : > { %v2362_v2 = vadd.f32 %v2361_v47, %v2360_v56  ;;  %v1962_v41 = vpop.f32.mrf.mxu3 }
 0x268   : > { %v2021_v28 = vadd.f32 %v1962_v41, %v1892_v54 }
 0x269   : > { %v2091_v14 = vpop.f32.mrf.mxu0 }
 0x26a   : > { %v1709_v3 = vpop.f32.mrf.mxu1  ;;  %v2150_v38 = vadd.f32 %v2091_v14, %v2021_v28 }
 0x26b   : > { %v1765_v29 = vadd.f32 %v1709_v3, %v3889_v17 }
 0x26c   : > { %2740 = vmatmul.msk.bf16.gmra.mxu0 %vm783_vm1, %v4442_v30  ;;  %v2182_v61 = vpack.c.bf16 %v2150_v38, %v2150_v38  ;;  %v2261_v24 = vsel %vm2233_vm5, %v2150_v38, 0.0  ;;  %v2318_v26 = vmul.f32 %v2150_v38, %v2150_v38  ;;  %v1835_v25 = vpop.f32.mrf.mxu2 }
 0x26d   : > { %v2262_v20 = vadd.f32 %v2261_v24, %v2260_v6  ;;  %v1893_v33 = vadd.f32 %v1835_v25, %v1764_v35 }
 0x26e   : > { %2215 = vst.msk [vmem:[%s4006_s15 + $0x38] sm:$0xf] %vm2200_vm4, %v2182_v61  ;;  %v2363_v43 = vsel %vm2233_vm5, %v2318_v26, 0.0 }
 0x26f   : > { %v2364_v27 = vadd.f32 %v2363_v43, %v2362_v2  ;;  %v1964_v23 = vpop.f32.mrf.mxu3 }
 0x270   : > { %v2022_v32 = vadd.f32 %v1964_v23, %v1893_v33 }
 0x271   : > { %v2093_v57 = vpop.f32.mrf.mxu0 }
 0x272   : > { %v1711_v1 = vpop.f32.mrf.mxu1  ;;  %v2151_v50 = vadd.f32 %v2093_v57, %v2022_v32 }
 0x273   : > { %v1766_v17 = vadd.f32 %v1711_v1, %v3898_v59 }
 0x274   : > { %v2183_v53 = vpack.c.bf16 %v2151_v50, %v2151_v50  ;;  %v2263_v7 = vsel %vm2233_vm5, %v2151_v50, 0.0  ;;  %v2319_v49 = vmul.f32 %v2151_v50, %v2151_v50  ;;  %v1838_v22 = vpop.f32.mrf.mxu2 }
 0x275   : > { %v2264_v36 = vadd.f32 %v2263_v7, %v2262_v20  ;;  %v1894_v9 = vadd.f32 %v1838_v22, %v1765_v29 }
 0x276   : > { %2216 = vst.msk [vmem:[%s4006_s15 + $0x3c] sm:$0xf] %vm2200_vm4, %v2183_v53  ;;  %v2365_v63 = vsel %vm2233_vm5, %v2319_v49, 0.0 }
 0x277   : > { %v2366_v62 = vadd.f32 %v2365_v63, %v2364_v27  ;;  %v1967_v45 = vpop.f32.mrf.mxu3 }
 0x278   : > { %v2023_v19 = vadd.f32 %v1967_v45, %v1894_v9 }
 0x279   : > { %v2096_v56 = vpop.f32.mrf.mxu0 }
 0x27a   : > { %v1714_v51 = vpop.f32.mrf.mxu1  ;;  %v2152_v34 = vadd.f32 %v2096_v56, %v2023_v19 }
 0x27b   : > { %v1767_v59 = vadd.f32 %v1714_v51, %v3903_v10 }
 0x27c   : > { %v2184_v42 = vpack.c.bf16 %v2152_v34, %v2152_v34  ;;  %v2265_v11 = vsel %vm2233_vm5, %v2152_v34, 0.0  ;;  %v2320_v48 = vmul.f32 %v2152_v34, %v2152_v34  ;;  %v1840_v55 = vpop.f32.mrf.mxu2 }
 0x27d   : > { %v2266_v16 = vadd.f32 %v2265_v11, %v2264_v36  ;;  %v1895_v58 = vadd.f32 %v1840_v55, %v1766_v17 }
 0x27e   : > { %2217 = vst.msk [vmem:[%s4006_s15 + $0x40] sm:$0xf] %vm2200_vm4, %v2184_v42  ;;  %v2367_v21 = vsel %vm2233_vm5, %v2320_v48, 0.0 }
 0x27f   : > { %v2368_v52 = vadd.f32 %v2367_v21, %v2366_v62  ;;  %v1969_v40 = vpop.f32.mrf.mxu3 }
 0x280   : > { %v2024_v18 = vadd.f32 %v1969_v40, %v1895_v58 }
 0x281   : > { %v2098_v6 = vpop.f32.mrf.mxu0 }
 0x282   : > { %v1716_v54 = vpop.f32.mrf.mxu1  ;;  %v2153_v47 = vadd.f32 %v2098_v6, %v2024_v18 }
 0x283   : > { %v1768_v10 = vadd.f32 %v1716_v54, %v3912_v8 }
 0x284   : > { %v2185_v2 = vpack.c.bf16 %v2153_v47, %v2153_v47  ;;  %v2267_v41 = vsel %vm2233_vm5, %v2153_v47, 0.0  ;;  %v2321_v28 = vmul.f32 %v2153_v47, %v2153_v47  ;;  %v1843_v14 = vpop.f32.mrf.mxu2 }
 0x285   : > { %v2268_v3 = vadd.f32 %v2267_v41, %v2266_v16  ;;  %v1896_v38 = vadd.f32 %v1843_v14, %v1767_v59 }
 0x286   : > { %2218 = vst.msk [vmem:[%s4006_s15 + $0x44] sm:$0xf] %vm2200_vm4, %v2185_v2  ;;  %v2369_v35 = vsel %vm2233_vm5, %v2321_v28, 0.0 }
 0x287   : > { %v2370_v30 = vadd.f32 %v2369_v35, %v2368_v52  ;;  %v1972_v61 = vpop.f32.mrf.mxu3 }
 0x288   : > { %v2025_v24 = vadd.f32 %v1972_v61, %v1896_v38 }
 0x289   : > { %v2101_v26 = vpop.f32.mrf.mxu0 }
 0x28a   : > { %v1719_v25 = vpop.f32.mrf.mxu1  ;;  %v2154_v20 = vadd.f32 %v2101_v26, %v2025_v24 }
 0x28b   : > { %v1769_v8 = vadd.f32 %v1719_v25, %v3917_v39 }
 0x28c   : > { %v2186_v33 = vpack.c.bf16 %v2154_v20, %v2154_v20  ;;  %v2269_v43 = vsel %vm2233_vm5, %v2154_v20, 0.0  ;;  %v2322_v27 = vmul.f32 %v2154_v20, %v2154_v20  ;;  %v1845_v23 = vpop.f32.mrf.mxu2 }
 0x28d   : > { %v2270_v32 = vadd.f32 %v2269_v43, %v2268_v3  ;;  %v1897_v57 = vadd.f32 %v1845_v23, %v1768_v10 }
 0x28e   : > { %2219 = vst.msk [vmem:[%s4006_s15 + $0x48] sm:$0xf] %vm2200_vm4, %v2186_v33  ;;  %v2371_v1 = vsel %vm2233_vm5, %v2322_v27, 0.0 }
 0x28f   : > { %v2372_v50 = vadd.f32 %v2371_v1, %v2370_v30  ;;  %v1974_v29 = vpop.f32.mrf.mxu3 }
 0x290   : > { %v2026_v53 = vadd.f32 %v1974_v29, %v1897_v57 }
 0x291   : > { %v2103_v7 = vpop.f32.mrf.mxu0 }
 0x292   : > { %v1721_v49 = vpop.f32.mrf.mxu1  ;;  %v2155_v22 = vadd.f32 %v2103_v7, %v2026_v53 }
 0x293   : > { %v1770_v39 = vadd.f32 %v1721_v49, %v3926_v13 }
 0x294   : > { %v2187_v36 = vpack.c.bf16 %v2155_v22, %v2155_v22  ;;  %v2271_v9 = vsel %vm2233_vm5, %v2155_v22, 0.0  ;;  %v2323_v63 = vmul.f32 %v2155_v22, %v2155_v22  ;;  %v1848_v62 = vpop.f32.mrf.mxu2 }
 0x295   : > { %v2272_v45 = vadd.f32 %v2271_v9, %v2270_v32  ;;  %v1898_v19 = vadd.f32 %v1848_v62, %v1769_v8 }
 0x296   : > { %2220 = vst.msk [vmem:[%s4006_s15 + $0x4c] sm:$0xf] %vm2200_vm4, %v2187_v36  ;;  %v2373_v56 = vsel %vm2233_vm5, %v2323_v63, 0.0 }
 0x297   : > { %v2374_v51 = vadd.f32 %v2373_v56, %v2372_v50  ;;  %v1977_v34 = vpop.f32.mrf.mxu3 }
 0x298   : > { %v2027_v17 = vadd.f32 %v1977_v34, %v1898_v19 }
 0x299   : > { %v2106_v42 = vpop.f32.mrf.mxu0 }
 0x29a   : > { %v1724_v11 = vpop.f32.mrf.mxu1  ;;  %v2156_v48 = vadd.f32 %v2106_v42, %v2027_v17 }
 0x29b   : > { %v1771_v13 = vadd.f32 %v1724_v11, %v3931_v5 }
 0x29c   : > { %v2188_v55 = vpack.c.bf16 %v2156_v48, %v2156_v48  ;;  %v2273_v16 = vsel %vm2233_vm5, %v2156_v48, 0.0  ;;  %v2324_v58 = vmul.f32 %v2156_v48, %v2156_v48  ;;  %v1850_v21 = vpop.f32.mrf.mxu2 }
 0x29d   : > { %v2274_v52 = vadd.f32 %v2273_v16, %v2272_v45  ;;  %v1899_v40 = vadd.f32 %v1850_v21, %v1770_v39 }
 0x29e   : > { %2221 = vst.msk [vmem:[%s4006_s15 + $0x50] sm:$0xf] %vm2200_vm4, %v2188_v55  ;;  %v2375_v18 = vsel %vm2233_vm5, %v2324_v58, 0.0 }
 0x29f   : > { %v2376_v6 = vadd.f32 %v2375_v18, %v2374_v51  ;;  %v1979_v54 = vpop.f32.mrf.mxu3 }
 0x2a0   : > { %v2028_v47 = vadd.f32 %v1979_v54, %v1899_v40 }
 0x2a1   : > { %v2108_v59 = vpop.f32.mrf.mxu0 }
 0x2a2   : > { %v1726_v2 = vpop.f32.mrf.mxu1  ;;  %v2157_v41 = vadd.f32 %v2108_v59, %v2028_v47 }
 0x2a3   : > { %v1772_v5 = vadd.f32 %v1726_v2, %v3940_v4 }
 0x2a4   : > { %v2189_v28 = vpack.c.bf16 %v2157_v41, %v2157_v41  ;;  %v2275_v14 = vsel %vm2233_vm5, %v2157_v41, 0.0  ;;  %v2325_v3 = vmul.f32 %v2157_v41, %v2157_v41  ;;  %v1853_v38 = vpop.f32.mrf.mxu2 }
 0x2a5   : > { %v2276_v35 = vadd.f32 %v2275_v14, %v2274_v52  ;;  %v1900_v30 = vadd.f32 %v1853_v38, %v1771_v13 }
 0x2a6   : > { %2222 = vst.msk [vmem:[%s4006_s15 + $0x54] sm:$0xf] %vm2200_vm4, %v2189_v28  ;;  %v2377_v61 = vsel %vm2233_vm5, %v2325_v3, 0.0 }
 0x2a7   : > { %v2378_v24 = vadd.f32 %v2377_v61, %v2376_v6  ;;  %v1982_v26 = vpop.f32.mrf.mxu3 }
 0x2a8   : > { %v2029_v25 = vadd.f32 %v1982_v26, %v1900_v30 }
 0x2a9   : > { %v2111_v20 = vpop.f32.mrf.mxu0 }
 0x2aa   : > { %v1729_v10 = vpop.f32.mrf.mxu1  ;;  %v2158_v33 = vadd.f32 %v2111_v20, %v2029_v25 }
 0x2ab   : > { %v1773_v4 = vadd.f32 %v1729_v10, %v3945_v15 }
 0x2ac   : > { %v2190_v43 = vpack.c.bf16 %v2158_v33, %v2158_v33  ;;  %v2277_v27 = vsel %vm2233_vm5, %v2158_v33, 0.0  ;;  %v2326_v23 = vmul.f32 %v2158_v33, %v2158_v33  ;;  %v1855_v32 = vpop.f32.mrf.mxu2 }
 0x2ad   : > { %v2278_v57 = vadd.f32 %v2277_v27, %v2276_v35  ;;  %v1901_v1 = vadd.f32 %v1855_v32, %v1772_v5 }
 0x2ae   : > { %2223 = vst.msk [vmem:[%s4006_s15 + $0x58] sm:$0xf] %vm2200_vm4, %v2190_v43  ;;  %v2379_v50 = vsel %vm2233_vm5, %v2326_v23, 0.0 }
 0x2af   : > { %v2380_v29 = vadd.f32 %v2379_v50, %v2378_v24  ;;  %v1984_v53 = vpop.f32.mrf.mxu3 }
 0x2b0   : > { %v2030_v7 = vadd.f32 %v1984_v53, %v1901_v1 }
 0x2b1   : > { %v2113_v49 = vpop.f32.mrf.mxu0 }
 0x2b2   : > { %v1731_v22 = vpop.f32.mrf.mxu1  ;;  %v2159_v8 = vadd.f32 %v2113_v49, %v2030_v7 }
 0x2b3   : > { %v1774_v15 = vadd.f32 %v1731_v22, %v3954_v46 }
 0x2b4   : > { %v2191_v36 = vpack.c.bf16 %v2159_v8, %v2159_v8  ;;  %v2279_v9 = vsel %vm2233_vm5, %v2159_v8, 0.0  ;;  %v2327_v63 = vmul.f32 %v2159_v8, %v2159_v8  ;;  %v1858_v62 = vpop.f32.mrf.mxu2 }
 0x2b5   : > { %v2280_v45 = vadd.f32 %v2279_v9, %v2278_v57  ;;  %v1902_v19 = vadd.f32 %v1858_v62, %v1773_v4 }
 0x2b6   : > { %2224 = vst.msk [vmem:[%s4006_s15 + $0x5c] sm:$0xf] %vm2200_vm4, %v2191_v36  ;;  %v2381_v56 = vsel %vm2233_vm5, %v2327_v63, 0.0 }
 0x2b7   : > { %v2382_v51 = vadd.f32 %v2381_v56, %v2380_v29  ;;  %v1987_v34 = vpop.f32.mrf.mxu3 }
 0x2b8   : > { %v2031_v17 = vadd.f32 %v1987_v34, %v1902_v19 }
 0x2b9   : > { %v2116_v42 = vpop.f32.mrf.mxu0 }
 0x2ba   : > { %v1734_v11 = vpop.f32.mrf.mxu1  ;;  %v2160_v48 = vadd.f32 %v2116_v42, %v2031_v17 }
 0x2bb   : > { %v1775_v46 = vadd.f32 %v1734_v11, %v3959_v37 }
 0x2bc   : > { %v2192_v39 = vpack.c.bf16 %v2160_v48, %v2160_v48  ;;  %v2281_v55 = vsel %vm2233_vm5, %v2160_v48, 0.0  ;;  %v2328_v16 = vmul.f32 %v2160_v48, %v2160_v48  ;;  %v1860_v58 = vpop.f32.mrf.mxu2 }
 0x2bd   : > { %v2282_v21 = vadd.f32 %v2281_v55, %v2280_v45  ;;  %v1903_v52 = vadd.f32 %v1860_v58, %v1774_v15 }
 0x2be   : > { %2225 = vst.msk [vmem:[%s4006_s15 + $0x60] sm:$0xf] %vm2200_vm4, %v2192_v39  ;;  %v2383_v40 = vsel %vm2233_vm5, %v2328_v16, 0.0 }
 0x2bf   : > { %v2384_v18 = vadd.f32 %v2383_v40, %v2382_v51  ;;  %v1989_v6 = vpop.f32.mrf.mxu3 }
 0x2c0   : > { %v2032_v54 = vadd.f32 %v1989_v6, %v1903_v52 }
 0x2c1   : > { %v2118_v47 = vpop.f32.mrf.mxu0 }
 0x2c2   : > { %v1736_v59 = vpop.f32.mrf.mxu1  ;;  %v2161_v2 = vadd.f32 %v2118_v47, %v2032_v54 }
 0x2c3   : > { %v1776_v37 = vadd.f32 %v1736_v59, %v3968_v60 }
 0x2c4   : > { %v2193_v41 = vpack.c.bf16 %v2161_v2, %v2161_v2  ;;  %v2283_v13 = vsel %vm2233_vm5, %v2161_v2, 0.0  ;;  %v2329_v28 = vmul.f32 %v2161_v2, %v2161_v2  ;;  %v1863_v14 = vpop.f32.mrf.mxu2 }
 0x2c5   : > { %v2284_v3 = vadd.f32 %v2283_v13, %v2282_v21  ;;  %v1904_v38 = vadd.f32 %v1863_v14, %v1775_v46 }
 0x2c6   : > { %2226 = vst.msk [vmem:[%s4006_s15 + $0x64] sm:$0xf] %vm2200_vm4, %v2193_v41  ;;  %v2385_v35 = vsel %vm2233_vm5, %v2329_v28, 0.0 }
 0x2c7   : > { %v2386_v30 = vadd.f32 %v2385_v35, %v2384_v18  ;;  %v1992_v61 = vpop.f32.mrf.mxu3 }
 0x2c8   : > { %v2033_v24 = vadd.f32 %v1992_v61, %v1904_v38 }
 0x2c9   : > { %v2121_v26 = vpop.f32.mrf.mxu0 }
 0x2ca   : > { %v2162_v25 = vadd.f32 %v2121_v26, %v2033_v24  ;;  %v1739_v20 = vpop.f32.mrf.mxu1 }
 0x2cb   : > { %v1777_v7 = vadd.f32 %v1739_v20, %v3973_v12 }
 0x2cc   : > { %v2194_v10 = vpack.c.bf16 %v2162_v25, %v2162_v25  ;;  %v2285_v33 = vsel %vm2233_vm5, %v2162_v25, 0.0  ;;  %v2330_v5 = vmul.f32 %v2162_v25, %v2162_v25  ;;  %v1865_v43 = vpop.f32.mrf.mxu2 }
 0x2cd   : > { %v2286_v27 = vadd.f32 %v2285_v33, %v2284_v3  ;;  %v1905_v23 = vadd.f32 %v1865_v43, %v1776_v37 }
 0x2ce   : > { %2227 = vst.msk [vmem:[%s4006_s15 + $0x68] sm:$0xf] %vm2200_vm4, %v2194_v10  ;;  %v2387_v32 = vsel %vm2233_vm5, %v2330_v5, 0.0 }
 0x2cf   : > { %v2388_v57 = vadd.f32 %v2387_v32, %v2386_v30  ;;  %v1994_v1 = vpop.f32.mrf.mxu3 }
 0x2d0   : > { %v2034_v50 = vadd.f32 %v1994_v1, %v1905_v23 }
 0x2d1   : > { %v2123_v29 = vpop.f32.mrf.mxu0 }
 0x2d2   : > { %v2163_v53 = vadd.f32 %v2123_v29, %v2034_v50  ;;  %v1741_v4 = vpop.f32.mrf.mxu1 }
 0x2d3   : > { %v1778_v12 = vadd.f32 %v1741_v4, %v3982_v31 }
 0x2d4   : > { %v2195_v60 = vpack.c.bf16 %v2163_v53, %v2163_v53  ;;  %v2287_v49 = vsel %vm2233_vm5, %v2163_v53, 0.0  ;;  %v2331_v22 = vmul.f32 %v2163_v53, %v2163_v53  ;;  %v1868_v8 = vpop.f32.mrf.mxu2 }
 0x2d5   : > { %v2288_v36 = vadd.f32 %v2287_v49, %v2286_v27  ;;  %v1906_v9 = vadd.f32 %v1868_v8, %v1777_v7 }
 0x2d6   : > { %2228 = vst.msk [vmem:[%s4006_s15 + $0x6c] sm:$0xf] %vm2200_vm4, %v2195_v60  ;;  %v2389_v63 = vsel %vm2233_vm5, %v2331_v22, 0.0 }
 0x2d7   : > { %v2390_v62 = vadd.f32 %v2389_v63, %v2388_v57  ;;  %v1997_v45 = vpop.f32.mrf.mxu3 }
 0x2d8   : > { %v2035_v19 = vadd.f32 %v1997_v45, %v1906_v9 }
 0x2d9   : > { %v2126_v56 = vpop.f32.mrf.mxu0 }
 0x2da   : > { %v2164_v51 = vadd.f32 %v2126_v56, %v2035_v19  ;;  %v1744_v55 = vpop.f32.mrf.mxu1 }
 0x2db   : > { %v1779_v31 = vadd.f32 %v1744_v55, %v3987_v0 }
 0x2dc   : > { %v2196_v34 = vpack.c.bf16 %v2164_v51, %v2164_v51  ;;  %v2289_v17 = vsel %vm2233_vm5, %v2164_v51, 0.0  ;;  %v2332_v42 = vmul.f32 %v2164_v51, %v2164_v51  ;;  %v1870_v11 = vpop.f32.mrf.mxu2 }
 0x2dd   : > { %v2290_v48 = vadd.f32 %v2289_v17, %v2288_v36  ;;  %v1907_v15 = vadd.f32 %v1870_v11, %v1778_v12 }
 0x2de   : > { %2229 = vst.msk [vmem:[%s4006_s15 + $0x70] sm:$0xf] %vm2200_vm4, %v2196_v34  ;;  %v2391_v39 = vsel %vm2233_vm5, %v2332_v42, 0.0 }
 0x2df   : > { %v2392_v16 = vadd.f32 %v2391_v39, %v2390_v62  ;;  %v1999_v58 = vpop.f32.mrf.mxu3 }
 0x2e0   : > { %v2036_v21 = vadd.f32 %v1999_v58, %v1907_v15 }
 0x2e1   : > { %v2128_v52 = vpop.f32.mrf.mxu0 }
 0x2e2   : > { %v2165_v40 = vadd.f32 %v2128_v52, %v2036_v21  ;;  %v1746_v14 = vpop.f32.mrf.mxu1 }
 0x2e3   : > { %v1780_v0 = vadd.f32 %v1746_v14, %v3996_v44 }
 0x2e4   : > { %v2197_v18 = vpack.c.bf16 %v2165_v40, %v2165_v40  ;;  %v2291_v6 = vsel %vm2233_vm5, %v2165_v40, 0.0  ;;  %v2333_v54 = vmul.f32 %v2165_v40, %v2165_v40  ;;  %v1873_v47 = vpop.f32.mrf.mxu2 }
 0x2e5   : > { %v2292_v59 = vadd.f32 %v2291_v6, %v2290_v48  ;;  %v1908_v2 = vadd.f32 %v1873_v47, %v1779_v31 }
 0x2e6   : > { %2230 = vst.msk [vmem:[%s4006_s15 + $0x74] sm:$0xf] %vm2200_vm4, %v2197_v18  ;;  %v2393_v46 = vsel %vm2233_vm5, %v2333_v54, 0.0 }
 0x2e7   : > { %v2394_v41 = vadd.f32 %v2393_v46, %v2392_v16  ;;  %v2002_v13 = vpop.f32.mrf.mxu3 }
 0x2e8   : > { %v2037_v28 = vadd.f32 %v2002_v13, %v1908_v2 }
 0x2e9   : > { %v2131_v3 = vpop.f32.mrf.mxu0 }
 0x2ea   : > { %v2166_v38 = vadd.f32 %v2131_v3, %v2037_v28 }
 0x2ec   : > { %v2198_v35 = vpack.c.bf16 %v2166_v38, %v2166_v38  ;;  %v2293_v30 = vsel %vm2233_vm5, %v2166_v38, 0.0  ;;  %v2334_v61 = vmul.f32 %v2166_v38, %v2166_v38  ;;  %v1875_v24 = vpop.f32.mrf.mxu2 }
 0x2ed   : > { %v2294_v26 = vadd.f32 %v2293_v30, %v2292_v59  ;;  %v1909_v25 = vadd.f32 %v1875_v24, %v1780_v0 }
 0x2ee   : > { %2231 = vst.msk [vmem:[%s4006_s15 + $0x78] sm:$0xf] %vm2200_vm4, %v2198_v35  ;;  %v2395_v20 = vsel %vm2233_vm5, %v2334_v61, 0.0 }
 0x2ef   : > { %v2396_v37 = vadd.f32 %v2395_v20, %v2394_v41  ;;  %v2004_v10 = vpop.f32.mrf.mxu3 }
 0x2f0   : > { %v2038_v33 = vadd.f32 %v2004_v10, %v1909_v25 }
 0x2f1   : > { %v2133_v5 = vpop.f32.mrf.mxu0 }
 0x2f2   : > { %v2167_v43 = vadd.f32 %v2133_v5, %v2038_v33 }
 0x2f4   : > { %v2199_v44 = vpack.c.bf16 %v2167_v43, %v2167_v43  ;;  %v2295_v27 = vsel %vm2233_vm5, %v2167_v43, 0.0  ;;  %v2335_v23 = vmul.f32 %v2167_v43, %v2167_v43 }
 0x2f5   : > { %v2296_v32 = vadd.f32 %v2295_v27, %v2294_v26 }
 0x2f6   : > { %2232 = vst.msk [vmem:[%s4006_s15 + $0x7c] sm:$0xf] %vm2200_vm4, %v2199_v44  ;;  %v2397_v57 = vsel %vm2233_vm5, %v2335_v23, 0.0  ;;  %s2902_s15 = scalar_lea.hbm %s2901_s14, 1 }
 0x2f7   : > { %v2297_v1 = vrot.slane %v2296_v32, 4  ;;  %v2398_v50 = vadd.f32 %v2397_v57, %v2396_v37  ;;  %p2903_p11 = scmp.ne.s32.totalorder %s2901_s14, %s2902_s15  ;;  %p2908_p1 = scmp.lt.s32.totalorder %s2906_s17, %s2902_s15 }
 0x2f9   : > { %v2298_v29 = vadd.f32 %v2297_v1, %v2296_v32  ;;  %v2399_v53 = vrot.slane %v2398_v50, 4  ;;  %p2904_p12 = pnand %p2903_p11, %p3057_p5  ;;  %p2909_p2 = por %p2908_p1, %p2907_p0 }
 0x2fb   : > { %v2299_v7 = vrot.slane %v2298_v29, 2  ;;  %v2400_v60 = vadd.f32 %v2399_v53, %v2398_v50  ;;  %p2905_p13 = pneg %p2904_p12 }
 0x2fd   : > { %v2300_v49 = vadd.f32 %v2299_v7, %v2298_v29  ;;  %v2401_v22 = vrot.slane %v2400_v60, 2  ;;  %p2910_p3 = pnand %p2909_p2, %p2905_p13 }
 0x2ff   : > { %v2301_v8 = vrot.slane %v2300_v49, 1  ;;  %v2402_v4 = vadd.f32 %v2401_v22, %v2400_v60 }
 0x301   : > { %v2302_v36 = vadd.f32 %v2301_v8, %v2300_v49  ;;  %v2403_v9 = vrot.slane %v2402_v4, 1 }
 0x303   : > { %2407 = vst.msk [vmem:[%s254_s28] sm:$0x1] %vm2406_vm6, %v2302_v36  ;;  %v2404_v63 = vadd.f32 %v2403_v9, %v2402_v4 }
 0x304   : > { %2913 = shalt.err (!%p2910_p3)
}
 0x305   : > { %2836 = dma.vmem_to_hbm [thread:$0]  (%p3057_p5), %s2433_s29, 16, %s2435_s9, %s2415_s25   ;;  %2408 = vst.msk [vmem:[%s260_s10] sm:$0x1] %vm2406_vm6, %v2404_v63 }
 0x306   : > { %s2419_s26 = scalar_lea.sflag [#allocation5], %s4232_s11  ;;  %s2928_s28 = sshra.s32 %s2448_s13, 4  ;;  %s2929_s28 = int_to_ptr.hbm [resolvable:$true] %s2928_s28 }
 0x307   : > { %s2930_s20 = scalar_lea.hbm %s2929_s28, 1  ;;  %s2934_s16 = scalar_lea.hbm %s4309_s6, 2 }
 0x308   : > { %p2931_p4 = scmp.ne.s32.totalorder %s2929_s28, %s2930_s20  ;;  %p2935_p9 = scmp.lt.s32.totalorder %s2929_s28, %s4309_s6 }
 0x309   : > { %p2936_p10 = scmp.lt.s32.totalorder %s2934_s16, %s2930_s20 }
 0x30a   : > { %p2932_p7 = pnand %p2931_p4, %p3057_p5 }
 0x30b   : > { %p2937_p11 = por %p2936_p10, %p2935_p9 }
 0x30c   : > { %p2933_p8 = pneg %p2932_p7 }
 0x30e   : > { %p2938_p12 = pnand %p2937_p11, %p2933_p8 }
 0x310   : > { %2941 = shalt.err (!%p2938_p12)
}
 0x311   : > { %2837 = dma.vmem_to_hbm [thread:$0]  (%p3057_p5), %s2446_s12, 16, %s2448_s13, %s2419_s26  }
 0x312 PF: > { %p2847_p13 = scmp.ge.s32.totalorder %s2980_s24, 2  ;;  %s2467_s11 = sand.u32 1, %s2968_s21  }
 0x313   : > { %s2468_s29 = scalar_lea.sflag [#allocation3], %s2467_s11 }
 0x314   : > { %p2841_p0 = pnand %p2847_p13, %p3061_p6 }
 0x316   : > { %p2842_p1 = pneg %p2841_p0 }
 0x318   : > { %2959 = dma.done.wait (%p2842_p1), %s2468_s29, 16  }
 0x319   : > { %2961 = vsyncadd (%p2842_p1), %s2468_s29, 4294967280  ;;  %s2477_s9 = scalar_lea.sflag [#allocation5], %s2467_s11 }
 0x31a   : > { %2963 = dma.done.wait (%p2842_p1), %s2477_s9, 16  }
 0x31b   : > { %2965 = vsyncadd (%p2842_p1), %s2477_s9, 4294967280  ;;  %p20_p5 = scmp.ge.s32.totalorder %s3044_s27, 4   ;;  %s4443_s21 = smov %s2972_s22 }
 0x31c   : > { %s4444_s22 = smov %s2976_s23  ;;  %s4445_s23 = smov %s3055_s30 }
 0x31d   : > { %s4446_s24 = smov %s3044_s27  ;;  %22 = sbr.rel (!%p20_p5) target bundleno = 5 (0x5), region = 100 }
 0x322   :  { %2482 = vsyncpa [#allocation3], 1 }
 0x323   :  { %2484 = vsyncpa [#allocation3 + $0x1], 1 }
 0x324   :  { %2485 = vsyncpa [#allocation5], 1 }
 0x325   :  { %2487 = vsyncpa [#allocation5 + $0x1], 1 }

</bundles_post_ra>
